<compile_context>
chip_gen: v5e
topology: v5e:2x2
jax: 0.10.0
libtpu: 0.0.40
codegen_flags: <defaults>
</compile_context>

<pallas_src>
import math

import jax
import jax.numpy as jnp
from jax.experimental import pallas as pl
from jax.experimental.pallas import tpu as pltpu

_MXU_DTYPE = jnp.bfloat16       # matmul operand dtype (accumulation stays f32)
_DEFAULT_BLOCK_B = 128          # boards per grid step (multiple of 128 -> lane-dense)


# ----------------------------------------------------------------------------
# Small helpers
# ----------------------------------------------------------------------------
def _round_up(n, m):
    return (n + m - 1) // m * m


def _block_layout(batch, block_b=_DEFAULT_BLOCK_B):
    bb = min(block_b, _round_up(max(batch, 1), 128))
    return bb, _round_up(batch, bb)


def _dropout_masks(key, n_cols):
    """{0, 2} inverted-dropout masks (p=0.5) in feature-major layout."""
    k1, k2 = jax.random.split(key)
    m1 = jax.random.bernoulli(k1, 0.5, (128, n_cols)).astype(jnp.float32) * 2.0
    m2 = jax.random.bernoulli(k2, 0.5, (64, n_cols)).astype(jnp.float32) * 2.0
    return m1, m2


def _full_spec(a):
    zeros = (0,) * a.ndim
    return pl.BlockSpec(a.shape, lambda b: zeros)   # grid-invariant -> VMEM-resident


# ----------------------------------------------------------------------------
# Fused kernel: one grid step == full ChessCNN forward for BB boards.
# All activations are (features, BB) with the batch on lanes.
# ----------------------------------------------------------------------------
def _chess_cnn_kernel(x_ref, w1_ref, b1_ref, w2_ref, b2_ref, w3_ref, b3_ref,
                      w4_ref, b4_ref, fw1_ref, fb1_ref, fw2_ref, fb2_ref,
                      fw3_ref, fb3_ref, m1_ref, m2_ref, o_ref):

    def lin_relu(w_ref, b_ref, h):
        # One MXU dot per layer: (out_feat, in_feat) @ (in_feat, BB), f32 acc.
        y = jnp.dot(w_ref[...], h.astype(w_ref.dtype),
                    preferred_element_type=jnp.float32)
        return jnp.maximum(y + b_ref[...], 0.0)

    x = x_ref[...]                                           # (384, BB) bf16
    h = lin_relu(w1_ref, b1_ref, x)                          # conv1            (800, BB)
    h = lin_relu(w2_ref, b2_ref, h)                          # conv2            (800, BB)
    h = lin_relu(w3_ref, b3_ref, h)                          # avgpool2 + conv3 (256, BB)
    h = lin_relu(w4_ref, b4_ref, h)                          # conv4 (HWC rows) (256, BB)

    # MaxPool2d(2,2): 2x2 spatial -> 1x1.  conv4 rows are (ho, wo, co) ordered,
    # so the four spatial positions are contiguous 64-row sublane slices.
    feat = jnp.maximum(jnp.maximum(h[0:64], h[64:128]),
                       jnp.maximum(h[128:192], h[192:256]))  # (64, BB)

    g = lin_relu(fw1_ref, fb1_ref, feat) * m1_ref[...]       # fc1 + dropout    (128, BB)
    g = lin_relu(fw2_ref, fb2_ref, g) * m2_ref[...]          # fc2 + dropout    (64, BB)

    # fc3 has a single output unit: VPU multiply + sublane reduction (no MXU).
    z = jnp.sum(g * fw3_ref[...], axis=0, keepdims=True) + fb3_ref[...]   # (1, BB)
    o_ref[...] = 1.0 / (1.0 + jnp.exp(-z))                   # sigmoid, lane-dense store


# ----------------------------------------------------------------------------
# pallas_call wrapper
# ----------------------------------------------------------------------------
def chess_cnn_forward(params, x_nchw, key, *, block_b=_DEFAULT_BLOCK_B):
    """ChessCNN.forward.  x_nchw: (B, 6, 8, 8) float32 (PyTorch layout) -> (B, 1)."""
    batch = x_nchw.shape[0]
    bb, b_pad = _block_layout(batch, block_b)

    # Single host-side pass over x: NCHW flatten -> bf16 cast -> feature-major.
    xt = jnp.transpose(x_nchw.reshape(batch, 6 * 8 * 8).astype(_MXU_DTYPE))  # (384, B)
    if b_pad != batch:
        xt = jnp.pad(xt, ((0, 0), (0, b_pad - batch)))

    m1, m2 = _dropout_masks(key, b_pad)

    out = pl.pallas_call(
        _chess_cnn_kernel,
        out_shape=jax.ShapeDtypeStruct((1, b_pad), jnp.float32),
        grid=(b_pad // bb,),                                 # one block of BB boards/step
        in_specs=[
            pl.BlockSpec((384, bb), lambda b: (0, b)),       # boards, feature-major
            _full_spec(params["w1d"]), _full_spec(params["b1c"]),
            _full_spec(params["w2d"]), _full_spec(params["b2c"]),
            _full_spec(params["w3d"]), _full_spec(params["b3c"]),
            _full_spec(params["w4d"]), _full_spec(params["b4c"]),
            _full_spec(params["fw1"]), _full_spec(params["fb1"]),
            _full_spec(params["fw2"]), _full_spec(params["fb2"]),
            _full_spec(params["fw3c"]), _full_spec(params["fb3"]),
            pl.BlockSpec((128, bb), lambda b: (0, b)),       # dropout mask 1
            pl.BlockSpec((64, bb), lambda b: (0, b)),        # dropout mask 2
        ],
        out_specs=pl.BlockSpec((1, bb), lambda b: (0, b)),   # lane-dense output row
        compiler_params=pltpu.CompilerParams(
            dimension_semantics=("parallel",)),              # batch blocks across TCs
    )(xt, params["w1d"], params["b1c"], params["w2d"], params["b2c"],
      params["w3d"], params["b3c"], params["w4d"], params["b4c"],
      params["fw1"], params["fb1"], params["fw2"], params["fb2"],
      params["fw3c"], params["fb3"], m1, m2)

    return jnp.transpose(out[:, :batch])                     # (B, 1)


# ----------------------------------------------------------------------------
# Weight preparation (host side, once): fold convs (+ avgpool) into dense
# matrices via the identity-basis trick.  Convolution is linear, so feeding an
# identity batch through lax.conv materializes its (out_feat, in_feat) matrix.
# ----------------------------------------------------------------------------
def _conv2d_nchw(x, w, pad):
    return jax.lax.conv_general_dilated(
        x, w, window_strides=(1, 1), padding=[(pad, pad), (pad, pad)],
        dimension_numbers=("NCHW", "OIHW", "NCHW"))


def _avgpool2_nchw(x):
    s = jax.lax.reduce_window(x, 0.0, jax.lax.add,
                              (1, 1, 2, 2), (1, 1, 2, 2), "VALID")
    return s * 0.25


def _maxpool2_nchw(x):
    return jax.lax.reduce_window(x, -jnp.inf, jax.lax.max,
                                 (1, 1, 2, 2), (1, 1, 2, 2), "VALID")


def _dense_of(linear_image_fn, in_shape):
    """Materialize a linear image->image map as an (out_feat, in_feat) matrix."""
    n_in = math.prod(in_shape)
    basis = jnp.eye(n_in, dtype=jnp.float32).reshape((n_in,) + tuple(in_shape))
    out = linear_image_fn(basis)
    return out.reshape(n_in, -1).T


def pack_params(tp):
    """Fold PyTorch-layout ChessCNN weights into kernel-ready dense matrices."""
    p = {}
    # conv1: (6,8,8) -> (32,5,5), pad 0; rows/cols flattened CHW.
    w1d = _dense_of(lambda x: _conv2d_nchw(x, tp["conv1.w"], 0), (6, 8, 8))       # (800, 384)
    # conv2: (32,5,5) -> (32,5,5), pad 1.
    w2d = _dense_of(lambda x: _conv2d_nchw(x, tp["conv2.w"], 1), (32, 5, 5))      # (800, 800)
    # avgpool(2,2) folded into conv3 (both linear): (32,5,5) -> (64,2,2).
    w3d = _dense_of(lambda x: _conv2d_nchw(_avgpool2_nchw(x), tp["conv3.w"], 1),
                    (32, 5, 5))                                                   # (256, 800)
    # conv4: (64,2,2) -> (64,2,2); output rows re-ordered to HWC so the 2x2
    # maxpool in the kernel is three contiguous-sublane maximums.
    w4d = _dense_of(lambda x: jnp.transpose(_conv2d_nchw(x, tp["conv4.w"], 1),
                                            (0, 2, 3, 1)), (64, 2, 2))            # (256, 256)

    p["w1d"], p["w2d"] = w1d.astype(_MXU_DTYPE), w2d.astype(_MXU_DTYPE)
    p["w3d"], p["w4d"] = w3d.astype(_MXU_DTYPE), w4d.astype(_MXU_DTYPE)

    # Bias columns (f32), broadcast over each conv's spatial positions.
    p["b1c"] = jnp.repeat(tp["conv1.b"], 25).reshape(800, 1)    # CHW ordering
    p["b2c"] = jnp.repeat(tp["conv2.b"], 25).reshape(800, 1)
    p["b3c"] = jnp.repeat(tp["conv3.b"], 4).reshape(256, 1)
    p["b4c"] = jnp.tile(tp["conv4.b"], 4).reshape(256, 1)       # HWC ordering

    # FC head stays in PyTorch (out, in) layout for the feature-major matmuls.
    p["fw1"] = tp["fc1.w"].astype(_MXU_DTYPE)                   # (128, 64)
    p["fb1"] = tp["fc1.b"].reshape(128, 1)
    p["fw2"] = tp["fc2.w"].astype(_MXU_DTYPE)                   # (64, 128)
    p["fb2"] = tp["fc2.b"].reshape(64, 1)
    p["fw3c"] = tp["fc3.w"].reshape(64, 1)                      # fc3 weight column, f32
    p["fb3"] = tp["fc3.b"].reshape(1, 1)
    return p


# ----------------------------------------------------------------------------
# Deterministic parameter init in native PyTorch layouts (PyTorch default init).
# ----------------------------------------------------------------------------
def init_torch_params(key):
    def uni(k, shape, fan_in):
        bound = 1.0 / math.sqrt(fan_in)
        return jax.random.uniform(k, shape, jnp.float32, -bound, bound)

    ks = jax.random.split(key, 14)
    p = {}

    def conv(kw, kb, cout, cin, ksz):
        fan = cin * ksz * ksz
        return uni(kw, (cout, cin, ksz, ksz), fan), uni(kb, (cout,), fan)

    p["conv1.w"], p["conv1.b"] = conv(ks[0], ks[1], 32, 6, 4)
    p["conv2.w"], p["conv2.b"] = conv(ks[2], ks[3], 32, 32, 3)
    p["conv3.w"], p["conv3.b"] = conv(ks[4], ks[5], 64, 32, 3)
    p["conv4.w"], p["conv4.b"] = conv(ks[6], ks[7], 64, 64, 3)

    def lin(kw, kb, outf, inf):
        return uni(kw, (outf, inf), inf), uni(kb, (outf,), inf)

    p["fc1.w"], p["fc1.b"] = lin(ks[8], ks[9], 128, 64)
    p["fc2.w"], p["fc2.b"] = lin(ks[10], ks[11], 64, 128)
    p["fc3.w"], p["fc3.b"] = lin(ks[12], ks[13], 1, 64)
    return p


# ----------------------------------------------------------------------------
# Pure-JAX f32 reference (same dropout masks), for a correctness check.
# ----------------------------------------------------------------------------
def _reference_forward(tp, x_nchw, m1_cols, m2_cols):
    b = x_nchw.shape[0]

    def conv(x, w, bias, pad):
        return _conv2d_nchw(x, w, pad) + bias.reshape(1, -1, 1, 1)

    h = jax.nn.relu(conv(x_nchw, tp["conv1.w"], tp["conv1.b"], 0))
    h = jax.nn.relu(conv(h, tp["conv2.w"], tp["conv2.b"], 1))
    h = _avgpool2_nchw(h)
    h = jax.nn.relu(conv(h, tp["conv3.w"], tp["conv3.b"], 1))
    h = jax.nn.relu(conv(h, tp["conv4.w"], tp["conv4.b"], 1))
    h = _maxpool2_nchw(h).reshape(b, -1)                                   # (B, 64)
    h = jax.nn.relu(h @ tp["fc1.w"].T + tp["fc1.b"]) * m1_cols[:, :b].T
    h = jax.nn.relu(h @ tp["fc2.w"].T + tp["fc2.b"]) * m2_cols[:, :b].T
    return jax.nn.sigmoid(h @ tp["fc3.w"].T + tp["fc3.b"])                 # (B, 1)


if __name__ == "__main__":
    key = jax.random.PRNGKey(0)
    pkey, xkey, dkey = jax.random.split(key, 3)

    torch_params = init_torch_params(pkey)
    params = pack_params(torch_params)                         # one-time weight folding
    x = jax.random.normal(xkey, (2, 6, 8, 8), dtype=jnp.float32)   # NCHW chess boards

    fwd = jax.jit(chess_cnn_forward)
    out = jax.block_until_ready(fwd(params, x, dkey))

    assert out.shape == (2, 1), out.shape
    assert bool(jnp.all(jnp.isfinite(out)))
    assert bool(jnp.all((out >= 0.0) & (out <= 1.0)))          # sigmoid range

    # Cross-check against a pure-JAX f32 reference using the same dropout masks
    # (kernel uses bf16 MXU operands, hence the loose tolerance).
    _, b_pad = _block_layout(x.shape[0])
    m1, m2 = _dropout_masks(dkey, b_pad)
    ref = _reference_forward(torch_params, x, m1, m2)
    assert float(jnp.max(jnp.abs(out - ref))) < 5e-2, (out, ref)

    print("KERNEL_OK")
</pallas_src>

<mosaic_0001>
module attributes {stable_mosaic.version = 11 : i64} {
  func.func @_chess_cnn_kernel(%arg0: i32, %arg1: memref<384x128xbf16, #tpu.memory_space<vmem>>, %arg2: memref<800x384xbf16, #tpu.memory_space<vmem>>, %arg3: memref<800x1xf32, #tpu.memory_space<vmem>>, %arg4: memref<800x800xbf16, #tpu.memory_space<vmem>>, %arg5: memref<800x1xf32, #tpu.memory_space<vmem>>, %arg6: memref<256x800xbf16, #tpu.memory_space<vmem>>, %arg7: memref<256x1xf32, #tpu.memory_space<vmem>>, %arg8: memref<256x256xbf16, #tpu.memory_space<vmem>>, %arg9: memref<256x1xf32, #tpu.memory_space<vmem>>, %arg10: memref<128x64xbf16, #tpu.memory_space<vmem>>, %arg11: memref<128x1xf32, #tpu.memory_space<vmem>>, %arg12: memref<64x128xbf16, #tpu.memory_space<vmem>>, %arg13: memref<64x1xf32, #tpu.memory_space<vmem>>, %arg14: memref<64x1xf32, #tpu.memory_space<vmem>>, %arg15: memref<1x1xf32, #tpu.memory_space<vmem>>, %arg16: memref<128x128xf32, #tpu.memory_space<vmem>>, %arg17: memref<64x128xf32, #tpu.memory_space<vmem>>, %arg18: memref<1x128xf32, #tpu.memory_space<vmem>>) attributes {dimension_semantics = [#tpu.dimension_semantics<parallel>], iteration_bounds = array<i64: 1>, scalar_prefetch = 0 : i64, scratch_operands = 0 : i64, tpu.core_type = #tpu.core_type<tc>, window_params = [{transform_indices = @transform_0, window_bounds = array<i64: 384, 128>}, {pipeline_mode = #tpu.pipeline_mode<synchronous>, transform_indices = @transform_1, window_bounds = array<i64: 800, 384>}, {pipeline_mode = #tpu.pipeline_mode<synchronous>, transform_indices = @transform_2, window_bounds = array<i64: 800, 1>}, {pipeline_mode = #tpu.pipeline_mode<synchronous>, transform_indices = @transform_3, window_bounds = array<i64: 800, 800>}, {pipeline_mode = #tpu.pipeline_mode<synchronous>, transform_indices = @transform_4, window_bounds = array<i64: 800, 1>}, {pipeline_mode = #tpu.pipeline_mode<synchronous>, transform_indices = @transform_5, window_bounds = array<i64: 256, 800>}, {pipeline_mode = #tpu.pipeline_mode<synchronous>, transform_indices = @transform_6, window_bounds = array<i64: 256, 1>}, {pipeline_mode = #tpu.pipeline_mode<synchronous>, transform_indices = @transform_7, window_bounds = array<i64: 256, 256>}, {pipeline_mode = #tpu.pipeline_mode<synchronous>, transform_indices = @transform_8, window_bounds = array<i64: 256, 1>}, {pipeline_mode = #tpu.pipeline_mode<synchronous>, transform_indices = @transform_9, window_bounds = array<i64: 128, 64>}, {pipeline_mode = #tpu.pipeline_mode<synchronous>, transform_indices = @transform_10, window_bounds = array<i64: 128, 1>}, {pipeline_mode = #tpu.pipeline_mode<synchronous>, transform_indices = @transform_11, window_bounds = array<i64: 64, 128>}, {pipeline_mode = #tpu.pipeline_mode<synchronous>, transform_indices = @transform_12, window_bounds = array<i64: 64, 1>}, {pipeline_mode = #tpu.pipeline_mode<synchronous>, transform_indices = @transform_13, window_bounds = array<i64: 64, 1>}, {pipeline_mode = #tpu.pipeline_mode<synchronous>, transform_indices = @transform_14, window_bounds = array<i64: 1, 1>}, {transform_indices = @transform_15, window_bounds = array<i64: 128, 128>}, {transform_indices = @transform_16, window_bounds = array<i64: 64, 128>}, {transform_indices = @transform_17, window_bounds = array<i64: 1, 128>}]} {
    %c0 = arith.constant 0 : index
    %c0_0 = arith.constant 0 : index
    %0 = vector.load %arg1[%c0, %c0_0] : memref<384x128xbf16, #tpu.memory_space<vmem>>, vector<384x128xbf16>
    %c0_1 = arith.constant 0 : index
    %c0_2 = arith.constant 0 : index
    %1 = vector.load %arg2[%c0_1, %c0_2] : memref<800x384xbf16, #tpu.memory_space<vmem>>, vector<800x384xbf16>
    %cst = arith.constant dense<0.000000e+00> : vector<800x128xf32>
    %2 = tpu.matmul %1, %0, %cst {dimension_numbers = #tpu.dot_dimension_numbers<[1], [0], [0], [1], [0, 0, 1, 1], [], []>} : vector<800x384xbf16>, vector<384x128xbf16>, vector<800x128xf32> -> vector<800x128xf32>
    %c0_3 = arith.constant 0 : index
    %c0_4 = arith.constant 0 : index
    %3 = vector.load %arg3[%c0_3, %c0_4] : memref<800x1xf32, #tpu.memory_space<vmem>>, vector<800x1xf32>
    %4 = vector.broadcast %3 : vector<800x1xf32> to vector<800x128xf32>
    %5 = arith.addf %2, %4 : vector<800x128xf32>
    %cst_5 = arith.constant 0.000000e+00 : f32
    %6 = vector.broadcast %cst_5 : f32 to vector<800x128xf32>
    %7 = arith.maximumf %5, %6 : vector<800x128xf32>
    %c0_6 = arith.constant 0 : index
    %c0_7 = arith.constant 0 : index
    %8 = vector.load %arg4[%c0_6, %c0_7] : memref<800x800xbf16, #tpu.memory_space<vmem>>, vector<800x800xbf16>
    %9 = arith.truncf %7 : vector<800x128xf32> to vector<800x128xbf16>
    %cst_8 = arith.constant dense<0.000000e+00> : vector<800x128xf32>
    %10 = tpu.matmul %8, %9, %cst_8 {dimension_numbers = #tpu.dot_dimension_numbers<[1], [0], [0], [1], [0, 0, 1, 1], [], []>} : vector<800x800xbf16>, vector<800x128xbf16>, vector<800x128xf32> -> vector<800x128xf32>
    %c0_9 = arith.constant 0 : index
    %c0_10 = arith.constant 0 : index
    %11 = vector.load %arg5[%c0_9, %c0_10] : memref<800x1xf32, #tpu.memory_space<vmem>>, vector<800x1xf32>
    %12 = vector.broadcast %11 : vector<800x1xf32> to vector<800x128xf32>
    %13 = arith.addf %10, %12 : vector<800x128xf32>
    %cst_11 = arith.constant 0.000000e+00 : f32
    %14 = vector.broadcast %cst_11 : f32 to vector<800x128xf32>
    %15 = arith.maximumf %13, %14 : vector<800x128xf32>
    %c0_12 = arith.constant 0 : index
    %c0_13 = arith.constant 0 : index
    %16 = vector.load %arg6[%c0_12, %c0_13] : memref<256x800xbf16, #tpu.memory_space<vmem>>, vector<256x800xbf16>
    %17 = arith.truncf %15 : vector<800x128xf32> to vector<800x128xbf16>
    %cst_14 = arith.constant dense<0.000000e+00> : vector<256x128xf32>
    %18 = tpu.matmul %16, %17, %cst_14 {dimension_numbers = #tpu.dot_dimension_numbers<[1], [0], [0], [1], [0, 0, 1, 1], [], []>} : vector<256x800xbf16>, vector<800x128xbf16>, vector<256x128xf32> -> vector<256x128xf32>
    %c0_15 = arith.constant 0 : index
    %c0_16 = arith.constant 0 : index
    %19 = vector.load %arg7[%c0_15, %c0_16] : memref<256x1xf32, #tpu.memory_space<vmem>>, vector<256x1xf32>
    %20 = vector.broadcast %19 : vector<256x1xf32> to vector<256x128xf32>
    %21 = arith.addf %18, %20 : vector<256x128xf32>
    %cst_17 = arith.constant 0.000000e+00 : f32
    %22 = vector.broadcast %cst_17 : f32 to vector<256x128xf32>
    %23 = arith.maximumf %21, %22 : vector<256x128xf32>
    %c0_18 = arith.constant 0 : index
    %c0_19 = arith.constant 0 : index
    %24 = vector.load %arg8[%c0_18, %c0_19] : memref<256x256xbf16, #tpu.memory_space<vmem>>, vector<256x256xbf16>
    %25 = arith.truncf %23 : vector<256x128xf32> to vector<256x128xbf16>
    %cst_20 = arith.constant dense<0.000000e+00> : vector<256x128xf32>
    %26 = tpu.matmul %24, %25, %cst_20 {dimension_numbers = #tpu.dot_dimension_numbers<[1], [0], [0], [1], [0, 0, 1, 1], [], []>} : vector<256x256xbf16>, vector<256x128xbf16>, vector<256x128xf32> -> vector<256x128xf32>
    %c0_21 = arith.constant 0 : index
    %c0_22 = arith.constant 0 : index
    %27 = vector.load %arg9[%c0_21, %c0_22] : memref<256x1xf32, #tpu.memory_space<vmem>>, vector<256x1xf32>
    %28 = vector.broadcast %27 : vector<256x1xf32> to vector<256x128xf32>
    %29 = arith.addf %26, %28 : vector<256x128xf32>
    %cst_23 = arith.constant 0.000000e+00 : f32
    %30 = vector.broadcast %cst_23 : f32 to vector<256x128xf32>
    %31 = arith.maximumf %29, %30 : vector<256x128xf32>
    %32 = vector.extract_strided_slice %31 {offsets = [0, 0], sizes = [64, 128], strides = [1, 1]} : vector<256x128xf32> to vector<64x128xf32>
    %33 = vector.extract_strided_slice %31 {offsets = [64, 0], sizes = [64, 128], strides = [1, 1]} : vector<256x128xf32> to vector<64x128xf32>
    %34 = arith.maximumf %32, %33 : vector<64x128xf32>
    %35 = vector.extract_strided_slice %31 {offsets = [128, 0], sizes = [64, 128], strides = [1, 1]} : vector<256x128xf32> to vector<64x128xf32>
    %36 = vector.extract_strided_slice %31 {offsets = [192, 0], sizes = [64, 128], strides = [1, 1]} : vector<256x128xf32> to vector<64x128xf32>
    %37 = arith.maximumf %35, %36 : vector<64x128xf32>
    %38 = arith.maximumf %34, %37 : vector<64x128xf32>
    %c0_24 = arith.constant 0 : index
    %c0_25 = arith.constant 0 : index
    %39 = vector.load %arg10[%c0_24, %c0_25] : memref<128x64xbf16, #tpu.memory_space<vmem>>, vector<128x64xbf16>
    %40 = arith.truncf %38 : vector<64x128xf32> to vector<64x128xbf16>
    %cst_26 = arith.constant dense<0.000000e+00> : vector<128x128xf32>
    %41 = tpu.matmul %39, %40, %cst_26 {dimension_numbers = #tpu.dot_dimension_numbers<[1], [0], [0], [1], [0, 0, 1, 1], [], []>} : vector<128x64xbf16>, vector<64x128xbf16>, vector<128x128xf32> -> vector<128x128xf32>
    %c0_27 = arith.constant 0 : index
    %c0_28 = arith.constant 0 : index
    %42 = vector.load %arg11[%c0_27, %c0_28] : memref<128x1xf32, #tpu.memory_space<vmem>>, vector<128x1xf32>
    %43 = vector.broadcast %42 : vector<128x1xf32> to vector<128x128xf32>
    %44 = arith.addf %41, %43 : vector<128x128xf32>
    %cst_29 = arith.constant 0.000000e+00 : f32
    %45 = vector.broadcast %cst_29 : f32 to vector<128x128xf32>
    %46 = arith.maximumf %44, %45 : vector<128x128xf32>
    %c0_30 = arith.constant 0 : index
    %c0_31 = arith.constant 0 : index
    %47 = vector.load %arg16[%c0_30, %c0_31] : memref<128x128xf32, #tpu.memory_space<vmem>>, vector<128x128xf32>
    %48 = arith.mulf %46, %47 : vector<128x128xf32>
    %c0_32 = arith.constant 0 : index
    %c0_33 = arith.constant 0 : index
    %49 = vector.load %arg12[%c0_32, %c0_33] : memref<64x128xbf16, #tpu.memory_space<vmem>>, vector<64x128xbf16>
    %50 = arith.truncf %48 : vector<128x128xf32> to vector<128x128xbf16>
    %cst_34 = arith.constant dense<0.000000e+00> : vector<64x128xf32>
    %51 = tpu.matmul %49, %50, %cst_34 {dimension_numbers = #tpu.dot_dimension_numbers<[1], [0], [0], [1], [0, 0, 1, 1], [], []>} : vector<64x128xbf16>, vector<128x128xbf16>, vector<64x128xf32> -> vector<64x128xf32>
    %c0_35 = arith.constant 0 : index
    %c0_36 = arith.constant 0 : index
    %52 = vector.load %arg13[%c0_35, %c0_36] : memref<64x1xf32, #tpu.memory_space<vmem>>, vector<64x1xf32>
    %53 = vector.broadcast %52 : vector<64x1xf32> to vector<64x128xf32>
    %54 = arith.addf %51, %53 : vector<64x128xf32>
    %cst_37 = arith.constant 0.000000e+00 : f32
    %55 = vector.broadcast %cst_37 : f32 to vector<64x128xf32>
    %56 = arith.maximumf %54, %55 : vector<64x128xf32>
    %c0_38 = arith.constant 0 : index
    %c0_39 = arith.constant 0 : index
    %57 = vector.load %arg17[%c0_38, %c0_39] : memref<64x128xf32, #tpu.memory_space<vmem>>, vector<64x128xf32>
    %58 = arith.mulf %56, %57 : vector<64x128xf32>
    %c0_40 = arith.constant 0 : index
    %c0_41 = arith.constant 0 : index
    %59 = vector.load %arg14[%c0_40, %c0_41] : memref<64x1xf32, #tpu.memory_space<vmem>>, vector<64x1xf32>
    %60 = vector.broadcast %59 : vector<64x1xf32> to vector<64x128xf32>
    %61 = arith.mulf %58, %60 : vector<64x128xf32>
    %cst_42 = arith.constant dense<0.000000e+00> : vector<128xf32>
    %62 = vector.multi_reduction <add>, %61, %cst_42 [0] : vector<64x128xf32> to vector<128xf32>
    %63 = vector.shape_cast %62 : vector<128xf32> to vector<1x128xf32>
    %c0_43 = arith.constant 0 : index
    %c0_44 = arith.constant 0 : index
    %64 = vector.load %arg15[%c0_43, %c0_44] : memref<1x1xf32, #tpu.memory_space<vmem>>, vector<1x1xf32>
    %65 = vector.broadcast %64 : vector<1x1xf32> to vector<1x128xf32>
    %66 = arith.addf %63, %65 : vector<1x128xf32>
    %cst_45 = arith.constant 0.000000e+00 : f32
    %67 = vector.broadcast %cst_45 : f32 to vector<1x128xf32>
    %68 = arith.subf %67, %66 : vector<1x128xf32>
    %69 = math.exp %68 : vector<1x128xf32>
    %cst_46 = arith.constant 1.000000e+00 : f32
    %70 = vector.broadcast %cst_46 : f32 to vector<1x128xf32>
    %71 = arith.addf %70, %69 : vector<1x128xf32>
    %cst_47 = arith.constant 1.000000e+00 : f32
    %72 = vector.broadcast %cst_47 : f32 to vector<1x128xf32>
    %73 = arith.divf %72, %71 : vector<1x128xf32>
    %c0_48 = arith.constant 0 : index
    %c0_49 = arith.constant 0 : index
    %74 = vector.load %arg18[%c0_48, %c0_49] : memref<1x128xf32, #tpu.memory_space<vmem>>, vector<1x128xf32>
    tpu.vector_store %arg18[%c0_48, %c0_49], %73 {strides = array<i32>} : memref<1x128xf32, #tpu.memory_space<vmem>>, vector<1x128xf32>,
    return
  }
  func.func @transform_0(%arg0: i32) -> (i32, i32) {
    %c0_i32 = arith.constant 0 : i32
    %c0_i32_0 = arith.constant 0 : i32
    return %c0_i32, %arg0 : i32, i32
  }
  func.func @transform_1(%arg0: i32) -> (i32, i32) {
    %c0_i32 = arith.constant 0 : i32
    %c0_i32_0 = arith.constant 0 : i32
    %c0_i32_1 = arith.constant 0 : i32
    return %c0_i32, %c0_i32_0 : i32, i32
  }
  func.func @transform_2(%arg0: i32) -> (i32, i32) {
    %c0_i32 = arith.constant 0 : i32
    %c0_i32_0 = arith.constant 0 : i32
    %c0_i32_1 = arith.constant 0 : i32
    return %c0_i32, %c0_i32_0 : i32, i32
  }
  func.func @transform_3(%arg0: i32) -> (i32, i32) {
    %c0_i32 = arith.constant 0 : i32
    %c0_i32_0 = arith.constant 0 : i32
    %c0_i32_1 = arith.constant 0 : i32
    return %c0_i32, %c0_i32_0 : i32, i32
  }
  func.func @transform_4(%arg0: i32) -> (i32, i32) {
    %c0_i32 = arith.constant 0 : i32
    %c0_i32_0 = arith.constant 0 : i32
    %c0_i32_1 = arith.constant 0 : i32
    return %c0_i32, %c0_i32_0 : i32, i32
  }
  func.func @transform_5(%arg0: i32) -> (i32, i32) {
    %c0_i32 = arith.constant 0 : i32
    %c0_i32_0 = arith.constant 0 : i32
    %c0_i32_1 = arith.constant 0 : i32
    return %c0_i32, %c0_i32_0 : i32, i32
  }
  func.func @transform_6(%arg0: i32) -> (i32, i32) {
    %c0_i32 = arith.constant 0 : i32
    %c0_i32_0 = arith.constant 0 : i32
    %c0_i32_1 = arith.constant 0 : i32
    return %c0_i32, %c0_i32_0 : i32, i32
  }
  func.func @transform_7(%arg0: i32) -> (i32, i32) {
    %c0_i32 = arith.constant 0 : i32
    %c0_i32_0 = arith.constant 0 : i32
    %c0_i32_1 = arith.constant 0 : i32
    return %c0_i32, %c0_i32_0 : i32, i32
  }
  func.func @transform_8(%arg0: i32) -> (i32, i32) {
    %c0_i32 = arith.constant 0 : i32
    %c0_i32_0 = arith.constant 0 : i32
    %c0_i32_1 = arith.constant 0 : i32
    return %c0_i32, %c0_i32_0 : i32, i32
  }
  func.func @transform_9(%arg0: i32) -> (i32, i32) {
    %c0_i32 = arith.constant 0 : i32
    %c0_i32_0 = arith.constant 0 : i32
    %c0_i32_1 = arith.constant 0 : i32
    return %c0_i32, %c0_i32_0 : i32, i32
  }
  func.func @transform_10(%arg0: i32) -> (i32, i32) {
    %c0_i32 = arith.constant 0 : i32
    %c0_i32_0 = arith.constant 0 : i32
    %c0_i32_1 = arith.constant 0 : i32
    return %c0_i32, %c0_i32_0 : i32, i32
  }
  func.func @transform_11(%arg0: i32) -> (i32, i32) {
    %c0_i32 = arith.constant 0 : i32
    %c0_i32_0 = arith.constant 0 : i32
    %c0_i32_1 = arith.constant 0 : i32
    return %c0_i32, %c0_i32_0 : i32, i32
  }
  func.func @transform_12(%arg0: i32) -> (i32, i32) {
    %c0_i32 = arith.constant 0 : i32
    %c0_i32_0 = arith.constant 0 : i32
    %c0_i32_1 = arith.constant 0 : i32
    return %c0_i32, %c0_i32_0 : i32, i32
  }
  func.func @transform_13(%arg0: i32) -> (i32, i32) {
    %c0_i32 = arith.constant 0 : i32
    %c0_i32_0 = arith.constant 0 : i32
    %c0_i32_1 = arith.constant 0 : i32
    return %c0_i32, %c0_i32_0 : i32, i32
  }
  func.func @transform_14(%arg0: i32) -> (i32, i32) {
    %c0_i32 = arith.constant 0 : i32
    %c0_i32_0 = arith.constant 0 : i32
    %c0_i32_1 = arith.constant 0 : i32
    return %c0_i32, %c0_i32_0 : i32, i32
  }
  func.func @transform_15(%arg0: i32) -> (i32, i32) {
    %c0_i32 = arith.constant 0 : i32
    %c0_i32_0 = arith.constant 0 : i32
    return %c0_i32, %arg0 : i32, i32
  }
  func.func @transform_16(%arg0: i32) -> (i32, i32) {
    %c0_i32 = arith.constant 0 : i32
    %c0_i32_0 = arith.constant 0 : i32
    return %c0_i32, %arg0 : i32, i32
  }
  func.func @transform_17(%arg0: i32) -> (i32, i32) {
    %c0_i32 = arith.constant 0 : i32
    %c0_i32_0 = arith.constant 0 : i32
    return %c0_i32, %arg0 : i32, i32
  }
}

</mosaic_0001>

<bundles_post_ra>
// kernel: chess_cnn_forward.1
= control target key start
LH: loop header
LB: loop body
LE: loop exit
PB: predicated region body
PF: predicated region fallthrough
CT: control target
= control target key end

     0   :  { %v13869_v0 = vmov 0   ;;  %vm5528_vm0 = vcmask 261120   ;;  %vm10015_vm1 = vcmask 523264   ;;  %s22629_s2 = inlined_call_operand.vmem [shape: f32[800,1], index: 2, kind: input, shape index: {}]   ;;  %s22630_s0 = inlined_call_operand.vmem [shape: bf16[384,128], index: 0, kind: input, shape index: {}]   ;;  %s22631_s1 = inlined_call_operand.vmem [shape: bf16[800,384], index: 1, kind: input, shape index: {}]   ;;  %s22632_s4 = inlined_call_operand.vmem [shape: f32[800,1], index: 4, kind: input, shape index: {}]   ;;  %s22633_s3 = inlined_call_operand.vmem [shape: bf16[800,800], index: 3, kind: input, shape index: {}]   ;;  %s22634_s6 = inlined_call_operand.vmem [shape: f32[256,1], index: 6, kind: input, shape index: {}]   ;;  %s22635_s8 = inlined_call_operand.vmem [shape: f32[256,1], index: 8, kind: input, shape index: {}]   ;;  %s22636_s10 = inlined_call_operand.vmem [shape: f32[128,1], index: 10, kind: input, shape index: {}]   ;;  %s22637_s12 = inlined_call_operand.vmem [shape: f32[64,1], index: 12, kind: input, shape index: {}]   ;;  %s22638_s14 = inlined_call_operand.<no memory space> [shape: f32[1,1], index: 14, kind: input, shape index: {}]   ;;  %s22639_s13 = inlined_call_operand.vmem [shape: f32[64,1], index: 13, kind: input, shape index: {}]   ;;  %s22640_s5 = inlined_call_operand.vmem [shape: bf16[256,800], index: 5, kind: input, shape index: {}]   ;;  %s22641_s7 = inlined_call_operand.vmem [shape: bf16[256,256], index: 7, kind: input, shape index: {}]   ;;  %s22642_s9 = inlined_call_operand.vmem [shape: bf16[128,64], index: 9, kind: input, shape index: {}]   ;;  %s22643_s15 = inlined_call_operand.vmem [shape: f32[128,128], index: 15, kind: input, shape index: {}]   ;;  %s22644_s11 = inlined_call_operand.vmem [shape: bf16[64,128], index: 11, kind: input, shape index: {}]   ;;  %s22645_s16 = inlined_call_operand.vmem [shape: f32[64,128], index: 16, kind: input, shape index: {}]   ;;  %s22646_s17 = inlined_call_operand.vmem [shape: f32[1,128], index: 17, kind: output, shape index: {}]  }
   0x1   :  { %22649 = sst [smem:[#allocation110_spill]] %s22629_s2  ;;  %13864 = vset.pattern.permute.xlu2 %v13869_v0  ;;  %13863 = vset.pattern.permute.xlu1 %v13869_v0  ;;  %v10381_v27 = vld [vmem:[%s22631_s1] sm:$0xf]  ;;  %v13198_v28 = vld [vmem:[%s22631_s1 + $0x8] sm:$0xf0] }
   0x2   :  { %22650 = sst [smem:[#allocation111_spill]] %s22630_s0  ;;  %13862 = vset.pattern.permute.xlu0 %v13869_v0  ;;  %v10957_v29 = vld [vmem:[%s22631_s1 + $0x480] sm:$0xf]  ;;  %v13342_v30 = vld [vmem:[%s22631_s1 + $0x488] sm:$0xf0]  ;;  %v10382_v36 = vor.u32 %v13198_v28, %v10381_v27 }
   0x3   :  { %s22651_s26 = sld [smem:[#allocation110_spill]]  ;;  %v10958_v37 = vor.u32 %v13342_v30, %v10957_v29  ;;  %v10389_v40 = vld [vmem:[%s22631_s1 + $0x8] sm:$0xf]  ;;  %v13199_v41 = vld [vmem:[%s22631_s1 + $0x10] sm:$0xf0] }
   0x4   :  { %s22652_s19 = sld [smem:[#allocation111_spill]]  ;;  %v10390_v42 = vor.u32 %v13199_v41, %v10389_v40  ;;  %v10393_v48 = vld [vmem:[%s22631_s1 + $0x18] sm:$0xf]  ;;  %v13201_v49 = vld [vmem:[%s22631_s1 + $0x20] sm:$0xf0] }
   0x5   :  { %v10969_v50 = vld [vmem:[%s22631_s1 + $0x498] sm:$0xf]  ;;  %v13345_v51 = vld [vmem:[%s22631_s1 + $0x4a0] sm:$0xf0]  ;;  %v10394_v56 = vor.u32 %v13201_v49, %v10393_v48  ;;  %v10401_v59 = vld [vmem:[%s22631_s1 + $0x20] sm:$0xf] }
   0x6   :  { %v10970_v57 = vor.u32 %v13345_v51, %v10969_v50  ;;  %v13202_v60 = vld [vmem:[%s22631_s1 + $0x28] sm:$0xf0]  ;;  %v10425_v27 = vld [vmem:[%s22631_s1 + $0x50] sm:$0xf]  ;;  %v13208_v28 = vld [vmem:[%s22631_s1 + $0x58] sm:$0xf0] }
   0x7   :  { %v10402_v61 = vor.u32 %v13202_v60, %v10401_v59  ;;  %v10426_v29 = vor.u32 %v13208_v28, %v10425_v27  ;;  %v10441_v48 = vld [vmem:[%s22631_s1 + $0x78] sm:$0xf]  ;;  %v13213_v49 = vld [vmem:[%s22631_s1 + $0x80] sm:$0xf0]  ;;  %v13206_v50 = vld [vmem:[%s22631_s1 + $0x4c] sm:$0xf] }
   0x8   :  { %v10419_v51 = vld [vmem:[%s22631_s1 + $0x54] sm:$0xf0] }
   0x9   :  { %v321_v1 = vld [vmem:[%s22651_s26 + $0x70] sm:$0xff]  ;;  %v319_v2 = vld [vmem:[%s22651_s26 + $0x60] sm:$0xff]  ;;  %v320_v6 = vld [vmem:[%s22651_s26 + $0x68] sm:$0xff] }
   0xa   :  { %v317_v3 = vld [vmem:[%s22651_s26 + $0x50] sm:$0xff]  ;;  %469 = vperm.xlu1 %13863, %v319_v2   ;;  %v13180_v4 = vld [vmem:[%s22652_s19 + $0x38] sm:$0xff]  ;;  %479 = vperm.xlu0 %13862, %v321_v1   ;;  %v13178_v10 = vld [vmem:[%s22652_s19 + $0x28] sm:$0xff] }
   0xb   :  { %459 = vperm.xlu2 %13864, %v317_v3   ;;  %1851 = vmatpush.bf16.msra.mxu0 %v13180_v4  ;;  %v13179_v5 = vld [vmem:[%s22652_s19 + $0x30] sm:$0xff]  ;;  %v13196_v7 = vld [vmem:[%s22652_s19 + $0xb8] sm:$0xff]  ;;  %v13177_v12 = vld [vmem:[%s22652_s19 + $0x20] sm:$0xff] }
   0xc   :  { %13853 = vmatpush.bf16.msra.mxu1 %v13180_v4  ;;  %v322_v8 = vld [vmem:[%s22651_s26 + $0x78] sm:$0xff]  ;;  %2369 = vmatpush.bf16.msra.mxu2 %v13196_v7  ;;  %v13195_v11 = vld [vmem:[%s22652_s19 + $0xb0] sm:$0xff]  ;;  %v13194_v13 = vld [vmem:[%s22652_s19 + $0xa8] sm:$0xff] }
   0xd   :  { %v318_v9 = vld [vmem:[%s22651_s26 + $0x58] sm:$0xff]  ;;  %v316_v14 = vld [vmem:[%s22651_s26 + $0x48] sm:$0xff]  ;;  %v315_v15 = vld [vmem:[%s22651_s26 + $0x40] sm:$0xff] }
   0xe   :  { %v313_v16 = vld [vmem:[%s22651_s26 + $0x30] sm:$0xff]  ;;  %v13176_v17 = vld [vmem:[%s22652_s19 + $0x18] sm:$0xff]  ;;  %v13193_v18 = vld [vmem:[%s22652_s19 + $0xa0] sm:$0xff] }
   0xf   :  { %1852 = vmatpush.bf16.msra.mxu0 %v13179_v5  ;;  %v13175_v19 = vld [vmem:[%s22652_s19 + $0x10] sm:$0xff]  ;;  %v13192_v20 = vld [vmem:[%s22652_s19 + $0x98] sm:$0xff]  ;;  %v311_v21 = vld [vmem:[%s22651_s26 + $0x20] sm:$0xff] }
  0x10   :  { %13854 = vmatpush.bf16.msra.mxu1 %v13179_v5  ;;  %2370 = vmatpush.bf16.msra.mxu2 %v13195_v11  ;;  %v314_v22 = vld [vmem:[%s22651_s26 + $0x38] sm:$0xff]  ;;  %v312_v23 = vld [vmem:[%s22651_s26 + $0x28] sm:$0xff]  ;;  %v13191_v25 = vld [vmem:[%s22652_s19 + $0x90] sm:$0xff] }
  0x11   :  { %v13174_v24 = vld [vmem:[%s22652_s19 + $0x8] sm:$0xff]  ;;  %v13173_v26 = vld [vmem:[%s22652_s19] sm:$0xff]  ;;  %v13188_v31 = vld [vmem:[%s22652_s19 + $0x78] sm:$0xff] }
  0x12   :  { %474 = vperm.xlu1 %13863, %v320_v6   ;;  %484 = vperm.xlu0 %13862, %v322_v8   ;;  %v13190_v32 = vld [vmem:[%s22652_s19 + $0x88] sm:$0xff]  ;;  %v310_v33 = vld [vmem:[%s22651_s26 + $0x18] sm:$0xff]  ;;  %v309_v34 = vld [vmem:[%s22651_s26 + $0x10] sm:$0xff] }
  0x13   :  { %464 = vperm.xlu2 %13864, %v318_v9   ;;  %1853 = vmatpush.bf16.msra.mxu0 %v13178_v10  ;;  %v307_v35 = vld [vmem:[%s22651_s26] sm:$0xff]  ;;  %v13187_v38 = vld [vmem:[%s22652_s19 + $0x70] sm:$0xff]  ;;  %v13186_v43 = vld [vmem:[%s22652_s19 + $0x68] sm:$0xff] }
  0x14   :  { %13855 = vmatpush.bf16.msra.mxu1 %v13178_v10  ;;  %2371 = vmatpush.bf16.msra.mxu2 %v13194_v13  ;;  %v13189_v39 = vld [vmem:[%s22652_s19 + $0x80] sm:$0xff]  ;;  %v337_v44 = vld [vmem:[%s22651_s26 + $0xf0] sm:$0xff]  ;;  %v308_v45 = vld [vmem:[%s22651_s26 + $0x8] sm:$0xff] }
  0x15   :  { %v338_v46 = vld [vmem:[%s22651_s26 + $0xf8] sm:$0xff]  ;;  %v13185_v47 = vld [vmem:[%s22652_s19 + $0x60] sm:$0xff]  ;;  %v353_v54 = vld [vmem:[%s22651_s26 + $0x170] sm:$0xff] }
  0x16   :  { %v13184_v52 = vld [vmem:[%s22652_s19 + $0x58] sm:$0xff]  ;;  %v335_v55 = vld [vmem:[%s22651_s26 + $0xe0] sm:$0xff]  ;;  %v13183_v58 = vld [vmem:[%s22652_s19 + $0x50] sm:$0xff] }
  0x17   :  { %1854 = vmatpush.bf16.msra.mxu0 %v13177_v12  ;;  %v354_v53 = vld [vmem:[%s22651_s26 + $0x178] sm:$0xff]  ;;  %v13182_v62 = vld [vmem:[%s22652_s19 + $0x48] sm:$0xff]  ;;  %v351_v63 = vld [vmem:[%s22651_s26 + $0x160] sm:$0xff] }
  0x18   :  { %13856 = vmatpush.bf16.msra.mxu1 %v13177_v12  ;;  %2372 = vmatpush.bf16.msra.mxu2 %v13193_v18  ;;  %v336_v0 = vld [vmem:[%s22651_s26 + $0xe8] sm:$0xff]  ;;  %v13181_v2 = vld [vmem:[%s22652_s19 + $0x40] sm:$0xff]  ;;  %v10405_v3 = vld [vmem:[%s22631_s1 + $0x30] sm:$0xf] }
  0x19   :  { %v352_v1 = vld [vmem:[%s22651_s26 + $0x168] sm:$0xff]  ;;  %v13204_v4 = vld [vmem:[%s22631_s1 + $0x38] sm:$0xf0]  ;;  %v13197_v5 = vld [vmem:[%s22631_s1 + $0x4] sm:$0xf] }
  0x1a   :  { %454 = vperm.xlu1 %13863, %v316_v14   ;;  %449 = vperm.xlu0 %13862, %v315_v15   ;;  %v10383_v6 = vld [vmem:[%s22631_s1 + $0xc] sm:$0xf0]  ;;  %v334_v7 = vld [vmem:[%s22651_s26 + $0xd8] sm:$0xff]  ;;  %v10406_v10 = vor.u32 %v13204_v4, %v10405_v3  ;;  %v13205_v13 = vld [vmem:[%s22631_s1 + $0x40] sm:$0xf0] }
  0x1b   :  { %439 = vperm.xlu2 %13864, %v313_v16   ;;  %1855 = vmatpush.bf16.msra.mxu0 %v13176_v17  ;;  %v333_v8 = vld [vmem:[%s22651_s26 + $0xd0] sm:$0xff]  ;;  %v10386_v11 = vor.u32 %v13197_v5, %v10383_v6  ;;  %v10413_v12 = vld [vmem:[%s22631_s1 + $0x38] sm:$0xf]  ;;  %v331_v15 = vld [vmem:[%s22651_s26 + $0xc0] sm:$0xff] }
  0x1c   :  { %13857 = vmatpush.bf16.msra.mxu1 %v13176_v17  ;;  %2373 = vmatpush.bf16.msra.mxu2 %v13192_v20  ;;  %v349_v9 = vld [vmem:[%s22651_s26 + $0x150] sm:$0xff]  ;;  %v10414_v14 = vor.u32 %v13205_v13, %v10413_v12  ;;  %v350_v16 = vld [vmem:[%s22651_s26 + $0x158] sm:$0xff]  ;;  %v332_v17 = vld [vmem:[%s22651_s26 + $0xc8] sm:$0xff] }
  0x1d   :  { %v10417_v18 = vld [vmem:[%s22631_s1 + $0x48] sm:$0xf]  ;;  %v13200_v20 = vld [vmem:[%s22631_s1 + $0x1c] sm:$0xf]  ;;  %v345_v30 = vld [vmem:[%s22651_s26 + $0x130] sm:$0xff] }
  0x1e   :  { %v339_v60 = vld [vmem:[%s22651_s26 + $0x100] sm:$0xff]  ;;  %v370_v3 = vld [vmem:[%s22651_s26 + $0x1f8] sm:$0xff]  ;;  %v369_v4 = vld [vmem:[%s22651_s26 + $0x1f0] sm:$0xff] }
  0x1f   :  { %1856 = vmatpush.bf16.msra.mxu0 %v13175_v19  ;;  %v367_v5 = vld [vmem:[%s22651_s26 + $0x1e0] sm:$0xff]  ;;  %v368_v12 = vld [vmem:[%s22651_s26 + $0x1e8] sm:$0xff]  ;;  %v366_v13 = vld [vmem:[%s22651_s26 + $0x1d8] sm:$0xff] }
  0x20   :  { %13858 = vmatpush.bf16.msra.mxu1 %v13175_v19  ;;  %2374 = vmatpush.bf16.msra.mxu2 %v13191_v25  ;;  %v13207_v19 = vld [vmem:[%s22631_s1 + $0x50] sm:$0xf0]  ;;  %v359_v28 = vld [vmem:[%s22651_s26 + $0x1a0] sm:$0xff] }
  0x21   :  { %v10418_v25 = vor.u32 %v13207_v19, %v10417_v18  ;;  %v364_v18 = vld [vmem:[%s22651_s26 + $0x1c8] sm:$0xff]  ;;  %v363_v19 = vld [vmem:[%s22651_s26 + $0x1c0] sm:$0xff] }
  0x22   :  { %429 = vperm.xlu1 %13863, %v311_v21   ;;  %444 = vperm.xlu0 %13862, %v314_v22   ;;  %v10395_v21 = vld [vmem:[%s22631_s1 + $0x24] sm:$0xf0] }
  0x23   :  { %434 = vperm.xlu2 %13864, %v312_v23   ;;  %1857 = vmatpush.bf16.msra.mxu0 %v13174_v24  ;;  %v348_v22 = vld [vmem:[%s22651_s26 + $0x148] sm:$0xff]  ;;  %v347_v23 = vld [vmem:[%s22651_s26 + $0x140] sm:$0xff] }
  0x24   :  { %13859 = vmatpush.bf16.msra.mxu1 %v13174_v24  ;;  %2375 = vmatpush.bf16.msra.mxu2 %v13190_v32  ;;  %v329_v24 = vld [vmem:[%s22651_s26 + $0xb0] sm:$0xff]  ;;  %v346_v32 = vld [vmem:[%s22651_s26 + $0x138] sm:$0xff] }
  0x27   :  { %1858 = vmatpush.bf16.msra.mxu0 %v13173_v26 }
  0x28   :  { %13860 = vmatpush.bf16.msra.mxu1 %v13173_v26  ;;  %2376 = vmatpush.bf16.msra.mxu2 %v13189_v39  ;;  %v10398_v26 = vor.u32 %v13200_v20, %v10395_v21  ;;  %v343_v39 = vld [vmem:[%s22651_s26 + $0x120] sm:$0xff]  ;;  %v361_v20 = vld [vmem:[%s22651_s26 + $0x1b0] sm:$0xff] }
  0x2a   :  { %424 = vperm.xlu1 %13863, %v310_v33   ;;  %419 = vperm.xlu0 %13862, %v309_v34   ;;  %v10429_v33 = vld [vmem:[%s22631_s1 + $0x60] sm:$0xf]  ;;  %v13210_v34 = vld [vmem:[%s22631_s1 + $0x68] sm:$0xf0] }
  0x2b   :  { %409 = vperm.xlu2 %13864, %v307_v35   ;;  %1859 = vmatmul.bf16.vlgmr.msra.gmra.mxu0 %v10382_v36  ;;  %v13203_v35 = vld [vmem:[%s22631_s1 + $0x34] sm:$0xf]  ;;  %v10407_v36 = vld [vmem:[%s22631_s1 + $0x3c] sm:$0xf0]  ;;  %v10430_v40 = vor.u32 %v13210_v34, %v10429_v33  ;;  %v13222_v33 = vld [vmem:[%s22631_s1 + $0xc8] sm:$0xf0] }
  0x2c   :  { %2110 = vmatpush.bf16.msrb.mxu1 %v13188_v31  ;;  %2377 = vmatmul.bf16.vlgmr.msra.gmra.mxu2 %v10390_v42  ;;  %v330_v31 = vld [vmem:[%s22651_s26 + $0xb8] sm:$0xff]  ;;  %v10410_v41 = vor.u32 %v13203_v35, %v10407_v36  ;;  %v10437_v42 = vld [vmem:[%s22631_s1 + $0x68] sm:$0xf]  ;;  %v13215_v34 = vld [vmem:[%s22631_s1 + $0x94] sm:$0xf] }
  0x2d   :  { %2099 = vmatmul.bf16.vlgmr.msra.gmra.mxu1 %v10958_v37  ;;  %v328_v37 = vld [vmem:[%s22651_s26 + $0xa8] sm:$0xff]  ;;  %v10455_v35 = vld [vmem:[%s22631_s1 + $0x9c] sm:$0xf0] }
  0x30   :  { %2111 = vmatpush.bf16.msrb.mxu1 %v13187_v38  ;;  %v327_v38 = vld [vmem:[%s22651_s26 + $0xa0] sm:$0xff] }
  0x32   :  { %559 = vperm.xlu1 %13863, %v337_v44   ;;  %414 = vperm.xlu0 %13862, %v308_v45   ;;  %v325_v45 = vld [vmem:[%s22651_s26 + $0x90] sm:$0xff] }
  0x33   :  { %564 = vperm.xlu2 %13864, %v338_v46   ;;  %v344_v46 = vld [vmem:[%s22651_s26 + $0x128] sm:$0xff] }
  0x34   :  { %2112 = vmatpush.bf16.msrb.mxu1 %v13186_v43  ;;  %v13211_v43 = vld [vmem:[%s22631_s1 + $0x70] sm:$0xf0] }
  0x35   :  { %v10438_v44 = vor.u32 %v13211_v43, %v10437_v42 }
  0x38   :  { %2113 = vmatpush.bf16.msrb.mxu1 %v13185_v47  ;;  %v326_v47 = vld [vmem:[%s22651_s26 + $0x98] sm:$0xff] }
  0x3a   :  { %644 = vperm.xlu1 %13863, %v354_v53   ;;  %639 = vperm.xlu0 %13862, %v353_v54   ;;  %v341_v53 = vld [vmem:[%s22651_s26 + $0x110] sm:$0xff]  ;;  %v323_v54 = vld [vmem:[%s22651_s26 + $0x80] sm:$0xff] }
  0x3b   :  { %549 = vperm.xlu2 %13864, %v335_v55   ;;  %1864 = vmatmul.bf16.gmra.mxu0 %v10394_v56  ;;  %v10442_v55 = vor.u32 %v13213_v49, %v10441_v48  ;;  %v10422_v56 = vor.u32 %v13206_v50, %v10419_v51  ;;  %v385_v48 = vld [vmem:[%s22651_s26 + $0x270] sm:$0xff]  ;;  %v356_v50 = vld [vmem:[%s22651_s26 + $0x188] sm:$0xff]  ;;  %v386_v51 = vld [vmem:[%s22651_s26 + $0x278] sm:$0xff] }
  0x3c   :  { %2114 = vmatpush.bf16.msrb.mxu1 %v13184_v52  ;;  %2382 = vmatmul.bf16.gmra.mxu2 %v10402_v61  ;;  %v342_v52 = vld [vmem:[%s22651_s26 + $0x118] sm:$0xff]  ;;  %v324_v61 = vld [vmem:[%s22651_s26 + $0x88] sm:$0xff] }
  0x3d   :  { %2104 = vmatmul.bf16.gmra.mxu1 %v10970_v57  ;;  %v10449_v57 = vld [vmem:[%s22631_s1 + $0x80] sm:$0xf] }
  0x40   :  { %2115 = vmatpush.bf16.msrb.mxu1 %v13183_v58  ;;  %v13214_v58 = vld [vmem:[%s22631_s1 + $0x88] sm:$0xf0] }
  0x41   :  { %v10450_v59 = vor.u32 %v13214_v58, %v10449_v57  ;;  %v13225_v57 = vld [vmem:[%s22631_s1 + $0xe0] sm:$0xf0]  ;;  %v13218_v58 = vld [vmem:[%s22631_s1 + $0xac] sm:$0xf] }
  0x42   :  { %629 = vperm.xlu1 %13863, %v351_v63   ;;  %554 = vperm.xlu0 %13862, %v336_v0   ;;  %v10453_v63 = vld [vmem:[%s22631_s1 + $0x90] sm:$0xf]  ;;  %v13216_v0 = vld [vmem:[%s22631_s1 + $0x98] sm:$0xf0] }
  0x43   :  { %634 = vperm.xlu2 %13864, %v352_v1   ;;  %v13209_v1 = vld [vmem:[%s22631_s1 + $0x64] sm:$0xf]  ;;  %v10454_v6 = vor.u32 %v13216_v0, %v10453_v63  ;;  %v381_v63 = vld [vmem:[%s22651_s26 + $0x250] sm:$0xff] }
  0x44   :  { %2116 = vmatpush.bf16.msrb.mxu1 %v13182_v62  ;;  %v340_v62 = vld [vmem:[%s22651_s26 + $0x108] sm:$0xff] }
  0x48   :  { %2117 = vmatpush.bf16.msrb.mxu1 %v13181_v2  ;;  %v10431_v2 = vld [vmem:[%s22631_s1 + $0x6c] sm:$0xf0] }
  0x4a   :  { %544 = vperm.xlu1 %13863, %v334_v7   ;;  %539 = vperm.xlu0 %13862, %v333_v8   ;;  %v10434_v7 = vor.u32 %v13209_v1, %v10431_v2  ;;  %v10461_v8 = vld [vmem:[%s22631_s1 + $0x98] sm:$0xf] }
  0x4b   :  { %619 = vperm.xlu2 %13864, %v349_v9   ;;  %1869 = vmatmul.bf16.gmra.mxu0 %v10406_v10  ;;  %v13217_v9 = vld [vmem:[%s22631_s1 + $0xa0] sm:$0xf0] }
  0x4c   :  { %2387 = vmatmul.bf16.gmra.mxu2 %v10414_v14  ;;  %v10462_v10 = vor.u32 %v13217_v9, %v10461_v8  ;;  %v10465_v14 = vld [vmem:[%s22631_s1 + $0xa8] sm:$0xf] }
  0x4d   :  { %2118 = vmatmul.bf16.vlgmr.msrb.gmra.mxu1 %v10386_v11  ;;  %v365_v11 = vld [vmem:[%s22651_s26 + $0x1d0] sm:$0xff] }
  0x52   :  { %529 = vperm.xlu1 %13863, %v331_v15   ;;  %624 = vperm.xlu0 %13862, %v350_v16   ;;  %v13219_v15 = vld [vmem:[%s22631_s1 + $0xb0] sm:$0xf0]  ;;  %v13212_v16 = vld [vmem:[%s22631_s1 + $0x7c] sm:$0xf] }
  0x53   :  { %534 = vperm.xlu2 %13864, %v332_v17   ;;  %v10443_v17 = vld [vmem:[%s22631_s1 + $0x84] sm:$0xf0]  ;;  %v10466_v21 = vor.u32 %v13219_v15, %v10465_v14 }
  0x5a   :  { %614 = vperm.xlu1 %13863, %v348_v22   ;;  %609 = vperm.xlu0 %13862, %v347_v23   ;;  %v10446_v22 = vor.u32 %v13212_v16, %v10443_v17  ;;  %v10473_v23 = vld [vmem:[%s22631_s1 + $0xb0] sm:$0xf] }
  0x5b   :  { %519 = vperm.xlu2 %13864, %v329_v24   ;;  %1874 = vmatmul.bf16.gmra.mxu0 %v10418_v25  ;;  %v13220_v24 = vld [vmem:[%s22631_s1 + $0xb8] sm:$0xf0]  ;;  %v10501_v17 = vld [vmem:[%s22631_s1 + $0xf0] sm:$0xf] }
  0x5c   :  { %2392 = vmatmul.bf16.gmra.mxu2 %v10426_v29  ;;  %v10474_v27 = vor.u32 %v13220_v24, %v10473_v23  ;;  %v362_v29 = vld [vmem:[%s22651_s26 + $0x1b8] sm:$0xff] }
  0x5d   :  { %2123 = vmatmul.bf16.gmra.mxu1 %v10398_v26  ;;  %v378_v23 = vld [vmem:[%s22651_s26 + $0x238] sm:$0xff] }
  0x62   :  { %599 = vperm.xlu1 %13863, %v345_v30   ;;  %524 = vperm.xlu0 %13862, %v330_v31   ;;  %v360_v30 = vld [vmem:[%s22651_s26 + $0x1a8] sm:$0xff] }
  0x63   :  { %604 = vperm.xlu2 %13864, %v346_v32   ;;  %v10477_v32 = vld [vmem:[%s22631_s1 + $0xc0] sm:$0xf] }
  0x65   :  { %v14349_v26 = vpop.permute.xlu2 %459 }
  0x6a   :  { %514 = vperm.xlu1 %13863, %v328_v37   ;;  %509 = vperm.xlu0 %13862, %v327_v38   ;;  %v358_v37 = vld [vmem:[%s22651_s26 + $0x198] sm:$0xff]  ;;  %v357_v38 = vld [vmem:[%s22651_s26 + $0x190] sm:$0xff] }
  0x6b   :  { %589 = vperm.xlu2 %13864, %v343_v39   ;;  %1879 = vmatmul.bf16.gmra.mxu0 %v10430_v40  ;;  %v355_v39 = vld [vmem:[%s22651_s26 + $0x180] sm:$0xff]  ;;  %v10478_v40 = vor.u32 %v13222_v33, %v10477_v32 }
  0x6c   :  { %2397 = vmatmul.bf16.gmra.mxu2 %v10438_v44  ;;  %v10485_v44 = vld [vmem:[%s22631_s1 + $0xc8] sm:$0xf] }
  0x6d   :  { %2128 = vmatmul.bf16.gmra.mxu1 %v10410_v41  ;;  %v14374_v36 = vpop.permute.xlu2 %464  ;;  %v10458_v41 = vor.u32 %v13215_v34, %v10455_v35  ;;  %v10509_v34 = vld [vmem:[%s22631_s1 + $0xf8] sm:$0xf]  ;;  %v13229_v35 = vld [vmem:[%s22631_s1 + $0x100] sm:$0xf0] }
  0x72   :  { %499 = vperm.xlu1 %13863, %v325_v45   ;;  %594 = vperm.xlu0 %13862, %v344_v46   ;;  %v13223_v45 = vld [vmem:[%s22631_s1 + $0xd0] sm:$0xf0] }
  0x73   :  { %504 = vperm.xlu2 %13864, %v326_v47   ;;  %v10486_v46 = vor.u32 %v13223_v45, %v10485_v44  ;;  %v373_v44 = vld [vmem:[%s22651_s26 + $0x210] sm:$0xff]  ;;  %v376_v45 = vld [vmem:[%s22651_s26 + $0x228] sm:$0xff] }
  0x75   :  { %v14398_v49 = vpop.permute.xlu2 %439 }
  0x7a   :  { %584 = vperm.xlu1 %13863, %v342_v52   ;;  %579 = vperm.xlu0 %13862, %v341_v53  }
  0x7b   :  { %489 = vperm.xlu2 %13864, %v323_v54   ;;  %1884 = vmatmul.bf16.gmra.mxu0 %v10442_v55 }
  0x7c   :  { %2402 = vmatmul.bf16.gmra.mxu2 %v10450_v59  ;;  %v14347_v25 = vpop.permute.xlu0 %479  ;;  %v14410_v55 = vpop.permute.xlu1 %469  ;;  %v10467_v59 = vld [vmem:[%s22631_s1 + $0xb4] sm:$0xf0] }
  0x7d   :  { %2133 = vmatmul.bf16.gmra.mxu1 %v10422_v56  ;;  %v10489_v56 = vld [vmem:[%s22631_s1 + $0xd8] sm:$0xf]  ;;  %v10470_v1 = vor.u32 %v13218_v58, %v10467_v59  ;;  %v13231_v58 = vld [vmem:[%s22631_s1 + $0x110] sm:$0xf0]  ;;  %v13224_v59 = vld [vmem:[%s22631_s1 + $0xdc] sm:$0xf] }
  0x7e   :  { %v10490_v0 = vor.u32 %v13225_v57, %v10489_v56  ;;  %v10513_v57 = vld [vmem:[%s22631_s1 + $0x108] sm:$0xf] }
  0x82   :  { %569 = vperm.xlu1 %13863, %v339_v60   ;;  %494 = vperm.xlu0 %13862, %v324_v61   ;;  %v384_v60 = vld [vmem:[%s22651_s26 + $0x268] sm:$0xff] }
  0x83   :  { %574 = vperm.xlu2 %13864, %v340_v62   ;;  %v383_v62 = vld [vmem:[%s22651_s26 + $0x260] sm:$0xff] }
  0x84   :  { %v14360_v31 = vpop.permute.xlu0 %484  ;;  %v14447_v9 = vpop.permute.xlu1 %474 }
  0x8a   :  { %724 = vperm.xlu1 %13863, %v370_v3   ;;  %719 = vperm.xlu0 %13862, %v369_v4   ;;  %v10497_v4 = vld [vmem:[%s22631_s1 + $0xe0] sm:$0xf] }
  0x8b   :  { %709 = vperm.xlu2 %13864, %v367_v5   ;;  %1889 = vmatmul.bf16.gmra.mxu0 %v10454_v6  ;;  %v13226_v5 = vld [vmem:[%s22631_s1 + $0xe8] sm:$0xf0]  ;;  %v14445_v6 = vpop.permute.xlu2 %434 }
  0x8c   :  { %2407 = vmatmul.bf16.gmra.mxu2 %v10462_v10  ;;  %v14393_v47 = vpop.permute.xlu0 %449  ;;  %v10498_v8 = vor.u32 %v13226_v5, %v10497_v4  ;;  %v379_v10 = vld [vmem:[%s22651_s26 + $0x240] sm:$0xff]  ;;  %v14479_v24 = vpop.permute.xlu1 %454  ;;  %v401_v5 = vld [vmem:[%s22651_s26 + $0x2f0] sm:$0xff] }
  0x8d   :  { %2138 = vmatmul.bf16.gmra.mxu1 %v10434_v7  ;;  %v371_v4 = vld [vmem:[%s22651_s26 + $0x200] sm:$0xff] }
  0x92   :  { %699 = vperm.xlu1 %13863, %v365_v11   ;;  %714 = vperm.xlu0 %13862, %v368_v12   ;;  %v382_v11 = vld [vmem:[%s22651_s26 + $0x258] sm:$0xff]  ;;  %v380_v12 = vld [vmem:[%s22651_s26 + $0x248] sm:$0xff] }
  0x93   :  { %704 = vperm.xlu2 %13864, %v366_v13  }
  0x94   :  { %v14427_v61 = vpop.permute.xlu0 %444 }
  0x9a   :  { %694 = vperm.xlu1 %13863, %v364_v18   ;;  %689 = vperm.xlu0 %13862, %v363_v19   ;;  %v410_v18 = vpop.permute.xlu2 %409  ;;  %v13228_v19 = vld [vmem:[%s22631_s1 + $0xf8] sm:$0xf0] }
  0x9b   :  { %679 = vperm.xlu2 %13864, %v361_v20   ;;  %1894 = vmatmul.bf16.gmra.mxu0 %v10466_v21  ;;  %v13221_v20 = vld [vmem:[%s22631_s1 + $0xc4] sm:$0xf]  ;;  %v10479_v21 = vld [vmem:[%s22631_s1 + $0xcc] sm:$0xf0] }
  0x9c   :  { %2412 = vmatmul.bf16.gmra.mxu2 %v10474_v27  ;;  %v420_v15 = vpop.permute.xlu0 %419  ;;  %v377_v27 = vld [vmem:[%s22651_s26 + $0x230] sm:$0xff] }
  0x9d   :  { %2143 = vmatmul.bf16.gmra.mxu1 %v10446_v22 }
  0xa2   :  { %669 = vperm.xlu1 %13863, %v359_v28   ;;  %684 = vperm.xlu0 %13862, %v362_v29   ;;  %v375_v28 = vld [vmem:[%s22651_s26 + $0x220] sm:$0xff]  ;;  %v10502_v29 = vor.u32 %v13228_v19, %v10501_v17 }
  0xa3   :  { %674 = vperm.xlu2 %13864, %v360_v30   ;;  %v10482_v30 = vor.u32 %v13221_v20, %v10479_v21 }
  0xa8   :  { %v1860_v42 = vpop.f32.mrf.mxu0 }
  0xa9   :  { %v1861_v22 = vadd.f32 %v1860_v42, %v410_v18 }
  0xaa   :  { %v14385_v43 = vpop.f32.mrf.mxu1  ;;  %664 = vperm.xlu1 %13863, %v358_v37   ;;  %659 = vperm.xlu0 %13862, %v357_v38  }
  0xab   :  { %22653 = vst [vmem:[#allocation3_spill] sm:$0xff] %v14385_v43  ;;  %649 = vperm.xlu2 %13864, %v355_v39   ;;  %1899 = vmatmul.bf16.gmra.mxu0 %v10478_v40  ;;  %v10510_v40 = vor.u32 %v13229_v35, %v10509_v34  ;;  %v10525_v34 = vld [vmem:[%s22631_s1 + $0x120] sm:$0xf]  ;;  %v13234_v35 = vld [vmem:[%s22631_s1 + $0x128] sm:$0xf0] }
  0xac   :  { %2417 = vmatmul.bf16.gmra.mxu2 %v10486_v46  ;;  %v374_v46 = vld [vmem:[%s22651_s26 + $0x218] sm:$0xff] }
  0xad   :  { %2148 = vmatmul.bf16.gmra.mxu1 %v10458_v41  ;;  %v415_v41 = vpop.permute.xlu0 %414 }
  0xaf   :  { %v2378_v54 = vpop.f32.mrf.mxu2 }
  0xb0   :  { %v14406_v52 = vpop.f32.mrf.mxu0 }
  0xb1   :  { %v1863_v42 = vadd.f32 %v14406_v52, %v415_v41 }
  0xb2   :  { %v14408_v53 = vpop.f32.mrf.mxu1  ;;  %799 = vperm.xlu1 %13863, %v385_v48   ;;  %654 = vperm.xlu0 %13862, %v356_v50  }
  0xb3   :  { %22654 = vst [vmem:[#allocation4_spill] sm:$0xff] %v14408_v53  ;;  %804 = vperm.xlu2 %13864, %v386_v51   ;;  %v3208_v53 = vld [vmem:[%s22632_s4 + $0xf0] sm:$0xff] }
  0xb7   :  { %v2380_v7 = vpop.f32.mrf.mxu2 }
  0xb8   :  { %v14435_v2 = vpop.f32.mrf.mxu0 }
  0xba   :  { %v14437_v3 = vpop.f32.mrf.mxu1  ;;  %794 = vperm.xlu1 %13863, %v384_v60   ;;  %789 = vperm.xlu0 %13862, %v383_v62   ;;  %v10491_v60 = vld [vmem:[%s22631_s1 + $0xe4] sm:$0xf0]  ;;  %v1866_v62 = vadd.f32 %v14435_v2, %v420_v15  ;;  %v13232_v15 = vld [vmem:[%s22631_s1 + $0x118] sm:$0xf0] }
  0xbb   :  { %22655 = vst [vmem:[#allocation5_spill] sm:$0xff] %v14437_v3  ;;  %779 = vperm.xlu2 %13864, %v381_v63   ;;  %1904 = vmatmul.bf16.gmra.mxu0 %v10490_v0 }
  0xbc   :  { %2422 = vmatmul.bf16.gmra.mxu2 %v10498_v8  ;;  %v10494_v8 = vor.u32 %v13224_v59, %v10491_v60 }
  0xbd   :  { %2153 = vmatmul.bf16.gmra.mxu1 %v10470_v1  ;;  %v372_v1 = vld [vmem:[%s22651_s26 + $0x208] sm:$0xff] }
  0xbf   :  { %v14462_v16 = vpop.f32.mrf.mxu2 }
  0xc0   :  { %v14458_v13 = vpop.f32.mrf.mxu0 }
  0xc2   :  { %v14460_v14 = vpop.f32.mrf.mxu1  ;;  %769 = vperm.xlu1 %13863, %v379_v10   ;;  %784 = vperm.xlu0 %13862, %v382_v11  }
  0xc3   :  { %22656 = vst [vmem:[#allocation6_spill] sm:$0xff] %v14460_v14  ;;  %774 = vperm.xlu2 %13864, %v380_v12   ;;  %v10521_v12 = vld [vmem:[%s22631_s1 + $0x110] sm:$0xf]  ;;  %v3178_v14 = vld [vmem:[%s22632_s4] sm:$0xff] }
  0xc4   :  { %v10522_v20 = vor.u32 %v13232_v15, %v10521_v12  ;;  %v10537_v15 = vld [vmem:[%s22631_s1 + $0x138] sm:$0xf] }
  0xc7   :  { %v2385_v38 = vpop.f32.mrf.mxu2 }
  0xc8   :  { %v14487_v32 = vpop.f32.mrf.mxu0 }
  0xca   :  { %v2119_v33 = vpop.f32.mrf.mxu1  ;;  %764 = vperm.xlu1 %13863, %v378_v23   ;;  %759 = vperm.xlu0 %13862, %v377_v27   ;;  %v399_v23 = vld [vmem:[%s22651_s26 + $0x2e0] sm:$0xff]  ;;  %v402_v27 = vld [vmem:[%s22651_s26 + $0x2f8] sm:$0xff] }
  0xcb   :  { %v2120_v37 = vadd.f32 %v2119_v33, %v1861_v22  ;;  %749 = vperm.xlu2 %13864, %v375_v28   ;;  %1909 = vmatmul.bf16.gmra.mxu0 %v10502_v29  ;;  %v400_v28 = vld [vmem:[%s22651_s26 + $0x2e8] sm:$0xff] }
  0xcc   :  { %2427 = vmatmul.bf16.gmra.mxu2 %v10510_v40 }
  0xcd   :  { %v2379_v39 = vadd.f32 %v2378_v54, %v2120_v37  ;;  %2158 = vmatmul.bf16.gmra.mxu1 %v10482_v30  ;;  %v430_v54 = vpop.permute.xlu1 %429  ;;  %v13227_v37 = vld [vmem:[%s22631_s1 + $0xf4] sm:$0xf] }
  0xce   :  { %v1871_v40 = vadd.f32 %v14487_v32, %v430_v54  ;;  %v10533_v54 = vld [vmem:[%s22631_s1 + $0x128] sm:$0xf] }
  0xcf   :  { %v14507_v52 = vpop.f32.mrf.mxu2  ;;  %v2628_v63 = vmax.f32 %v2379_v39, 0.0  ;;  %v10503_v39 = vld [vmem:[%s22631_s1 + $0xfc] sm:$0xf0] }
  0xd0   :  { %v14505_v48 = vpop.f32.mrf.mxu0 }
  0xd2   :  { %v2121_v50 = vpop.f32.mrf.mxu1  ;;  %739 = vperm.xlu1 %13863, %v373_v44   ;;  %754 = vperm.xlu0 %13862, %v376_v45   ;;  %v397_v44 = vld [vmem:[%s22651_s26 + $0x2d0] sm:$0xff]  ;;  %v395_v45 = vld [vmem:[%s22651_s26 + $0x2c0] sm:$0xff] }
  0xd3   :  { %v2122_v51 = vadd.f32 %v2121_v50, %v1863_v42  ;;  %744 = vperm.xlu2 %13864, %v374_v46   ;;  %v398_v42 = vld [vmem:[%s22651_s26 + $0x2d8] sm:$0xff]  ;;  %v10526_v46 = vor.u32 %v13234_v35, %v10525_v34  ;;  %v10506_v50 = vor.u32 %v13227_v37, %v10503_v39  ;;  %v13238_v35 = vld [vmem:[%s22631_s1 + $0x148] sm:$0xf0] }
  0xd5   :  { %v2381_v56 = vadd.f32 %v2380_v7, %v2122_v51  ;;  %v10514_v7 = vor.u32 %v13231_v58, %v10513_v57  ;;  %v425_v21 = vpop.permute.xlu1 %424  ;;  %v13235_v57 = vld [vmem:[%s22631_s1 + $0x130] sm:$0xf0]  ;;  %v14588_v58 = vpop.permute.xlu2 %564 }
  0xd6   :  { %v1868_v22 = vadd.f32 %v14458_v13, %v425_v21 }
  0xd7   :  { %v2629_v0 = vmax.f32 %v2381_v56, 0.0  ;;  %v2390_v18 = vpop.f32.mrf.mxu2 }
  0xd8   :  { %v14533_v11 = vpop.f32.mrf.mxu0 }
  0xd9   :  { %v14531_v10 = vpack.c.bf16 %v2629_v0, %v2628_v63  ;;  %v10534_v63 = vor.u32 %v13235_v57, %v10533_v54  ;;  %v1873_v0 = vadd.f32 %v14505_v48, %v14445_v6  ;;  %v1876_v21 = vadd.f32 %v14533_v11, %v14398_v49  ;;  %v10545_v11 = vld [vmem:[%s22631_s1 + $0x140] sm:$0xf] }
  0xda   :  { %v2124_v2 = vpop.f32.mrf.mxu1  ;;  %734 = vperm.xlu1 %13863, %v372_v1   ;;  %729 = vperm.xlu0 %13862, %v371_v4   ;;  %v393_v1 = vld [vmem:[%s22651_s26 + $0x2b0] sm:$0xff]  ;;  %v396_v4 = vld [vmem:[%s22651_s26 + $0x2c8] sm:$0xff] }
  0xdb   :  { %v2125_v17 = vadd.f32 %v2124_v2, %v1866_v62  ;;  %879 = vperm.xlu2 %13864, %v401_v5   ;;  %1914 = vmatmul.bf16.gmra.mxu0 %v10514_v7  ;;  %v394_v5 = vld [vmem:[%s22651_s26 + $0x2b8] sm:$0xff] }
  0xdc   :  { %2432 = vmatmul.bf16.gmra.mxu2 %v10522_v20  ;;  %v10515_v20 = vld [vmem:[%s22631_s1 + $0x114] sm:$0xf0] }
  0xdd   :  { %v2384_v19 = vadd.f32 %v14462_v16, %v2125_v17  ;;  %2163 = vmatmul.bf16.gmra.mxu1 %v10494_v8  ;;  %v14604_v8 = vpop.permute.xlu0 %639  ;;  %v14608_v48 = vpop.permute.xlu2 %549  ;;  %v13237_v17 = vld [vmem:[%s22631_s1 + $0x140] sm:$0xf0] }
  0xde   :  { %22657 = vst [vmem:[#allocation7_spill] sm:$0xff] %v14604_v8 }
  0xdf   :  { %v14554_v13 = vpop.f32.mrf.mxu2  ;;  %v2630_v41 = vmax.f32 %v2384_v19, 0.0  ;;  %v13230_v19 = vld [vmem:[%s22631_s1 + $0x10c] sm:$0xf] }
  0xe0   :  { %v14552_v16 = vpop.f32.mrf.mxu0 }
  0xe2   :  { %v2126_v29 = vpop.f32.mrf.mxu1  ;;  %869 = vperm.xlu1 %13863, %v399_v23   ;;  %884 = vperm.xlu0 %13862, %v402_v27   ;;  %v392_v23 = vld [vmem:[%s22651_s26 + $0x2a8] sm:$0xff]  ;;  %v391_v27 = vld [vmem:[%s22651_s26 + $0x2a0] sm:$0xff] }
  0xe3   :  { %v2127_v30 = vadd.f32 %v2126_v29, %v1868_v22  ;;  %874 = vperm.xlu2 %13864, %v400_v28   ;;  %v389_v28 = vld [vmem:[%s22651_s26 + $0x290] sm:$0xff]  ;;  %v10538_v29 = vor.u32 %v13237_v17, %v10537_v15  ;;  %v403_v15 = vld [vmem:[%s22651_s26 + $0x300] sm:$0xff] }
  0xe5   :  { %v2386_v33 = vadd.f32 %v2385_v38, %v2127_v30  ;;  %v10518_v30 = vor.u32 %v13230_v19, %v10515_v20 }
  0xe7   :  { %v2631_v38 = vmax.f32 %v2386_v33, 0.0  ;;  %v2395_v60 = vpop.f32.mrf.mxu2 }
  0xe8   :  { %v14580_v56 = vpop.f32.mrf.mxu0 }
  0xe9   :  { %v14578_v51 = vpack.c.bf16 %v2631_v38, %v2630_v41  ;;  %v10546_v38 = vor.u32 %v13238_v35, %v10545_v11  ;;  %v404_v11 = vld [vmem:[%s22651_s26 + $0x308] sm:$0xff] }
  0xea   :  { %v2129_v32 = vpop.f32.mrf.mxu1  ;;  %864 = vperm.xlu1 %13863, %v398_v42   ;;  %859 = vperm.xlu0 %13862, %v397_v44   ;;  %v14648_v42 = vpop.permute.xlu2 %634  ;;  %v1878_v44 = vadd.f32 %v14552_v16, %v14427_v61 }
  0xeb   :  { %v2130_v59 = vadd.f32 %v2129_v32, %v1871_v40  ;;  %849 = vperm.xlu2 %13864, %v395_v45   ;;  %1919 = vmatmul.bf16.gmra.mxu0 %v10526_v46  ;;  %v14645_v40 = vpop.permute.xlu0 %554  ;;  %22658 = vst [vmem:[#allocation8_spill] sm:$0xff] %v14648_v42  ;;  %v405_v45 = vld [vmem:[%s22651_s26 + $0x310] sm:$0xff]  ;;  %v390_v46 = vld [vmem:[%s22651_s26 + $0x298] sm:$0xff]  ;;  %v14665_v16 = vpop.permute.xlu1 %559 }
  0xec   :  { %2437 = vmatmul.bf16.gmra.mxu2 %v10534_v63  ;;  %v13233_v63 = vld [vmem:[%s22631_s1 + $0x124] sm:$0xf] }
  0xed   :  { %v2389_v62 = vadd.f32 %v14507_v52, %v2130_v59  ;;  %2168 = vmatmul.bf16.gmra.mxu1 %v10506_v50  ;;  %v10549_v59 = vld [vmem:[%s22631_s1 + $0x150] sm:$0xf] }
  0xef   :  { %v14606_v6 = vpop.f32.mrf.mxu2 }
  0xf0   :  { %v14602_v52 = vpop.f32.mrf.mxu0 }
  0xf2   :  { %v2131_v7 = vpop.f32.mrf.mxu1  ;;  %839 = vperm.xlu1 %13863, %v393_v1   ;;  %854 = vperm.xlu0 %13862, %v396_v4  }
  0xf3   :  { %v2132_v2 = vadd.f32 %v2131_v7, %v1873_v0  ;;  %844 = vperm.xlu2 %13864, %v394_v5   ;;  %v10527_v0 = vld [vmem:[%s22631_s1 + $0x12c] sm:$0xf0]  ;;  %v14679_v1 = vpop.permute.xlu0 %539  ;;  %v388_v7 = vld [vmem:[%s22651_s26 + $0x288] sm:$0xff] }
  0xf4   :  { %v10530_v19 = vor.u32 %v13233_v63, %v10527_v0 }
  0xf5   :  { %v2391_v12 = vadd.f32 %v2390_v18, %v2132_v2  ;;  %v2632_v18 = vmax.f32 %v2389_v62, 0.0  ;;  %v13240_v62 = vld [vmem:[%s22631_s1 + $0x158] sm:$0xf0]  ;;  %v14686_v2 = vpop.permute.xlu2 %619 }
  0xf6   :  { %22659 = vst [vmem:[#allocation9_spill] sm:$0xff] %v14686_v2  ;;  %v10550_v17 = vor.u32 %v13240_v62, %v10549_v59  ;;  %v3188_v59 = vld [vmem:[%s22632_s4 + $0x50] sm:$0xff] }
  0xf7   :  { %v2633_v22 = vmax.f32 %v2391_v12, 0.0  ;;  %v14643_v39 = vpop.f32.mrf.mxu2  ;;  %v387_v12 = vld [vmem:[%s22651_s26 + $0x280] sm:$0xff] }
  0xf8   :  { %v14635_v34 = vpop.f32.mrf.mxu0 }
  0xf9   :  { %v14633_v33 = vpack.c.bf16 %v2633_v22, %v2632_v18  ;;  %v13241_v18 = vld [vmem:[%s22631_s1 + $0x160] sm:$0xf0] }
  0xfa   :  { %v2134_v49 = vpop.f32.mrf.mxu1  ;;  %834 = vperm.xlu1 %13863, %v392_v23   ;;  %829 = vperm.xlu0 %13862, %v391_v27  }
  0xfb   :  { %v2135_v37 = vadd.f32 %v2134_v49, %v1876_v21  ;;  %819 = vperm.xlu2 %13864, %v389_v28   ;;  %1924 = vmatmul.bf16.gmra.mxu0 %v10538_v29  ;;  %v10557_v21 = vld [vmem:[%s22631_s1 + $0x158] sm:$0xf]  ;;  %v14709_v29 = vpop.permute.xlu1 %644  ;;  %v14714_v49 = vpop.permute.xlu0 %624 }
  0xfc   :  { %2442 = vmatmul.bf16.gmra.mxu2 %v10546_v38  ;;  %v10558_v28 = vor.u32 %v13241_v18, %v10557_v21  ;;  %22660 = vst [vmem:[#allocation10_spill] sm:$0xff] %v14709_v29  ;;  %v3187_v21 = vld [vmem:[%s22632_s4 + $0x48] sm:$0xff] }
  0xfd   :  { %v2394_v41 = vadd.f32 %v14554_v13, %v2135_v37  ;;  %2173 = vmatmul.bf16.gmra.mxu1 %v10518_v30  ;;  %v406_v13 = vld [vmem:[%s22651_s26 + $0x318] sm:$0xff]  ;;  %v3192_v30 = vld [vmem:[%s22632_s4 + $0x70] sm:$0xff]  ;;  %22661 = vst [vmem:[#allocation11_spill] sm:$0xff] %v14714_v49 }
  0xff   :  { %v14663_v61 = vpop.f32.mrf.mxu2  ;;  %v2634_v4 = vmax.f32 %v2394_v41, 0.0  ;;  %v14726_v41 = vpop.permute.xlu2 %534 }
 0x100   :  { %v14661_v50 = vpop.f32.mrf.mxu0 }
 0x102   :  { %v2136_v32 = vpop.f32.mrf.mxu1  ;;  %899 = vperm.xlu1 %13863, %v405_v45   ;;  %824 = vperm.xlu0 %13862, %v390_v46   ;;  %v13243_v45 = vld [vmem:[%s22631_s1 + $0x170] sm:$0xf0]  ;;  %v13236_v46 = vld [vmem:[%s22631_s1 + $0x13c] sm:$0xf] }
 0x103   :  { %v2137_v54 = vadd.f32 %v2136_v32, %v1878_v44  ;;  %904 = vperm.xlu2 %13864, %v406_v13   ;;  %v10561_v44 = vld [vmem:[%s22631_s1 + $0x168] sm:$0xf] }
 0x104   :  { %v10539_v13 = vld [vmem:[%s22631_s1 + $0x144] sm:$0xf0]  ;;  %v10562_v62 = vor.u32 %v13243_v45, %v10561_v44  ;;  %v13246_v44 = vld [vmem:[%s22631_s1 + $0x188] sm:$0xf0]  ;;  %v13239_v45 = vld [vmem:[%s22631_s1 + $0x154] sm:$0xf] }
 0x105   :  { %v2396_v57 = vadd.f32 %v2395_v60, %v2137_v54  ;;  %v1881_v60 = vadd.f32 %v14580_v56, %v14393_v47  ;;  %v3191_v32 = vld [vmem:[%s22632_s4 + $0x68] sm:$0xff]  ;;  %v14745_v54 = vpop.permute.xlu1 %629  ;;  %v10542_v63 = vor.u32 %v13236_v46, %v10539_v13  ;;  %v10551_v46 = vld [vmem:[%s22631_s1 + $0x15c] sm:$0xf0] }
 0x106   :  { %22662 = vst [vmem:[#allocation12_spill] sm:$0xff] %v14745_v54  ;;  %v13250_v54 = vld [vmem:[%s22631_s1 + $0x1a8] sm:$0xf0] }
 0x107   :  { %v2635_v5 = vmax.f32 %v2396_v57, 0.0  ;;  %v14704_v23 = vpop.f32.mrf.mxu2  ;;  %v3190_v57 = vld [vmem:[%s22632_s4 + $0x60] sm:$0xff] }
 0x108   :  { %v14696_v47 = vpop.f32.mrf.mxu0 }
 0x109   :  { %v14694_v20 = vpack.c.bf16 %v2635_v5, %v2634_v4  ;;  %v10569_v4 = vld [vmem:[%s22631_s1 + $0x170] sm:$0xf]  ;;  %v13244_v5 = vld [vmem:[%s22631_s1 + $0x178] sm:$0xf0] }
 0x10a   :  { %v2139_v56 = vpop.f32.mrf.mxu1  ;;  %814 = vperm.xlu1 %13863, %v388_v7   ;;  %809 = vperm.xlu0 %13862, %v387_v12   ;;  %v14763_v7 = vpop.permute.xlu0 %609 }
 0x10b   :  { %v2140_v22 = vadd.f32 %v2139_v56, %v1881_v60  ;;  %889 = vperm.xlu2 %13864, %v403_v15   ;;  %1929 = vmatmul.bf16.gmra.mxu0 %v10550_v17  ;;  %22663 = vst [vmem:[#allocation13_spill] sm:$0xff] %v14763_v7  ;;  %v14767_v15 = vpop.permute.xlu2 %519  ;;  %v10570_v17 = vor.u32 %v13244_v5, %v10569_v4  ;;  %v3189_v56 = vld [vmem:[%s22632_s4 + $0x58] sm:$0xff] }
 0x10c   :  { %2447 = vmatmul.bf16.gmra.mxu2 %v10558_v28 }
 0x10d   :  { %v14707_v27 = vadd.f32 %v14606_v6, %v2140_v22  ;;  %2178 = vmatmul.bf16.gmra.mxu1 %v10530_v19  ;;  %v3193_v6 = vld [vmem:[%s22632_s4 + $0x78] sm:$0xff]  ;;  %v3186_v19 = vld [vmem:[%s22632_s4 + $0x40] sm:$0xff]  ;;  %v14782_v28 = vpop.permute.xlu1 %544 }
 0x10f   :  { %v14728_v38 = vpop.f32.mrf.mxu2 }
 0x110   :  { %v14722_v35 = vpop.f32.mrf.mxu0 }
 0x112   :  { %v14724_v37 = vpop.f32.mrf.mxu1  ;;  %3350 = vperm.xlu1 %13863, %v3192_v30   ;;  %894 = vperm.xlu0 %13862, %v404_v11   ;;  %v14786_v11 = vpop.permute.xlu0 %524 }
 0x113   :  { %3355 = vperm.xlu2 %13864, %v3193_v6   ;;  %v10573_v6 = vld [vmem:[%s22631_s1 + $0x180] sm:$0xf]  ;;  %v14800_v13 = vpop.permute.xlu2 %604 }
 0x117   :  { %v14765_v12 = vpop.f32.mrf.mxu2 }
 0x118   :  { %v14753_v0 = vpop.f32.mrf.mxu0 }
 0x119   :  { %v1896_v8 = vadd.f32 %v14753_v0, %v14347_v25  ;;  %v1888_v0 = vadd.f32 %v14661_v50, %v14374_v36 }
 0x11a   :  { %v14755_v60 = vpop.f32.mrf.mxu1  ;;  %3345 = vperm.xlu1 %13863, %v3191_v32   ;;  %3340 = vperm.xlu0 %13862, %v3190_v57   ;;  %v3185_v32 = vld [vmem:[%s22632_s4 + $0x38] sm:$0xff]  ;;  %v3184_v57 = vld [vmem:[%s22632_s4 + $0x30] sm:$0xff] }
 0x11b   :  { %3330 = vperm.xlu2 %13864, %v3188_v59   ;;  %1934 = vmatmul.bf16.gmra.mxu0 %v10562_v62  ;;  %v3182_v59 = vld [vmem:[%s22632_s4 + $0x20] sm:$0xff]  ;;  %v10574_v62 = vor.u32 %v13246_v44, %v10573_v6  ;;  %v14823_v44 = vpop.permute.xlu0 %509 }
 0x11c   :  { %2452 = vmatmul.bf16.gmra.mxu2 %v10570_v17  ;;  %v10581_v17 = vld [vmem:[%s22631_s1 + $0x188] sm:$0xf] }
 0x11d   :  { %2183 = vmatmul.bf16.gmra.mxu1 %v10542_v63  ;;  %v10554_v63 = vor.u32 %v13239_v45, %v10551_v46  ;;  %v3180_v45 = vld [vmem:[%s22632_s4 + $0x10] sm:$0xff]  ;;  %v14828_v46 = vpop.permute.xlu2 %589 }
 0x11f   :  { %v14784_v30 = vpop.f32.mrf.mxu2 }
 0x120   :  { %v14778_v18 = vpop.f32.mrf.mxu0 }
 0x121   :  { %v1898_v7 = vadd.f32 %v14778_v18, %v14360_v31  ;;  %v1886_v31 = vadd.f32 %v14635_v34, %v14349_v26 }
 0x122   :  { %v14780_v22 = vpop.f32.mrf.mxu1  ;;  %3320 = vperm.xlu1 %13863, %v3186_v19   ;;  %3335 = vperm.xlu0 %13862, %v3189_v56   ;;  %v13247_v19 = vld [vmem:[%s22631_s1 + $0x190] sm:$0xf0] }
 0x123   :  { %3325 = vperm.xlu2 %13864, %v3187_v21   ;;  %v14821_v21 = vpop.permute.xlu1 %529  ;;  %v10582_v6 = vor.u32 %v13247_v19, %v10581_v17  ;;  %v10585_v17 = vld [vmem:[%s22631_s1 + $0x198] sm:$0xf]  ;;  %v13249_v19 = vld [vmem:[%s22631_s1 + $0x1a0] sm:$0xf0]  ;;  %v14857_v43 = vpop.permute.xlu0 %594 }
 0x124   :  { %v10586_v3 = vor.u32 %v13249_v19, %v10585_v17  ;;  %v1893_v19 = vadd.f32 %v14722_v35, %v14447_v9  ;;  %v1883_v35 = vadd.f32 %v14602_v52, %v14479_v24  ;;  %v13252_v24 = vld [vmem:[%s22631_s1 + $0x1b8] sm:$0xf0]  ;;  %v13245_v52 = vld [vmem:[%s22631_s1 + $0x184] sm:$0xf] }
 0x125   :  { %v14875_v42 = vpop.permute.xlu2 %504 }
 0x127   :  { %v14819_v56 = vpop.f32.mrf.mxu2 }
 0x128   :  { %v14811_v4 = vpop.f32.mrf.mxu0 }
 0x12a   :  { %v2149_v5 = vpop.f32.mrf.mxu1  ;;  %3315 = vperm.xlu1 %13863, %v3185_v32   ;;  %3310 = vperm.xlu0 %13862, %v3184_v57   ;;  %v3183_v32 = vld [vmem:[%s22632_s4 + $0x28] sm:$0xff]  ;;  %v3181_v57 = vld [vmem:[%s22632_s4 + $0x18] sm:$0xff] }
 0x12b   :  { %3300 = vperm.xlu2 %13864, %v3182_v59   ;;  %1939 = vmatmul.bf16.gmra.mxu0 %v10574_v62 }
 0x12c   :  { %2457 = vmatmul.bf16.gmra.mxu2 %v10582_v6  ;;  %v13242_v6 = vld [vmem:[%s22631_s1 + $0x16c] sm:$0xf] }
 0x12d   :  { %2188 = vmatmul.bf16.gmra.mxu1 %v10554_v63 }
 0x12f   :  { %v14838_v63 = vpop.f32.mrf.mxu2 }
 0x130   :  { %v14836_v59 = vpop.f32.mrf.mxu0 }
 0x132   :  { %v2151_v62 = vpop.f32.mrf.mxu1  ;;  %3290 = vperm.xlu1 %13863, %v3180_v45   ;;  %3305 = vperm.xlu0 %13862, %v3183_v32   ;;  %v10563_v45 = vld [vmem:[%s22631_s1 + $0x174] sm:$0xf0]  ;;  %v14852_v32 = vpop.permute.xlu1 %614 }
 0x133   :  { %3295 = vperm.xlu2 %13864, %v3181_v57   ;;  %22664 = vst [vmem:[#allocation14_spill] sm:$0xff] %v14852_v32  ;;  %v3179_v57 = vld [vmem:[%s22632_s4 + $0x8] sm:$0xff]  ;;  %v10566_v2 = vor.u32 %v13242_v6, %v10563_v45  ;;  %v10593_v32 = vld [vmem:[%s22631_s1 + $0x1a0] sm:$0xf]  ;;  %v1891_v45 = vadd.f32 %v14696_v47, %v14410_v55  ;;  %v2152_v9 = vadd.f32 %v2151_v62, %v1893_v19  ;;  %v3225_v55 = vld [vmem:[%s22632_s4 + $0x178] sm:$0xff] }
 0x134   :  { %v10594_v6 = vor.u32 %v13250_v54, %v10593_v32  ;;  %v2147_v54 = vadd.f32 %v14780_v22, %v1888_v0  ;;  %v3207_v19 = vld [vmem:[%s22632_s4 + $0xe8] sm:$0xff] }
 0x135   :  { %v2150_v50 = vadd.f32 %v2149_v5, %v1891_v45  ;;  %v2411_v26 = vadd.f32 %v14765_v12, %v2152_v9  ;;  %v2145_v5 = vadd.f32 %v14755_v60, %v1886_v31  ;;  %v10575_v12 = vld [vmem:[%s22631_s1 + $0x18c] sm:$0xf0]  ;;  %v2142_v60 = vadd.f32 %v14724_v37, %v1883_v35  ;;  %v13253_v9 = vld [vmem:[%s22631_s1 + $0x1c0] sm:$0xf0] }
 0x136   :  { %v10578_v0 = vor.u32 %v13245_v52, %v10575_v12 }
 0x137   :  { %v14877_v17 = vpop.f32.mrf.mxu2 }
 0x138   :  { %v14865_v29 = vpop.f32.mrf.mxu0 }
 0x13a   :  { %v2154_v49 = vpop.f32.mrf.mxu1  ;;  %3285 = vperm.xlu1 %13863, %v3179_v57   ;;  %3280 = vperm.xlu0 %13862, %v3178_v14   ;;  %v14890_v14 = vpop.permute.xlu1 %599  ;;  %v2406_v57 = vadd.f32 %v14704_v23, %v2147_v54  ;;  %v10605_v23 = vld [vmem:[%s22631_s1 + $0x1b8] sm:$0xf] }
 0x13b   :  { %3430 = vperm.xlu2 %13864, %v3208_v53   ;;  %1944 = vmatmul.bf16.gmra.mxu0 %v10586_v3  ;;  %v2155_v25 = vadd.f32 %v2154_v49, %v1896_v8  ;;  %v3224_v53 = vld [vmem:[%s22632_s4 + $0x170] sm:$0xff]  ;;  %v3209_v3 = vld [vmem:[%s22632_s4 + $0xf8] sm:$0xff]  ;;  %v14903_v49 = vpop.permute.xlu0 %579 }
 0x13c   :  { %2462 = vmatmul.bf16.gmra.mxu2 %v10594_v6  ;;  %v2641_v6 = vmax.f32 %v2411_v26, 0.0  ;;  %v10606_v26 = vor.u32 %v13253_v9, %v10605_v23 }
 0x13d   :  { %2193 = vmatmul.bf16.gmra.mxu1 %v10566_v2  ;;  %v2414_v2 = vadd.f32 %v14784_v30, %v2155_v25  ;;  %v490_v30 = vpop.permute.xlu2 %489  ;;  %v3206_v25 = vld [vmem:[%s22632_s4 + $0xe0] sm:$0xff] }
 0x13e   :  { %v1901_v22 = vadd.f32 %v14811_v4, %v490_v30 }
 0x13f   :  { %v14908_v18 = vpop.f32.mrf.mxu2  ;;  %v2642_v62 = vmax.f32 %v2414_v2, 0.0 }
 0x140   :  { %v14900_v36 = vpop.f32.mrf.mxu0 }
 0x142   :  { %v2156_v8 = vpop.f32.mrf.mxu1  ;;  %3510 = vperm.xlu1 %13863, %v3224_v53   ;;  %3435 = vperm.xlu0 %13862, %v3209_v3   ;;  %v2404_v3 = vadd.f32 %v14663_v61, %v2145_v5 }
 0x143   :  { %v2157_v47 = vadd.f32 %v2156_v8, %v1898_v7  ;;  %3515 = vperm.xlu2 %13864, %v3225_v55   ;;  %v10597_v7 = vld [vmem:[%s22631_s1 + $0x1b0] sm:$0xf]  ;;  %v14947_v8 = vpop.permute.xlu1 %514  ;;  %v495_v61 = vpop.permute.xlu0 %494 }
 0x144   :  { %v10598_v4 = vor.u32 %v13252_v24, %v10597_v7  ;;  %v1903_v7 = vadd.f32 %v14836_v59, %v495_v61  ;;  %v3223_v24 = vld [vmem:[%s22632_s4 + $0x168] sm:$0xff]  ;;  %v2636_v59 = vmax.f32 %v14707_v27, 0.0  ;;  %v13248_v27 = vld [vmem:[%s22631_s1 + $0x19c] sm:$0xf]  ;;  %v3218_v61 = vld [vmem:[%s22632_s4 + $0x140] sm:$0xff] }
 0x145   :  { %v2416_v34 = vadd.f32 %v14819_v56, %v2157_v47  ;;  %v2409_v56 = vadd.f32 %v14728_v38, %v2150_v50  ;;  %v3222_v38 = vld [vmem:[%s22632_s4 + $0x160] sm:$0xff]  ;;  %v2401_v50 = vadd.f32 %v14643_v39, %v2142_v60  ;;  %v2639_v47 = vmax.f32 %v2406_v57, 0.0  ;;  %v3204_v39 = vld [vmem:[%s22632_s4 + $0xd0] sm:$0xff]  ;;  %v10609_v60 = vld [vmem:[%s22631_s1 + $0x1c8] sm:$0xf] }
 0x147   :  { %v2643_v32 = vmax.f32 %v2416_v34, 0.0  ;;  %v2640_v55 = vmax.f32 %v2409_v56, 0.0  ;;  %v14950_v2 = vpop.f32.mrf.mxu2  ;;  %v2638_v34 = vmax.f32 %v2404_v3, 0.0  ;;  %v2637_v30 = vmax.f32 %v2401_v50, 0.0 }
 0x148   :  { %v14938_v53 = vpop.f32.mrf.mxu0 }
 0x149   :  { %v3135_v45 = vpack.c.bf16 %v2643_v32, %v2642_v62  ;;  %v3134_v54 = vpack.c.bf16 %v2641_v6, %v2640_v55  ;;  %v3133_v5 = vpack.c.bf16 %v2639_v47, %v2638_v34  ;;  %v3132_v32 = vpack.c.bf16 %v2637_v30, %v2636_v59  ;;  %v10587_v6 = vld [vmem:[%s22631_s1 + $0x1a4] sm:$0xf0]  ;;  %v10617_v55 = vld [vmem:[%s22631_s1 + $0x1d0] sm:$0xf] }
 0x14a   :  { %v2159_v37 = vpop.f32.mrf.mxu1  ;;  %3425 = vperm.xlu1 %13863, %v3207_v19   ;;  %3420 = vperm.xlu0 %13862, %v3206_v25   ;;  %v13255_v19 = vld [vmem:[%s22631_s1 + $0x1d0] sm:$0xf0]  ;;  %v10590_v23 = vor.u32 %v13248_v27, %v10587_v6 }
 0x14b   :  { %v2160_v31 = vadd.f32 %v2159_v37, %v1901_v22  ;;  %5679 = vmatpush.bf16.msra.mxu3 %v3135_v45  ;;  %3500 = vperm.xlu2 %13864, %v3222_v38   ;;  %v500_v57 = vpop.permute.xlu1 %499  ;;  %v3221_v38 = vld [vmem:[%s22632_s4 + $0x158] sm:$0xff]  ;;  %v10610_v37 = vor.u32 %v13255_v19, %v10609_v60  ;;  %v3216_v60 = vld [vmem:[%s22632_s4 + $0x130] sm:$0xff] }
 0x14c   :  { %1949 = vmatmul.bf16.gmra.mxu0 %v10598_v4  ;;  %2467 = vmatmul.bf16.gmra.mxu2 %v10606_v26  ;;  %v3220_v4 = vld [vmem:[%s22632_s4 + $0x150] sm:$0xff]  ;;  %v1908_v26 = vadd.f32 %v14900_v36, %v14875_v42  ;;  %v13350_v42 = vld [vmem:[%s22633_s3 + $0x18] sm:$0xf0] }
 0x14d   :  { %v2419_v35 = vadd.f32 %v14838_v63, %v2160_v31  ;;  %2198 = vmatmul.bf16.gmra.mxu1 %v10578_v0  ;;  %v3205_v63 = vld [vmem:[%s22632_s4 + $0xd8] sm:$0xff]  ;;  %v3202_v0 = vld [vmem:[%s22632_s4 + $0xc0] sm:$0xff]  ;;  %v13259_v6 = vld [vmem:[%s22631_s1 + $0x1f0] sm:$0xf0] }
 0x14e   :  { %v13256_v31 = vld [vmem:[%s22631_s1 + $0x1d8] sm:$0xf0] }
 0x14f   :  { %5680 = vmatpush.bf16.msra.mxu3 %v3134_v54  ;;  %v14966_v56 = vpop.f32.mrf.mxu2  ;;  %v2644_v45 = vmax.f32 %v2419_v35, 0.0  ;;  %v10618_v54 = vor.u32 %v13256_v31, %v10617_v55 }
 0x150   :  { %v14963_v52 = vpop.f32.mrf.mxu0 }
 0x152   :  { %v2161_v12 = vpop.f32.mrf.mxu1  ;;  %3410 = vperm.xlu1 %13863, %v3204_v39   ;;  %3505 = vperm.xlu0 %13862, %v3223_v24   ;;  %v13258_v24 = vld [vmem:[%s22631_s1 + $0x1e8] sm:$0xf0] }
 0x153   :  { %v2162_v22 = vadd.f32 %v2161_v12, %v1903_v7  ;;  %5681 = vmatpush.bf16.msra.mxu3 %v3133_v5  ;;  %3415 = vperm.xlu2 %13864, %v3205_v63   ;;  %v10621_v5 = vld [vmem:[%s22631_s1 + $0x1e0] sm:$0xf]  ;;  %v13251_v63 = vld [vmem:[%s22631_s1 + $0x1b4] sm:$0xf] }
 0x154   :  { %v10599_v12 = vld [vmem:[%s22631_s1 + $0x1bc] sm:$0xf0] }
 0x155   :  { %v2421_v62 = vadd.f32 %v14877_v17, %v2162_v22  ;;  %v1906_v17 = vadd.f32 %v14865_v29, %v500_v57  ;;  %v10622_v57 = vor.u32 %v13258_v24, %v10621_v5  ;;  %v10602_v19 = vor.u32 %v13251_v63, %v10599_v12  ;;  %v13262_v63 = vld [vmem:[%s22631_s1 + $0x208] sm:$0xf0] }
 0x157   :  { %v2645_v25 = vmax.f32 %v2421_v62, 0.0  ;;  %5682 = vmatpush.bf16.msra.mxu3 %v3132_v32  ;;  %v15002_v47 = vpop.f32.mrf.mxu2  ;;  %v3201_v62 = vld [vmem:[%s22632_s4 + $0xb8] sm:$0xff]  ;;  %v3200_v32 = vld [vmem:[%s22632_s4 + $0xb0] sm:$0xff] }
 0x158   :  { %v14993_v29 = vpop.f32.mrf.mxu0 }
 0x159   :  { %v14991_v9 = vpack.c.bf16 %v2645_v25, %v2644_v45 }
 0x15a   :  { %v2164_v3 = vpop.f32.mrf.mxu1  ;;  %3495 = vperm.xlu1 %13863, %v3221_v38   ;;  %3490 = vperm.xlu0 %13862, %v3220_v4   ;;  %v1913_v4 = vadd.f32 %v14963_v52, %v14947_v8  ;;  %v11105_v8 = vld [vmem:[%s22633_s3 + $0x38] sm:$0xf]  ;;  %v13357_v52 = vld [vmem:[%s22633_s3 + $0x50] sm:$0xf0] }
 0x15b   :  { %v2165_v50 = vadd.f32 %v2164_v3, %v1906_v17  ;;  %5683 = vmatpush.bf16.msra.mxu3 %v14694_v20  ;;  %3400 = vperm.xlu2 %13864, %v3202_v0   ;;  %v3203_v20 = vld [vmem:[%s22632_s4 + $0xc8] sm:$0xff]  ;;  %v3198_v0 = vld [vmem:[%s22632_s4 + $0xa0] sm:$0xff] }
 0x15c   :  { %1954 = vmatmul.bf16.gmra.mxu0 %v10610_v37  ;;  %2472 = vmatmul.bf16.gmra.mxu2 %v10618_v54  ;;  %v3217_v37 = vld [vmem:[%s22632_s4 + $0x138] sm:$0xff]  ;;  %v11106_v54 = vor.u32 %v13357_v52, %v11105_v8  ;;  %v3210_v8 = vld [vmem:[%s22632_s4 + $0x100] sm:$0xff] }
 0x15d   :  { %v2424_v35 = vadd.f32 %v14908_v18, %v2165_v50  ;;  %2203 = vmatmul.bf16.gmra.mxu1 %v10590_v23  ;;  %v3219_v18 = vld [vmem:[%s22632_s4 + $0x148] sm:$0xff] }
 0x15e   :  { %v3199_v23 = vld [vmem:[%s22632_s4 + $0xa8] sm:$0xff] }
 0x15f   :  { %5684 = vmatpush.bf16.msra.mxu3 %v14633_v33  ;;  %v11077_v33 = vld [vmem:[%s22633_s3] sm:$0xf]  ;;  %v15026_v36 = vpop.f32.mrf.mxu2  ;;  %v2646_v59 = vmax.f32 %v2424_v35, 0.0  ;;  %v10633_v35 = vld [vmem:[%s22631_s1 + $0x1f8] sm:$0xf] }
 0x160   :  { %v15017_v34 = vpop.f32.mrf.mxu0 }
 0x162   :  { %v2166_v7 = vpop.f32.mrf.mxu1  ;;  %3480 = vperm.xlu1 %13863, %v3218_v61   ;;  %3405 = vperm.xlu0 %13862, %v3203_v20   ;;  %v13254_v61 = vld [vmem:[%s22631_s1 + $0x1cc] sm:$0xf]  ;;  %v10611_v20 = vld [vmem:[%s22631_s1 + $0x1d4] sm:$0xf0] }
 0x163   :  { %v2167_v39 = vadd.f32 %v2166_v7, %v1908_v26  ;;  %5685 = vmatpush.bf16.msra.mxu3 %v14578_v51  ;;  %3485 = vperm.xlu2 %13864, %v3219_v18   ;;  %v11078_v51 = vor.u32 %v13350_v42, %v11077_v33  ;;  %v13261_v26 = vld [vmem:[%s22631_s1 + $0x200] sm:$0xf0]  ;;  %v3196_v42 = vld [vmem:[%s22632_s4 + $0x90] sm:$0xff]  ;;  %v10614_v5 = vor.u32 %v13254_v61, %v10611_v20 }
 0x164   :  { %v3214_v33 = vld [vmem:[%s22632_s4 + $0x120] sm:$0xff] }
 0x165   :  { %v2426_v30 = vadd.f32 %v14950_v2, %v2167_v39  ;;  %v1911_v2 = vadd.f32 %v14938_v53, %v14823_v44  ;;  %v3215_v39 = vld [vmem:[%s22632_s4 + $0x128] sm:$0xff] }
 0x167   :  { %v2647_v22 = vmax.f32 %v2426_v30, 0.0  ;;  %5686 = vmatpush.bf16.msra.mxu3 %v14531_v10  ;;  %v10629_v10 = vld [vmem:[%s22631_s1 + $0x1e8] sm:$0xf]  ;;  %v2435_v45 = vpop.f32.mrf.mxu2  ;;  %v10634_v30 = vor.u32 %v13261_v26, %v10633_v35  ;;  %v13265_v26 = vld [vmem:[%s22631_s1 + $0x220] sm:$0xf0] }
 0x168   :  { %v15055_v44 = vpop.f32.mrf.mxu0  ;;  %v10630_v38 = vor.u32 %v13259_v6, %v10629_v10 }
 0x169   :  { %v15053_v27 = vpack.c.bf16 %v2647_v22, %v2646_v59 }
 0x16a   :  { %v2169_v53 = vpop.f32.mrf.mxu1  ;;  %5687 = vmatmul.bf16.vlgmr.msra.gmra.mxu3 %v11078_v51  ;;  %3395 = vperm.xlu1 %13863, %v3201_v62   ;;  %v1918_v62 = vadd.f32 %v15017_v34, %v14786_v11  ;;  %v11133_v11 = vld [vmem:[%s22633_s3 + $0x70] sm:$0xf]  ;;  %v13364_v34 = vld [vmem:[%s22633_s3 + $0x88] sm:$0xf0] }
 0x16b   :  { %v2170_v17 = vadd.f32 %v2169_v53, %v1911_v2  ;;  %3390 = vperm.xlu0 %13862, %v3200_v32   ;;  %3470 = vperm.xlu2 %13864, %v3216_v60   ;;  %v3212_v32 = vld [vmem:[%s22632_s4 + $0x110] sm:$0xff]  ;;  %v3197_v60 = vld [vmem:[%s22632_s4 + $0x98] sm:$0xff] }
 0x16c   :  { %1959 = vmatmul.bf16.gmra.mxu0 %v10622_v57  ;;  %2477 = vmatmul.bf16.gmra.mxu2 %v10630_v38  ;;  %v3213_v57 = vld [vmem:[%s22632_s4 + $0x118] sm:$0xff] }
 0x16d   :  { %v2429_v25 = vadd.f32 %v14966_v56, %v2170_v17  ;;  %2208 = vmatmul.bf16.gmra.mxu1 %v10602_v19  ;;  %v10645_v17 = vld [vmem:[%s22631_s1 + $0x210] sm:$0xf]  ;;  %v13264_v38 = vld [vmem:[%s22631_s1 + $0x218] sm:$0xf0] }
 0x16e   :  { %v10646_v52 = vor.u32 %v13264_v38, %v10645_v17  ;;  %v3254_v38 = vld [vmem:[%s22632_s4 + $0x260] sm:$0xff] }
 0x16f   :  { %v15083_v31 = vpop.f32.mrf.mxu2  ;;  %v2648_v18 = vmax.f32 %v2429_v25, 0.0  ;;  %v11134_v25 = vor.u32 %v13364_v34, %v11133_v11  ;;  %v10665_v34 = vld [vmem:[%s22631_s1 + $0x230] sm:$0xf] }
 0x170   :  { %v15075_v56 = vpop.f32.mrf.mxu0 }
 0x172   :  { %v2171_v3 = vpop.f32.mrf.mxu1  ;;  %3380 = vperm.xlu1 %13863, %v3198_v0   ;;  %v10623_v0 = vld [vmem:[%s22631_s1 + $0x1ec] sm:$0xf0] }
 0x173   :  { %v2172_v55 = vadd.f32 %v2171_v3, %v1913_v4  ;;  %3475 = vperm.xlu0 %13862, %v3217_v37   ;;  %3385 = vperm.xlu2 %13864, %v3199_v23   ;;  %v13257_v4 = vld [vmem:[%s22631_s1 + $0x1e4] sm:$0xf]  ;;  %v3195_v3 = vld [vmem:[%s22632_s4 + $0x88] sm:$0xff] }
 0x175   :  { %v2431_v50 = vadd.f32 %v15002_v47, %v2172_v55  ;;  %v1916_v47 = vadd.f32 %v14993_v29, %v14767_v15  ;;  %v10641_v29 = vld [vmem:[%s22631_s1 + $0x200] sm:$0xf] }
 0x176   :  { %v10642_v22 = vor.u32 %v13262_v63, %v10641_v29  ;;  %v3194_v55 = vld [vmem:[%s22632_s4 + $0x80] sm:$0xff]  ;;  %v10657_v29 = vld [vmem:[%s22631_s1 + $0x228] sm:$0xf] }
 0x177   :  { %v2649_v7 = vmax.f32 %v2431_v50, 0.0  ;;  %v15119_v2 = vpop.f32.mrf.mxu2  ;;  %v10626_v50 = vor.u32 %v13257_v4, %v10623_v0  ;;  %v3239_v4 = vld [vmem:[%s22632_s4 + $0x1e8] sm:$0xff] }
 0x178   :  { %v15111_v24 = vpop.f32.mrf.mxu0  ;;  %v3255_v0 = vld [vmem:[%s22632_s4 + $0x268] sm:$0xff] }
 0x179   :  { %v15109_v51 = vpack.c.bf16 %v2649_v7, %v2648_v18  ;;  %v3240_v7 = vld [vmem:[%s22632_s4 + $0x1f0] sm:$0xff] }
 0x17a   :  { %v2174_v15 = vpop.f32.mrf.mxu1  ;;  %5692 = vmatmul.bf16.gmra.mxu3 %v11106_v54  ;;  %3465 = vperm.xlu1 %13863, %v3215_v39   ;;  %v3211_v39 = vld [vmem:[%s22632_s4 + $0x108] sm:$0xff] }
 0x17b   :  { %v2175_v12 = vadd.f32 %v2174_v15, %v1916_v47  ;;  %3460 = vperm.xlu0 %13862, %v3214_v33   ;;  %3370 = vperm.xlu2 %13864, %v3196_v42   ;;  %v3241_v33 = vld [vmem:[%s22632_s4 + $0x1f8] sm:$0xff] }
 0x17c   :  { %1964 = vmatmul.bf16.gmra.mxu0 %v10634_v30  ;;  %2482 = vmatmul.bf16.gmra.mxu2 %v10642_v22  ;;  %v11161_v30 = vld [vmem:[%s22633_s3 + $0xa8] sm:$0xf] }
 0x17d   :  { %v2434_v59 = vadd.f32 %v15026_v36, %v2175_v12  ;;  %2213 = vmatmul.bf16.gmra.mxu1 %v10614_v5  ;;  %v13371_v5 = vld [vmem:[%s22633_s3 + $0xc0] sm:$0xf0]  ;;  %v13267_v12 = vld [vmem:[%s22631_s1 + $0x230] sm:$0xf0]  ;;  %v10635_v22 = vld [vmem:[%s22631_s1 + $0x204] sm:$0xf0] }
 0x17e   :  { %v11162_v63 = vor.u32 %v13371_v5, %v11161_v30  ;;  %v10677_v5 = vld [vmem:[%s22631_s1 + $0x248] sm:$0xf] }
 0x17f   :  { %v15141_v10 = vpop.f32.mrf.mxu2  ;;  %v2650_v37 = vmax.f32 %v2434_v59, 0.0  ;;  %v13260_v59 = vld [vmem:[%s22631_s1 + $0x1fc] sm:$0xf] }
 0x180   :  { %v15133_v36 = vpop.f32.mrf.mxu0 }
 0x182   :  { %v2176_v19 = vpop.f32.mrf.mxu1  ;;  %3450 = vperm.xlu1 %13863, %v3212_v32   ;;  %v3256_v32 = vld [vmem:[%s22632_s4 + $0x270] sm:$0xff] }
 0x183   :  { %v2177_v53 = vadd.f32 %v2176_v19, %v1918_v62  ;;  %3375 = vperm.xlu0 %13862, %v3197_v60   ;;  %3455 = vperm.xlu2 %13864, %v3213_v57   ;;  %v3257_v62 = vld [vmem:[%s22632_s4 + $0x278] sm:$0xff]  ;;  %v3238_v60 = vld [vmem:[%s22632_s4 + $0x1e0] sm:$0xff]  ;;  %v10658_v57 = vor.u32 %v13267_v12, %v10657_v29  ;;  %v10638_v19 = vor.u32 %v13260_v59, %v10635_v22  ;;  %v13271_v29 = vld [vmem:[%s22631_s1 + $0x250] sm:$0xf0] }
 0x184   :  { %v10678_v12 = vor.u32 %v13271_v29, %v10677_v5  ;;  %v3234_v59 = vld [vmem:[%s22632_s4 + $0x1c0] sm:$0xff]  ;;  %v3253_v22 = vld [vmem:[%s22632_s4 + $0x258] sm:$0xff] }
 0x185   :  { %v2436_v6 = vadd.f32 %v2435_v45, %v2177_v53  ;;  %v1921_v45 = vadd.f32 %v15055_v44, %v14821_v21  ;;  %v10653_v44 = vld [vmem:[%s22631_s1 + $0x218] sm:$0xf] }
 0x186   :  { %v10654_v18 = vor.u32 %v13265_v26, %v10653_v44  ;;  %v10647_v44 = vld [vmem:[%s22631_s1 + $0x21c] sm:$0xf0]  ;;  %v3237_v26 = vld [vmem:[%s22632_s4 + $0x1d8] sm:$0xff] }
 0x187   :  { %v2651_v23 = vmax.f32 %v2436_v6, 0.0  ;;  %v15176_v20 = vpop.f32.mrf.mxu2  ;;  %v13268_v6 = vld [vmem:[%s22631_s1 + $0x238] sm:$0xf0] }
 0x188   :  { %v15168_v54 = vpop.f32.mrf.mxu0 }
 0x189   :  { %v15166_v35 = vpack.c.bf16 %v2651_v23, %v2650_v37  ;;  %v11189_v23 = vld [vmem:[%s22633_s3 + $0xe0] sm:$0xf] }
 0x18a   :  { %v2179_v21 = vpop.f32.mrf.mxu1  ;;  %5697 = vmatmul.bf16.gmra.mxu3 %v11134_v25  ;;  %3365 = vperm.xlu1 %13863, %v3195_v3   ;;  %v10666_v25 = vor.u32 %v13268_v6, %v10665_v34  ;;  %v13378_v3 = vld [vmem:[%s22633_s3 + $0xf8] sm:$0xf0]  ;;  %v10681_v6 = vld [vmem:[%s22631_s1 + $0x258] sm:$0xf] }
 0x18b   :  { %v2180_v61 = vadd.f32 %v2179_v21, %v1921_v45  ;;  %3360 = vperm.xlu0 %13862, %v3194_v55   ;;  %3440 = vperm.xlu2 %13864, %v3210_v8   ;;  %v10669_v8 = vld [vmem:[%s22631_s1 + $0x240] sm:$0xf]  ;;  %v13263_v21 = vld [vmem:[%s22631_s1 + $0x214] sm:$0xf] }
 0x18c   :  { %1969 = vmatmul.bf16.gmra.mxu0 %v10646_v52  ;;  %2487 = vmatmul.bf16.gmra.mxu2 %v10654_v18  ;;  %v11190_v52 = vor.u32 %v13378_v3, %v11189_v23  ;;  %v3252_v18 = vld [vmem:[%s22632_s4 + $0x250] sm:$0xff]  ;;  %v3251_v23 = vld [vmem:[%s22632_s4 + $0x248] sm:$0xff]  ;;  %v3250_v3 = vld [vmem:[%s22632_s4 + $0x240] sm:$0xff] }
 0x18d   :  { %v15179_v47 = vadd.f32 %v15083_v31, %v2180_v61  ;;  %2218 = vmatmul.bf16.gmra.mxu1 %v10626_v50  ;;  %v13270_v50 = vld [vmem:[%s22631_s1 + $0x248] sm:$0xf0]  ;;  %v3236_v61 = vld [vmem:[%s22632_s4 + $0x1d0] sm:$0xff] }
 0x18f   :  { %v15200_v15 = vpop.f32.mrf.mxu2 }
 0x190   :  { %v15190_v42 = vpop.f32.mrf.mxu0 }
 0x191   :  { %v1933_v5 = vadd.f32 %v15190_v42, %v14645_v40  ;;  %v3233_v40 = vld [vmem:[%s22632_s4 + $0x1b8] sm:$0xff] }
 0x192   :  { %v15192_v31 = vpop.f32.mrf.mxu1  ;;  %3590 = vperm.xlu1 %13863, %v3240_v7   ;;  %v10670_v7 = vor.u32 %v13270_v50, %v10669_v8  ;;  %v3232_v8 = vld [vmem:[%s22632_s4 + $0x1b0] sm:$0xff] }
 0x193   :  { %3445 = vperm.xlu0 %13862, %v3211_v39   ;;  %3595 = vperm.xlu2 %13864, %v3241_v33   ;;  %v10650_v39 = vor.u32 %v13263_v21, %v10647_v44 }
 0x197   :  { %v15233_v17 = vpop.f32.mrf.mxu2 }
 0x198   :  { %v15223_v53 = vpop.f32.mrf.mxu0 }
 0x19a   :  { %v15225_v11 = vpop.f32.mrf.mxu1  ;;  %5702 = vmatmul.bf16.gmra.mxu3 %v11162_v63  ;;  %3675 = vperm.xlu1 %13863, %v3257_v62   ;;  %v3235_v62 = vld [vmem:[%s22632_s4 + $0x1c8] sm:$0xff] }
 0x19b   :  { %3670 = vperm.xlu0 %13862, %v3256_v32   ;;  %3580 = vperm.xlu2 %13864, %v3238_v60  }
 0x19c   :  { %1974 = vmatmul.bf16.gmra.mxu0 %v10658_v57  ;;  %2492 = vmatmul.bf16.gmra.mxu2 %v10666_v25  ;;  %v11217_v57 = vld [vmem:[%s22633_s3 + $0x118] sm:$0xf] }
 0x19d   :  { %2223 = vmatmul.bf16.gmra.mxu1 %v10638_v19  ;;  %v13385_v19 = vld [vmem:[%s22633_s3 + $0x130] sm:$0xf0] }
 0x19e   :  { %v11218_v25 = vor.u32 %v13385_v19, %v11217_v57  ;;  %v11245_v57 = vld [vmem:[%s22633_s3 + $0x150] sm:$0xf]  ;;  %v13392_v19 = vld [vmem:[%s22633_s3 + $0x168] sm:$0xf0] }
 0x19f   :  { %v15254_v55 = vpop.f32.mrf.mxu2 }
 0x1a0   :  { %v15244_v45 = vpop.f32.mrf.mxu0 }
 0x1a2   :  { %v15246_v37 = vpop.f32.mrf.mxu1  ;;  %3660 = vperm.xlu1 %13863, %v3254_v38   ;;  %v13273_v38 = vld [vmem:[%s22631_s1 + $0x260] sm:$0xf0] }
 0x1a3   :  { %3585 = vperm.xlu0 %13862, %v3239_v4   ;;  %3665 = vperm.xlu2 %13864, %v3255_v0   ;;  %v13266_v4 = vld [vmem:[%s22631_s1 + $0x22c] sm:$0xf]  ;;  %v10659_v0 = vld [vmem:[%s22631_s1 + $0x234] sm:$0xf0] }
 0x1a4   :  { %v10662_v50 = vor.u32 %v13266_v4, %v10659_v0  ;;  %v11246_v0 = vor.u32 %v13392_v19, %v11245_v57  ;;  %v3229_v19 = vld [vmem:[%s22632_s4 + $0x198] sm:$0xff] }
 0x1a7   :  { %v15285_v63 = vpop.f32.mrf.mxu2 }
 0x1a8   :  { %v15277_v33 = vpop.f32.mrf.mxu0 }
 0x1aa   :  { %v2189_v30 = vpop.f32.mrf.mxu1  ;;  %5707 = vmatmul.bf16.gmra.mxu3 %v11190_v52  ;;  %3575 = vperm.xlu1 %13863, %v3237_v26   ;;  %v10682_v52 = vor.u32 %v13273_v38, %v10681_v6  ;;  %v10689_v26 = vld [vmem:[%s22631_s1 + $0x260] sm:$0xf]  ;;  %v10693_v38 = vld [vmem:[%s22631_s1 + $0x270] sm:$0xf] }
 0x1ab   :  { %3570 = vperm.xlu0 %13862, %v3236_v61   ;;  %3650 = vperm.xlu2 %13864, %v3252_v18   ;;  %v13274_v61 = vld [vmem:[%s22631_s1 + $0x268] sm:$0xf0]  ;;  %v15335_v18 = vpop.permute.xlu1 %584 }
 0x1ac   :  { %1979 = vmatmul.bf16.gmra.mxu0 %v10670_v7  ;;  %2497 = vmatmul.bf16.gmra.mxu2 %v10678_v12  ;;  %v1936_v7 = vadd.f32 %v15223_v53, %v14665_v16  ;;  %v10690_v29 = vor.u32 %v13274_v61, %v10689_v26  ;;  %v1931_v12 = vadd.f32 %v15168_v54, %v14608_v48  ;;  %v3248_v53 = vld [vmem:[%s22632_s4 + $0x230] sm:$0xff]  ;;  %v3249_v48 = vld [vmem:[%s22632_s4 + $0x238] sm:$0xff]  ;;  %v3230_v26 = vld [vmem:[%s22632_s4 + $0x1a0] sm:$0xff] }
 0x1ad   :  { %2228 = vmatmul.bf16.gmra.mxu1 %v10650_v39  ;;  %v1928_v16 = vadd.f32 %v15133_v36, %v14782_v28  ;;  %v575_v36 = vpop.permute.xlu2 %574 }
 0x1ae   :  { %v2190_v42 = vadd.f32 %v2189_v30, %v1931_v12 }
 0x1af   :  { %v15304_v34 = vpop.f32.mrf.mxu2 }
 0x1b0   :  { %v15296_v32 = vpop.f32.mrf.mxu0 }
 0x1b2   :  { %v2191_v60 = vpop.f32.mrf.mxu1  ;;  %3560 = vperm.xlu1 %13863, %v3234_v59   ;;  %v1938_v59 = vadd.f32 %v15244_v45, %v14588_v58  ;;  %v1926_v58 = vadd.f32 %v15111_v24, %v14679_v1  ;;  %v1923_v1 = vadd.f32 %v15075_v56, %v14726_v41  ;;  %v2187_v24 = vadd.f32 %v15246_v37, %v1928_v16  ;;  %v13276_v41 = vld [vmem:[%s22631_s1 + $0x278] sm:$0xf0]  ;;  %v13269_v56 = vld [vmem:[%s22631_s1 + $0x244] sm:$0xf] }
 0x1b3   :  { %3655 = vperm.xlu0 %13862, %v3253_v22   ;;  %3565 = vperm.xlu2 %13864, %v3235_v62   ;;  %v2192_v62 = vadd.f32 %v2191_v60, %v1933_v5  ;;  %v13277_v5 = vld [vmem:[%s22631_s1 + $0x280] sm:$0xf0] }
 0x1b4   :  { %v2185_v4 = vadd.f32 %v15225_v11, %v1926_v58  ;;  %v2182_v11 = vadd.f32 %v15192_v31, %v1923_v1 }
 0x1b5   :  { %v2451_v6 = vadd.f32 %v15233_v17, %v2192_v62  ;;  %v10671_v17 = vld [vmem:[%s22631_s1 + $0x24c] sm:$0xf0] }
 0x1b6   :  { %v10674_v61 = vor.u32 %v13269_v56, %v10671_v17  ;;  %v13272_v56 = vld [vmem:[%s22631_s1 + $0x25c] sm:$0xf]  ;;  %v10683_v17 = vld [vmem:[%s22631_s1 + $0x264] sm:$0xf0] }
 0x1b7   :  { %v15339_v39 = vpop.f32.mrf.mxu2 }
 0x1b8   :  { %v15327_v21 = vpop.f32.mrf.mxu0 }
 0x1ba   :  { %v2194_v44 = vpop.f32.mrf.mxu1  ;;  %5712 = vmatmul.bf16.gmra.mxu3 %v11218_v25  ;;  %3645 = vperm.xlu1 %13863, %v3251_v23  }
 0x1bb   :  { %3640 = vperm.xlu0 %13862, %v3250_v3   ;;  %3550 = vperm.xlu2 %13864, %v3232_v8   ;;  %v2195_v22 = vadd.f32 %v2194_v44, %v1936_v7  ;;  %v2446_v8 = vadd.f32 %v15176_v20, %v2187_v24  ;;  %v10701_v20 = vld [vmem:[%s22631_s1 + $0x278] sm:$0xf] }
 0x1bc   :  { %1984 = vmatmul.bf16.gmra.mxu0 %v10682_v52  ;;  %2502 = vmatmul.bf16.gmra.mxu2 %v10690_v29  ;;  %v3231_v52 = vld [vmem:[%s22632_s4 + $0x1a8] sm:$0xff]  ;;  %v2444_v29 = vadd.f32 %v15141_v10, %v2185_v4  ;;  %v10702_v58 = vor.u32 %v13277_v5, %v10701_v20 }
 0x1bd   :  { %2233 = vmatmul.bf16.gmra.mxu1 %v10662_v50  ;;  %v2454_v45 = vadd.f32 %v15254_v55, %v2195_v22  ;;  %v570_v55 = vpop.permute.xlu1 %569  ;;  %v2657_v50 = vmax.f32 %v2451_v6, 0.0  ;;  %v2441_v22 = vadd.f32 %v15119_v2, %v2182_v11  ;;  %v2655_v62 = vmax.f32 %v2446_v8, 0.0  ;;  %v3228_v2 = vld [vmem:[%s22632_s4 + $0x190] sm:$0xff]  ;;  %v13399_v6 = vld [vmem:[%s22633_s3 + $0x1a0] sm:$0xf0] }
 0x1be   :  { %v1941_v37 = vadd.f32 %v15277_v33, %v570_v55  ;;  %v10694_v33 = vor.u32 %v13276_v41, %v10693_v38  ;;  %v11273_v55 = vld [vmem:[%s22633_s3 + $0x188] sm:$0xf]  ;;  %v13279_v41 = vld [vmem:[%s22631_s1 + $0x290] sm:$0xf0] }
 0x1bf   :  { %v15372_v30 = vpop.f32.mrf.mxu2  ;;  %v2658_v23 = vmax.f32 %v2454_v45, 0.0  ;;  %v15423_v45 = vpop.permute.xlu0 %719  ;;  %v3244_v8 = vld [vmem:[%s22632_s4 + $0x210] sm:$0xff] }
 0x1c0   :  { %v15360_v54 = vpop.f32.mrf.mxu0 }
 0x1c2   :  { %v2196_v28 = vpop.f32.mrf.mxu1  ;;  %3630 = vperm.xlu1 %13863, %v3248_v53   ;;  %v15414_v53 = vpop.permute.xlu2 %709 }
 0x1c3   :  { %v2197_v60 = vadd.f32 %v2196_v28, %v1938_v59  ;;  %3555 = vperm.xlu0 %13862, %v3233_v40   ;;  %3635 = vperm.xlu2 %13864, %v3249_v48   ;;  %v2654_v28 = vmax.f32 %v2444_v29, 0.0 }
 0x1c5   :  { %v2456_v25 = vadd.f32 %v15285_v63, %v2197_v60  ;;  %v2449_v63 = vadd.f32 %v15200_v15, %v2190_v42  ;;  %v3246_v15 = vld [vmem:[%s22632_s4 + $0x220] sm:$0xff]  ;;  %v15417_v10 = vpop.permute.xlu1 %724  ;;  %v1943_v42 = vadd.f32 %v15296_v32, %v575_v36  ;;  %v2653_v60 = vmax.f32 %v2441_v22, 0.0  ;;  %v3227_v22 = vld [vmem:[%s22632_s4 + $0x188] sm:$0xff] }
 0x1c6   :  { %v3141_v57 = vpack.c.bf16 %v2655_v62, %v2654_v28  ;;  %v2652_v36 = vmax.f32 %v15179_v47, 0.0  ;;  %v10705_v47 = vld [vmem:[%s22631_s1 + $0x288] sm:$0xf] }
 0x1c7   :  { %v2659_v3 = vmax.f32 %v2456_v25, 0.0  ;;  %v2656_v12 = vmax.f32 %v2449_v63, 0.0  ;;  %v15412_v16 = vpop.f32.mrf.mxu2 }
 0x1c8   :  { %v3140_v4 = vpack.c.bf16 %v2653_v60, %v2652_v36  ;;  %v13282_v60 = vld [vmem:[%s22631_s1 + $0x2a8] sm:$0xf0]  ;;  %v3273_v36 = vld [vmem:[%s22632_s4 + $0x2f8] sm:$0xff] }
 0x1c9   :  { %v3143_v44 = vpack.c.bf16 %v2659_v3, %v2658_v23  ;;  %v15402_v7 = vpop.f32.mrf.mxu0  ;;  %v3142_v48 = vpack.c.bf16 %v2657_v50, %v2656_v12  ;;  %v3245_v3 = vld [vmem:[%s22632_s4 + $0x218] sm:$0xff]  ;;  %v10706_v50 = vor.u32 %v13279_v41, %v10705_v47  ;;  %v1948_v12 = vadd.f32 %v15360_v54, %v15335_v18  ;;  %v13283_v47 = vld [vmem:[%s22631_s1 + $0x2b0] sm:$0xf0] }
 0x1ca   :  { %v2199_v31 = vpop.f32.mrf.mxu1  ;;  %5717 = vmatmul.bf16.gmra.mxu3 %v11246_v0  ;;  %3545 = vperm.xlu1 %13863, %v3231_v52   ;;  %v11274_v0 = vor.u32 %v13399_v6, %v11273_v55  ;;  %v3226_v52 = vld [vmem:[%s22632_s4 + $0x180] sm:$0xff] }
 0x1cb   :  { %v2200_v59 = vadd.f32 %v2199_v31, %v1941_v37  ;;  %5938 = vmatpush.bf16.msrb.mxu0 %v3143_v44  ;;  %3540 = vperm.xlu0 %13862, %v3230_v26   ;;  %v15455_v37 = vpop.permute.xlu2 %704  ;;  %v10686_v44 = vor.u32 %v13272_v56, %v10683_v17  ;;  %v3270_v55 = vld [vmem:[%s22632_s4 + $0x2e0] sm:$0xff] }
 0x1cc   :  { %3620 = vperm.xlu2 %13864, %v3246_v15   ;;  %1989 = vmatmul.bf16.gmra.mxu0 %v10694_v33  ;;  %v10713_v15 = vld [vmem:[%s22631_s1 + $0x290] sm:$0xf]  ;;  %v13280_v33 = vld [vmem:[%s22631_s1 + $0x298] sm:$0xf0] }
 0x1cd   :  { %v2459_v40 = vadd.f32 %v15304_v34, %v2200_v59  ;;  %2238 = vmatmul.bf16.gmra.mxu1 %v10674_v61  ;;  %v3247_v34 = vld [vmem:[%s22632_s4 + $0x228] sm:$0xff]  ;;  %2507 = vmatmul.bf16.gmra.mxu2 %v10702_v58  ;;  %v15462_v11 = vpop.permute.xlu1 %699  ;;  %v15480_v61 = vpop.permute.xlu0 %714  ;;  %v10714_v29 = vor.u32 %v13280_v33, %v10713_v15  ;;  %v3242_v59 = vld [vmem:[%s22632_s4 + $0x200] sm:$0xff] }
 0x1cf   :  { %5939 = vmatpush.bf16.msrb.mxu0 %v3142_v48  ;;  %v15440_v25 = vpop.f32.mrf.mxu2  ;;  %v2660_v63 = vmax.f32 %v2459_v40, 0.0  ;;  %v11301_v40 = vld [vmem:[%s22633_s3 + $0x1c0] sm:$0xf]  ;;  %v13406_v48 = vld [vmem:[%s22633_s3 + $0x1d8] sm:$0xf0] }
 0x1d1   :  { %v15431_v1 = vpop.f32.mrf.mxu0 }
 0x1d2   :  { %v2201_v32 = vpop.f32.mrf.mxu1  ;;  %3530 = vperm.xlu1 %13863, %v3228_v2   ;;  %v11302_v2 = vor.u32 %v13406_v48, %v11301_v40 }
 0x1d3   :  { %v2202_v24 = vadd.f32 %v2201_v32, %v1943_v42  ;;  %5940 = vmatpush.bf16.msrb.mxu0 %v3141_v57  ;;  %3625 = vperm.xlu0 %13862, %v3247_v34   ;;  %v13275_v57 = vld [vmem:[%s22631_s1 + $0x274] sm:$0xf]  ;;  %v10695_v34 = vld [vmem:[%s22631_s1 + $0x27c] sm:$0xf0] }
 0x1d4   :  { %3535 = vperm.xlu2 %13864, %v3229_v19  }
 0x1d5   :  { %v2461_v38 = vadd.f32 %v15339_v39, %v2202_v24  ;;  %v1946_v39 = vadd.f32 %v15327_v21, %v14903_v49  ;;  %v15502_v54 = vpop.permute.xlu1 %694  ;;  %v15513_v28 = vpop.permute.xlu0 %689  ;;  %v3272_v24 = vld [vmem:[%s22632_s4 + $0x2f0] sm:$0xff] }
 0x1d7   :  { %v2661_v23 = vmax.f32 %v2461_v38, 0.0  ;;  %5941 = vmatpush.bf16.msrb.mxu0 %v3140_v4  ;;  %v15483_v20 = vpop.f32.mrf.mxu2  ;;  %v10698_v38 = vor.u32 %v13275_v57, %v10695_v34 }
 0x1d9   :  { %v15470_v49 = vpack.c.bf16 %v2661_v23, %v2660_v63  ;;  %v15472_v21 = vpop.f32.mrf.mxu0 }
 0x1da   :  { %v2204_v26 = vpop.f32.mrf.mxu1  ;;  %5722 = vmatmul.bf16.gmra.mxu3 %v11274_v0  ;;  %3615 = vperm.xlu1 %13863, %v3245_v3  }
 0x1db   :  { %v2205_v31 = vadd.f32 %v2204_v26, %v1946_v39  ;;  %5942 = vmatpush.bf16.msrb.mxu0 %v15166_v35  ;;  %3610 = vperm.xlu0 %13862, %v3244_v8   ;;  %v15492_v35 = vpop.permute.xlu2 %679  ;;  %v1953_v8 = vadd.f32 %v15431_v1, %v14857_v43  ;;  %v11329_v43 = vld [vmem:[%s22633_s3 + $0x1f8] sm:$0xf]  ;;  %v13413_v1 = vld [vmem:[%s22633_s3 + $0x210] sm:$0xf0] }
 0x1dc   :  { %3520 = vperm.xlu2 %13864, %v3226_v52   ;;  %1994 = vmatmul.bf16.gmra.mxu0 %v10706_v50  ;;  %v3268_v52 = vld [vmem:[%s22632_s4 + $0x2d0] sm:$0xff]  ;;  %v3271_v50 = vld [vmem:[%s22632_s4 + $0x2e8] sm:$0xff] }
 0x1dd   :  { %v2464_v5 = vadd.f32 %v15372_v30, %v2205_v31  ;;  %2243 = vmatmul.bf16.gmra.mxu1 %v10686_v44  ;;  %v3243_v30 = vld [vmem:[%s22632_s4 + $0x208] sm:$0xff]  ;;  %2512 = vmatmul.bf16.gmra.mxu2 %v10714_v29  ;;  %v15554_v17 = vpop.permute.xlu1 %669  ;;  %v15559_v3 = vpop.permute.xlu0 %684 }
 0x1df   :  { %5943 = vmatpush.bf16.msrb.mxu0 %v15109_v51  ;;  %v15511_v58 = vpop.f32.mrf.mxu2  ;;  %v2662_v19 = vmax.f32 %v2464_v5, 0.0 }
 0x1e1   :  { %v15500_v62 = vpop.f32.mrf.mxu0 }
 0x1e2   :  { %v2206_v18 = vpop.f32.mrf.mxu1  ;;  %3600 = vperm.xlu1 %13863, %v3242_v59   ;;  %v11330_v59 = vor.u32 %v13413_v1, %v11329_v43  ;;  %v10741_v43 = vld [vmem:[%s22631_s1 + $0x2d0] sm:$0xf] }
 0x1e3   :  { %v2207_v51 = vadd.f32 %v2206_v18, %v1948_v12  ;;  %5944 = vmatpush.bf16.msrb.mxu0 %v15053_v27  ;;  %3525 = vperm.xlu0 %13862, %v3227_v22   ;;  %v10717_v27 = vld [vmem:[%s22631_s1 + $0x2a0] sm:$0xf]  ;;  %v15550_v0 = vpop.permute.xlu2 %674  ;;  %v10729_v12 = vld [vmem:[%s22631_s1 + $0x2b8] sm:$0xf]  ;;  %v13285_v22 = vld [vmem:[%s22631_s1 + $0x2c0] sm:$0xf0] }
 0x1e4   :  { %3605 = vperm.xlu2 %13864, %v3243_v30   ;;  %v10718_v6 = vor.u32 %v13282_v60, %v10717_v27  ;;  %v13278_v30 = vld [vmem:[%s22631_s1 + $0x28c] sm:$0xf]  ;;  %v10707_v18 = vld [vmem:[%s22631_s1 + $0x294] sm:$0xf0]  ;;  %v3264_v60 = vld [vmem:[%s22632_s4 + $0x2b0] sm:$0xff]  ;;  %v10730_v57 = vor.u32 %v13285_v22, %v10729_v12 }
 0x1e5   :  { %v2466_v42 = vadd.f32 %v15412_v16, %v2207_v51  ;;  %v1951_v16 = vadd.f32 %v15402_v7, %v14828_v46  ;;  %v1956_v51 = vadd.f32 %v15472_v21, %v14890_v14  ;;  %v15606_v27 = vpop.permute.xlu0 %659  ;;  %v10710_v34 = vor.u32 %v13278_v30, %v10707_v18  ;;  %v13281_v12 = vld [vmem:[%s22631_s1 + $0x2a4] sm:$0xf] }
 0x1e7   :  { %v2663_v32 = vmax.f32 %v2466_v42, 0.0  ;;  %5945 = vmatpush.bf16.msrb.mxu0 %v14991_v9  ;;  %v10725_v9 = vld [vmem:[%s22631_s1 + $0x2a8] sm:$0xf]  ;;  %v15552_v56 = vpop.f32.mrf.mxu2 }
 0x1e8   :  { %v10726_v23 = vor.u32 %v13283_v47, %v10725_v9  ;;  %v3267_v42 = vld [vmem:[%s22632_s4 + $0x2c8] sm:$0xff]  ;;  %v1958_v9 = vadd.f32 %v15500_v62, %v14800_v13  ;;  %v3262_v47 = vld [vmem:[%s22632_s4 + $0x2a0] sm:$0xff]  ;;  %v11357_v62 = vld [vmem:[%s22633_s3 + $0x230] sm:$0xf] }
 0x1e9   :  { %v15540_v4 = vpack.c.bf16 %v2663_v32, %v2662_v19  ;;  %v15542_v46 = vpop.f32.mrf.mxu0  ;;  %v10737_v19 = vld [vmem:[%s22631_s1 + $0x2c0] sm:$0xf]  ;;  %v13286_v32 = vld [vmem:[%s22631_s1 + $0x2c8] sm:$0xf0] }
 0x1ea   :  { %v2209_v7 = vpop.f32.mrf.mxu1  ;;  %5727 = vmatmul.bf16.gmra.mxu3 %v11302_v2  ;;  %3755 = vperm.xlu1 %13863, %v3273_v36   ;;  %v3266_v2 = vld [vmem:[%s22632_s4 + $0x2c0] sm:$0xff] }
 0x1eb   :  { %v2210_v41 = vadd.f32 %v2209_v7, %v1951_v16  ;;  %3750 = vperm.xlu0 %13862, %v3272_v24   ;;  %v15582_v31 = vpop.permute.xlu2 %649 }
 0x1ec   :  { %3740 = vperm.xlu2 %13864, %v3270_v55   ;;  %1999 = vmatmul.bf16.gmra.mxu0 %v10718_v6 }
 0x1ed   :  { %v2469_v39 = vadd.f32 %v15440_v25, %v2210_v41  ;;  %2248 = vmatmul.bf16.gmra.mxu1 %v10698_v38  ;;  %v15557_v63 = vpop.f32.mrf.mxu3  ;;  %v3269_v25 = vld [vmem:[%s22632_s4 + $0x2d8] sm:$0xff]  ;;  %2517 = vmatmul.bf16.gmra.mxu2 %v10726_v23  ;;  %v10738_v38 = vor.u32 %v13286_v32, %v10737_v19  ;;  %v13289_v19 = vld [vmem:[%s22631_s1 + $0x2e0] sm:$0xf0] }
 0x1ee   :  { %22665 = vst [vmem:[#allocation15_spill] sm:$0xff] %v15557_v63  ;;  %v13295_v63 = vld [vmem:[%s22631_s1 + $0x310] sm:$0xf0] }
 0x1ef   :  { %v15580_v33 = vpop.f32.mrf.mxu2  ;;  %v2664_v40 = vmax.f32 %v2469_v39, 0.0  ;;  %v3263_v39 = vld [vmem:[%s22632_s4 + $0x2a8] sm:$0xff] }
 0x1f1   :  { %v15572_v44 = vpop.f32.mrf.mxu0 }
 0x1f2   :  { %v2211_v26 = vpop.f32.mrf.mxu1  ;;  %3730 = vperm.xlu1 %13863, %v3268_v52   ;;  %v15646_v52 = vpop.permute.xlu0 %654 }
 0x1f3   :  { %v2212_v15 = vadd.f32 %v2211_v26, %v1953_v8  ;;  %3745 = vperm.xlu0 %13862, %v3271_v50   ;;  %v15629_v7 = vpop.permute.xlu2 %804  ;;  %v13420_v50 = vld [vmem:[%s22633_s3 + $0x248] sm:$0xf0] }
 0x1f4   :  { %3735 = vperm.xlu2 %13864, %v3269_v25   ;;  %22668 = vst [vmem:[#allocation18_spill] sm:$0xff] %v15629_v7  ;;  %v11358_v1 = vor.u32 %v13420_v50, %v11357_v62 }
 0x1f5   :  { %v2471_v5 = vadd.f32 %v15483_v20, %v2212_v15  ;;  %v15585_v29 = vpop.f32.mrf.mxu3  ;;  %v15599_v20 = vpop.permute.xlu1 %664 }
 0x1f6   :  { %22666 = vst [vmem:[#allocation16_spill] sm:$0xff] %v15585_v29  ;;  %v10773_v29 = vld [vmem:[%s22631_s1 + $0x308] sm:$0xf] }
 0x1f7   :  { %v2665_v48 = vmax.f32 %v2471_v5, 0.0  ;;  %v15624_v24 = vpop.f32.mrf.mxu2  ;;  %v13288_v5 = vld [vmem:[%s22631_s1 + $0x2d8] sm:$0xf0] }
 0x1f9   :  { %v15614_v16 = vpack.c.bf16 %v2665_v48, %v2664_v40  ;;  %v15616_v14 = vpop.f32.mrf.mxu0  ;;  %v3260_v48 = vld [vmem:[%s22632_s4 + $0x290] sm:$0xff] }
 0x1fa   :  { %v2214_v21 = vpop.f32.mrf.mxu1  ;;  %5732 = vmatmul.bf16.gmra.mxu3 %v11330_v59  ;;  %3725 = vperm.xlu1 %13863, %v3267_v42   ;;  %v10719_v59 = vld [vmem:[%s22631_s1 + $0x2ac] sm:$0xf0] }
 0x1fb   :  { %v2215_v36 = vadd.f32 %v2214_v21, %v1956_v51  ;;  %3720 = vperm.xlu0 %13862, %v3266_v2   ;;  %v3261_v51 = vld [vmem:[%s22632_s4 + $0x298] sm:$0xff]  ;;  %v15676_v40 = vpop.permute.xlu2 %779  ;;  %v3276_v42 = vld [vmem:[%s22632_s4 + $0x310] sm:$0xff]  ;;  %v10742_v2 = vor.u32 %v13288_v5, %v10741_v43  ;;  %v13427_v43 = vld [vmem:[%s22633_s3 + $0x280] sm:$0xf0] }
 0x1fc   :  { %3710 = vperm.xlu2 %13864, %v3264_v60   ;;  %2004 = vmatmul.bf16.gmra.mxu0 %v10730_v57  ;;  %v10722_v60 = vor.u32 %v13281_v12, %v10719_v59  ;;  %v10749_v21 = vld [vmem:[%s22631_s1 + $0x2d8] sm:$0xf]  ;;  %v10753_v59 = vld [vmem:[%s22631_s1 + $0x2e8] sm:$0xf] }
 0x1fd   :  { %v2474_v55 = vadd.f32 %v15511_v58, %v2215_v36  ;;  %2253 = vmatmul.bf16.gmra.mxu1 %v10710_v34  ;;  %v15627_v6 = vpop.f32.mrf.mxu3  ;;  %v15636_v41 = vpop.permute.xlu1 %799  ;;  %v3265_v58 = vld [vmem:[%s22632_s4 + $0x2b8] sm:$0xff]  ;;  %2522 = vmatmul.bf16.gmra.mxu2 %v10738_v38 }
 0x1fe   :  { %22667 = vst [vmem:[#allocation17_spill] sm:$0xff] %v15627_v6  ;;  %v15698_v38 = vpop.permute.xlu0 %789 }
 0x1ff   :  { %22669 = vst [vmem:[#allocation19_spill] sm:$0xff] %v15636_v41  ;;  %v15654_v25 = vpop.f32.mrf.mxu2  ;;  %v2666_v30 = vmax.f32 %v2474_v55, 0.0 }
 0x200   :  { %22674 = vst [vmem:[#allocation22_spill] sm:$0xff] %v15698_v38 }
 0x201   :  { %v15644_v23 = vpop.f32.mrf.mxu0 }
 0x202   :  { %v2216_v8 = vpop.f32.mrf.mxu1  ;;  %3700 = vperm.xlu1 %13863, %v3262_v47  }
 0x203   :  { %v2217_v13 = vadd.f32 %v2216_v8, %v1958_v9  ;;  %3715 = vperm.xlu0 %13862, %v3265_v58   ;;  %v10750_v58 = vor.u32 %v13289_v19, %v10749_v21  ;;  %v3277_v8 = vld [vmem:[%s22632_s4 + $0x318] sm:$0xff]  ;;  %v15718_v50 = vpop.permute.xlu2 %774 }
 0x204   :  { %3705 = vperm.xlu2 %13864, %v3263_v39   ;;  %v3258_v39 = vld [vmem:[%s22632_s4 + $0x280] sm:$0xff]  ;;  %22676 = vst [vmem:[#allocation24_spill] sm:$0xff] %v15718_v50 }
 0x205   :  { %v2476_v26 = vadd.f32 %v15552_v56, %v2217_v13  ;;  %v15657_v15 = vpop.f32.mrf.mxu3  ;;  %v22671_v56 = vld [vmem:[#allocation13_spill] sm:$0xff]  ;;  %v15694_v32 = vpop.permute.xlu1 %794  ;;  %v3259_v13 = vld [vmem:[%s22632_s4 + $0x288] sm:$0xff] }
 0x206   :  { %22670 = vst [vmem:[#allocation20_spill] sm:$0xff] %v15657_v15  ;;  %v1961_v22 = vadd.f32 %v15542_v46, %v22671_v56 }
 0x207   :  { %v2667_v18 = vmax.f32 %v2476_v26, 0.0  ;;  %22672 = vst [vmem:[#allocation13_spill] sm:$0xff] %v15676_v40  ;;  %v15696_v55 = vpop.f32.mrf.mxu2  ;;  %v11385_v26 = vld [vmem:[%s22633_s3 + $0x268] sm:$0xf]  ;;  %v7801_v40 = vld [vmem:[%s22634_s6 + $0xf8] sm:$0xff] }
 0x208   :  { %22673 = vst [vmem:[#allocation21_spill] sm:$0xff] %v15694_v32  ;;  %v11386_v56 = vor.u32 %v13427_v43, %v11385_v26 }
 0x209   :  { %v15684_v57 = vpack.c.bf16 %v2667_v18, %v2666_v30  ;;  %v15686_v46 = vpop.f32.mrf.mxu0  ;;  %v13284_v30 = vld [vmem:[%s22631_s1 + $0x2bc] sm:$0xf]  ;;  %v10731_v18 = vld [vmem:[%s22631_s1 + $0x2c4] sm:$0xf0] }
 0x20a   :  { %v2219_v34 = vpop.f32.mrf.mxu1  ;;  %5737 = vmatmul.bf16.gmra.mxu3 %v11358_v1  ;;  %3695 = vperm.xlu1 %13863, %v3261_v51   ;;  %v15744_v51 = vpop.permute.xlu0 %784 }
 0x20b   :  { %v2220_v36 = vadd.f32 %v2219_v34, %v1961_v22  ;;  %3690 = vperm.xlu0 %13862, %v3260_v48   ;;  %v13291_v22 = vld [vmem:[%s22631_s1 + $0x2f0] sm:$0xf0]  ;;  %22679 = vst [vmem:[#allocation27_spill] sm:$0xff] %v15744_v51  ;;  %v3275_v48 = vld [vmem:[%s22632_s4 + $0x308] sm:$0xff]  ;;  %v10734_v34 = vor.u32 %v13284_v30, %v10731_v18  ;;  %v13297_v51 = vld [vmem:[%s22631_s1 + $0x320] sm:$0xf0] }
 0x20c   :  { %3770 = vperm.xlu2 %13864, %v3276_v42   ;;  %2009 = vmatmul.bf16.gmra.mxu0 %v10742_v2  ;;  %v3274_v42 = vld [vmem:[%s22632_s4 + $0x300] sm:$0xff]  ;;  %v7784_v2 = vld [vmem:[%s22634_s6 + $0x70] sm:$0xff]  ;;  %v7783_v30 = vld [vmem:[%s22634_s6 + $0x68] sm:$0xff] }
 0x20d   :  { %v15701_v9 = vadd.f32 %v15580_v33, %v2220_v36  ;;  %2258 = vmatmul.bf16.gmra.mxu1 %v10722_v60  ;;  %v15703_v47 = vpop.f32.mrf.mxu3  ;;  %2527 = vmatmul.bf16.gmra.mxu2 %v10750_v58  ;;  %v15728_v5 = vpop.permute.xlu1 %769  ;;  %v10754_v60 = vor.u32 %v13291_v22, %v10753_v59  ;;  %v10761_v36 = vld [vmem:[%s22631_s1 + $0x2f0] sm:$0xf]  ;;  %v13292_v58 = vld [vmem:[%s22631_s1 + $0x2f8] sm:$0xf0]  ;;  %v7782_v59 = vld [vmem:[%s22634_s6 + $0x60] sm:$0xff] }
 0x20e   :  { %22675 = vst [vmem:[#allocation23_spill] sm:$0xff] %v15703_v47  ;;  %v10762_v26 = vor.u32 %v13292_v58, %v10761_v36  ;;  %v7785_v22 = vld [vmem:[%s22634_s6 + $0x78] sm:$0xff]  ;;  %v10765_v36 = vld [vmem:[%s22631_s1 + $0x300] sm:$0xf] }
 0x20f   :  { %v15726_v1 = vpop.f32.mrf.mxu2  ;;  %22677 = vst [vmem:[#allocation25_spill] sm:$0xff] %v15728_v5  ;;  %v10785_v5 = vld [vmem:[%s22631_s1 + $0x320] sm:$0xf] }
 0x211   :  { %v15714_v33 = vpop.f32.mrf.mxu0 }
 0x212   :  { %v15716_v62 = vpop.f32.mrf.mxu1  ;;  %3680 = vperm.xlu1 %13863, %v3258_v39  }
 0x213   :  { %3775 = vperm.xlu0 %13862, %v3277_v8   ;;  %v15767_v8 = vpop.permute.xlu2 %749 }
 0x214   :  { %3685 = vperm.xlu2 %13864, %v3259_v13   ;;  %22680 = vst [vmem:[#allocation28_spill] sm:$0xff] %v15767_v8 }
 0x215   :  { %v15730_v12 = vpop.f32.mrf.mxu3  ;;  %v15771_v43 = vpop.permute.xlu1 %764 }
 0x216   :  { %22678 = vst [vmem:[#allocation26_spill] sm:$0xff] %v15730_v12 }
 0x217   :  { %v15765_v39 = vpop.f32.mrf.mxu2  ;;  %22682 = vst [vmem:[#allocation30_spill] sm:$0xff] %v15771_v43  ;;  %v13298_v43 = vld [vmem:[%s22631_s1 + $0x328] sm:$0xf0] }
 0x219   :  { %v15755_v21 = vpop.f32.mrf.mxu0 }
 0x21a   :  { %v15757_v19 = vpop.f32.mrf.mxu1  ;;  %5742 = vmatmul.bf16.gmra.mxu3 %v11386_v56  ;;  %3765 = vperm.xlu1 %13863, %v3275_v48   ;;  %v15776_v56 = vpop.permute.xlu0 %759 }
 0x21b   :  { %3760 = vperm.xlu0 %13862, %v3274_v42   ;;  %22683 = vst [vmem:[#allocation31_spill] sm:$0xff] %v15776_v56  ;;  %v11413_v42 = vld [vmem:[%s22633_s3 + $0x2a0] sm:$0xf] }
 0x21c   :  { %7874 = vperm.xlu2 %13864, %v7784_v2   ;;  %2014 = vmatmul.bf16.gmra.mxu0 %v10754_v60  ;;  %v13434_v2 = vld [vmem:[%s22633_s3 + $0x2b8] sm:$0xf0] }
 0x21d   :  { %2263 = vmatmul.bf16.gmra.mxu1 %v10734_v34  ;;  %v15769_v13 = vpop.f32.mrf.mxu3  ;;  %2532 = vmatmul.bf16.gmra.mxu2 %v10762_v26  ;;  %v11414_v58 = vor.u32 %v13434_v2, %v11413_v42  ;;  %v13294_v26 = vld [vmem:[%s22631_s1 + $0x308] sm:$0xf0]  ;;  %v7780_v42 = vld [vmem:[%s22634_s6 + $0x50] sm:$0xff] }
 0x21e   :  { %22681 = vst [vmem:[#allocation29_spill] sm:$0xff] %v15769_v13  ;;  %v15815_v13 = vpop.permute.xlu1 %739  ;;  %v7800_v2 = vld [vmem:[%s22634_s6 + $0xf0] sm:$0xff]  ;;  %v10766_v12 = vor.u32 %v13294_v26, %v10765_v36 }
 0x21f   :  { %v15794_v60 = vpop.f32.mrf.mxu2  ;;  %22686 = vst [vmem:[#allocation34_spill] sm:$0xff] %v15815_v13 }
 0x221   :  { %v15784_v18 = vpop.f32.mrf.mxu0 }
 0x222   :  { %v15786_v48 = vpop.f32.mrf.mxu1  ;;  %7864 = vperm.xlu1 %13863, %v7782_v59   ;;  %v13287_v59 = vld [vmem:[%s22631_s1 + $0x2d4] sm:$0xf]  ;;  %v15833_v50 = vpop.permute.xlu0 %754 }
 0x223   :  { %7879 = vperm.xlu0 %13862, %v7785_v22   ;;  %v10743_v22 = vld [vmem:[%s22631_s1 + $0x2dc] sm:$0xf0]  ;;  %22687 = vst [vmem:[#allocation35_spill] sm:$0xff] %v15833_v50 }
 0x224   :  { %7869 = vperm.xlu2 %13864, %v7783_v30   ;;  %v15810_v30 = vpop.permute.xlu2 %744  ;;  %v10746_v47 = vor.u32 %v13287_v59, %v10743_v22  ;;  %v7778_v59 = vld [vmem:[%s22634_s6 + $0x40] sm:$0xff] }
 0x225   :  { %v15796_v34 = vpop.f32.mrf.mxu3  ;;  %22685 = vst [vmem:[#allocation33_spill] sm:$0xff] %v15810_v30  ;;  %v10786_v30 = vor.u32 %v13298_v43, %v10785_v5  ;;  %v7777_v5 = vld [vmem:[%s22634_s6 + $0x38] sm:$0xff] }
 0x226   :  { %22684 = vst [vmem:[#allocation32_spill] sm:$0xff] %v15796_v34  ;;  %v7781_v34 = vld [vmem:[%s22634_s6 + $0x58] sm:$0xff] }
 0x227   :  { %v15835_v36 = vpop.f32.mrf.mxu2 }
 0x229   :  { %v15823_v15 = vpop.f32.mrf.mxu0 }
 0x22a   :  { %v15825_v6 = vpop.f32.mrf.mxu1  ;;  %5747 = vmatmul.bf16.gmra.mxu3 %v11414_v58  ;;  %7859 = vperm.xlu1 %13863, %v7781_v34   ;;  %v10774_v58 = vor.u32 %v13295_v63, %v10773_v29  ;;  %v7779_v34 = vld [vmem:[%s22634_s6 + $0x48] sm:$0xff]  ;;  %v11441_v63 = vld [vmem:[%s22633_s3 + $0x2d8] sm:$0xf]  ;;  %v13441_v29 = vld [vmem:[%s22633_s3 + $0x2f0] sm:$0xf0] }
 0x22b   :  { %7854 = vperm.xlu0 %13862, %v7780_v42   ;;  %v15852_v42 = vpop.permute.xlu1 %734 }
 0x22c   :  { %7954 = vperm.xlu2 %13864, %v7800_v2   ;;  %2019 = vmatmul.bf16.gmra.mxu0 %v10766_v12  ;;  %v15842_v22 = vpop.permute.xlu2 %879 }
 0x22d   :  { %2268 = vmatmul.bf16.gmra.mxu1 %v10746_v47  ;;  %v15837_v26 = vpop.f32.mrf.mxu3  ;;  %22689 = vst [vmem:[#allocation37_spill] sm:$0xff] %v15842_v22  ;;  %2537 = vmatmul.bf16.gmra.mxu2 %v10774_v58  ;;  %v11442_v22 = vor.u32 %v13441_v29, %v11441_v63  ;;  %v7798_v63 = vld [vmem:[%s22634_s6 + $0xe0] sm:$0xff]  ;;  %v7776_v29 = vld [vmem:[%s22634_s6 + $0x30] sm:$0xff] }
 0x22e   :  { %22688 = vst [vmem:[#allocation36_spill] sm:$0xff] %v15837_v26  ;;  %v15862_v26 = vpop.permute.xlu0 %729 }
 0x22f   :  { %v15860_v2 = vpop.f32.mrf.mxu2 }
 0x231   :  { %v15850_v12 = vpop.f32.mrf.mxu0 }
 0x232   :  { %v2231_v47 = vpop.f32.mrf.mxu1  ;;  %7844 = vperm.xlu1 %13863, %v7778_v59   ;;  %v10777_v59 = vld [vmem:[%s22631_s1 + $0x318] sm:$0xf] }
 0x233   :  { %7959 = vperm.xlu0 %13862, %v7801_v40   ;;  %v13290_v40 = vld [vmem:[%s22631_s1 + $0x2ec] sm:$0xf]  ;;  %v10778_v7 = vor.u32 %v13297_v51, %v10777_v59  ;;  %v15899_v51 = vpop.permute.xlu1 %869 }
 0x234   :  { %7849 = vperm.xlu2 %13864, %v7779_v34   ;;  %v10755_v34 = vld [vmem:[%s22631_s1 + $0x2f4] sm:$0xf0]  ;;  %v15895_v56 = vpop.permute.xlu2 %874  ;;  %22692 = vst [vmem:[#allocation40_spill] sm:$0xff] %v15899_v51  ;;  %v22693_v59 = vld [vmem:[#allocation8_spill] sm:$0xff] }
 0x235   :  { %v15864_v58 = vpop.f32.mrf.mxu3  ;;  %v10758_v38 = vor.u32 %v13290_v40, %v10755_v34  ;;  %22691 = vst [vmem:[#allocation39_spill] sm:$0xff] %v15895_v56  ;;  %v22694_v40 = vld [vmem:[#allocation7_spill] sm:$0xff] }
 0x236   :  { %22690 = vst [vmem:[#allocation38_spill] sm:$0xff] %v15864_v58  ;;  %v7799_v58 = vld [vmem:[%s22634_s6 + $0xe8] sm:$0xff]  ;;  %v1976_v34 = vadd.f32 %v15755_v21, %v22694_v40  ;;  %v15907_v13 = vpop.permute.xlu0 %884  ;;  %v22700_v21 = vld [vmem:[#allocation9_spill] sm:$0xff]  ;;  %v22701_v40 = vld [vmem:[#allocation14_spill] sm:$0xff] }
 0x237   :  { %v15897_v50 = vpop.f32.mrf.mxu2  ;;  %22696 = vst [vmem:[#allocation7_spill] sm:$0xff] %v15907_v13  ;;  %v22698_v56 = vld [vmem:[#allocation11_spill] sm:$0xff]  ;;  %v1966_v43 = vadd.f32 %v15616_v14, %v22700_v21  ;;  %v1981_v21 = vadd.f32 %v15823_v15, %v15582_v31  ;;  %v10797_v15 = vld [vmem:[%s22631_s1 + $0x338] sm:$0xf] }
 0x238   :  { %v1968_v51 = vadd.f32 %v15644_v23, %v22698_v56 }
 0x239   :  { %v15887_v32 = vpop.f32.mrf.mxu0 }
 0x23a   :  { %v2234_v41 = vpop.f32.mrf.mxu1  ;;  %5752 = vmatmul.bf16.gmra.mxu3 %v11442_v22  ;;  %7949 = vperm.xlu1 %13863, %v7799_v58   ;;  %v1973_v22 = vadd.f32 %v15714_v33, %v22693_v59  ;;  %v22697_v58 = vld [vmem:[#allocation12_spill] sm:$0xff]  ;;  %v22699_v59 = vld [vmem:[#allocation10_spill] sm:$0xff] }
 0x23b   :  { %7944 = vperm.xlu0 %13862, %v7798_v63   ;;  %v1971_v63 = vadd.f32 %v15686_v46, %v22697_v58  ;;  %v7796_v33 = vld [vmem:[%s22634_s6 + $0xd0] sm:$0xff]  ;;  %v7797_v46 = vld [vmem:[%s22634_s6 + $0xd8] sm:$0xff]  ;;  %v2227_v58 = vadd.f32 %v15786_v48, %v1968_v51  ;;  %v13293_v48 = vld [vmem:[%s22631_s1 + $0x304] sm:$0xf]  ;;  %v2225_v51 = vadd.f32 %v15757_v19, %v1966_v43 }
 0x23c   :  { %7834 = vperm.xlu2 %13864, %v7776_v29   ;;  %2024 = vmatmul.bf16.gmra.mxu0 %v10778_v7  ;;  %v2235_v29 = vadd.f32 %v2234_v41, %v1976_v34  ;;  %v1978_v7 = vadd.f32 %v15784_v18, %v22699_v59  ;;  %v1963_v34 = vadd.f32 %v15572_v44, %v22701_v40  ;;  %v13300_v44 = vld [vmem:[%s22631_s1 + $0x338] sm:$0xf0] }
 0x23d   :  { %2273 = vmatmul.bf16.gmra.mxu1 %v10758_v38  ;;  %v15905_v8 = vpop.f32.mrf.mxu3  ;;  %v2232_v38 = vadd.f32 %v2231_v47, %v1973_v22  ;;  %2542 = vmatmul.bf16.gmra.mxu2 %v10786_v30  ;;  %v2230_v56 = vadd.f32 %v15825_v6, %v1971_v63  ;;  %v11469_v22 = vld [vmem:[%s22633_s3 + $0x310] sm:$0xf]  ;;  %v13448_v30 = vld [vmem:[%s22633_s3 + $0x328] sm:$0xf0]  ;;  %v15941_v6 = vpop.permute.xlu2 %849 }
 0x23e   :  { %22695 = vst [vmem:[#allocation8_spill] sm:$0xff] %v15905_v8  ;;  %v2494_v18 = vadd.f32 %v15794_v60, %v2235_v29  ;;  %v11470_v59 = vor.u32 %v13448_v30, %v11469_v22  ;;  %v15970_v22 = vpop.permute.xlu0 %859 }
 0x23f   :  { %v15939_v14 = vpop.f32.mrf.mxu2  ;;  %v2491_v60 = vadd.f32 %v15765_v39, %v2232_v38  ;;  %v10767_v39 = vld [vmem:[%s22631_s1 + $0x30c] sm:$0xf0]  ;;  %22704 = vst [vmem:[#allocation10_spill] sm:$0xff] %v15970_v22 }
 0x240   :  { %v2674_v38 = vmax.f32 %v2494_v18, 0.0  ;;  %v10770_v19 = vor.u32 %v13293_v48, %v10767_v39  ;;  %v2484_v18 = vadd.f32 %v15654_v25, %v2225_v51 }
 0x241   :  { %v15924_v41 = vpop.f32.mrf.mxu0  ;;  %v2673_v30 = vmax.f32 %v2491_v60, 0.0 }
 0x242   :  { %v2236_v23 = vpop.f32.mrf.mxu1  ;;  %7934 = vperm.xlu1 %13863, %v7796_v33   ;;  %v10789_v33 = vld [vmem:[%s22631_s1 + $0x330] sm:$0xf]  ;;  %v2670_v51 = vmax.f32 %v2484_v18, 0.0  ;;  %v13296_v18 = vld [vmem:[%s22631_s1 + $0x31c] sm:$0xf] }
 0x243   :  { %v2237_v47 = vadd.f32 %v2236_v23, %v1978_v7  ;;  %7839 = vperm.xlu0 %13862, %v7777_v5   ;;  %v2489_v7 = vadd.f32 %v15726_v1, %v2230_v56  ;;  %v2486_v23 = vadd.f32 %v15696_v55, %v2227_v58  ;;  %v7774_v1 = vld [vmem:[%s22634_s6 + $0x20] sm:$0xff]  ;;  %v10790_v55 = vor.u32 %v13300_v44, %v10789_v33 }
 0x244   :  { %7939 = vperm.xlu2 %13864, %v7797_v46   ;;  %v2222_v46 = vadd.f32 %v15716_v62, %v1963_v34  ;;  %v7794_v62 = vld [vmem:[%s22634_s6 + $0xc0] sm:$0xff] }
 0x245   :  { %v2496_v63 = vadd.f32 %v15835_v36, %v2237_v47  ;;  %v15945_v29 = vpop.f32.mrf.mxu3  ;;  %v15959_v36 = vpop.permute.xlu1 %864  ;;  %v7775_v47 = vld [vmem:[%s22634_s6 + $0x28] sm:$0xff]  ;;  %v13301_v56 = vld [vmem:[%s22631_s1 + $0x340] sm:$0xf0]  ;;  %v2672_v34 = vmax.f32 %v2489_v7, 0.0  ;;  %v2671_v33 = vmax.f32 %v2486_v23, 0.0  ;;  %v7773_v23 = vld [vmem:[%s22634_s6 + $0x18] sm:$0xff] }
 0x246   :  { %22702 = vst [vmem:[#allocation12_spill] sm:$0xff] %v15945_v29  ;;  %v2481_v60 = vadd.f32 %v15624_v24, %v2222_v46  ;;  %v10798_v39 = vor.u32 %v13301_v56, %v10797_v15  ;;  %v15993_v25 = vpop.permute.xlu2 %844  ;;  %v7772_v24 = vld [vmem:[%s22634_s6 + $0x10] sm:$0xff]  ;;  %v7795_v46 = vld [vmem:[%s22634_s6 + $0xc8] sm:$0xff] }
 0x247   :  { %22703 = vst [vmem:[#allocation11_spill] sm:$0xff] %v15959_v36  ;;  %v2675_v5 = vmax.f32 %v2496_v63, 0.0  ;;  %v15988_v63 = vpop.f32.mrf.mxu2  ;;  %v3150_v48 = vpack.c.bf16 %v2673_v30, %v2672_v34  ;;  %v16010_v30 = vpop.permute.xlu0 %854  ;;  %v13303_v56 = vld [vmem:[%s22631_s1 + $0x350] sm:$0xf0]  ;;  %v13322_v36 = vld [vmem:[%s22631_s1 + $0x3e8] sm:$0xf0] }
 0x248   :  { %22706 = vst [vmem:[#allocation14_spill] sm:$0xff] %v16010_v30 }
 0x249   :  { %v3151_v40 = vpack.c.bf16 %v2675_v5, %v2674_v38  ;;  %v15978_v43 = vpop.f32.mrf.mxu0  ;;  %v2669_v38 = vmax.f32 %v2481_v60, 0.0  ;;  %v3149_v5 = vpack.c.bf16 %v2671_v33, %v2670_v51  ;;  %v7793_v60 = vld [vmem:[%s22634_s6 + $0xb8] sm:$0xff]  ;;  %v7770_v51 = vld [vmem:[%s22634_s6] sm:$0xff] }
 0x24a   :  { %v2239_v31 = vpop.f32.mrf.mxu1  ;;  %5757 = vmatmul.bf16.gmra.mxu3 %v11470_v59  ;;  %7829 = vperm.xlu1 %13863, %v7775_v47  }
 0x24b   :  { %v2240_v58 = vadd.f32 %v2239_v31, %v1981_v21  ;;  %6197 = vmatpush.bf16.msra.mxu1 %v3151_v40  ;;  %7824 = vperm.xlu0 %13862, %v7774_v1   ;;  %v2668_v40 = vmax.f32 %v15701_v9, 0.0  ;;  %v10801_v31 = vld [vmem:[%s22631_s1 + $0x348] sm:$0xf] }
 0x24c   :  { %7924 = vperm.xlu2 %13864, %v7794_v62   ;;  %2029 = vmatmul.bf16.gmra.mxu0 %v10790_v55 }
 0x24d   :  { %v2499_v59 = vadd.f32 %v15860_v2, %v2240_v58  ;;  %2278 = vmatmul.bf16.gmra.mxu1 %v10770_v19  ;;  %v15991_v44 = vpop.f32.mrf.mxu3  ;;  %v15998_v7 = vpop.permute.xlu1 %839  ;;  %v1983_v2 = vadd.f32 %v15850_v12, %v15646_v52  ;;  %2547 = vmatmul.bf16.gmra.mxu2 %v10798_v39  ;;  %v11497_v52 = vld [vmem:[%s22633_s3 + $0x348] sm:$0xf]  ;;  %v13455_v12 = vld [vmem:[%s22633_s3 + $0x360] sm:$0xf0]  ;;  %v3148_v9 = vpack.c.bf16 %v2669_v38, %v2668_v40  ;;  %v7792_v39 = vld [vmem:[%s22634_s6 + $0xb0] sm:$0xff] }
 0x24e   :  { %22705 = vst [vmem:[#allocation9_spill] sm:$0xff] %v15991_v44  ;;  %v11498_v15 = vor.u32 %v13455_v12, %v11497_v52  ;;  %v16039_v33 = vpop.permute.xlu2 %819  ;;  %v10857_v44 = vld [vmem:[%s22631_s1 + $0x3b0] sm:$0xf] }
 0x24f   :  { %6198 = vmatpush.bf16.msra.mxu1 %v3150_v48  ;;  %v2676_v34 = vmax.f32 %v2499_v59, 0.0  ;;  %v1986_v48 = vadd.f32 %v15887_v32, %v15606_v27  ;;  %v10802_v59 = vor.u32 %v13303_v56, %v10801_v31  ;;  %v10809_v27 = vld [vmem:[%s22631_s1 + $0x350] sm:$0xf]  ;;  %v13304_v32 = vld [vmem:[%s22631_s1 + $0x358] sm:$0xf0]  ;;  %v16064_v40 = vpop.permute.xlu0 %829 }
 0x250   :  { %v16019_v62 = vpop.f32.mrf.mxu2  ;;  %v10810_v12 = vor.u32 %v13304_v32, %v10809_v27  ;;  %v1991_v27 = vadd.f32 %v15978_v43, %v15554_v17  ;;  %v7788_v32 = vld [vmem:[%s22634_s6 + $0x90] sm:$0xff]  ;;  %v10821_v17 = vld [vmem:[%s22631_s1 + $0x368] sm:$0xf] }
 0x251   :  { %v16008_v21 = vpop.f32.mrf.mxu0  ;;  %v13307_v43 = vld [vmem:[%s22631_s1 + $0x370] sm:$0xf0] }
 0x252   :  { %v2241_v47 = vpop.f32.mrf.mxu1  ;;  %7814 = vperm.xlu1 %13863, %v7772_v24  }
 0x253   :  { %v2242_v1 = vadd.f32 %v2241_v47, %v1983_v2  ;;  %6199 = vmatpush.bf16.msra.mxu1 %v3149_v5  ;;  %7929 = vperm.xlu0 %13862, %v7795_v46  }
 0x254   :  { %7819 = vperm.xlu2 %13864, %v7773_v23  }
 0x255   :  { %v2501_v55 = vadd.f32 %v15897_v50, %v2242_v1  ;;  %v16022_v19 = vpop.f32.mrf.mxu3  ;;  %v10779_v50 = vld [vmem:[%s22631_s1 + $0x324] sm:$0xf0]  ;;  %v16059_v46 = vpop.permute.xlu1 %834 }
 0x256   :  { %22707 = vst [vmem:[#allocation41_spill] sm:$0xff] %v16022_v19  ;;  %v10782_v24 = vor.u32 %v13296_v18, %v10779_v50 }
 0x257   :  { %v2677_v58 = vmax.f32 %v2501_v55, 0.0  ;;  %6200 = vmatpush.bf16.msra.mxu1 %v3148_v9  ;;  %v1988_v55 = vadd.f32 %v15924_v41, %v15599_v20  ;;  %v7771_v9 = vld [vmem:[%s22634_s6 + $0x8] sm:$0xff]  ;;  %v11525_v20 = vld [vmem:[%s22633_s3 + $0x380] sm:$0xf]  ;;  %v13462_v41 = vld [vmem:[%s22633_s3 + $0x398] sm:$0xf0] }
 0x258   :  { %v16062_v47 = vpop.f32.mrf.mxu2 }
 0x259   :  { %v16049_v38 = vpack.c.bf16 %v2677_v58, %v2676_v34  ;;  %v16051_v2 = vpop.f32.mrf.mxu0 }
 0x25a   :  { %v2244_v5 = vpop.f32.mrf.mxu1  ;;  %5762 = vmatmul.bf16.gmra.mxu3 %v11498_v15  ;;  %7919 = vperm.xlu1 %13863, %v7793_v60   ;;  %v11526_v60 = vor.u32 %v13462_v41, %v11525_v20  ;;  %v10822_v41 = vor.u32 %v13307_v43, %v10821_v17  ;;  %v10803_v17 = vld [vmem:[%s22631_s1 + $0x354] sm:$0xf0] }
 0x25b   :  { %v2245_v23 = vadd.f32 %v2244_v5, %v1986_v48  ;;  %6201 = vmatpush.bf16.msra.mxu1 %v15684_v57  ;;  %7914 = vperm.xlu0 %13862, %v7792_v39   ;;  %v7790_v57 = vld [vmem:[%s22634_s6 + $0xa0] sm:$0xff]  ;;  %v13306_v48 = vld [vmem:[%s22631_s1 + $0x368] sm:$0xf0]  ;;  %v13299_v39 = vld [vmem:[%s22631_s1 + $0x334] sm:$0xf] }
 0x25c   :  { %7804 = vperm.xlu2 %13864, %v7770_v51   ;;  %2034 = vmatmul.bf16.gmra.mxu0 %v10802_v59  ;;  %v10791_v51 = vld [vmem:[%s22631_s1 + $0x33c] sm:$0xf0]  ;;  %v7789_v5 = vld [vmem:[%s22634_s6 + $0x98] sm:$0xff] }
 0x25d   :  { %v2504_v1 = vadd.f32 %v15939_v14, %v2245_v23  ;;  %2283 = vmatmul.bf16.gmra.mxu1 %v10782_v24  ;;  %v16067_v52 = vpop.f32.mrf.mxu3  ;;  %v7791_v14 = vld [vmem:[%s22634_s6 + $0xa8] sm:$0xff]  ;;  %2552 = vmatmul.bf16.gmra.mxu2 %v10810_v12  ;;  %v16094_v50 = vpop.permute.xlu1 %899  ;;  %v7786_v23 = vld [vmem:[%s22634_s6 + $0x80] sm:$0xff] }
 0x25e   :  { %22708 = vst [vmem:[#allocation42_spill] sm:$0xff] %v16067_v52 }
 0x25f   :  { %6202 = vmatpush.bf16.msra.mxu1 %v15614_v16  ;;  %v16083_v16 = vpop.permute.xlu2 %904  ;;  %22710 = vst [vmem:[#allocation44_spill] sm:$0xff] %v16094_v50  ;;  %v2678_v59 = vmax.f32 %v2504_v1, 0.0  ;;  %v10794_v1 = vor.u32 %v13299_v39, %v10791_v51  ;;  %v9280_v39 = vld [vmem:[%s22635_s8 + $0x38] sm:$0xff] }
 0x260   :  { %22709 = vst [vmem:[#allocation43_spill] sm:$0xff] %v16083_v16  ;;  %v16092_v18 = vpop.f32.mrf.mxu2  ;;  %v10869_v16 = vld [vmem:[%s22631_s1 + $0x3c8] sm:$0xf]  ;;  %v9300_v50 = vld [vmem:[%s22635_s8 + $0xd8] sm:$0xff] }
 0x261   :  { %v16081_v31 = vpop.f32.mrf.mxu0 }
 0x262   :  { %v2246_v15 = vpop.f32.mrf.mxu1  ;;  %7904 = vperm.xlu1 %13863, %v7790_v57  }
 0x263   :  { %v2247_v56 = vadd.f32 %v2246_v15, %v1988_v55  ;;  %6203 = vmatpush.bf16.msra.mxu1 %v15540_v4  ;;  %7809 = vperm.xlu0 %13862, %v7771_v9   ;;  %v10813_v4 = vld [vmem:[%s22631_s1 + $0x360] sm:$0xf] }
 0x264   :  { %7909 = vperm.xlu2 %13864, %v7791_v14   ;;  %v10814_v12 = vor.u32 %v13306_v48, %v10813_v4  ;;  %v9279_v4 = vld [vmem:[%s22635_s8 + $0x30] sm:$0xff]  ;;  %v1993_v48 = vadd.f32 %v16008_v21, %v15550_v0 }
 0x265   :  { %v2506_v34 = vadd.f32 %v15988_v63, %v2247_v56  ;;  %v16097_v58 = vpop.f32.mrf.mxu3  ;;  %v16111_v63 = vpop.permute.xlu0 %824  ;;  %v13469_v0 = vld [vmem:[%s22633_s3 + $0x3d0] sm:$0xf0] }
 0x266   :  { %22711 = vst [vmem:[#allocation45_spill] sm:$0xff] %v16097_v58 }
 0x267   :  { %v2679_v24 = vmax.f32 %v2506_v34, 0.0  ;;  %6204 = vmatpush.bf16.msra.mxu1 %v15470_v49  ;;  %v16137_v15 = vpop.permute.xlu2 %889  ;;  %v16142_v34 = vpop.permute.xlu1 %814 }
 0x268   :  { %v16135_v14 = vpop.f32.mrf.mxu2  ;;  %22712 = vst [vmem:[#allocation46_spill] sm:$0xff] %v16137_v15 }
 0x269   :  { %v16125_v57 = vpack.c.bf16 %v2679_v24, %v2678_v59  ;;  %v16127_v49 = vpop.f32.mrf.mxu0 }
 0x26a   :  { %v2249_v55 = vpop.f32.mrf.mxu1  ;;  %5767 = vmatmul.bf16.gmra.mxu3 %v11526_v60  ;;  %7899 = vperm.xlu1 %13863, %v7789_v5   ;;  %v11553_v5 = vld [vmem:[%s22633_s3 + $0x3b8] sm:$0xf] }
 0x26b   :  { %v2250_v9 = vadd.f32 %v2249_v55, %v1991_v27  ;;  %7894 = vperm.xlu0 %13862, %v7788_v32   ;;  %v13302_v55 = vld [vmem:[%s22631_s1 + $0x34c] sm:$0xf] }
 0x26c   :  { %7884 = vperm.xlu2 %13864, %v7786_v23   ;;  %2039 = vmatmul.bf16.gmra.mxu0 %v10814_v12  ;;  %v10825_v23 = vld [vmem:[%s22631_s1 + $0x378] sm:$0xf]  ;;  %v11554_v12 = vor.u32 %v13469_v0, %v11553_v5 }
 0x26d   :  { %v2509_v56 = vadd.f32 %v16019_v62, %v2250_v9  ;;  %2288 = vmatmul.bf16.gmra.mxu1 %v10794_v1  ;;  %v16140_v20 = vpop.f32.mrf.mxu3  ;;  %v16147_v60 = vpop.permute.xlu0 %809  ;;  %v7787_v62 = vld [vmem:[%s22634_s6 + $0x88] sm:$0xff]  ;;  %2557 = vmatmul.bf16.gmra.mxu2 %v10822_v41  ;;  %v13309_v1 = vld [vmem:[%s22631_s1 + $0x380] sm:$0xf0]  ;;  %v9288_v41 = vld [vmem:[%s22635_s8 + $0x78] sm:$0xff] }
 0x26e   :  { %22713 = vst [vmem:[#allocation47_spill] sm:$0xff] %v16140_v20 }
 0x26f   :  { %v2680_v43 = vmax.f32 %v2509_v56, 0.0  ;;  %v10806_v56 = vor.u32 %v13302_v55, %v10803_v17  ;;  %v9303_v17 = vld [vmem:[%s22635_s8 + $0xf0] sm:$0xff] }
 0x270   :  { %v16165_v21 = vpop.f32.mrf.mxu2 }
 0x271   :  { %v16157_v51 = vpop.f32.mrf.mxu0 }
 0x272   :  { %v2251_v59 = vpop.f32.mrf.mxu1  ;;  %9337 = vperm.xlu1 %13863, %v9279_v4   ;;  %v16187_v4 = vpop.permute.xlu1 %3350 }
 0x273   :  { %v2252_v24 = vadd.f32 %v2251_v59, %v1993_v48  ;;  %7889 = vperm.xlu0 %13862, %v7787_v62   ;;  %22716 = vst [vmem:[#allocation50_spill] sm:$0xff] %v16187_v4  ;;  %v1996_v48 = vadd.f32 %v16051_v2, %v15492_v35  ;;  %v9287_v62 = vld [vmem:[%s22635_s8 + $0x70] sm:$0xff]  ;;  %v10826_v59 = vor.u32 %v13309_v1, %v10825_v23  ;;  %v10833_v35 = vld [vmem:[%s22631_s1 + $0x380] sm:$0xf]  ;;  %v13310_v2 = vld [vmem:[%s22631_s1 + $0x388] sm:$0xf0] }
 0x274   :  { %9342 = vperm.xlu2 %13864, %v9280_v39   ;;  %v9295_v39 = vld [vmem:[%s22635_s8 + $0xb0] sm:$0xff]  ;;  %v10834_v55 = vor.u32 %v13310_v2, %v10833_v35 }
 0x275   :  { %v2511_v27 = vadd.f32 %v16062_v47, %v2252_v24  ;;  %v16168_v32 = vpop.f32.mrf.mxu3  ;;  %v16182_v47 = vpop.permute.xlu2 %3355  ;;  %v10837_v2 = vld [vmem:[%s22631_s1 + $0x390] sm:$0xf] }
 0x276   :  { %22714 = vst [vmem:[#allocation48_spill] sm:$0xff] %v16168_v32 }
 0x277   :  { %22715 = vst [vmem:[#allocation49_spill] sm:$0xff] %v16182_v47  ;;  %v2681_v9 = vmax.f32 %v2511_v27, 0.0  ;;  %v16207_v27 = vpop.permute.xlu0 %894 }
 0x278   :  { %22717 = vst [vmem:[#allocation51_spill] sm:$0xff] %v16207_v27  ;;  %v16209_v23 = vpop.f32.mrf.mxu2 }
 0x279   :  { %v16197_v24 = vpack.c.bf16 %v2681_v9, %v2680_v43  ;;  %v16199_v5 = vpop.f32.mrf.mxu0  ;;  %v1998_v9 = vadd.f32 %v16081_v31, %v15559_v3  ;;  %v11581_v3 = vld [vmem:[%s22633_s3 + $0x3f0] sm:$0xf]  ;;  %v13476_v31 = vld [vmem:[%s22633_s3 + $0x408] sm:$0xf0] }
 0x27a   :  { %v2254_v0 = vpop.f32.mrf.mxu1  ;;  %5772 = vmatmul.bf16.gmra.mxu3 %v11554_v12  ;;  %9382 = vperm.xlu1 %13863, %v9288_v41   ;;  %v9296_v41 = vld [vmem:[%s22635_s8 + $0xb8] sm:$0xff] }
 0x27b   :  { %v2255_v32 = vadd.f32 %v2254_v0, %v1996_v48  ;;  %9377 = vperm.xlu0 %13862, %v9287_v62   ;;  %v16229_v62 = vpop.permute.xlu1 %3345 }
 0x27c   :  { %9417 = vperm.xlu2 %13864, %v9295_v39   ;;  %2044 = vmatmul.bf16.gmra.mxu0 %v10826_v59  ;;  %22720 = vst [vmem:[#allocation54_spill] sm:$0xff] %v16229_v62 }
 0x27d   :  { %v2514_v1 = vadd.f32 %v16092_v18, %v2255_v32  ;;  %2293 = vmatmul.bf16.gmra.mxu1 %v10806_v56  ;;  %v16212_v12 = vpop.f32.mrf.mxu3  ;;  %v16217_v43 = vpop.permute.xlu2 %3330  ;;  %v9304_v18 = vld [vmem:[%s22635_s8 + $0xf8] sm:$0xff]  ;;  %2562 = vmatmul.bf16.gmra.mxu2 %v10834_v55  ;;  %v11582_v55 = vor.u32 %v13476_v31, %v11581_v3  ;;  %v9277_v3 = vld [vmem:[%s22635_s8 + $0x20] sm:$0xff] }
 0x27e   :  { %22718 = vst [vmem:[#allocation52_spill] sm:$0xff] %v16212_v12  ;;  %v9285_v31 = vld [vmem:[%s22635_s8 + $0x60] sm:$0xff] }
 0x27f   :  { %22719 = vst [vmem:[#allocation53_spill] sm:$0xff] %v16217_v43  ;;  %v16239_v56 = vpop.permute.xlu0 %3340  ;;  %v13311_v43 = vld [vmem:[%s22631_s1 + $0x394] sm:$0xf] }
 0x280   :  { %v16237_v59 = vpop.f32.mrf.mxu2  ;;  %22721 = vst [vmem:[#allocation55_spill] sm:$0xff] %v16239_v56  ;;  %v13316_v56 = vld [vmem:[%s22631_s1 + $0x3b8] sm:$0xf0] }
 0x281   :  { %v16227_v32 = vpop.f32.mrf.mxu0 }
 0x282   :  { %v2256_v48 = vpop.f32.mrf.mxu1  ;;  %9457 = vperm.xlu1 %13863, %v9303_v17   ;;  %v13312_v17 = vld [vmem:[%s22631_s1 + $0x398] sm:$0xf0] }
 0x283   :  { %v2257_v39 = vadd.f32 %v2256_v48, %v1998_v9  ;;  %9422 = vperm.xlu0 %13862, %v9296_v41   ;;  %v13305_v9 = vld [vmem:[%s22631_s1 + $0x364] sm:$0xf]  ;;  %v10815_v41 = vld [vmem:[%s22631_s1 + $0x36c] sm:$0xf0]  ;;  %v9278_v48 = vld [vmem:[%s22635_s8 + $0x28] sm:$0xff] }
 0x284   :  { %9462 = vperm.xlu2 %13864, %v9304_v18   ;;  %v10818_v12 = vor.u32 %v13305_v9, %v10815_v41 }
 0x285   :  { %v2516_v0 = vadd.f32 %v16135_v14, %v2257_v39  ;;  %v16242_v35 = vpop.f32.mrf.mxu3  ;;  %v2682_v14 = vmax.f32 %v2514_v1, 0.0  ;;  %v2001_v39 = vadd.f32 %v16127_v49, %v15513_v28  ;;  %v10845_v28 = vld [vmem:[%s22631_s1 + $0x398] sm:$0xf]  ;;  %v13313_v49 = vld [vmem:[%s22631_s1 + $0x3a0] sm:$0xf0]  ;;  %v16277_v58 = vpop.permute.xlu2 %3325 }
 0x286   :  { %22722 = vst [vmem:[#allocation56_spill] sm:$0xff] %v16242_v35  ;;  %v10838_v35 = vor.u32 %v13312_v17, %v10837_v2  ;;  %v16281_v17 = vpop.permute.xlu1 %3320  ;;  %v10846_v41 = vor.u32 %v13313_v49, %v10845_v28  ;;  %v10849_v28 = vld [vmem:[%s22631_s1 + $0x3a8] sm:$0xf] }
 0x287   :  { %v2683_v18 = vmax.f32 %v2516_v0, 0.0  ;;  %22723 = vst [vmem:[#allocation57_spill] sm:$0xff] %v16277_v58 }
 0x288   :  { %v16279_v2 = vpop.f32.mrf.mxu2  ;;  %22724 = vst [vmem:[#allocation58_spill] sm:$0xff] %v16281_v17 }
 0x289   :  { %v16267_v20 = vpack.c.bf16 %v2683_v18, %v2682_v14  ;;  %v16269_v1 = vpop.f32.mrf.mxu0  ;;  %v16288_v14 = vpop.permute.xlu0 %3335  ;;  %v9293_v18 = vld [vmem:[%s22635_s8 + $0xa0] sm:$0xff] }
 0x28a   :  { %v2259_v0 = vpop.f32.mrf.mxu1  ;;  %5777 = vmatmul.bf16.gmra.mxu3 %v11582_v55  ;;  %9332 = vperm.xlu1 %13863, %v9278_v48   ;;  %22726 = vst [vmem:[#allocation60_spill] sm:$0xff] %v16288_v14  ;;  %v9286_v48 = vld [vmem:[%s22635_s8 + $0x68] sm:$0xff]  ;;  %v10861_v14 = vld [vmem:[%s22631_s1 + $0x3c0] sm:$0xf] }
 0x28b   :  { %v2260_v47 = vadd.f32 %v2259_v0, %v2001_v39  ;;  %9327 = vperm.xlu0 %13862, %v9277_v3   ;;  %v13483_v39 = vld [vmem:[%s22633_s3 + $0x440] sm:$0xf0] }
 0x28c   :  { %9367 = vperm.xlu2 %13864, %v9285_v31   ;;  %2049 = vmatmul.bf16.gmra.mxu0 %v10838_v35  ;;  %v11609_v35 = vld [vmem:[%s22633_s3 + $0x428] sm:$0xf] }
 0x28d   :  { %v16284_v55 = vadd.f32 %v16165_v21, %v2260_v47  ;;  %2298 = vmatmul.bf16.gmra.mxu1 %v10818_v12  ;;  %v16286_v9 = vpop.f32.mrf.mxu3  ;;  %v9294_v21 = vld [vmem:[%s22635_s8 + $0xa8] sm:$0xff]  ;;  %2567 = vmatmul.bf16.gmra.mxu2 %v10846_v41  ;;  %v16311_v31 = vpop.permute.xlu2 %3300  ;;  %v11610_v49 = vor.u32 %v13483_v39, %v11609_v35  ;;  %v13315_v41 = vld [vmem:[%s22631_s1 + $0x3b0] sm:$0xf0]  ;;  %v9301_v35 = vld [vmem:[%s22635_s8 + $0xe0] sm:$0xff] }
 0x28e   :  { %22725 = vst [vmem:[#allocation59_spill] sm:$0xff] %v16286_v9  ;;  %v9275_v39 = vld [vmem:[%s22635_s8 + $0x10] sm:$0xff]  ;;  %v10850_v52 = vor.u32 %v13315_v41, %v10849_v28  ;;  %v10858_v41 = vor.u32 %v13316_v56, %v10857_v44 }
 0x28f   :  { %22727 = vst [vmem:[#allocation61_spill] sm:$0xff] %v16311_v31 }
 0x290   :  { %v16309_v3 = vpop.f32.mrf.mxu2 }
 0x291   :  { %v16299_v47 = vpop.f32.mrf.mxu0  ;;  %v16332_v9 = vpop.permute.xlu0 %3310 }
 0x292   :  { %v16301_v12 = vpop.f32.mrf.mxu1  ;;  %9407 = vperm.xlu1 %13863, %v9293_v18   ;;  %v13308_v18 = vld [vmem:[%s22631_s1 + $0x37c] sm:$0xf]  ;;  %22730 = vst [vmem:[#allocation64_spill] sm:$0xff] %v16332_v9  ;;  %v13321_v9 = vld [vmem:[%s22631_s1 + $0x3e0] sm:$0xf0] }
 0x293   :  { %9372 = vperm.xlu0 %13862, %v9286_v48   ;;  %v10827_v48 = vld [vmem:[%s22631_s1 + $0x384] sm:$0xf0] }
 0x294   :  { %9412 = vperm.xlu2 %13864, %v9294_v21   ;;  %v16327_v21 = vpop.permute.xlu1 %3315  ;;  %v10830_v4 = vor.u32 %v13308_v18, %v10827_v48 }
 0x295   :  { %v16313_v0 = vpop.f32.mrf.mxu3  ;;  %22729 = vst [vmem:[#allocation63_spill] sm:$0xff] %v16327_v21  ;;  %v16354_v18 = vpop.permute.xlu2 %3295 }
 0x296   :  { %22728 = vst [vmem:[#allocation62_spill] sm:$0xff] %v16313_v0  ;;  %v9302_v0 = vld [vmem:[%s22635_s8 + $0xe8] sm:$0xff] }
 0x297   :  { %22732 = vst [vmem:[#allocation66_spill] sm:$0xff] %v16354_v18 }
 0x298   :  { %v16350_v29 = vpop.f32.mrf.mxu2 }
 0x299   :  { %v16340_v19 = vpop.f32.mrf.mxu0  ;;  %v16371_v56 = vpop.permute.xlu0 %3305 }
 0x29a   :  { %v16342_v62 = vpop.f32.mrf.mxu1  ;;  %5782 = vmatmul.bf16.gmra.mxu3 %v11610_v49  ;;  %9452 = vperm.xlu1 %13863, %v9302_v0   ;;  %v9283_v49 = vld [vmem:[%s22635_s8 + $0x50] sm:$0xff]  ;;  %v9276_v0 = vld [vmem:[%s22635_s8 + $0x18] sm:$0xff]  ;;  %22733 = vst [vmem:[#allocation67_spill] sm:$0xff] %v16371_v56 }
 0x29b   :  { %9447 = vperm.xlu0 %13862, %v9301_v35   ;;  %v11637_v35 = vld [vmem:[%s22633_s3 + $0x460] sm:$0xf] }
 0x29c   :  { %9317 = vperm.xlu2 %13864, %v9275_v39   ;;  %2054 = vmatmul.bf16.gmra.mxu0 %v10850_v52  ;;  %v16359_v48 = vpop.permute.xlu1 %3290  ;;  %v9284_v52 = vld [vmem:[%s22635_s8 + $0x58] sm:$0xff] }
 0x29d   :  { %2303 = vmatmul.bf16.gmra.mxu1 %v10830_v4  ;;  %v16352_v28 = vpop.f32.mrf.mxu3  ;;  %2572 = vmatmul.bf16.gmra.mxu2 %v10858_v41  ;;  %v13490_v39 = vld [vmem:[%s22633_s3 + $0x478] sm:$0xf0] }
 0x29e   :  { %22731 = vst [vmem:[#allocation65_spill] sm:$0xff] %v16352_v28  ;;  %v11638_v8 = vor.u32 %v13490_v39, %v11637_v35  ;;  %v9291_v35 = vld [vmem:[%s22635_s8 + $0x90] sm:$0xff] }
 0x29f   :  { %v9299_v39 = vld [vmem:[%s22635_s8 + $0xd0] sm:$0xff] }
 0x2a0   :  { %v16379_v28 = vpop.f32.mrf.mxu2 }
 0x2a1   :  { %v16367_v4 = vpop.f32.mrf.mxu0 }
 0x2a2   :  { %v16369_v44 = vpop.f32.mrf.mxu1  ;;  %9357 = vperm.xlu1 %13863, %v9283_v49   ;;  %v13318_v49 = vld [vmem:[%s22631_s1 + $0x3c8] sm:$0xf0] }
 0x2a3   :  { %9322 = vperm.xlu0 %13862, %v9276_v0   ;;  %v10839_v0 = vld [vmem:[%s22631_s1 + $0x39c] sm:$0xf0]  ;;  %v10862_v58 = vor.u32 %v13318_v49, %v10861_v14 }
 0x2a4   :  { %9362 = vperm.xlu2 %13864, %v9284_v52   ;;  %v9292_v52 = vld [vmem:[%s22635_s8 + $0x98] sm:$0xff]  ;;  %v10842_v17 = vor.u32 %v13311_v43, %v10839_v0  ;;  %v16416_v27 = vpop.permute.xlu1 %3285  ;;  %v16420_v43 = vpop.permute.xlu0 %3280  ;;  %v9273_v0 = vld [vmem:[%s22635_s8] sm:$0xff] }
 0x2a5   :  { %v16381_v41 = vpop.f32.mrf.mxu3 }
 0x2a6   :  { %22734 = vst [vmem:[#allocation68_spill] sm:$0xff] %v16381_v41  ;;  %v16398_v41 = vpop.permute.xlu2 %3430 }
 0x2a7   :  { %22735 = vst [vmem:[#allocation69_spill] sm:$0xff] %v16398_v41  ;;  %v13319_v41 = vld [vmem:[%s22631_s1 + $0x3d0] sm:$0xf0] }
 0x2a8   :  { %v16418_v14 = vpop.f32.mrf.mxu2  ;;  %v10870_v49 = vor.u32 %v13319_v41, %v10869_v16  ;;  %v11665_v16 = vld [vmem:[%s22633_s3 + $0x498] sm:$0xf]  ;;  %v13497_v41 = vld [vmem:[%s22633_s3 + $0x4b0] sm:$0xf0] }
 0x2a9   :  { %v16406_v21 = vpop.f32.mrf.mxu0 }
 0x2aa   :  { %v16408_v15 = vpop.f32.mrf.mxu1  ;;  %5787 = vmatmul.bf16.gmra.mxu3 %v11638_v8  ;;  %9402 = vperm.xlu1 %13863, %v9292_v52   ;;  %v9274_v52 = vld [vmem:[%s22635_s8 + $0x8] sm:$0xff] }
 0x2ab   :  { %9397 = vperm.xlu0 %13862, %v9291_v35  }
 0x2ac   :  { %9437 = vperm.xlu2 %13864, %v9299_v39   ;;  %2059 = vmatmul.bf16.gmra.mxu0 %v10862_v58 }
 0x2ad   :  { %2308 = vmatmul.bf16.gmra.mxu1 %v10842_v17  ;;  %v16422_v8 = vpop.f32.mrf.mxu3  ;;  %2577 = vmatmul.bf16.gmra.mxu2 %v10870_v49 }
 0x2ae   :  { %22736 = vst [vmem:[#allocation70_spill] sm:$0xff] %v16422_v8  ;;  %v16435_v17 = vpop.permute.xlu2 %3515  ;;  %v16445_v8 = vpop.permute.xlu1 %3510 }
 0x2af   :  { %22737 = vst [vmem:[#allocation71_spill] sm:$0xff] %v16435_v17  ;;  %v11666_v17 = vor.u32 %v13497_v41, %v11665_v16  ;;  %v9281_v16 = vld [vmem:[%s22635_s8 + $0x40] sm:$0xff] }
 0x2b0   :  { %v16443_v39 = vpop.f32.mrf.mxu2  ;;  %22738 = vst [vmem:[#allocation72_spill] sm:$0xff] %v16445_v8  ;;  %v16461_v8 = vpop.permute.xlu0 %3435  ;;  %v9289_v41 = vld [vmem:[%s22635_s8 + $0x80] sm:$0xff] }
 0x2b1   :  { %v16433_v35 = vpop.f32.mrf.mxu0  ;;  %22740 = vst [vmem:[#allocation74_spill] sm:$0xff] %v16461_v8  ;;  %v10881_v8 = vld [vmem:[%s22631_s1 + $0x3e0] sm:$0xf] }
 0x2b2   :  { %v2271_v58 = vpop.f32.mrf.mxu1  ;;  %9307 = vperm.xlu1 %13863, %v9273_v0   ;;  %v10873_v0 = vld [vmem:[%s22631_s1 + $0x3d8] sm:$0xf] }
 0x2b3   :  { %9442 = vperm.xlu0 %13862, %v9300_v50   ;;  %v13314_v50 = vld [vmem:[%s22631_s1 + $0x3ac] sm:$0xf]  ;;  %v10874_v56 = vor.u32 %v13321_v9, %v10873_v0  ;;  %v2016_v9 = vadd.f32 %v16340_v19, %v15423_v45  ;;  %v10882_v0 = vor.u32 %v13322_v36, %v10881_v8  ;;  %v2011_v45 = vadd.f32 %v16269_v1, %v15414_v53 }
 0x2b4   :  { %9312 = vperm.xlu2 %13864, %v9274_v52   ;;  %v10851_v52 = vld [vmem:[%s22631_s1 + $0x3b4] sm:$0xf0]  ;;  %v2018_v19 = vadd.f32 %v16367_v4, %v15417_v10  ;;  %v9290_v36 = vld [vmem:[%s22635_s8 + $0x88] sm:$0xff]  ;;  %v11693_v4 = vld [vmem:[%s22633_s3 + $0x4d0] sm:$0xf] }
 0x2b5   :  { %v16447_v49 = vpop.f32.mrf.mxu3  ;;  %v10854_v31 = vor.u32 %v13314_v50, %v10851_v52  ;;  %v2013_v52 = vadd.f32 %v16299_v47, %v15480_v61  ;;  %v9298_v61 = vld [vmem:[%s22635_s8 + $0xc8] sm:$0xff]  ;;  %v2270_v53 = vadd.f32 %v16408_v15, %v2011_v45  ;;  %v2006_v15 = vadd.f32 %v16199_v5, %v15462_v11  ;;  %v13317_v11 = vld [vmem:[%s22631_s1 + $0x3c4] sm:$0xf] }
 0x2b6   :  { %22739 = vst [vmem:[#allocation73_spill] sm:$0xff] %v16447_v49  ;;  %v9282_v49 = vld [vmem:[%s22635_s8 + $0x48] sm:$0xff]  ;;  %v16482_v18 = vpop.permute.xlu2 %3500  ;;  %v16488_v50 = vpop.permute.xlu1 %3425 }
 0x2b7   :  { %22741 = vst [vmem:[#allocation75_spill] sm:$0xff] %v16482_v18  ;;  %v13504_v8 = vld [vmem:[%s22633_s3 + $0x4e8] sm:$0xf0] }
 0x2b8   :  { %v16480_v13 = vpop.f32.mrf.mxu2  ;;  %22743 = vst [vmem:[#allocation77_spill] sm:$0xff] %v16488_v50 }
 0x2b9   :  { %v16472_v30 = vpop.f32.mrf.mxu0 }
 0x2ba   :  { %v2274_v22 = vpop.f32.mrf.mxu1  ;;  %5792 = vmatmul.bf16.gmra.mxu3 %v11666_v17  ;;  %9352 = vperm.xlu1 %13863, %v9282_v49  }
 0x2bb   :  { %9347 = vperm.xlu0 %13862, %v9281_v16   ;;  %v2275_v49 = vadd.f32 %v2274_v22, %v2016_v9  ;;  %v9297_v16 = vld [vmem:[%s22635_s8 + $0xc0] sm:$0xff]  ;;  %v2008_v22 = vadd.f32 %v16227_v32, %v15455_v37 }
 0x2bc   :  { %9387 = vperm.xlu2 %13864, %v9289_v41   ;;  %2064 = vmatmul.bf16.gmra.mxu0 %v10874_v56  ;;  %v16495_v41 = vpop.permute.xlu0 %3420 }
 0x2bd   :  { %2313 = vmatmul.bf16.gmra.mxu1 %v10854_v31  ;;  %v16486_v17 = vpop.f32.mrf.mxu3  ;;  %22744 = vst [vmem:[#allocation78_spill] sm:$0xff] %v16495_v41  ;;  %v2272_v31 = vadd.f32 %v2271_v58, %v2013_v52  ;;  %2582 = vmatmul.bf16.gmra.mxu2 %v10882_v0  ;;  %v2534_v10 = vadd.f32 %v16379_v28, %v2275_v49  ;;  %v10885_v0 = vld [vmem:[%s22631_s1 + $0x3f0] sm:$0xf]  ;;  %v13324_v49 = vld [vmem:[%s22631_s1 + $0x3f8] sm:$0xf0] }
 0x2be   :  { %22742 = vst [vmem:[#allocation76_spill] sm:$0xff] %v16486_v17  ;;  %v2267_v58 = vadd.f32 %v16369_v44, %v2008_v22  ;;  %v2003_v44 = vadd.f32 %v16157_v51, %v15502_v54  ;;  %v11694_v52 = vor.u32 %v13504_v8, %v11693_v4  ;;  %v16542_v5 = vpop.permute.xlu2 %3415 }
 0x2bf   :  { %v2531_v32 = vadd.f32 %v16350_v29, %v2272_v31  ;;  %v10863_v29 = vld [vmem:[%s22631_s1 + $0x3cc] sm:$0xf0]  ;;  %22746 = vst [vmem:[#allocation80_spill] sm:$0xff] %v16542_v5  ;;  %v2690_v54 = vmax.f32 %v2534_v10, 0.0  ;;  %v2021_v31 = vadd.f32 %v16406_v21, %v15862_v26  ;;  %v10893_v21 = vld [vmem:[%s22631_s1 + $0x3f8] sm:$0xf] }
 0x2c0   :  { %v16520_v37 = vpop.f32.mrf.mxu2  ;;  %v2262_v45 = vadd.f32 %v16301_v12, %v2003_v44  ;;  %v9891_v12 = vld [vmem:[%s22636_s10 + $0x60] sm:$0xff] }
 0x2c1   :  { %v16509_v47 = vpop.f32.mrf.mxu0  ;;  %v2689_v22 = vmax.f32 %v2531_v32, 0.0  ;;  %v13325_v10 = vld [vmem:[%s22631_s1 + $0x400] sm:$0xf0] }
 0x2c2   :  { %v2276_v56 = vpop.f32.mrf.mxu1  ;;  %9427 = vperm.xlu1 %13863, %v9297_v16   ;;  %v2529_v16 = vadd.f32 %v16309_v3, %v2270_v53  ;;  %v10866_v3 = vor.u32 %v13317_v11, %v10863_v29  ;;  %v9889_v11 = vld [vmem:[%s22636_s10 + $0x50] sm:$0xff]  ;;  %v22790_v5 = vld [vmem:[#allocation19_spill] sm:$0xff] }
 0x2c3   :  { %v2277_v1 = vadd.f32 %v2276_v56, %v2018_v19  ;;  %9392 = vperm.xlu0 %13862, %v9290_v36   ;;  %v2526_v19 = vadd.f32 %v16279_v2, %v2267_v58  ;;  %v9894_v36 = vld [vmem:[%s22636_s10 + $0x78] sm:$0xff]  ;;  %v10886_v2 = vor.u32 %v13324_v49, %v10885_v0  ;;  %v10894_v49 = vor.u32 %v13325_v10, %v10893_v21 }
 0x2c4   :  { %9432 = vperm.xlu2 %13864, %v9298_v61   ;;  %v16553_v61 = vpop.permute.xlu1 %3410  ;;  %v2688_v8 = vmax.f32 %v2529_v16, 0.0  ;;  %v13320_v21 = vld [vmem:[%s22631_s1 + $0x3dc] sm:$0xf] }
 0x2c5   :  { %v2536_v28 = vadd.f32 %v16418_v14, %v2277_v1  ;;  %v16526_v9 = vpop.f32.mrf.mxu3  ;;  %v2265_v14 = vadd.f32 %v16342_v62, %v2006_v15  ;;  %22747 = vst [vmem:[#allocation81_spill] sm:$0xff] %v16553_v61  ;;  %v9893_v62 = vld [vmem:[%s22636_s10 + $0x70] sm:$0xff]  ;;  %v16569_v1 = vpop.permute.xlu0 %3505  ;;  %v2521_v15 = vadd.f32 %v16209_v23, %v2262_v45 }
 0x2c6   :  { %22745 = vst [vmem:[#allocation79_spill] sm:$0xff] %v16526_v9  ;;  %v16581_v23 = vpop.permute.xlu2 %3400 }
 0x2c7   :  { %v2691_v51 = vmax.f32 %v2536_v28, 0.0  ;;  %22748 = vst [vmem:[#allocation82_spill] sm:$0xff] %v16569_v1  ;;  %v2524_v4 = vadd.f32 %v16237_v59, %v2265_v14  ;;  %v2687_v28 = vmax.f32 %v2526_v19, 0.0  ;;  %v2685_v29 = vmax.f32 %v2521_v15, 0.0 }
 0x2c8   :  { %v16573_v32 = vpop.f32.mrf.mxu2  ;;  %22750 = vst [vmem:[#allocation84_spill] sm:$0xff] %v16581_v23  ;;  %v2023_v14 = vadd.f32 %v16433_v35, %v15852_v42  ;;  %v11721_v42 = vld [vmem:[%s22633_s3 + $0x508] sm:$0xf]  ;;  %v13511_v35 = vld [vmem:[%s22633_s3 + $0x520] sm:$0xf0]  ;;  %v22793_v23 = vld [vmem:[#allocation18_spill] sm:$0xff] }
 0x2c9   :  { %v3159_v56 = vpack.c.bf16 %v2691_v51, %v2690_v54  ;;  %v16561_v53 = vpop.f32.mrf.mxu0  ;;  %v2686_v59 = vmax.f32 %v2524_v4, 0.0  ;;  %v9890_v54 = vld [vmem:[%s22636_s10 + $0x58] sm:$0xff] }
 0x2ca   :  { %v2279_v26 = vpop.f32.mrf.mxu1  ;;  %5797 = vmatmul.bf16.gmra.mxu3 %v11694_v52  ;;  %9972 = vperm.xlu1 %13863, %v9894_v36   ;;  %v3158_v52 = vpack.c.bf16 %v2689_v22, %v2688_v8  ;;  %v9888_v8 = vld [vmem:[%s22636_s10 + $0x48] sm:$0xff] }
 0x2cb   :  { %v2280_v58 = vadd.f32 %v2279_v26, %v2021_v31  ;;  %6456 = vmatpush.bf16.msrb.mxu2 %v3159_v56  ;;  %9967 = vperm.xlu0 %13862, %v9893_v62   ;;  %v3157_v16 = vpack.c.bf16 %v2687_v28, %v2686_v59  ;;  %v2684_v31 = vmax.f32 %v16284_v55, 0.0  ;;  %v13327_v26 = vld [vmem:[%s22631_s1 + $0x410] sm:$0xf0]  ;;  %v9887_v28 = vld [vmem:[%s22636_s10 + $0x40] sm:$0xff] }
 0x2cc   :  { %9957 = vperm.xlu2 %13864, %v9891_v12   ;;  %2069 = vmatmul.bf16.gmra.mxu0 %v10886_v2  ;;  %v16593_v19 = vpop.permute.xlu1 %3495  ;;  %v10897_v2 = vld [vmem:[%s22631_s1 + $0x408] sm:$0xf] }
 0x2cd   :  { %v2539_v0 = vadd.f32 %v16443_v39, %v2280_v58  ;;  %2318 = vmatmul.bf16.gmra.mxu1 %v10866_v3  ;;  %v16576_v44 = vpop.f32.mrf.mxu3  ;;  %v9892_v39 = vld [vmem:[%s22636_s10 + $0x68] sm:$0xff]  ;;  %2587 = vmatmul.bf16.gmra.mxu2 %v10894_v49  ;;  %22751 = vst [vmem:[#allocation85_spill] sm:$0xff] %v16593_v19  ;;  %v16604_v56 = vpop.permute.xlu0 %3490  ;;  %v3156_v12 = vpack.c.bf16 %v2685_v29, %v2684_v31  ;;  %v22754_v58 = vld [vmem:[#allocation34_spill] sm:$0xff] }
 0x2ce   :  { %22749 = vst [vmem:[#allocation83_spill] sm:$0xff] %v16576_v44  ;;  %v11722_v3 = vor.u32 %v13511_v35, %v11721_v42  ;;  %v2026_v15 = vadd.f32 %v16472_v30, %v22754_v58  ;;  %v10898_v49 = vor.u32 %v13327_v26, %v10897_v2  ;;  %v10905_v30 = vld [vmem:[%s22631_s1 + $0x410] sm:$0xf]  ;;  %v9884_v2 = vld [vmem:[%s22636_s10 + $0x28] sm:$0xff] }
 0x2cf   :  { %6457 = vmatpush.bf16.msrb.mxu2 %v3158_v52  ;;  %22752 = vst [vmem:[#allocation86_spill] sm:$0xff] %v16604_v56  ;;  %v2692_v10 = vmax.f32 %v2539_v0, 0.0  ;;  %v9885_v52 = vld [vmem:[%s22636_s10 + $0x30] sm:$0xff]  ;;  %v13330_v58 = vld [vmem:[%s22631_s1 + $0x428] sm:$0xf0] }
 0x2d0   :  { %v16602_v22 = vpop.f32.mrf.mxu2 }
 0x2d1   :  { %v16591_v51 = vpop.f32.mrf.mxu0 }
 0x2d2   :  { %v2281_v45 = vpop.f32.mrf.mxu1  ;;  %9947 = vperm.xlu1 %13863, %v9889_v11  }
 0x2d3   :  { %v2282_v36 = vadd.f32 %v2281_v45, %v2023_v14  ;;  %6458 = vmatpush.bf16.msrb.mxu2 %v3157_v16  ;;  %9962 = vperm.xlu0 %13862, %v9892_v39   ;;  %v13328_v14 = vld [vmem:[%s22631_s1 + $0x418] sm:$0xf0]  ;;  %v16643_v39 = vpop.permute.xlu2 %3485 }
 0x2d4   :  { %9952 = vperm.xlu2 %13864, %v9890_v54   ;;  %22755 = vst [vmem:[#allocation34_spill] sm:$0xff] %v16643_v39  ;;  %v16647_v45 = vpop.permute.xlu1 %3480  ;;  %v10906_v42 = vor.u32 %v13328_v14, %v10905_v30  ;;  %v22764_v14 = vld [vmem:[#allocation28_spill] sm:$0xff] }
 0x2d5   :  { %v2541_v62 = vadd.f32 %v16480_v13, %v2282_v36  ;;  %v16607_v55 = vpop.f32.mrf.mxu3  ;;  %v10875_v13 = vld [vmem:[%s22631_s1 + $0x3e4] sm:$0xf0]  ;;  %22756 = vst [vmem:[#allocation88_spill] sm:$0xff] %v16647_v45  ;;  %v16652_v35 = vpop.permute.xlu0 %3405  ;;  %v10280_v39 = vld [vmem:[%s22639_s13 + $0x10] sm:$0xff]  ;;  %v10281_v45 = vld [vmem:[%s22639_s13 + $0x18] sm:$0xff] }
 0x2d6   :  { %22753 = vst [vmem:[#allocation87_spill] sm:$0xff] %v16607_v55  ;;  %v10878_v59 = vor.u32 %v13320_v21, %v10875_v13  ;;  %v13518_v21 = vld [vmem:[%s22633_s3 + $0x558] sm:$0xf0] }
 0x2d7   :  { %v2693_v4 = vmax.f32 %v2541_v62, 0.0  ;;  %6459 = vmatpush.bf16.msrb.mxu2 %v3156_v12  ;;  %22758 = vst [vmem:[#allocation90_spill] sm:$0xff] %v16652_v35  ;;  %v22759_v62 = vld [vmem:[#allocation33_spill] sm:$0xff] }
 0x2d8   :  { %v16645_v54 = vpop.f32.mrf.mxu2  ;;  %v2028_v12 = vadd.f32 %v16509_v47, %v22759_v62  ;;  %v11749_v47 = vld [vmem:[%s22633_s3 + $0x540] sm:$0xf] }
 0x2d9   :  { %v16632_v0 = vpack.c.bf16 %v2693_v4, %v2692_v10  ;;  %v16634_v11 = vpop.f32.mrf.mxu0 }
 0x2da   :  { %v2284_v29 = vpop.f32.mrf.mxu1  ;;  %5802 = vmatmul.bf16.gmra.mxu3 %v11722_v3  ;;  %9942 = vperm.xlu1 %13863, %v9888_v8   ;;  %v11750_v8 = vor.u32 %v13518_v21, %v11749_v47 }
 0x2db   :  { %v2285_v16 = vadd.f32 %v2284_v29, %v2026_v15  ;;  %6460 = vmatpush.bf16.msrb.mxu2 %v16267_v20  ;;  %9937 = vperm.xlu0 %13862, %v9887_v28   ;;  %v9883_v20 = vld [vmem:[%s22636_s10 + $0x20] sm:$0xff]  ;;  %v13323_v15 = vld [vmem:[%s22631_s1 + $0x3f4] sm:$0xf]  ;;  %v9882_v29 = vld [vmem:[%s22636_s10 + $0x18] sm:$0xff] }
 0x2dc   :  { %9927 = vperm.xlu2 %13864, %v9885_v52   ;;  %2074 = vmatmul.bf16.gmra.mxu0 %v10898_v49  ;;  %v10887_v28 = vld [vmem:[%s22631_s1 + $0x3fc] sm:$0xf0]  ;;  %v16694_v52 = vpop.permute.xlu1 %3395 }
 0x2dd   :  { %v2544_v31 = vadd.f32 %v16520_v37, %v2285_v16  ;;  %2323 = vmatmul.bf16.gmra.mxu1 %v10878_v59  ;;  %v16650_v36 = vpop.f32.mrf.mxu3  ;;  %v9886_v37 = vld [vmem:[%s22636_s10 + $0x38] sm:$0xff]  ;;  %2592 = vmatmul.bf16.gmra.mxu2 %v10906_v42  ;;  %22762 = vst [vmem:[#allocation92_spill] sm:$0xff] %v16694_v52  ;;  %v16700_v30 = vpop.permute.xlu0 %3390  ;;  %v2031_v16 = vadd.f32 %v16561_v53, %v22764_v14  ;;  %v9881_v42 = vld [vmem:[%s22636_s10 + $0x10] sm:$0xff]  ;;  %v10917_v53 = vld [vmem:[%s22631_s1 + $0x428] sm:$0xf] }
 0x2de   :  { %22757 = vst [vmem:[#allocation89_spill] sm:$0xff] %v16650_v36  ;;  %v10890_v62 = vor.u32 %v13323_v15, %v10887_v28  ;;  %v22768_v15 = vld [vmem:[#allocation35_spill] sm:$0xff] }
 0x2df   :  { %6461 = vmatpush.bf16.msrb.mxu2 %v16197_v24  ;;  %v2694_v49 = vmax.f32 %v2544_v31, 0.0  ;;  %22763 = vst [vmem:[#allocation93_spill] sm:$0xff] %v16700_v30  ;;  %v9879_v31 = vld [vmem:[%s22636_s10] sm:$0xff]  ;;  %v2033_v28 = vadd.f32 %v16591_v51, %v22768_v15  ;;  %v11777_v51 = vld [vmem:[%s22633_s3 + $0x578] sm:$0xf] }
 0x2e0   :  { %v16675_v13 = vpop.f32.mrf.mxu2 }
 0x2e1   :  { %v16666_v3 = vpop.f32.mrf.mxu0 }
 0x2e2   :  { %v2286_v26 = vpop.f32.mrf.mxu1  ;;  %9917 = vperm.xlu1 %13863, %v9883_v20  }
 0x2e3   :  { %v2287_v24 = vadd.f32 %v2286_v26, %v2028_v12  ;;  %6462 = vmatpush.bf16.msrb.mxu2 %v16125_v57  ;;  %9932 = vperm.xlu0 %13862, %v9886_v37   ;;  %v10909_v57 = vld [vmem:[%s22631_s1 + $0x420] sm:$0xf] }
 0x2e4   :  { %9922 = vperm.xlu2 %13864, %v9884_v2   ;;  %v10910_v20 = vor.u32 %v13330_v58, %v10909_v57  ;;  %v13331_v2 = vld [vmem:[%s22631_s1 + $0x430] sm:$0xf0]  ;;  %v10153_v57 = vld [vmem:[%s22637_s12] sm:$0xff]  ;;  %v16730_v58 = vpop.permute.xlu1 %3380 }
 0x2e5   :  { %v2546_v10 = vadd.f32 %v16573_v32, %v2287_v24  ;;  %v16678_v4 = vpop.f32.mrf.mxu3  ;;  %v16692_v32 = vpop.permute.xlu2 %3470  ;;  %22767 = vst [vmem:[#allocation95_spill] sm:$0xff] %v16730_v58 }
 0x2e6   :  { %22760 = vst [vmem:[#allocation33_spill] sm:$0xff] %v16678_v4  ;;  %v16742_v14 = vpop.permute.xlu0 %3475 }
 0x2e7   :  { %22761 = vst [vmem:[#allocation91_spill] sm:$0xff] %v16692_v32  ;;  %v2695_v59 = vmax.f32 %v2546_v10, 0.0  ;;  %6463 = vmatpush.bf16.msrb.mxu2 %v16049_v38  ;;  %v10918_v10 = vor.u32 %v13331_v2, %v10917_v53  ;;  %v10921_v53 = vld [vmem:[%s22631_s1 + $0x438] sm:$0xf] }
 0x2e8   :  { %v16720_v24 = vpop.f32.mrf.mxu2  ;;  %22769 = vst [vmem:[#allocation35_spill] sm:$0xff] %v16742_v14 }
 0x2e9   :  { %v16710_v38 = vpack.c.bf16 %v2695_v59, %v2694_v49  ;;  %v16712_v12 = vpop.f32.mrf.mxu0  ;;  %v10154_v49 = vld [vmem:[%s22637_s12 + $0x8] sm:$0xff] }
 0x2ea   :  { %v2289_v37 = vpop.f32.mrf.mxu1  ;;  %5807 = vmatmul.bf16.gmra.mxu3 %v11750_v8  ;;  %9912 = vperm.xlu1 %13863, %v9882_v29  }
 0x2eb   :  { %v2290_v26 = vadd.f32 %v2289_v37, %v2031_v16  ;;  %9907 = vperm.xlu0 %13862, %v9881_v42   ;;  %v13525_v42 = vld [vmem:[%s22633_s3 + $0x590] sm:$0xf0] }
 0x2ec   :  { %9897 = vperm.xlu2 %13864, %v9879_v31   ;;  %2079 = vmatmul.bf16.gmra.mxu0 %v10910_v20  ;;  %v22_v20 = vstv %s22638_s14  ;;  %v11778_v2 = vor.u32 %v13525_v42, %v11777_v51 }
 0x2ed   :  { %v2549_v47 = vadd.f32 %v16602_v22, %v2290_v26  ;;  %2328 = vmatmul.bf16.gmra.mxu1 %v10890_v62  ;;  %v16723_v21 = vpop.f32.mrf.mxu3  ;;  %v16728_v8 = vpop.permute.xlu2 %3385  ;;  %v9880_v22 = vld [vmem:[%s22636_s10 + $0x8] sm:$0xff]  ;;  %2597 = vmatmul.bf16.gmra.mxu2 %v10918_v10  ;;  %23 = vst [vmem:[#allocation2] sm:$0x1] %v22_v20  ;;  %v13333_v26 = vld [vmem:[%s22631_s1 + $0x440] sm:$0xf0] }
 0x2ee   :  { %22765 = vst [vmem:[#allocation28_spill] sm:$0xff] %v16723_v21  ;;  %v13326_v10 = vld [vmem:[%s22631_s1 + $0x40c] sm:$0xf]  ;;  %v10922_v51 = vor.u32 %v13333_v26, %v10921_v53  ;;  %v16793_v53 = vpop.permute.xlu1 %3465 }
 0x2ef   :  { %22766 = vst [vmem:[#allocation94_spill] sm:$0xff] %v16728_v8  ;;  %v22794_v8 = vld [vmem:[#allocation27_spill] sm:$0xff] }
 0x2f0   :  { %v16750_v31 = vpop.f32.mrf.mxu2 }
 0x2f1   :  { %v16740_v59 = vpop.f32.mrf.mxu0 }
 0x2f2   :  { %v2291_v29 = vpop.f32.mrf.mxu1  ;;  %10163 = vperm.xlu1 %13863, %v10153_v57   ;;  %v2696_v57 = vmax.f32 %v2549_v47, 0.0 }
 0x2f3   :  { %v2292_v16 = vadd.f32 %v2291_v29, %v2033_v28  ;;  %9902 = vperm.xlu0 %13862, %v9880_v22   ;;  %v10156_v28 = vld [vmem:[%s22637_s12 + $0x18] sm:$0xff]  ;;  %v22771_v22 = vld [vmem:[#allocation31_spill] sm:$0xff]  ;;  %v10155_v29 = vld [vmem:[%s22637_s12 + $0x10] sm:$0xff] }
 0x2f4   :  { %10168 = vperm.xlu2 %13864, %v10154_v49   ;;  %v2036_v49 = vadd.f32 %v16634_v11, %v22771_v22  ;;  %v10929_v11 = vld [vmem:[%s22631_s1 + $0x440] sm:$0xf]  ;;  %v13334_v22 = vld [vmem:[%s22631_s1 + $0x448] sm:$0xf0]  ;;  %22772 = vst [vmem:[#allocation31_spill] sm:$0xff] %v16793_v53 }
 0x2f5   :  { %v2551_v62 = vadd.f32 %v16645_v54, %v2292_v16  ;;  %v16756_v37 = vpop.f32.mrf.mxu3  ;;  %v10899_v54 = vld [vmem:[%s22631_s1 + $0x414] sm:$0xf0]  ;;  %v10157_v16 = vld [vmem:[%s22637_s12 + $0x20] sm:$0xff]  ;;  %v16791_v1 = vpop.permute.xlu2 %3370 }
 0x2f6   :  { %22770 = vst [vmem:[#allocation96_spill] sm:$0xff] %v16756_v37  ;;  %v10902_v42 = vor.u32 %v13326_v10, %v10899_v54  ;;  %v16797_v10 = vpop.permute.xlu0 %3460 }
 0x2f7   :  { %v2697_v15 = vmax.f32 %v2551_v62, 0.0  ;;  %22773 = vst [vmem:[#allocation97_spill] sm:$0xff] %v16797_v10 }
 0x2f8   :  { %v16795_v26 = vpop.f32.mrf.mxu2 }
 0x2f9   :  { %v16781_v20 = vpack.c.bf16 %v2697_v15, %v2696_v57  ;;  %v16783_v47 = vpop.f32.mrf.mxu0  ;;  %v10930_v57 = vor.u32 %v13334_v22, %v10929_v11  ;;  %v10279_v15 = vld [vmem:[%s22639_s13 + $0x8] sm:$0xff] }
 0x2fa   :  { %v2294_v62 = vpop.f32.mrf.mxu1  ;;  %5812 = vmatmul.bf16.gmra.mxu3 %v11778_v2  ;;  %10178 = vperm.xlu1 %13863, %v10156_v28   ;;  %v22775_v28 = vld [vmem:[#allocation30_spill] sm:$0xff] }
 0x2fb   :  { %v2295_v18 = vadd.f32 %v2294_v62, %v2036_v49  ;;  %10173 = vperm.xlu0 %13862, %v10155_v29   ;;  %v2038_v49 = vadd.f32 %v16666_v3, %v22775_v28  ;;  %v10278_v29 = vld [vmem:[%s22639_s13] sm:$0xff]  ;;  %v13532_v3 = vld [vmem:[%s22633_s3 + $0x5c8] sm:$0xf0] }
 0x2fc   :  { %10183 = vperm.xlu2 %13864, %v10157_v16   ;;  %2084 = vmatmul.bf16.gmra.mxu0 %v10922_v51 }
 0x2fd   :  { %v2554_v2 = vadd.f32 %v16675_v13, %v2295_v18  ;;  %2333 = vmatmul.bf16.gmra.mxu1 %v10902_v42  ;;  %v16800_v54 = vpop.f32.mrf.mxu3  ;;  %v10158_v18 = vld [vmem:[%s22637_s12 + $0x28] sm:$0xff]  ;;  %2602 = vmatmul.bf16.gmra.mxu2 %v10930_v57  ;;  %v11805_v42 = vld [vmem:[%s22633_s3 + $0x5b0] sm:$0xf] }
 0x2fe   :  { %22774 = vst [vmem:[#allocation98_spill] sm:$0xff] %v16800_v54  ;;  %v10933_v57 = vld [vmem:[%s22631_s1 + $0x450] sm:$0xf]  ;;  %v11806_v28 = vor.u32 %v13532_v3, %v11805_v42 }
 0x2ff   :  { %v10159_v42 = vld [vmem:[%s22637_s12 + $0x30] sm:$0xff] }
 0x300   :  { %v16821_v62 = vpop.f32.mrf.mxu2  ;;  %v22779_v3 = vld [vmem:[#allocation25_spill] sm:$0xff] }
 0x301   :  { %v16813_v13 = vpop.f32.mrf.mxu0  ;;  %v2041_v56 = vadd.f32 %v16712_v12, %v22779_v3  ;;  %v10941_v12 = vld [vmem:[%s22631_s1 + $0x458] sm:$0xf]  ;;  %v13337_v3 = vld [vmem:[%s22631_s1 + $0x460] sm:$0xf0]  ;;  %v10953_v54 = vld [vmem:[%s22631_s1 + $0x470] sm:$0xf] }
 0x302   :  { %v2296_v16 = vpop.f32.mrf.mxu1  ;;  %10293 = vperm.xlu1 %13863, %v10279_v15   ;;  %v16829_v15 = vpop.permute.xlu2 %3455  ;;  %v2048_v58 = vadd.f32 %v16813_v13, %v22794_v8 }
 0x303   :  { %v2297_v51 = vadd.f32 %v2296_v16, %v2038_v49  ;;  %10288 = vperm.xlu0 %13862, %v10278_v29   ;;  %22777 = vst [vmem:[#allocation99_spill] sm:$0xff] %v16829_v15  ;;  %v13336_v49 = vld [vmem:[%s22631_s1 + $0x458] sm:$0xf0]  ;;  %v13329_v29 = vld [vmem:[%s22631_s1 + $0x424] sm:$0xf]  ;;  %v16842_v16 = vpop.permute.xlu0 %3375 }
 0x304   :  { %10188 = vperm.xlu2 %13864, %v10158_v18   ;;  %v16840_v18 = vpop.permute.xlu1 %3450  ;;  %v10934_v14 = vor.u32 %v13336_v49, %v10933_v57  ;;  %v10942_v49 = vor.u32 %v13337_v3, %v10941_v12  ;;  %v10945_v12 = vld [vmem:[%s22631_s1 + $0x468] sm:$0xf] }
 0x305   :  { %v2556_v11 = vadd.f32 %v16720_v24, %v2297_v51  ;;  %v16824_v22 = vpop.f32.mrf.mxu3  ;;  %v10911_v24 = vld [vmem:[%s22631_s1 + $0x42c] sm:$0xf0]  ;;  %22778 = vst [vmem:[#allocation100_spill] sm:$0xff] %v16840_v18  ;;  %v2698_v51 = vmax.f32 %v2554_v2, 0.0  ;;  %v13340_v18 = vld [vmem:[%s22631_s1 + $0x478] sm:$0xf0] }
 0x306   :  { %22776 = vst [vmem:[#allocation30_spill] sm:$0xff] %v16824_v22  ;;  %v10914_v32 = vor.u32 %v13329_v29, %v10911_v24  ;;  %v10282_v24 = vld [vmem:[%s22639_s13 + $0x20] sm:$0xff] }
 0x307   :  { %v2699_v19 = vmax.f32 %v2556_v11, 0.0 }
 0x308   :  { %v16865_v57 = vpop.f32.mrf.mxu2 }
 0x309   :  { %v16855_v53 = vpack.c.bf16 %v2699_v19, %v2698_v51  ;;  %v16857_v2 = vpop.f32.mrf.mxu0  ;;  %v13539_v51 = vld [vmem:[%s22633_s3 + $0x600] sm:$0xf0] }
 0x30a   :  { %v2299_v11 = vpop.f32.mrf.mxu1  ;;  %5817 = vmatmul.bf16.gmra.mxu3 %v11806_v28  ;;  %10193 = vperm.xlu1 %13863, %v10159_v42   ;;  %v16872_v29 = vpop.permute.xlu2 %3440 }
 0x30b   :  { %v2300_v10 = vadd.f32 %v2299_v11, %v2041_v56  ;;  %10298 = vperm.xlu0 %13862, %v10280_v39   ;;  %22781 = vst [vmem:[#allocation101_spill] sm:$0xff] %v16872_v29  ;;  %v16879_v39 = vpop.permute.xlu0 %3360 }
 0x30c   :  { %10303 = vperm.xlu2 %13864, %v10281_v45   ;;  %2089 = vmatmul.bf16.gmra.mxu0 %v10934_v14  ;;  %v16877_v56 = vpop.permute.xlu1 %3365  ;;  %v10160_v45 = vld [vmem:[%s22637_s12 + $0x38] sm:$0xff] }
 0x30d   :  { %v16868_v19 = vadd.f32 %v16750_v31, %v2300_v10  ;;  %2338 = vmatmul.bf16.gmra.mxu1 %v10914_v32  ;;  %v16870_v28 = vpop.f32.mrf.mxu3  ;;  %v10283_v32 = vld [vmem:[%s22639_s13 + $0x28] sm:$0xff]  ;;  %2607 = vmatmul.bf16.gmra.mxu2 %v10942_v49  ;;  %v13339_v49 = vld [vmem:[%s22631_s1 + $0x470] sm:$0xf0] }
 0x30e   :  { %22780 = vst [vmem:[#allocation25_spill] sm:$0xff] %v16870_v28  ;;  %v11833_v10 = vld [vmem:[%s22633_s3 + $0x5e8] sm:$0xf] }
 0x30f   :  { %v11834_v3 = vor.u32 %v13539_v51, %v11833_v10  ;;  %v10284_v10 = vld [vmem:[%s22639_s13 + $0x30] sm:$0xff]  ;;  %v10347_v51 = vld [vmem:[#allocation2] sm:$0x1] }
 0x310   :  { %v16897_v42 = vpop.f32.mrf.mxu2 }
 0x311   :  { %v16887_v14 = vpop.f32.mrf.mxu0 }
 0x312   :  { %v16889_v31 = vpop.f32.mrf.mxu1  ;;  %10308 = vperm.xlu1 %13863, %v10282_v24   ;;  %v13332_v24 = vld [vmem:[%s22631_s1 + $0x43c] sm:$0xf]  ;;  %v16927_v37 = vpop.permute.xlu2 %3595 }
 0x313   :  { %10198 = vperm.xlu0 %13862, %v10160_v45   ;;  %v10923_v45 = vld [vmem:[%s22631_s1 + $0x444] sm:$0xf0]  ;;  %22783 = vst [vmem:[#allocation103_spill] sm:$0xff] %v16927_v37  ;;  %v16931_v29 = vpop.permute.xlu0 %3445  ;;  %v11861_v37 = vld [vmem:[%s22633_s3 + $0x620] sm:$0xf] }
 0x314   :  { %10313 = vperm.xlu2 %13864, %v10283_v32   ;;  %v10285_v32 = vld [vmem:[%s22639_s13 + $0x38] sm:$0xff]  ;;  %v10926_v28 = vor.u32 %v13332_v24, %v10923_v45  ;;  %v16929_v21 = vpop.permute.xlu1 %3590  ;;  %22785 = vst [vmem:[#allocation105_spill] sm:$0xff] %v16931_v29 }
 0x315   :  { %v16899_v11 = vpop.f32.mrf.mxu3  ;;  %22784 = vst [vmem:[#allocation104_spill] sm:$0xff] %v16929_v21 }
 0x316   :  { %22782 = vst [vmem:[#allocation102_spill] sm:$0xff] %v16899_v11  ;;  %v10946_v11 = vor.u32 %v13339_v49, %v10945_v12  ;;  %v10954_v49 = vor.u32 %v13340_v18, %v10953_v54  ;;  %v10935_v54 = vld [vmem:[%s22631_s1 + $0x45c] sm:$0xf0]  ;;  %v13347_v18 = vld [vmem:[%s22633_s3 + $0x4] sm:$0xf] }
 0x318   :  { %v16933_v12 = vpop.f32.mrf.mxu2 }
 0x319   :  { %v2055_v22 = vpop.f32.mrf.mxu0 }
 0x31a   :  { %v16919_v15 = vpop.f32.mrf.mxu1  ;;  %5822 = vmatmul.bf16.gmra.mxu3 %v11834_v3  ;;  %10323 = vperm.xlu1 %13863, %v10285_v32   ;;  %v13546_v32 = vld [vmem:[%s22633_s3 + $0x638] sm:$0xf0]  ;;  %v2056_v17 = vadd.f32 %v2055_v22, %v22790_v5 }
 0x31b   :  { %10318 = vperm.xlu0 %13862, %v10284_v10  }
 0x31c   :  { %10350 = vperm.xlu2 %13864, %v10347_v51   ;;  %2094 = vmatmul.bf16.gmra.mxu0 %v10946_v11  ;;  %v11862_v11 = vor.u32 %v13546_v32, %v11861_v37  ;;  %v10965_v37 = vld [vmem:[%s22631_s1 + $0x488] sm:$0xf]  ;;  %v13343_v32 = vld [vmem:[%s22631_s1 + $0x490] sm:$0xf0] }
 0x31d   :  { %2343 = vmatmul.bf16.gmra.mxu1 %v10926_v28  ;;  %v16935_v3 = vpop.f32.mrf.mxu3  ;;  %2612 = vmatmul.bf16.gmra.mxu2 %v10954_v49  ;;  %v13335_v28 = vld [vmem:[%s22631_s1 + $0x454] sm:$0xf]  ;;  %v11079_v49 = vld [vmem:[%s22633_s3 + $0x1c] sm:$0xf0]  ;;  %v10966_v55 = vor.u32 %v13343_v32, %v10965_v37  ;;  %v13354_v37 = vld [vmem:[%s22633_s3 + $0x3c] sm:$0xf] }
 0x31e   :  { %22786 = vst [vmem:[#allocation106_spill] sm:$0xff] %v16935_v3  ;;  %v10938_v21 = vor.u32 %v13335_v28, %v10935_v54  ;;  %v11082_v3 = vor.u32 %v13347_v18, %v11079_v49  ;;  %v13553_v18 = vld [vmem:[%s22633_s3 + $0x670] sm:$0xf0]  ;;  %v11107_v32 = vld [vmem:[%s22633_s3 + $0x54] sm:$0xf0] }
 0x31f   :  { %v11110_v44 = vor.u32 %v13354_v37, %v11107_v32  ;;  %v22792_v32 = vld [vmem:[#allocation22_spill] sm:$0xff] }
 0x320   :  { %v2573_v10 = vpop.f32.mrf.mxu2  ;;  %v2051_v35 = vadd.f32 %v16857_v2, %v22792_v32 }
 0x321   :  { %v2057_v24 = vpop.f32.mrf.mxu0 }
 0x322   :  { %v2306_v45 = vpop.f32.mrf.mxu1  ;;  %v2058_v52 = vadd.f32 %v2057_v24, %v22793_v23 }
 0x323   :  { %v2307_v23 = vadd.f32 %v2306_v45, %v2048_v58  ;;  %v10959_v58 = vld [vmem:[%s22631_s1 + $0x48c] sm:$0xf0] }
 0x325   :  { %v16943_v51 = vpop.f32.mrf.mxu3 }
 0x326   :  { %22787 = vst [vmem:[#allocation107_spill] sm:$0xff] %v16943_v51 }
 0x328   :  { %v2575_v4 = vpop.f32.mrf.mxu2 }
 0x329   :  { %v16957_v51 = vpop.f32.mrf.mxu0 }
 0x32a   :  { %v2309_v29 = vpop.f32.mrf.mxu1  ;;  %5827 = vmatmul.bf16.gmra.mxu3 %v11862_v11  ;;  %v11889_v11 = vld [vmem:[%s22633_s3 + $0x658] sm:$0xf] }
 0x32b   :  { %v2310_v22 = vadd.f32 %v2309_v29, %v2051_v35  ;;  %v22796_v29 = vld [vmem:[#allocation24_spill] sm:$0xff] }
 0x32c   :  { %5946 = vmatmul.bf16.vlgmr.msrb.gmra.mxu0 %v11082_v3  ;;  %v10947_v3 = vld [vmem:[%s22631_s1 + $0x474] sm:$0xf0] }
 0x32d   :  { %2348 = vmatmul.bf16.gmra.mxu1 %v10938_v21  ;;  %v16965_v36 = vpop.f32.mrf.mxu3  ;;  %2617 = vmatmul.bf16.gmra.mxu2 %v10966_v55  ;;  %v13338_v21 = vld [vmem:[%s22631_s1 + $0x46c] sm:$0xf]  ;;  %v11890_v55 = vor.u32 %v13553_v18, %v11889_v11  ;;  %v10977_v11 = vld [vmem:[%s22631_s1 + $0x4a0] sm:$0xf] }
 0x32e   :  { %22788 = vst [vmem:[#allocation108_spill] sm:$0xff] %v16965_v36  ;;  %v10950_v36 = vor.u32 %v13338_v21, %v10947_v3  ;;  %v13346_v18 = vld [vmem:[%s22631_s1 + $0x4a8] sm:$0xf0]  ;;  %v22791_v3 = vld [vmem:[#allocation21_spill] sm:$0xff] }
 0x32f   :  { %v10978_v21 = vor.u32 %v13346_v18, %v10977_v11 }
 0x330   :  { %v16975_v49 = vpop.f32.mrf.mxu2 }
 0x331   :  { %v16967_v28 = vpop.f32.mrf.mxu0 }
 0x332   :  { %v2311_v54 = vpop.f32.mrf.mxu1 }
 0x335   :  { %v16977_v50 = vpop.f32.mrf.mxu3 }
 0x336   :  { %22789 = vst [vmem:[#allocation109_spill] sm:$0xff] %v16977_v50 }
 0x338   :  { %v16999_v9 = vpop.f32.mrf.mxu2 }
 0x339   :  { %v16991_v50 = vpop.f32.mrf.mxu0 }
 0x33a   :  { %v2314_v41 = vpop.f32.mrf.mxu1  ;;  %5832 = vmatmul.bf16.gmra.mxu3 %v11890_v55  ;;  %v2053_v55 = vadd.f32 %v16887_v14, %v22791_v3  ;;  %v22795_v14 = vld [vmem:[#allocation13_spill] sm:$0xff]  ;;  %v2061_v3 = vadd.f32 %v16957_v51, %v16147_v60 }
 0x33b   :  { %v2315_v37 = vadd.f32 %v2314_v41, %v2056_v17  ;;  %v11917_v17 = vld [vmem:[%s22633_s3 + $0x690] sm:$0xf]  ;;  %v13560_v41 = vld [vmem:[%s22633_s3 + $0x6a8] sm:$0xf0]  ;;  %v2046_v8 = vadd.f32 %v16783_v47, %v22795_v14  ;;  %v13361_v47 = vld [vmem:[%s22633_s3 + $0x74] sm:$0xf] }
 0x33c   :  { %5951 = vmatmul.bf16.gmra.mxu0 %v11110_v44  ;;  %v2312_v30 = vadd.f32 %v2311_v54, %v2053_v55  ;;  %v11918_v54 = vor.u32 %v13560_v41, %v11917_v17 }
 0x33d   :  { %2353 = vmatmul.bf16.gmra.mxu1 %v10950_v36  ;;  %v17002_v61 = vpop.f32.mrf.mxu3  ;;  %2622 = vmatmul.bf16.gmra.mxu2 %v10978_v21  ;;  %v2574_v44 = vadd.f32 %v2573_v10, %v2315_v37  ;;  %v2043_v10 = vadd.f32 %v16740_v59, %v22796_v29  ;;  %v2566_v21 = vadd.f32 %v16865_v57, %v2307_v23 }
 0x33e   :  { %v2571_v13 = vadd.f32 %v16933_v12, %v2312_v30  ;;  %v2305_v30 = vadd.f32 %v16919_v15, %v2046_v8  ;;  %v2569_v12 = vadd.f32 %v16897_v42, %v2310_v22  ;;  %v13348_v15 = vld [vmem:[%s22633_s3 + $0xc] sm:$0xf] }
 0x33f   :  { %v2706_v45 = vmax.f32 %v2574_v44, 0.0  ;;  %v2302_v59 = vadd.f32 %v16889_v31, %v2043_v10  ;;  %v11087_v31 = vld [vmem:[%s22633_s3 + $0x24] sm:$0xf0]  ;;  %v2703_v44 = vmax.f32 %v2566_v21, 0.0  ;;  %v2700_v10 = vmax.f32 %v16868_v19, 0.0 }
 0x340   :  { %v17019_v2 = vpop.f32.mrf.mxu2  ;;  %v2705_v55 = vmax.f32 %v2571_v13, 0.0  ;;  %v2564_v57 = vadd.f32 %v16821_v62, %v2305_v30  ;;  %v2704_v42 = vmax.f32 %v2569_v12, 0.0  ;;  %v11090_v8 = vor.u32 %v13348_v15, %v11087_v31  ;;  %v13344_v19 = vld [vmem:[%s22631_s1 + $0x49c] sm:$0xf]  ;;  %v10971_v12 = vld [vmem:[%s22631_s1 + $0x4a4] sm:$0xf0] }
 0x341   :  { %v17011_v5 = vpop.f32.mrf.mxu0  ;;  %v2561_v51 = vadd.f32 %v16795_v26, %v2302_v59  ;;  %v2063_v62 = vadd.f32 %v16967_v28, %v16142_v34  ;;  %v2066_v21 = vadd.f32 %v16991_v50, %v16039_v33  ;;  %v11115_v15 = vld [vmem:[%s22633_s3 + $0x5c] sm:$0xf0] }
 0x342   :  { %v2316_v36 = vpop.f32.mrf.mxu1  ;;  %v3166_v14 = vpack.c.bf16 %v2705_v55, %v2704_v42  ;;  %v2702_v13 = vmax.f32 %v2564_v57, 0.0 }
 0x343   :  { %v2317_v11 = vadd.f32 %v2316_v36, %v2058_v52  ;;  %v13341_v52 = vld [vmem:[%s22631_s1 + $0x484] sm:$0xf] }
 0x344   :  { %v10962_v32 = vor.u32 %v13341_v52, %v10959_v58  ;;  %v3165_v52 = vpack.c.bf16 %v2703_v44, %v2702_v13  ;;  %v13567_v58 = vld [vmem:[%s22633_s3 + $0x6e0] sm:$0xf0]  ;;  %v11085_v13 = vld [vmem:[%s22633_s3 + $0x8] sm:$0xf] }
 0x345   :  { %v2576_v24 = vadd.f32 %v2575_v4, %v2317_v11  ;;  %v17024_v35 = vpop.f32.mrf.mxu3  ;;  %v11135_v4 = vld [vmem:[%s22633_s3 + $0x8c] sm:$0xf0] }
 0x346   :  { %v11138_v36 = vor.u32 %v13361_v47, %v11135_v4 }
 0x347   :  { %v2707_v18 = vmax.f32 %v2576_v24, 0.0  ;;  %v2701_v24 = vmax.f32 %v2561_v51, 0.0 }
 0x348   :  { %v2585_v22 = vpop.f32.mrf.mxu2 }
 0x349   :  { %v3167_v37 = vpack.c.bf16 %v2707_v18, %v2706_v45  ;;  %v17046_v11 = vpop.f32.mrf.mxu0  ;;  %v3164_v4 = vpack.c.bf16 %v2701_v24, %v2700_v10  ;;  %v13368_v45 = vld [vmem:[%s22633_s3 + $0xac] sm:$0xf]  ;;  %v13351_v24 = vld [vmem:[%s22633_s3 + $0x20] sm:$0xf0] }
 0x34a   :  { %v2319_v17 = vpop.f32.mrf.mxu1  ;;  %5837 = vmatmul.bf16.gmra.mxu3 %v11918_v54  ;;  %v11945_v54 = vld [vmem:[%s22633_s3 + $0x6c8] sm:$0xf]  ;;  %v11086_v10 = vor.u32 %v13351_v24, %v11085_v13 }
 0x34b   :  { %v2320_v60 = vadd.f32 %v2319_v17, %v2061_v3  ;;  %6715 = vmatpush.bf16.msrb.mxu3 %v3167_v37  ;;  %v11946_v30 = vor.u32 %v13567_v58, %v11945_v54  ;;  %v10974_v3 = vor.u32 %v13344_v19, %v10971_v12  ;;  %v13355_v17 = vld [vmem:[%s22633_s3 + $0x44] sm:$0xf] }
 0x34c   :  { %5956 = vmatmul.bf16.gmra.mxu0 %v11138_v36  ;;  %v11118_v42 = vor.u32 %v13355_v17, %v11115_v15  ;;  %v11113_v17 = vld [vmem:[%s22633_s3 + $0x40] sm:$0xf]  ;;  %v13358_v15 = vld [vmem:[%s22633_s3 + $0x58] sm:$0xf0] }
 0x34d   :  { %v2579_v41 = vadd.f32 %v16975_v49, %v2320_v60  ;;  %2358 = vmatmul.bf16.gmra.mxu1 %v10962_v32  ;;  %v17057_v23 = vpop.f32.mrf.mxu3  ;;  %6464 = vmatmul.bf16.vlgmr.msrb.gmra.mxu2 %v11090_v8  ;;  %v2068_v60 = vadd.f32 %v17011_v5, %v16111_v63  ;;  %v13375_v63 = vld [vmem:[%s22633_s3 + $0xe4] sm:$0xf] }
 0x34f   :  { %6716 = vmatpush.bf16.msrb.mxu3 %v3166_v14  ;;  %v2708_v18 = vmax.f32 %v2579_v41, 0.0 }
 0x350   :  { %v2588_v47 = vpop.f32.mrf.mxu2 }
 0x351   :  { %v17061_v29 = vpop.f32.mrf.mxu0 }
 0x352   :  { %v2321_v26 = vpop.f32.mrf.mxu1 }
 0x353   :  { %v2322_v49 = vadd.f32 %v2321_v26, %v2063_v62  ;;  %6717 = vmatpush.bf16.msrb.mxu3 %v3165_v52  ;;  %v2071_v52 = vadd.f32 %v17046_v11, %v16064_v40  ;;  %v2073_v11 = vadd.f32 %v17061_v29, %v16059_v46  ;;  %v13382_v46 = vld [vmem:[%s22633_s3 + $0x11c] sm:$0xf] }
 0x355   :  { %v2581_v34 = vadd.f32 %v16999_v9, %v2322_v49  ;;  %v17071_v28 = vpop.f32.mrf.mxu3  ;;  %v11163_v9 = vld [vmem:[%s22633_s3 + $0xc4] sm:$0xf0] }
 0x356   :  { %v11166_v55 = vor.u32 %v13368_v45, %v11163_v9 }
 0x357   :  { %v2709_v59 = vmax.f32 %v2581_v34, 0.0  ;;  %6718 = vmatpush.bf16.msrb.mxu3 %v3164_v4  ;;  %v13362_v34 = vld [vmem:[%s22633_s3 + $0x7c] sm:$0xf]  ;;  %v11143_v4 = vld [vmem:[%s22633_s3 + $0x94] sm:$0xf0] }
 0x358   :  { %v2590_v33 = vpop.f32.mrf.mxu2  ;;  %v11146_v40 = vor.u32 %v13362_v34, %v11143_v4  ;;  %v11247_v34 = vld [vmem:[%s22633_s3 + $0x16c] sm:$0xf0]  ;;  %v11141_v4 = vld [vmem:[%s22633_s3 + $0x78] sm:$0xf] }
 0x359   :  { %v17087_v37 = vpack.c.bf16 %v2709_v59, %v2708_v18  ;;  %v17089_v32 = vpop.f32.mrf.mxu0  ;;  %v12001_v59 = vld [vmem:[%s22633_s3 + $0x738] sm:$0xf] }
 0x35a   :  { %v2324_v36 = vpop.f32.mrf.mxu1  ;;  %5842 = vmatmul.bf16.gmra.mxu3 %v11946_v30 }
 0x35b   :  { %v2325_v31 = vadd.f32 %v2324_v36, %v2066_v21  ;;  %6719 = vmatpush.bf16.msrb.mxu3 %v16855_v53  ;;  %v11973_v53 = vld [vmem:[%s22633_s3 + $0x700] sm:$0xf]  ;;  %v11219_v36 = vld [vmem:[%s22633_s3 + $0x134] sm:$0xf0] }
 0x35c   :  { %5961 = vmatmul.bf16.gmra.mxu0 %v11166_v55 }
 0x35d   :  { %v2584_v50 = vadd.f32 %v17019_v2, %v2325_v31  ;;  %2363 = vmatmul.bf16.gmra.mxu1 %v10974_v3  ;;  %v17099_v57 = vpop.f32.mrf.mxu3  ;;  %6469 = vmatmul.bf16.gmra.mxu2 %v11118_v42  ;;  %v13574_v2 = vld [vmem:[%s22633_s3 + $0x718] sm:$0xf0]  ;;  %v11222_v42 = vor.u32 %v13382_v46, %v11219_v36  ;;  %v11199_v46 = vld [vmem:[%s22633_s3 + $0x104] sm:$0xf0] }
 0x35e   :  { %v11974_v5 = vor.u32 %v13574_v2, %v11973_v53  ;;  %v13369_v2 = vld [vmem:[%s22633_s3 + $0xb4] sm:$0xf] }
 0x35f   :  { %6720 = vmatpush.bf16.msrb.mxu3 %v16781_v20 }
 0x360   :  { %v2593_v14 = vpop.f32.mrf.mxu2 }
 0x361   :  { %v17104_v51 = vpop.f32.mrf.mxu0 }
 0x362   :  { %v2326_v44 = vpop.f32.mrf.mxu1  ;;  %v2078_v13 = vadd.f32 %v17104_v51, %v15993_v25  ;;  %v13389_v25 = vld [vmem:[%s22633_s3 + $0x154] sm:$0xf] }
 0x363   :  { %v2327_v41 = vadd.f32 %v2326_v44, %v2068_v60  ;;  %6721 = vmatpush.bf16.msrb.mxu3 %v16710_v38  ;;  %v11191_v38 = vld [vmem:[%s22633_s3 + $0xfc] sm:$0xf0]  ;;  %v11114_v60 = vor.u32 %v13358_v15, %v11113_v17 }
 0x364   :  { %v11194_v26 = vor.u32 %v13375_v63, %v11191_v38 }
 0x365   :  { %v2586_v20 = vadd.f32 %v2585_v22, %v2327_v41  ;;  %v17113_v8 = vpop.f32.mrf.mxu3  ;;  %v2710_v22 = vmax.f32 %v2584_v50, 0.0  ;;  %v2076_v50 = vadd.f32 %v17089_v32, %v15998_v7 }
 0x367   :  { %v2711_v62 = vmax.f32 %v2586_v20, 0.0  ;;  %6722 = vmatpush.bf16.msrb.mxu3 %v16632_v0  ;;  %v11171_v20 = vld [vmem:[%s22633_s3 + $0xcc] sm:$0xf0] }
 0x368   :  { %v2595_v0 = vpop.f32.mrf.mxu2  ;;  %v11174_v38 = vor.u32 %v13369_v2, %v11171_v20  ;;  %v11275_v2 = vld [vmem:[%s22633_s3 + $0x1a4] sm:$0xf0]  ;;  %v11169_v20 = vld [vmem:[%s22633_s3 + $0xb0] sm:$0xf] }
 0x369   :  { %v17130_v49 = vpack.c.bf16 %v2711_v62, %v2710_v22  ;;  %v2080_v54 = vpop.f32.mrf.mxu0 }
 0x36a   :  { %v2329_v58 = vpop.f32.mrf.mxu1  ;;  %5847 = vmatmul.bf16.gmra.mxu3 %v11974_v5 }
 0x36b   :  { %v2330_v19 = vadd.f32 %v2329_v58, %v2071_v52  ;;  %v12029_v52 = vld [vmem:[%s22633_s3 + $0x770] sm:$0xf] }
 0x36c   :  { %5966 = vmatmul.bf16.gmra.mxu0 %v11194_v26 }
 0x36d   :  { %v2589_v30 = vadd.f32 %v2588_v47, %v2330_v19  ;;  %v17138_v12 = vpop.f32.mrf.mxu3  ;;  %6205 = vmatmul.bf16.vlgmr.msra.gmra.mxu1 %v11086_v10  ;;  %6474 = vmatmul.bf16.gmra.mxu2 %v11146_v40  ;;  %v13581_v47 = vld [vmem:[%s22633_s3 + $0x750] sm:$0xf0]  ;;  %v2081_v40 = vadd.f32 %v2080_v54, %v15941_v6 }
 0x36e   :  { %v12002_v29 = vor.u32 %v13581_v47, %v12001_v59  ;;  %v13365_v19 = vld [vmem:[%s22633_s3 + $0x90] sm:$0xf0] }
 0x36f   :  { %v2712_v31 = vmax.f32 %v2589_v30, 0.0 }
 0x370   :  { %v2598_v21 = vpop.f32.mrf.mxu2 }
 0x371   :  { %v17142_v45 = vpop.f32.mrf.mxu0 }
 0x372   :  { %v2331_v9 = vpop.f32.mrf.mxu1 }
 0x373   :  { %v2332_v18 = vadd.f32 %v2331_v9, %v2073_v11  ;;  %v11250_v11 = vor.u32 %v13389_v25, %v11247_v34  ;;  %v11142_v9 = vor.u32 %v13365_v19, %v11141_v4  ;;  %v12085_v4 = vld [vmem:[%s22633_s3 + $0x7e0] sm:$0xf]  ;;  %v13602_v19 = vld [vmem:[%s22633_s3 + $0x7f8] sm:$0xf0] }
 0x375   :  { %v2591_v3 = vadd.f32 %v2590_v33, %v2332_v18  ;;  %v17150_v55 = vpop.f32.mrf.mxu3 }
 0x377   :  { %v2713_v33 = vmax.f32 %v2591_v3, 0.0  ;;  %v13376_v3 = vld [vmem:[%s22633_s3 + $0xec] sm:$0xf] }
 0x378   :  { %v17176_v5 = vpop.f32.mrf.mxu2  ;;  %v11202_v17 = vor.u32 %v13376_v3, %v11199_v46  ;;  %v13379_v3 = vld [vmem:[%s22633_s3 + $0x100] sm:$0xf0] }
 0x379   :  { %v17166_v44 = vpack.c.bf16 %v2713_v33, %v2712_v31  ;;  %v17168_v41 = vpop.f32.mrf.mxu0  ;;  %v12057_v33 = vld [vmem:[%s22633_s3 + $0x7a8] sm:$0xf] }
 0x37a   :  { %v2334_v53 = vpop.f32.mrf.mxu1  ;;  %5852 = vmatmul.bf16.gmra.mxu3 %v12002_v29  ;;  %v22800_v46 = vld [vmem:[#allocation15_spill] sm:$0xff] }
 0x37b   :  { %v2335_v63 = vadd.f32 %v2334_v53, %v2076_v50  ;;  %v13595_v50 = vld [vmem:[%s22633_s3 + $0x7c0] sm:$0xf0] }
 0x37c   :  { %5971 = vmatmul.bf16.gmra.mxu0 %v11222_v42  ;;  %v12058_v53 = vor.u32 %v13595_v50, %v12057_v33 }
 0x37d   :  { %v2594_v7 = vadd.f32 %v2593_v14, %v2335_v63  ;;  %v17178_v32 = vpop.f32.mrf.mxu3  ;;  %6210 = vmatmul.bf16.gmra.mxu1 %v11114_v60  ;;  %6479 = vmatmul.bf16.gmra.mxu2 %v11174_v38  ;;  %v13588_v14 = vld [vmem:[%s22633_s3 + $0x788] sm:$0xf0] }
 0x37e   :  { %v12030_v51 = vor.u32 %v13588_v14, %v12029_v52  ;;  %v13396_v60 = vld [vmem:[%s22633_s3 + $0x18c] sm:$0xf]  ;;  %v11227_v52 = vld [vmem:[%s22633_s3 + $0x13c] sm:$0xf0] }
 0x37f   :  { %v13372_v63 = vld [vmem:[%s22633_s3 + $0xc8] sm:$0xf0] }
 0x380   :  { %v17190_v26 = vpop.f32.mrf.mxu2  ;;  %v11170_v38 = vor.u32 %v13372_v63, %v11169_v20 }
 0x381   :  { %v17182_v24 = vpop.f32.mrf.mxu0 }
 0x382   :  { %v2336_v22 = vpop.f32.mrf.mxu1 }
 0x383   :  { %v2337_v62 = vadd.f32 %v2336_v22, %v2078_v13 }
 0x385   :  { %v2596_v10 = vadd.f32 %v2595_v0, %v2337_v62  ;;  %v17192_v58 = vpop.f32.mrf.mxu3  ;;  %v2714_v0 = vmax.f32 %v2594_v7, 0.0  ;;  %v11278_v7 = vor.u32 %v13396_v60, %v11275_v2  ;;  %v13383_v62 = vld [vmem:[%s22633_s3 + $0x124] sm:$0xf]  ;;  %v11255_v2 = vld [vmem:[%s22633_s3 + $0x174] sm:$0xf0] }
 0x386   :  { %v11230_v25 = vor.u32 %v13383_v62, %v11227_v52 }
 0x387   :  { %v2715_v30 = vmax.f32 %v2596_v10, 0.0 }
 0x388   :  { %v17217_v36 = vpop.f32.mrf.mxu2 }
 0x389   :  { %v17207_v18 = vpack.c.bf16 %v2715_v30, %v2714_v0  ;;  %v17209_v59 = vpop.f32.mrf.mxu0 }
 0x38a   :  { %v2339_v47 = vpop.f32.mrf.mxu1  ;;  %5857 = vmatmul.bf16.gmra.mxu3 %v12030_v51 }
 0x38b   :  { %v2340_v29 = vadd.f32 %v2339_v47, %v2081_v40  ;;  %v13403_v40 = vld [vmem:[%s22633_s3 + $0x1c4] sm:$0xf]  ;;  %v11197_v47 = vld [vmem:[%s22633_s3 + $0xe8] sm:$0xf] }
 0x38c   :  { %5976 = vmatmul.bf16.gmra.mxu0 %v11250_v11  ;;  %v12086_v11 = vor.u32 %v13602_v19, %v12085_v4  ;;  %v11198_v33 = vor.u32 %v13379_v3, %v11197_v47  ;;  %v12113_v19 = vld [vmem:[%s22633_s3 + $0x818] sm:$0xf] }
 0x38d   :  { %v17219_v6 = vadd.f32 %v2598_v21, %v2340_v29  ;;  %v17221_v54 = vpop.f32.mrf.mxu3  ;;  %6215 = vmatmul.bf16.gmra.mxu1 %v11142_v9  ;;  %6484 = vmatmul.bf16.gmra.mxu2 %v11202_v17  ;;  %v11303_v9 = vld [vmem:[%s22633_s3 + $0x1dc] sm:$0xf0]  ;;  %v5689_v29 = vadd.f32 %v22800_v46, %v16420_v43  ;;  %v11331_v3 = vld [vmem:[%s22633_s3 + $0x214] sm:$0xf0] }
 0x38e   :  { %v11306_v17 = vor.u32 %v13403_v40, %v11303_v9  ;;  %v13609_v40 = vld [vmem:[%s22633_s3 + $0x830] sm:$0xf0]  ;;  %v11225_v46 = vld [vmem:[%s22633_s3 + $0x120] sm:$0xf] }
 0x38f   :  { %v12114_v47 = vor.u32 %v13609_v40, %v12113_v19  ;;  %v22805_v40 = vld [vmem:[#allocation37_spill] sm:$0xff] }
 0x390   :  { %v17233_v21 = vpop.f32.mrf.mxu2 }
 0x391   :  { %v17223_v15 = vpop.f32.mrf.mxu0 }
 0x392   :  { %v17225_v31 = vpop.f32.mrf.mxu1 }
 0x395   :  { %v17235_v42 = vpop.f32.mrf.mxu3 }
 0x396   :  { %22797 = vst [vmem:[#allocation19_spill] sm:$0xff] %v17235_v42 }
 0x398   :  { %v17257_v14 = vpop.f32.mrf.mxu2 }
 0x399   :  { %v2095_v13 = vpop.f32.mrf.mxu0 }
 0x39a   :  { %v17249_v22 = vpop.f32.mrf.mxu1  ;;  %5862 = vmatmul.bf16.gmra.mxu3 %v12058_v53  ;;  %v13390_v53 = vld [vmem:[%s22633_s3 + $0x15c] sm:$0xf] }
 0x39b   :  { %v11258_v43 = vor.u32 %v13390_v53, %v11255_v2 }
 0x39c   :  { %5981 = vmatmul.bf16.gmra.mxu0 %v11278_v7 }
 0x39d   :  { %v17259_v10 = vpop.f32.mrf.mxu3  ;;  %6220 = vmatmul.bf16.gmra.mxu1 %v11170_v38  ;;  %6489 = vmatmul.bf16.gmra.mxu2 %v11230_v25  ;;  %v22802_v38 = vld [vmem:[#allocation16_spill] sm:$0xff] }
 0x39e   :  { %22798 = vst [vmem:[#allocation21_spill] sm:$0xff] %v17259_v10  ;;  %v5691_v62 = vadd.f32 %v22802_v38, %v16416_v27  ;;  %v13410_v27 = vld [vmem:[%s22633_s3 + $0x1fc] sm:$0xf]  ;;  %v13397_v38 = vld [vmem:[%s22633_s3 + $0x194] sm:$0xf] }
 0x3a0   :  { %v2613_v0 = vpop.f32.mrf.mxu2 }
 0x3a1   :  { %v2097_v51 = vpop.f32.mrf.mxu0 }
 0x3a2   :  { %v17261_v34 = vpop.f32.mrf.mxu1 }
 0x3a5   :  { %v17269_v30 = vpop.f32.mrf.mxu3 }
 0x3a6   :  { %22799 = vst [vmem:[#allocation22_spill] sm:$0xff] %v17269_v30  ;;  %v22810_v30 = vld [vmem:[#allocation40_spill] sm:$0xff] }
 0x3a8   :  { %v2615_v63 = vpop.f32.mrf.mxu2 }
 0x3a9   :  { %v5947_v60 = vpop.f32.mrf.mxu0 }
 0x3aa   :  { %v2349_v50 = vpop.f32.mrf.mxu1  ;;  %5867 = vmatmul.bf16.gmra.mxu3 %v12086_v11  ;;  %v17291_v20 = vadd.f32 %v5947_v60, %v5689_v29  ;;  %v13386_v29 = vld [vmem:[%s22633_s3 + $0x138] sm:$0xf0]  ;;  %v11334_v60 = vor.u32 %v13410_v27, %v11331_v3 }
 0x3ab   :  { %v11226_v53 = vor.u32 %v13386_v29, %v11225_v46  ;;  %v22808_v29 = vld [vmem:[#allocation66_spill] sm:$0xff] }
 0x3ac   :  { %5986 = vmatmul.bf16.gmra.mxu0 %v11306_v17  ;;  %v22804_v17 = vld [vmem:[#allocation17_spill] sm:$0xff] }
 0x3ad   :  { %v17293_v7 = vpop.f32.mrf.mxu3  ;;  %6225 = vmatmul.bf16.gmra.mxu1 %v11198_v33  ;;  %6494 = vmatmul.bf16.gmra.mxu2 %v11258_v43  ;;  %v5694_v33 = vadd.f32 %v22804_v17, %v16359_v48  ;;  %v22809_v17 = vld [vmem:[#allocation20_spill] sm:$0xff] }
 0x3ae   :  { %22801 = vst [vmem:[#allocation18_spill] sm:$0xff] %v17293_v7  ;;  %v5696_v7 = vadd.f32 %v22809_v17, %v22808_v29 }
 0x3b0   :  { %v17305_v11 = vpop.f32.mrf.mxu2 }
 0x3b1   :  { %v5949_v25 = vpop.f32.mrf.mxu0 }
 0x3b2   :  { %v2351_v52 = vpop.f32.mrf.mxu1  ;;  %v17297_v4 = vadd.f32 %v5949_v25, %v5691_v62  ;;  %v11283_v62 = vld [vmem:[%s22633_s3 + $0x1ac] sm:$0xf0] }
 0x3b3   :  { %v11286_v27 = vor.u32 %v13397_v38, %v11283_v62 }
 0x3b5   :  { %v17307_v9 = vpop.f32.mrf.mxu3 }
 0x3b6   :  { %22803 = vst [vmem:[#allocation27_spill] sm:$0xff] %v17307_v9  ;;  %v2096_v9 = vadd.f32 %v2095_v13, %v22805_v40  ;;  %v22812_v13 = vld [vmem:[#allocation11_spill] sm:$0xff] }
 0x3b7   :  { %v2088_v40 = vadd.f32 %v17182_v24, %v22812_v13  ;;  %v22813_v24 = vld [vmem:[#allocation10_spill] sm:$0xff] }
 0x3b8   :  { %v17331_v19 = vpop.f32.mrf.mxu2 }
 0x3b9   :  { %v5952_v43 = vpop.f32.mrf.mxu0 }
 0x3ba   :  { %v2354_v2 = vpop.f32.mrf.mxu1  ;;  %5872 = vmatmul.bf16.gmra.mxu3 %v12114_v47  ;;  %v17329_v25 = vadd.f32 %v5952_v43, %v5694_v33  ;;  %v22807_v47 = vld [vmem:[#allocation39_spill] sm:$0xff]  ;;  %v2091_v33 = vadd.f32 %v17209_v59, %v22810_v30  ;;  %v13616_v59 = vld [vmem:[%s22633_s3 + $0x868] sm:$0xf0] }
 0x3bb   :  { %v2093_v3 = vadd.f32 %v17223_v15, %v22807_v47  ;;  %v2355_v46 = vadd.f32 %v2354_v2, %v2096_v9  ;;  %v22811_v43 = vld [vmem:[#allocation7_spill] sm:$0xff]  ;;  %v12141_v9 = vld [vmem:[%s22633_s3 + $0x850] sm:$0xf]  ;;  %v22814_v2 = vld [vmem:[#allocation14_spill] sm:$0xff] }
 0x3bc   :  { %5991 = vmatmul.bf16.gmra.mxu0 %v11334_v60  ;;  %v2098_v10 = vadd.f32 %v2097_v51, %v22811_v43  ;;  %v2350_v38 = vadd.f32 %v2349_v50, %v2091_v33  ;;  %v2347_v51 = vadd.f32 %v17261_v34, %v2088_v40  ;;  %v12142_v47 = vor.u32 %v13616_v59, %v12141_v9  ;;  %v11359_v34 = vld [vmem:[%s22633_s3 + $0x24c] sm:$0xf0] }
 0x3bd   :  { %v17334_v48 = vpop.f32.mrf.mxu3  ;;  %6230 = vmatmul.bf16.gmra.mxu1 %v11226_v53  ;;  %v2352_v42 = vadd.f32 %v2351_v52, %v2093_v3  ;;  %6499 = vmatmul.bf16.gmra.mxu2 %v11286_v27  ;;  %v2614_v62 = vadd.f32 %v2613_v0, %v2355_v46  ;;  %v2086_v52 = vadd.f32 %v17168_v41, %v22813_v24  ;;  %v11253_v41 = vld [vmem:[%s22633_s3 + $0x158] sm:$0xf]  ;;  %v22816_v46 = vld [vmem:[#allocation23_spill] sm:$0xff] }
 0x3be   :  { %22806 = vst [vmem:[#allocation13_spill] sm:$0xff] %v17334_v48  ;;  %v2083_v27 = vadd.f32 %v17142_v45, %v22814_v2  ;;  %v22815_v45 = vld [vmem:[#allocation61_spill] sm:$0xff]  ;;  %v2606_v33 = vadd.f32 %v17217_v36, %v2347_v51  ;;  %v22818_v2 = vld [vmem:[#allocation26_spill] sm:$0xff] }
 0x3bf   :  { %v2611_v0 = vadd.f32 %v17257_v14, %v2352_v42  ;;  %v13393_v42 = vld [vmem:[%s22633_s3 + $0x170] sm:$0xf0]  ;;  %v2345_v14 = vadd.f32 %v17249_v22, %v2086_v52  ;;  %v5699_v29 = vadd.f32 %v22816_v46, %v22815_v45  ;;  %v11311_v22 = vld [vmem:[%s22633_s3 + $0x1e4] sm:$0xf0] }
 0x3c0   :  { %v17354_v30 = vpop.f32.mrf.mxu2  ;;  %v2342_v17 = vadd.f32 %v17225_v31, %v2083_v27  ;;  %v2719_v51 = vmax.f32 %v2606_v33, 0.0  ;;  %v13400_v33 = vld [vmem:[%s22633_s3 + $0x1a8] sm:$0xf0] }
 0x3c1   :  { %v5954_v53 = vpop.f32.mrf.mxu0  ;;  %v2721_v43 = vmax.f32 %v2611_v0, 0.0  ;;  %v2604_v31 = vadd.f32 %v17190_v26, %v2345_v14  ;;  %v12169_v14 = vld [vmem:[%s22633_s3 + $0x888] sm:$0xf] }
 0x3c2   :  { %v2356_v60 = vpop.f32.mrf.mxu1  ;;  %v17345_v15 = vadd.f32 %v5954_v53, %v5696_v7  ;;  %v13417_v7 = vld [vmem:[%s22633_s3 + $0x234] sm:$0xf]  ;;  %v2601_v59 = vadd.f32 %v17176_v5, %v2342_v17  ;;  %v11281_v17 = vld [vmem:[%s22633_s3 + $0x190] sm:$0xf] }
 0x3c3   :  { %v2357_v48 = vadd.f32 %v2356_v60, %v2098_v10  ;;  %v11362_v40 = vor.u32 %v13417_v7, %v11359_v34  ;;  %v11254_v60 = vor.u32 %v13393_v42, %v11253_v41  ;;  %v22817_v7 = vld [vmem:[#allocation67_spill] sm:$0xff]  ;;  %v2716_v42 = vmax.f32 %v17219_v6, 0.0  ;;  %v13424_v6 = vld [vmem:[%s22633_s3 + $0x26c] sm:$0xf] }
 0x3c4   :  { %v5701_v26 = vadd.f32 %v22818_v2, %v22817_v7  ;;  %v2717_v27 = vmax.f32 %v2601_v59, 0.0 }
 0x3c5   :  { %v2616_v10 = vadd.f32 %v2615_v63, %v2357_v48  ;;  %v17359_v50 = vpop.f32.mrf.mxu3  ;;  %v2609_v63 = vadd.f32 %v17233_v21, %v2350_v38  ;;  %v2722_v48 = vmax.f32 %v2614_v62, 0.0  ;;  %v13404_v21 = vld [vmem:[%s22633_s3 + $0x1cc] sm:$0xf] }
 0x3c6   :  { %v11314_v0 = vor.u32 %v13404_v21, %v11311_v22  ;;  %v3172_v45 = vpack.c.bf16 %v2717_v27, %v2716_v42  ;;  %v22825_v27 = vld [vmem:[#allocation4_spill] sm:$0xff]  ;;  %v22826_v42 = vld [vmem:[#allocation43_spill] sm:$0xff] }
 0x3c7   :  { %v2723_v3 = vmax.f32 %v2616_v10, 0.0  ;;  %v2720_v38 = vmax.f32 %v2609_v63, 0.0  ;;  %v2718_v10 = vmax.f32 %v2604_v31, 0.0  ;;  %v13623_v63 = vld [vmem:[%s22633_s3 + $0x8a0] sm:$0xf0] }
 0x3c8   :  { %v17392_v62 = vpop.f32.mrf.mxu2  ;;  %v12170_v46 = vor.u32 %v13623_v63, %v12169_v14  ;;  %v13411_v31 = vld [vmem:[%s22633_s3 + $0x204] sm:$0xf]  ;;  %v22827_v14 = vld [vmem:[#allocation6_spill] sm:$0xff] }
 0x3c9   :  { %v3175_v13 = vpack.c.bf16 %v2723_v3, %v2722_v48  ;;  %v5957_v9 = vpop.f32.mrf.mxu0  ;;  %v3174_v52 = vpack.c.bf16 %v2721_v43, %v2720_v38  ;;  %v22819_v43 = vld [vmem:[#allocation64_spill] sm:$0xff]  ;;  %v11339_v38 = vld [vmem:[%s22633_s3 + $0x21c] sm:$0xf0]  ;;  %v2108_v63 = vadd.f32 %v22827_v14, %v22826_v42 }
 0x3ca   :  { %v17381_v53 = vpop.f32.mrf.mxu1  ;;  %5877 = vmatmul.bf16.gmra.mxu3 %v12142_v47  ;;  %v17390_v36 = vadd.f32 %v5957_v9, %v5699_v29  ;;  %v3173_v47 = vpack.c.bf16 %v2719_v51, %v2718_v10  ;;  %v11387_v29 = vld [vmem:[%s22633_s3 + $0x284] sm:$0xf0]  ;;  %v11282_v9 = vor.u32 %v13400_v33, %v11281_v17  ;;  %v11342_v2 = vor.u32 %v13411_v31, %v11339_v38 }
 0x3cb   :  { %6974 = vmatpush.bf16.msra.mxu0 %v3175_v13  ;;  %v22820_v13 = vld [vmem:[#allocation29_spill] sm:$0xff] }
 0x3cc   :  { %5996 = vmatmul.bf16.gmra.mxu0 %v11362_v40  ;;  %v5704_v40 = vadd.f32 %v22820_v13, %v22819_v43 }
 0x3cd   :  { %v17395_v24 = vpop.f32.mrf.mxu3  ;;  %6235 = vmatmul.bf16.gmra.mxu1 %v11254_v60  ;;  %6504 = vmatmul.bf16.gmra.mxu2 %v11314_v0  ;;  %v11390_v60 = vor.u32 %v13424_v6, %v11387_v29  ;;  %v22822_v0 = vld [vmem:[#allocation5_spill] sm:$0xff]  ;;  %v22831_v29 = vld [vmem:[#allocation32_spill] sm:$0xff] }
 0x3cf   :  { %6975 = vmatpush.bf16.msra.mxu0 %v3174_v52  ;;  %v22821_v52 = vld [vmem:[#allocation44_spill] sm:$0xff] }
 0x3d0   :  { %v17408_v48 = vpop.f32.mrf.mxu2  ;;  %v2106_v10 = vadd.f32 %v22822_v0, %v22821_v52  ;;  %v11415_v52 = vld [vmem:[%s22633_s3 + $0x2bc] sm:$0xf0]  ;;  %v11309_v0 = vld [vmem:[%s22633_s3 + $0x1c8] sm:$0xf] }
 0x3d1   :  { %v5959_v41 = vpop.f32.mrf.mxu0 }
 0x3d2   :  { %v2361_v34 = vpop.f32.mrf.mxu1  ;;  %v17400_v5 = vadd.f32 %v5959_v41, %v5701_v26  ;;  %v22824_v26 = vld [vmem:[#allocation51_spill] sm:$0xff] }
 0x3d3   :  { %6976 = vmatpush.bf16.msra.mxu0 %v3173_v47  ;;  %v2103_v47 = vadd.f32 %v22825_v27, %v22824_v26  ;;  %v22833_v26 = vld [vmem:[#allocation58_spill] sm:$0xff]  ;;  %v22834_v27 = vld [vmem:[#allocation36_spill] sm:$0xff] }
 0x3d5   :  { %v17410_v3 = vpop.f32.mrf.mxu3  ;;  %v2362_v33 = vadd.f32 %v2361_v34, %v2103_v47  ;;  %v13630_v34 = vld [vmem:[%s22633_s3 + $0x8d8] sm:$0xf0]  ;;  %v5709_v47 = vadd.f32 %v22834_v27, %v22833_v26  ;;  %v22840_v26 = vld [vmem:[#allocation8_spill] sm:$0xff] }
 0x3d7   :  { %6977 = vmatpush.bf16.msra.mxu0 %v3172_v45  ;;  %v22829_v45 = vld [vmem:[#allocation3_spill] sm:$0xff]  ;;  %v2621_v31 = vadd.f32 %v17331_v19, %v2362_v33 }
 0x3d8   :  { %v17435_v51 = vpop.f32.mrf.mxu2  ;;  %v13407_v19 = vld [vmem:[%s22633_s3 + $0x1e0] sm:$0xf0] }
 0x3d9   :  { %v5962_v22 = vpop.f32.mrf.mxu0 }
 0x3da   :  { %v2364_v21 = vpop.f32.mrf.mxu1  ;;  %5882 = vmatmul.bf16.gmra.mxu3 %v12170_v46  ;;  %v17432_v59 = vadd.f32 %v5962_v22, %v5704_v40  ;;  %v22830_v46 = vld [vmem:[#allocation63_spill] sm:$0xff] }
 0x3db   :  { %6978 = vmatpush.bf16.msra.mxu0 %v17207_v18  ;;  %v2365_v41 = vadd.f32 %v2364_v21, %v2106_v10  ;;  %v22828_v18 = vld [vmem:[#allocation46_spill] sm:$0xff]  ;;  %v5706_v17 = vadd.f32 %v22831_v29, %v22830_v46 }
 0x3dc   :  { %6001 = vmatmul.bf16.gmra.mxu0 %v11390_v60  ;;  %v2101_v6 = vadd.f32 %v22829_v45, %v22828_v18 }
 0x3dd   :  { %v17439_v7 = vpop.f32.mrf.mxu3  ;;  %6240 = vmatmul.bf16.gmra.mxu1 %v11282_v9  ;;  %6509 = vmatmul.bf16.gmra.mxu2 %v11342_v2  ;;  %v2624_v60 = vadd.f32 %v17354_v30, %v2365_v41  ;;  %v13431_v30 = vld [vmem:[%s22633_s3 + $0x2a4] sm:$0xf]  ;;  %v2725_v41 = vmax.f32 %v2621_v31, 0.0 }
 0x3de   :  { %22823 = vst [vmem:[#allocation24_spill] sm:$0xff] %v17439_v7  ;;  %v2360_v40 = vadd.f32 %v17381_v53, %v2101_v6  ;;  %v11418_v14 = vor.u32 %v13431_v30, %v11415_v52  ;;  %v13418_v6 = vld [vmem:[%s22633_s3 + $0x23c] sm:$0xf]  ;;  %v13637_v30 = vld [vmem:[%s22633_s3 + $0x910] sm:$0xf0] }
 0x3df   :  { %6979 = vmatpush.bf16.msra.mxu0 %v17166_v44  ;;  %v12197_v44 = vld [vmem:[%s22633_s3 + $0x8c0] sm:$0xf]  ;;  %v2726_v10 = vmax.f32 %v2624_v60, 0.0  ;;  %v22836_v60 = vld [vmem:[#allocation57_spill] sm:$0xff] }
 0x3e0   :  { %v6470_v22 = vpop.f32.mrf.mxu2 }
 0x3e1   :  { %v5964_v13 = vpop.f32.mrf.mxu0 }
 0x3e2   :  { %v2366_v43 = vpop.f32.mrf.mxu1  ;;  %v17452_v21 = vadd.f32 %v5964_v13, %v5706_v17 }
 0x3e3   :  { %v2367_v9 = vadd.f32 %v2366_v43, %v2108_v63  ;;  %6980 = vmatpush.bf16.msra.mxu0 %v17130_v49  ;;  %v12198_v49 = vor.u32 %v13630_v34, %v12197_v44  ;;  %v11310_v63 = vor.u32 %v13407_v19, %v11309_v0  ;;  %v13438_v19 = vld [vmem:[%s22633_s3 + $0x2dc] sm:$0xf] }
 0x3e5   :  { %v2626_v53 = vadd.f32 %v17392_v62, %v2367_v9  ;;  %v17463_v38 = vpop.f32.mrf.mxu3  ;;  %v2619_v62 = vadd.f32 %v17305_v11, %v2360_v40  ;;  %v11367_v11 = vld [vmem:[%s22633_s3 + $0x254] sm:$0xf0] }
 0x3e6   :  { %22832 = vst [vmem:[#allocation15_spill] sm:$0xff] %v17463_v38  ;;  %v11370_v40 = vor.u32 %v13418_v6, %v11367_v11  ;;  %v22837_v9 = vld [vmem:[#allocation38_spill] sm:$0xff] }
 0x3e7   :  { %v2727_v2 = vmax.f32 %v2626_v53, 0.0  ;;  %6981 = vmatpush.bf16.msra.mxu0 %v17087_v37  ;;  %v2724_v46 = vmax.f32 %v2619_v62, 0.0  ;;  %v5711_v44 = vadd.f32 %v22837_v9, %v22836_v60  ;;  %v22843_v60 = vld [vmem:[#allocation12_spill] sm:$0xff] }
 0x3e8   :  { %v6472_v17 = vpop.f32.mrf.mxu2 }
 0x3e9   :  { %v3177_v42 = vpack.c.bf16 %v2727_v2, %v2726_v10  ;;  %v5967_v18 = vpop.f32.mrf.mxu0  ;;  %v3176_v13 = vpack.c.bf16 %v2725_v41, %v2724_v46  ;;  %v11337_v10 = vld [vmem:[%s22633_s3 + $0x200] sm:$0xf]  ;;  %v22839_v2 = vld [vmem:[#allocation53_spill] sm:$0xff] }
 0x3ea   :  { %5887 = vmatmul.bf16.gmra.mxu3 %v12198_v49  ;;  %v6206_v45 = vpop.f32.mrf.mxu1  ;;  %v17487_v37 = vadd.f32 %v5967_v18, %v5709_v47  ;;  %v5714_v27 = vadd.f32 %v22840_v26, %v22839_v2  ;;  %v11395_v18 = vld [vmem:[%s22633_s3 + $0x28c] sm:$0xf0] }
 0x3eb   :  { %v6207_v29 = vadd.f32 %v6206_v45, %v17291_v20  ;;  %7239 = vmatpush.bf16.msrb.mxu1 %v3177_v42  ;;  %v22846_v2 = vld [vmem:[#allocation9_spill] sm:$0xff] }
 0x3ec   :  { %6006 = vmatmul.bf16.gmra.mxu0 %v11418_v14 }
 0x3ed   :  { %v17491_v33 = vadd.f32 %v17408_v48, %v6207_v29  ;;  %v17493_v43 = vpop.f32.mrf.mxu3  ;;  %6245 = vmatmul.bf16.gmra.mxu1 %v11310_v63  ;;  %6514 = vmatmul.bf16.gmra.mxu2 %v11370_v40  ;;  %v12225_v48 = vld [vmem:[%s22633_s3 + $0x8f8] sm:$0xf]  ;;  %v13425_v63 = vld [vmem:[%s22633_s3 + $0x274] sm:$0xf]  ;;  %v22842_v40 = vld [vmem:[#allocation60_spill] sm:$0xff] }
 0x3ee   :  { %22835 = vst [vmem:[#allocation16_spill] sm:$0xff] %v17493_v43  ;;  %v12226_v62 = vor.u32 %v13637_v30, %v12225_v48  ;;  %v5716_v9 = vadd.f32 %v22843_v60, %v22842_v40 }
 0x3ef   :  { %7240 = vmatpush.bf16.msrb.mxu1 %v3176_v13  ;;  %v11398_v13 = vor.u32 %v13425_v63, %v11395_v18  ;;  %v11423_v63 = vld [vmem:[%s22633_s3 + $0x2c4] sm:$0xf0] }
 0x3f0   :  { %v6475_v49 = vpop.f32.mrf.mxu2 }
 0x3f1   :  { %v5969_v34 = vpop.f32.mrf.mxu0 }
 0x3f2   :  { %v6208_v31 = vpop.f32.mrf.mxu1  ;;  %v17497_v53 = vadd.f32 %v5969_v34, %v5711_v44 }
 0x3f3   :  { %v6209_v20 = vadd.f32 %v6208_v31, %v17297_v4  ;;  %v11443_v4 = vld [vmem:[%s22633_s3 + $0x2f4] sm:$0xf0] }
 0x3f4   :  { %v11446_v47 = vor.u32 %v13438_v19, %v11443_v4 }
 0x3f5   :  { %v17507_v52 = vadd.f32 %v17435_v51, %v6209_v20  ;;  %v17509_v0 = vpop.f32.mrf.mxu3  ;;  %v13414_v51 = vld [vmem:[%s22633_s3 + $0x218] sm:$0xf0] }
 0x3f6   :  { %22838 = vst [vmem:[#allocation17_spill] sm:$0xff] %v17509_v0  ;;  %v11338_v41 = vor.u32 %v13414_v51, %v11337_v10  ;;  %v11365_v10 = vld [vmem:[%s22633_s3 + $0x238] sm:$0xf]  ;;  %v22845_v51 = vld [vmem:[#allocation55_spill] sm:$0xff] }
 0x3f7   :  { %v5719_v26 = vadd.f32 %v22846_v2, %v22845_v51  ;;  %v13452_v51 = vld [vmem:[%s22633_s3 + $0x34c] sm:$0xf] }
 0x3f8   :  { %v6477_v11 = vpop.f32.mrf.mxu2 }
 0x3f9   :  { %v5972_v42 = vpop.f32.mrf.mxu0 }
 0x3fa   :  { %5892 = vmatmul.bf16.gmra.mxu3 %v12226_v62  ;;  %v6211_v14 = vpop.f32.mrf.mxu1  ;;  %v17531_v45 = vadd.f32 %v5972_v42, %v5714_v27  ;;  %v13445_v62 = vld [vmem:[%s22633_s3 + $0x314] sm:$0xf] }
 0x3fb   :  { %v6212_v6 = vadd.f32 %v6211_v14, %v17329_v25  ;;  %v12253_v25 = vld [vmem:[%s22633_s3 + $0x930] sm:$0xf]  ;;  %v13432_v14 = vld [vmem:[%s22633_s3 + $0x2ac] sm:$0xf] }
 0x3fc   :  { %6011 = vmatmul.bf16.gmra.mxu0 %v11446_v47 }
 0x3fd   :  { %v17534_v46 = vadd.f32 %v6470_v22, %v6212_v6  ;;  %v17536_v29 = vpop.f32.mrf.mxu3  ;;  %6250 = vmatmul.bf16.gmra.mxu1 %v11338_v41  ;;  %6519 = vmatmul.bf16.gmra.mxu2 %v11398_v13  ;;  %v13644_v22 = vld [vmem:[%s22633_s3 + $0x948] sm:$0xf0] }
 0x3fe   :  { %22841 = vst [vmem:[#allocation37_spill] sm:$0xff] %v17536_v29  ;;  %v12254_v4 = vor.u32 %v13644_v22, %v12253_v25 }
 0x400   :  { %v6480_v48 = vpop.f32.mrf.mxu2 }
 0x401   :  { %v5974_v44 = vpop.f32.mrf.mxu0 }
 0x402   :  { %v6213_v34 = vpop.f32.mrf.mxu1  ;;  %v17540_v31 = vadd.f32 %v5974_v44, %v5716_v9  ;;  %v11426_v9 = vor.u32 %v13432_v14, %v11423_v63  ;;  %v22848_v44 = vld [vmem:[#allocation54_spill] sm:$0xff] }
 0x403   :  { %v6214_v20 = vadd.f32 %v6213_v34, %v17345_v15  ;;  %v11471_v15 = vld [vmem:[%s22633_s3 + $0x32c] sm:$0xf0] }
 0x404   :  { %v11474_v27 = vor.u32 %v13445_v62, %v11471_v15  ;;  %v22849_v34 = vld [vmem:[#allocation41_spill] sm:$0xff] }
 0x405   :  { %v17549_v30 = vadd.f32 %v6472_v17, %v6214_v20  ;;  %v17551_v19 = vpop.f32.mrf.mxu3  ;;  %v13421_v17 = vld [vmem:[%s22633_s3 + $0x250] sm:$0xf0]  ;;  %v5721_v20 = vadd.f32 %v22849_v34, %v22848_v44  ;;  %v11451_v44 = vld [vmem:[%s22633_s3 + $0x2fc] sm:$0xf0] }
 0x406   :  { %22844 = vst [vmem:[#allocation39_spill] sm:$0xff] %v17551_v19  ;;  %v11366_v47 = vor.u32 %v13421_v17, %v11365_v10 }
 0x408   :  { %v6482_v13 = vpop.f32.mrf.mxu2 }
 0x409   :  { %v5977_v41 = vpop.f32.mrf.mxu0 }
 0x40a   :  { %5897 = vmatmul.bf16.gmra.mxu3 %v12254_v4  ;;  %v6216_v42 = vpop.f32.mrf.mxu1  ;;  %v17573_v18 = vadd.f32 %v5977_v41, %v5719_v26  ;;  %v11393_v26 = vld [vmem:[%s22633_s3 + $0x270] sm:$0xf] }
 0x40b   :  { %v6217_v6 = vadd.f32 %v6216_v42, %v17390_v36  ;;  %v12281_v36 = vld [vmem:[%s22633_s3 + $0x968] sm:$0xf] }
 0x40c   :  { %6016 = vmatmul.bf16.gmra.mxu0 %v11474_v27  ;;  %v22851_v27 = vld [vmem:[#allocation50_spill] sm:$0xff] }
 0x40d   :  { %v17576_v40 = vadd.f32 %v6475_v49, %v6217_v6  ;;  %v17578_v60 = vpop.f32.mrf.mxu3  ;;  %6255 = vmatmul.bf16.gmra.mxu1 %v11366_v47  ;;  %6524 = vmatmul.bf16.gmra.mxu2 %v11426_v9  ;;  %v13651_v49 = vld [vmem:[%s22633_s3 + $0x980] sm:$0xf0]  ;;  %v22852_v47 = vld [vmem:[#allocation42_spill] sm:$0xff] }
 0x40e   :  { %22847 = vst [vmem:[#allocation66_spill] sm:$0xff] %v17578_v60  ;;  %v12282_v2 = vor.u32 %v13651_v49, %v12281_v36  ;;  %v5724_v41 = vadd.f32 %v22852_v47, %v22851_v27  ;;  %v13439_v9 = vld [vmem:[%s22633_s3 + $0x2e4] sm:$0xf]  ;;  %v22854_v49 = vld [vmem:[#allocation49_spill] sm:$0xff] }
 0x40f   :  { %v11454_v36 = vor.u32 %v13439_v9, %v11451_v44  ;;  %v22857_v9 = vld [vmem:[#allocation47_spill] sm:$0xff] }
 0x410   :  { %v6485_v15 = vpop.f32.mrf.mxu2  ;;  %v5729_v44 = vadd.f32 %v22857_v9, %v16879_v39 }
 0x411   :  { %v5979_v25 = vpop.f32.mrf.mxu0 }
 0x412   :  { %v6218_v22 = vpop.f32.mrf.mxu1  ;;  %v17582_v62 = vadd.f32 %v5979_v25, %v5721_v20 }
 0x413   :  { %v6219_v4 = vadd.f32 %v6218_v22, %v17400_v5  ;;  %v11499_v5 = vld [vmem:[%s22633_s3 + $0x364] sm:$0xf0] }
 0x414   :  { %v11502_v42 = vor.u32 %v13452_v51, %v11499_v5  ;;  %v22855_v51 = vld [vmem:[#allocation45_spill] sm:$0xff] }
 0x415   :  { %v17591_v10 = vadd.f32 %v6477_v11, %v6219_v4  ;;  %v17593_v17 = vpop.f32.mrf.mxu3  ;;  %v13428_v11 = vld [vmem:[%s22633_s3 + $0x288] sm:$0xf0] }
 0x416   :  { %22850 = vst [vmem:[#allocation20_spill] sm:$0xff] %v17593_v17  ;;  %v11394_v14 = vor.u32 %v13428_v11, %v11393_v26 }
 0x418   :  { %v6487_v25 = vpop.f32.mrf.mxu2 }
 0x419   :  { %v5982_v63 = vpop.f32.mrf.mxu0 }
 0x41a   :  { %5902 = vmatmul.bf16.gmra.mxu3 %v12282_v2  ;;  %v6221_v6 = vpop.f32.mrf.mxu1  ;;  %v17615_v34 = vadd.f32 %v5982_v63, %v5724_v41  ;;  %v5726_v2 = vadd.f32 %v22855_v51, %v22854_v49 }
 0x41b   :  { %v6222_v20 = vadd.f32 %v6221_v6, %v17432_v59  ;;  %v12309_v59 = vld [vmem:[%s22633_s3 + $0x9a0] sm:$0xf]  ;;  %v11421_v6 = vld [vmem:[%s22633_s3 + $0x2a8] sm:$0xf] }
 0x41c   :  { %6021 = vmatmul.bf16.gmra.mxu0 %v11502_v42 }
 0x41d   :  { %v17618_v22 = vadd.f32 %v6480_v48, %v6222_v20  ;;  %v17620_v4 = vpop.f32.mrf.mxu3  ;;  %6260 = vmatmul.bf16.gmra.mxu1 %v11394_v14  ;;  %6529 = vmatmul.bf16.gmra.mxu2 %v11454_v36  ;;  %v13658_v48 = vld [vmem:[%s22633_s3 + $0x9b8] sm:$0xf0]  ;;  %v13459_v14 = vld [vmem:[%s22633_s3 + $0x384] sm:$0xf] }
 0x41e   :  { %22853 = vst [vmem:[#allocation40_spill] sm:$0xff] %v17620_v4  ;;  %v12310_v63 = vor.u32 %v13658_v48, %v12309_v59 }
 0x420   :  { %v6490_v47 = vpop.f32.mrf.mxu2 }
 0x421   :  { %v5984_v5 = vpop.f32.mrf.mxu0 }
 0x422   :  { %v6223_v26 = vpop.f32.mrf.mxu1  ;;  %v17624_v11 = vadd.f32 %v5984_v5, %v5726_v2  ;;  %v13446_v2 = vld [vmem:[%s22633_s3 + $0x31c] sm:$0xf]  ;;  %v11479_v5 = vld [vmem:[%s22633_s3 + $0x334] sm:$0xf0] }
 0x423   :  { %v6224_v27 = vadd.f32 %v6223_v26, %v17452_v21  ;;  %v11527_v21 = vld [vmem:[%s22633_s3 + $0x39c] sm:$0xf0] }
 0x424   :  { %v11530_v20 = vor.u32 %v13459_v14, %v11527_v21  ;;  %v11482_v14 = vor.u32 %v13446_v2, %v11479_v5  ;;  %v11449_v2 = vld [vmem:[%s22633_s3 + $0x2e0] sm:$0xf]  ;;  %v22861_v5 = vld [vmem:[#allocation52_spill] sm:$0xff] }
 0x425   :  { %v17633_v41 = vadd.f32 %v6482_v13, %v6224_v27  ;;  %v17635_v42 = vpop.f32.mrf.mxu3  ;;  %v13435_v13 = vld [vmem:[%s22633_s3 + $0x2c0] sm:$0xf0] }
 0x426   :  { %22856 = vst [vmem:[#allocation7_spill] sm:$0xff] %v17635_v42  ;;  %v11422_v36 = vor.u32 %v13435_v13, %v11421_v6 }
 0x428   :  { %v6492_v59 = vpop.f32.mrf.mxu2 }
 0x429   :  { %v5987_v49 = vpop.f32.mrf.mxu0 }
 0x42a   :  { %5907 = vmatmul.bf16.gmra.mxu3 %v12310_v63  ;;  %v6226_v51 = vpop.f32.mrf.mxu1  ;;  %v17657_v26 = vadd.f32 %v5987_v49, %v5729_v44  ;;  %v22859_v63 = vld [vmem:[#allocation48_spill] sm:$0xff] }
 0x42b   :  { %v6227_v27 = vadd.f32 %v6226_v51, %v17487_v37  ;;  %v5731_v21 = vadd.f32 %v22859_v63, %v16877_v56  ;;  %v12337_v37 = vld [vmem:[%s22633_s3 + $0x9d8] sm:$0xf]  ;;  %v13466_v56 = vld [vmem:[%s22633_s3 + $0x3bc] sm:$0xf] }
 0x42c   :  { %6026 = vmatmul.bf16.gmra.mxu0 %v11530_v20 }
 0x42d   :  { %v17660_v48 = vadd.f32 %v6485_v15, %v6227_v27  ;;  %v17662_v39 = vpop.f32.mrf.mxu3  ;;  %6265 = vmatmul.bf16.gmra.mxu1 %v11422_v36  ;;  %6534 = vmatmul.bf16.gmra.mxu2 %v11482_v14  ;;  %v13665_v15 = vld [vmem:[%s22633_s3 + $0x9f0] sm:$0xf0]  ;;  %v5734_v27 = vadd.f32 %v22861_v5, %v16791_v1 }
 0x42e   :  { %22858 = vst [vmem:[#allocation11_spill] sm:$0xff] %v17662_v39  ;;  %v12338_v51 = vor.u32 %v13665_v15, %v12337_v37 }
 0x430   :  { %v6495_v20 = vpop.f32.mrf.mxu2 }
 0x431   :  { %v5989_v6 = vpop.f32.mrf.mxu0 }
 0x432   :  { %v6228_v13 = vpop.f32.mrf.mxu1  ;;  %v17666_v9 = vadd.f32 %v5989_v6, %v5731_v21 }
 0x433   :  { %v6229_v44 = vadd.f32 %v6228_v13, %v17497_v53  ;;  %v11555_v53 = vld [vmem:[%s22633_s3 + $0x3d4] sm:$0xf0]  ;;  %v13453_v13 = vld [vmem:[%s22633_s3 + $0x354] sm:$0xf] }
 0x434   :  { %v11558_v14 = vor.u32 %v13466_v56, %v11555_v53 }
 0x435   :  { %v17675_v36 = vadd.f32 %v6487_v25, %v6229_v44  ;;  %v17677_v49 = vpop.f32.mrf.mxu3  ;;  %v13442_v25 = vld [vmem:[%s22633_s3 + $0x2f8] sm:$0xf0]  ;;  %v11507_v44 = vld [vmem:[%s22633_s3 + $0x36c] sm:$0xf0] }
 0x436   :  { %22860 = vst [vmem:[#allocation10_spill] sm:$0xff] %v17677_v49  ;;  %v11450_v63 = vor.u32 %v13442_v25, %v11449_v2  ;;  %v11510_v56 = vor.u32 %v13453_v13, %v11507_v44  ;;  %v11477_v13 = vld [vmem:[%s22633_s3 + $0x318] sm:$0xf]  ;;  %v22865_v44 = vld [vmem:[#allocation95_spill] sm:$0xff] }
 0x438   :  { %v6497_v49 = vpop.f32.mrf.mxu2 }
 0x439   :  { %v5992_v21 = vpop.f32.mrf.mxu0 }
 0x43a   :  { %5912 = vmatmul.bf16.gmra.mxu3 %v12338_v51  ;;  %v6231_v6 = vpop.f32.mrf.mxu1  ;;  %v17699_v37 = vadd.f32 %v5992_v21, %v5734_v27  ;;  %v22863_v51 = vld [vmem:[#allocation56_spill] sm:$0xff] }
 0x43b   :  { %v6232_v15 = vadd.f32 %v6231_v6, %v17531_v45  ;;  %v5736_v53 = vadd.f32 %v22863_v51, %v16842_v16  ;;  %v12365_v45 = vld [vmem:[%s22633_s3 + $0xa10] sm:$0xf]  ;;  %v13473_v16 = vld [vmem:[%s22633_s3 + $0x3f4] sm:$0xf] }
 0x43c   :  { %6031 = vmatmul.bf16.gmra.mxu0 %v11558_v14 }
 0x43d   :  { %v17702_v39 = vadd.f32 %v6490_v47, %v6232_v15  ;;  %v17704_v1 = vpop.f32.mrf.mxu3  ;;  %6270 = vmatmul.bf16.gmra.mxu1 %v11450_v63  ;;  %6539 = vmatmul.bf16.gmra.mxu2 %v11510_v56  ;;  %v13672_v47 = vld [vmem:[%s22633_s3 + $0xa28] sm:$0xf0]  ;;  %v22866_v15 = vld [vmem:[#allocation59_spill] sm:$0xff] }
 0x43e   :  { %22862 = vst [vmem:[#allocation14_spill] sm:$0xff] %v17704_v1  ;;  %v12366_v6 = vor.u32 %v13672_v47, %v12365_v45  ;;  %v5739_v56 = vadd.f32 %v22866_v15, %v22865_v44  ;;  %v11535_v45 = vld [vmem:[%s22633_s3 + $0x3a4] sm:$0xf0] }
 0x440   :  { %v6500_v14 = vpop.f32.mrf.mxu2 }
 0x441   :  { %v5994_v2 = vpop.f32.mrf.mxu0 }
 0x442   :  { %v6233_v25 = vpop.f32.mrf.mxu1  ;;  %v17708_v5 = vadd.f32 %v5994_v2, %v5736_v53 }
 0x443   :  { %v6234_v27 = vadd.f32 %v6233_v25, %v17540_v31  ;;  %v11583_v31 = vld [vmem:[%s22633_s3 + $0x40c] sm:$0xf0] }
 0x444   :  { %v11586_v51 = vor.u32 %v13473_v16, %v11583_v31  ;;  %v22868_v31 = vld [vmem:[#allocation94_spill] sm:$0xff] }
 0x445   :  { %v17717_v63 = vadd.f32 %v6492_v59, %v6234_v27  ;;  %v17719_v21 = vpop.f32.mrf.mxu3  ;;  %v13449_v59 = vld [vmem:[%s22633_s3 + $0x330] sm:$0xf0]  ;;  %v13460_v27 = vld [vmem:[%s22633_s3 + $0x38c] sm:$0xf] }
 0x446   :  { %22864 = vst [vmem:[#allocation61_spill] sm:$0xff] %v17719_v21  ;;  %v11478_v53 = vor.u32 %v13449_v59, %v11477_v13  ;;  %v22869_v13 = vld [vmem:[#allocation62_spill] sm:$0xff] }
 0x447   :  { %v5741_v59 = vadd.f32 %v22869_v13, %v22868_v31 }
 0x448   :  { %v6502_v1 = vpop.f32.mrf.mxu2 }
 0x449   :  { %v5997_v2 = vpop.f32.mrf.mxu0 }
 0x44a   :  { %5917 = vmatmul.bf16.gmra.mxu3 %v12366_v6  ;;  %v6236_v25 = vpop.f32.mrf.mxu1  ;;  %v17741_v47 = vadd.f32 %v5997_v2, %v5739_v56  ;;  %v11538_v6 = vor.u32 %v13460_v27, %v11535_v45  ;;  %v13480_v2 = vld [vmem:[%s22633_s3 + $0x42c] sm:$0xf]  ;;  %v11505_v27 = vld [vmem:[%s22633_s3 + $0x350] sm:$0xf] }
 0x44b   :  { %v6237_v21 = vadd.f32 %v6236_v25, %v17573_v18  ;;  %v12393_v18 = vld [vmem:[%s22633_s3 + $0xa48] sm:$0xf]  ;;  %v22871_v45 = vld [vmem:[#allocation93_spill] sm:$0xff] }
 0x44c   :  { %6036 = vmatmul.bf16.gmra.mxu0 %v11586_v51 }
 0x44d   :  { %v17744_v42 = vadd.f32 %v6495_v20, %v6237_v21  ;;  %v17746_v16 = vpop.f32.mrf.mxu3  ;;  %6275 = vmatmul.bf16.gmra.mxu1 %v11478_v53  ;;  %6544 = vmatmul.bf16.gmra.mxu2 %v11538_v6  ;;  %v13679_v20 = vld [vmem:[%s22633_s3 + $0xa60] sm:$0xf0]  ;;  %v22872_v6 = vld [vmem:[#allocation65_spill] sm:$0xff] }
 0x44e   :  { %22867 = vst [vmem:[#allocation23_spill] sm:$0xff] %v17746_v16  ;;  %v12394_v25 = vor.u32 %v13679_v20, %v12393_v18  ;;  %v5744_v31 = vadd.f32 %v22872_v6, %v22871_v45  ;;  %v11563_v18 = vld [vmem:[%s22633_s3 + $0x3dc] sm:$0xf0] }
 0x450   :  { %v6505_v21 = vpop.f32.mrf.mxu2 }
 0x451   :  { %v5999_v44 = vpop.f32.mrf.mxu0 }
 0x452   :  { %v6238_v15 = vpop.f32.mrf.mxu1  ;;  %v17750_v4 = vadd.f32 %v5999_v44, %v5741_v59 }
 0x453   :  { %v6239_v56 = vadd.f32 %v6238_v15, %v17582_v62  ;;  %v11611_v62 = vld [vmem:[%s22633_s3 + $0x444] sm:$0xf0] }
 0x454   :  { %v11614_v13 = vor.u32 %v13480_v2, %v11611_v62  ;;  %v22874_v62 = vld [vmem:[#allocation92_spill] sm:$0xff] }
 0x455   :  { %v17759_v51 = vadd.f32 %v6497_v49, %v6239_v56  ;;  %v17761_v53 = vpop.f32.mrf.mxu3  ;;  %v13456_v49 = vld [vmem:[%s22633_s3 + $0x368] sm:$0xf0]  ;;  %v13467_v56 = vld [vmem:[%s22633_s3 + $0x3c4] sm:$0xf] }
 0x456   :  { %22870 = vst [vmem:[#allocation67_spill] sm:$0xff] %v17761_v53  ;;  %v11506_v59 = vor.u32 %v13456_v49, %v11505_v27  ;;  %v22875_v27 = vld [vmem:[#allocation68_spill] sm:$0xff] }
 0x457   :  { %v5746_v49 = vadd.f32 %v22875_v27, %v22874_v62 }
 0x458   :  { %v6507_v16 = vpop.f32.mrf.mxu2 }
 0x459   :  { %v6002_v44 = vpop.f32.mrf.mxu0 }
 0x45a   :  { %5922 = vmatmul.bf16.gmra.mxu3 %v12394_v25  ;;  %v6241_v15 = vpop.f32.mrf.mxu1  ;;  %v17783_v20 = vadd.f32 %v6002_v44, %v5744_v31  ;;  %v11566_v25 = vor.u32 %v13467_v56, %v11563_v18  ;;  %v13487_v44 = vld [vmem:[%s22633_s3 + $0x464] sm:$0xf]  ;;  %v11533_v56 = vld [vmem:[%s22633_s3 + $0x388] sm:$0xf] }
 0x45b   :  { %v6242_v53 = vadd.f32 %v6241_v15, %v17615_v34  ;;  %v12421_v34 = vld [vmem:[%s22633_s3 + $0xa80] sm:$0xf]  ;;  %v22877_v18 = vld [vmem:[#allocation84_spill] sm:$0xff] }
 0x45c   :  { %6041 = vmatmul.bf16.gmra.mxu0 %v11614_v13 }
 0x45d   :  { %v17786_v17 = vadd.f32 %v6500_v14, %v6242_v53  ;;  %v17788_v2 = vpop.f32.mrf.mxu3  ;;  %6280 = vmatmul.bf16.gmra.mxu1 %v11506_v59  ;;  %6549 = vmatmul.bf16.gmra.mxu2 %v11566_v25  ;;  %v13686_v14 = vld [vmem:[%s22633_s3 + $0xa98] sm:$0xf0] }
 0x45e   :  { %22873 = vst [vmem:[#allocation26_spill] sm:$0xff] %v17788_v2  ;;  %v12422_v15 = vor.u32 %v13686_v14, %v12421_v34  ;;  %v22878_v25 = vld [vmem:[#allocation70_spill] sm:$0xff] }
 0x45f   :  { %v5749_v62 = vadd.f32 %v22878_v25, %v22877_v18  ;;  %v11591_v34 = vld [vmem:[%s22633_s3 + $0x414] sm:$0xf0] }
 0x460   :  { %v6510_v53 = vpop.f32.mrf.mxu2 }
 0x461   :  { %v6004_v45 = vpop.f32.mrf.mxu0 }
 0x462   :  { %v6243_v6 = vpop.f32.mrf.mxu1  ;;  %v17792_v60 = vadd.f32 %v6004_v45, %v5746_v49 }
 0x463   :  { %v6244_v31 = vadd.f32 %v6243_v6, %v17624_v11  ;;  %v11639_v11 = vld [vmem:[%s22633_s3 + $0x47c] sm:$0xf0] }
 0x464   :  { %v11642_v27 = vor.u32 %v13487_v44, %v11639_v11  ;;  %v22880_v11 = vld [vmem:[#allocation90_spill] sm:$0xff] }
 0x465   :  { %v17801_v13 = vadd.f32 %v6502_v1, %v6244_v31  ;;  %v17803_v59 = vpop.f32.mrf.mxu3  ;;  %v13463_v1 = vld [vmem:[%s22633_s3 + $0x3a0] sm:$0xf0]  ;;  %v13474_v31 = vld [vmem:[%s22633_s3 + $0x3fc] sm:$0xf] }
 0x466   :  { %22876 = vst [vmem:[#allocation64_spill] sm:$0xff] %v17803_v59  ;;  %v11534_v49 = vor.u32 %v13463_v1, %v11533_v56  ;;  %v22881_v56 = vld [vmem:[#allocation73_spill] sm:$0xff] }
 0x467   :  { %v5751_v1 = vadd.f32 %v22881_v56, %v22880_v11 }
 0x468   :  { %v6512_v2 = vpop.f32.mrf.mxu2 }
 0x469   :  { %v6007_v45 = vpop.f32.mrf.mxu0 }
 0x46a   :  { %5927 = vmatmul.bf16.gmra.mxu3 %v12422_v15  ;;  %v6246_v6 = vpop.f32.mrf.mxu1  ;;  %v17825_v14 = vadd.f32 %v6007_v45, %v5749_v62  ;;  %v11594_v15 = vor.u32 %v13474_v31, %v11591_v34  ;;  %v13494_v45 = vld [vmem:[%s22633_s3 + $0x49c] sm:$0xf]  ;;  %v11561_v31 = vld [vmem:[%s22633_s3 + $0x3c0] sm:$0xf]  ;;  %v22884_v34 = vld [vmem:[#allocation81_spill] sm:$0xff] }
 0x46b   :  { %v6247_v59 = vadd.f32 %v6246_v6, %v17657_v26  ;;  %v12449_v26 = vld [vmem:[%s22633_s3 + $0xab8] sm:$0xf] }
 0x46c   :  { %6046 = vmatmul.bf16.gmra.mxu0 %v11642_v27 }
 0x46d   :  { %v17828_v19 = vadd.f32 %v6505_v21, %v6247_v59  ;;  %v17830_v44 = vpop.f32.mrf.mxu3  ;;  %6285 = vmatmul.bf16.gmra.mxu1 %v11534_v49  ;;  %6554 = vmatmul.bf16.gmra.mxu2 %v11594_v15  ;;  %v13693_v21 = vld [vmem:[%s22633_s3 + $0xad0] sm:$0xf0]  ;;  %v22885_v15 = vld [vmem:[#allocation76_spill] sm:$0xff] }
 0x46e   :  { %22879 = vst [vmem:[#allocation29_spill] sm:$0xff] %v17830_v44  ;;  %v12450_v6 = vor.u32 %v13693_v21, %v12449_v26  ;;  %v5754_v11 = vadd.f32 %v22885_v15, %v22884_v34  ;;  %v11619_v26 = vld [vmem:[%s22633_s3 + $0x44c] sm:$0xf0] }
 0x470   :  { %v6515_v59 = vpop.f32.mrf.mxu2 }
 0x471   :  { %v6009_v18 = vpop.f32.mrf.mxu0 }
 0x472   :  { %v6248_v25 = vpop.f32.mrf.mxu1  ;;  %v17834_v29 = vadd.f32 %v6009_v18, %v5751_v1 }
 0x473   :  { %v6249_v62 = vadd.f32 %v6248_v25, %v17666_v9  ;;  %v11667_v9 = vld [vmem:[%s22633_s3 + $0x4b4] sm:$0xf0] }
 0x474   :  { %v11670_v56 = vor.u32 %v13494_v45, %v11667_v9  ;;  %v22888_v9 = vld [vmem:[#allocation80_spill] sm:$0xff] }
 0x475   :  { %v17843_v27 = vadd.f32 %v6507_v16, %v6249_v62  ;;  %v17845_v49 = vpop.f32.mrf.mxu3  ;;  %v13470_v16 = vld [vmem:[%s22633_s3 + $0x3d8] sm:$0xf0]  ;;  %v13481_v62 = vld [vmem:[%s22633_s3 + $0x434] sm:$0xf] }
 0x476   :  { %22883 = vst [vmem:[#allocation5_spill] sm:$0xff] %v17845_v49  ;;  %v11562_v1 = vor.u32 %v13470_v16, %v11561_v31  ;;  %v22889_v31 = vld [vmem:[#allocation79_spill] sm:$0xff] }
 0x477   :  { %22882 = vst [vmem:[#allocation44_spill] sm:$0xff] %v17843_v27  ;;  %v5756_v16 = vadd.f32 %v22889_v31, %v22888_v9 }
 0x478   :  { %v6517_v44 = vpop.f32.mrf.mxu2 }
 0x479   :  { %v6012_v18 = vpop.f32.mrf.mxu0 }
 0x47a   :  { %5932 = vmatmul.bf16.gmra.mxu3 %v12450_v6  ;;  %v6251_v25 = vpop.f32.mrf.mxu1  ;;  %v17867_v21 = vadd.f32 %v6012_v18, %v5754_v11  ;;  %v11622_v6 = vor.u32 %v13481_v62, %v11619_v26  ;;  %v13501_v18 = vld [vmem:[%s22633_s3 + $0x4d4] sm:$0xf]  ;;  %v11589_v62 = vld [vmem:[%s22633_s3 + $0x3f8] sm:$0xf] }
 0x47b   :  { %v6252_v49 = vadd.f32 %v6251_v25, %v17699_v37  ;;  %v11093_v37 = vld [vmem:[%s22633_s3 + $0x10] sm:$0xf]  ;;  %v22892_v26 = vld [vmem:[#allocation78_spill] sm:$0xff] }
 0x47c   :  { %6051 = vmatmul.bf16.gmra.mxu0 %v11670_v56 }
 0x47d   :  { %v17870_v0 = vadd.f32 %v6510_v53, %v6252_v49  ;;  %v17872_v45 = vpop.f32.mrf.mxu3  ;;  %6290 = vmatmul.bf16.gmra.mxu1 %v11562_v1  ;;  %6559 = vmatmul.bf16.gmra.mxu2 %v11622_v6  ;;  %v13352_v53 = vld [vmem:[%s22633_s3 + $0x28] sm:$0xf0]  ;;  %v22893_v6 = vld [vmem:[#allocation83_spill] sm:$0xff] }
 0x47e   :  { %22887 = vst [vmem:[#allocation4_spill] sm:$0xff] %v17872_v45  ;;  %v11094_v25 = vor.u32 %v13352_v53, %v11093_v37  ;;  %v5759_v9 = vadd.f32 %v22893_v6, %v22892_v26  ;;  %v11647_v37 = vld [vmem:[%s22633_s3 + $0x484] sm:$0xf0] }
 0x47f   :  { %22886 = vst [vmem:[#allocation51_spill] sm:$0xff] %v17870_v0 }
 0x480   :  { %v6520_v49 = vpop.f32.mrf.mxu2 }
 0x481   :  { %v6014_v34 = vpop.f32.mrf.mxu0 }
 0x482   :  { %v6253_v15 = vpop.f32.mrf.mxu1  ;;  %v17876_v43 = vadd.f32 %v6014_v34, %v5756_v16 }
 0x483   :  { %v6254_v11 = vadd.f32 %v6253_v15, %v17708_v5  ;;  %v11695_v5 = vld [vmem:[%s22633_s3 + $0x4ec] sm:$0xf0] }
 0x484   :  { %v11698_v31 = vor.u32 %v13501_v18, %v11695_v5  ;;  %v22896_v5 = vld [vmem:[#allocation77_spill] sm:$0xff] }
 0x485   :  { %v17885_v56 = vadd.f32 %v6512_v2, %v6254_v11  ;;  %v17887_v1 = vpop.f32.mrf.mxu3  ;;  %v13477_v2 = vld [vmem:[%s22633_s3 + $0x410] sm:$0xf0]  ;;  %v13488_v11 = vld [vmem:[%s22633_s3 + $0x46c] sm:$0xf] }
 0x486   :  { %22891 = vst [vmem:[#allocation6_spill] sm:$0xff] %v17887_v1  ;;  %v11590_v16 = vor.u32 %v13477_v2, %v11589_v62  ;;  %v22897_v62 = vld [vmem:[#allocation87_spill] sm:$0xff] }
 0x487   :  { %22890 = vst [vmem:[#allocation43_spill] sm:$0xff] %v17885_v56  ;;  %v5761_v2 = vadd.f32 %v22897_v62, %v22896_v5 }
 0x488   :  { %v6522_v45 = vpop.f32.mrf.mxu2 }
 0x489   :  { %v6017_v34 = vpop.f32.mrf.mxu0 }
 0x48a   :  { %v6256_v15 = vpop.f32.mrf.mxu1  ;;  %6723 = vmatmul.bf16.vlgmr.msrb.gmra.mxu3 %v11094_v25  ;;  %v17909_v53 = vadd.f32 %v6017_v34, %v5759_v9  ;;  %v11650_v25 = vor.u32 %v13488_v11, %v11647_v37  ;;  %v13508_v34 = vld [vmem:[%s22633_s3 + $0x50c] sm:$0xf]  ;;  %v11617_v11 = vld [vmem:[%s22633_s3 + $0x430] sm:$0xf] }
 0x48b   :  { %v6257_v1 = vadd.f32 %v6256_v15, %v17741_v47  ;;  %v11121_v47 = vld [vmem:[%s22633_s3 + $0x48] sm:$0xf]  ;;  %v22900_v37 = vld [vmem:[#allocation69_spill] sm:$0xff] }
 0x48c   :  { %6056 = vmatmul.bf16.gmra.mxu0 %v11698_v31 }
 0x48d   :  { %v17912_v56 = vadd.f32 %v6515_v59, %v6257_v1  ;;  %v17914_v18 = vpop.f32.mrf.mxu3  ;;  %6295 = vmatmul.bf16.gmra.mxu1 %v11590_v16  ;;  %6564 = vmatmul.bf16.gmra.mxu2 %v11650_v25  ;;  %v13359_v59 = vld [vmem:[%s22633_s3 + $0x60] sm:$0xf0]  ;;  %v22901_v25 = vld [vmem:[#allocation89_spill] sm:$0xff] }
 0x48e   :  { %22895 = vst [vmem:[#allocation3_spill] sm:$0xff] %v17914_v18  ;;  %v11122_v15 = vor.u32 %v13359_v59, %v11121_v47  ;;  %v5764_v5 = vadd.f32 %v22901_v25, %v22900_v37  ;;  %v11675_v47 = vld [vmem:[%s22633_s3 + $0x4bc] sm:$0xf0] }
 0x48f   :  { %22894 = vst [vmem:[#allocation46_spill] sm:$0xff] %v17912_v56 }
 0x490   :  { %v6525_v1 = vpop.f32.mrf.mxu2 }
 0x491   :  { %v6019_v26 = vpop.f32.mrf.mxu0 }
 0x492   :  { %v6258_v6 = vpop.f32.mrf.mxu1  ;;  %v17918_v38 = vadd.f32 %v6019_v26, %v5761_v2 }
 0x493   :  { %v6259_v9 = vadd.f32 %v6258_v6, %v17750_v4  ;;  %v11723_v4 = vld [vmem:[%s22633_s3 + $0x524] sm:$0xf0] }
 0x494   :  { %v11726_v62 = vor.u32 %v13508_v34, %v11723_v4  ;;  %v22904_v4 = vld [vmem:[#allocation74_spill] sm:$0xff] }
 0x495   :  { %v17927_v31 = vadd.f32 %v6517_v44, %v6259_v9  ;;  %v17929_v16 = vpop.f32.mrf.mxu3  ;;  %v13484_v44 = vld [vmem:[%s22633_s3 + $0x448] sm:$0xf0]  ;;  %v13495_v9 = vld [vmem:[%s22633_s3 + $0x4a4] sm:$0xf] }
 0x496   :  { %22899 = vst [vmem:[#allocation32_spill] sm:$0xff] %v17929_v16  ;;  %v11618_v2 = vor.u32 %v13484_v44, %v11617_v11  ;;  %v22905_v11 = vld [vmem:[#allocation33_spill] sm:$0xff] }
 0x497   :  { %22898 = vst [vmem:[#allocation63_spill] sm:$0xff] %v17927_v31  ;;  %v5766_v44 = vadd.f32 %v22905_v11, %v22904_v4 }
 0x498   :  { %v6527_v18 = vpop.f32.mrf.mxu2 }
 0x499   :  { %v6022_v26 = vpop.f32.mrf.mxu0 }
 0x49a   :  { %v6261_v6 = vpop.f32.mrf.mxu1  ;;  %6728 = vmatmul.bf16.gmra.mxu3 %v11122_v15  ;;  %v17951_v59 = vadd.f32 %v6022_v26, %v5764_v5  ;;  %v11678_v15 = vor.u32 %v13495_v9, %v11675_v47  ;;  %v13515_v26 = vld [vmem:[%s22633_s3 + $0x544] sm:$0xf]  ;;  %v11645_v9 = vld [vmem:[%s22633_s3 + $0x468] sm:$0xf]  ;;  %v22908_v47 = vld [vmem:[#allocation101_spill] sm:$0xff] }
 0x49b   :  { %v6262_v16 = vadd.f32 %v6261_v6, %v17783_v20  ;;  %v11149_v20 = vld [vmem:[%s22633_s3 + $0x80] sm:$0xf] }
 0x49c   :  { %6061 = vmatmul.bf16.gmra.mxu0 %v11726_v62 }
 0x49d   :  { %v17954_v31 = vadd.f32 %v6520_v49, %v6262_v16  ;;  %v17956_v34 = vpop.f32.mrf.mxu3  ;;  %6300 = vmatmul.bf16.gmra.mxu1 %v11618_v2  ;;  %6569 = vmatmul.bf16.gmra.mxu2 %v11678_v15  ;;  %v13366_v49 = vld [vmem:[%s22633_s3 + $0x98] sm:$0xf0]  ;;  %v22909_v15 = vld [vmem:[#allocation28_spill] sm:$0xff] }
 0x49e   :  { %22903 = vst [vmem:[#allocation36_spill] sm:$0xff] %v17956_v34  ;;  %v11150_v6 = vor.u32 %v13366_v49, %v11149_v20  ;;  %v5769_v4 = vadd.f32 %v22909_v15, %v22908_v47  ;;  %v11703_v20 = vld [vmem:[%s22633_s3 + $0x4f4] sm:$0xf0] }
 0x49f   :  { %22902 = vst [vmem:[#allocation58_spill] sm:$0xff] %v17954_v31 }
 0x4a0   :  { %v6530_v16 = vpop.f32.mrf.mxu2 }
 0x4a1   :  { %v6024_v37 = vpop.f32.mrf.mxu0 }
 0x4a2   :  { %v6263_v25 = vpop.f32.mrf.mxu1  ;;  %v17960_v56 = vadd.f32 %v6024_v37, %v5766_v44 }
 0x4a3   :  { %v6264_v5 = vadd.f32 %v6263_v25, %v17792_v60  ;;  %v11751_v60 = vld [vmem:[%s22633_s3 + $0x55c] sm:$0xf0] }
 0x4a4   :  { %v11754_v11 = vor.u32 %v13515_v26, %v11751_v60  ;;  %v22912_v60 = vld [vmem:[#allocation105_spill] sm:$0xff] }
 0x4a5   :  { %v17969_v62 = vadd.f32 %v6522_v45, %v6264_v5  ;;  %v17971_v2 = vpop.f32.mrf.mxu3  ;;  %v13491_v45 = vld [vmem:[%s22633_s3 + $0x480] sm:$0xf0]  ;;  %v13502_v5 = vld [vmem:[%s22633_s3 + $0x4dc] sm:$0xf] }
 0x4a6   :  { %22907 = vst [vmem:[#allocation38_spill] sm:$0xff] %v17971_v2  ;;  %v11646_v44 = vor.u32 %v13491_v45, %v11645_v9  ;;  %v22913_v9 = vld [vmem:[#allocation96_spill] sm:$0xff] }
 0x4a7   :  { %22906 = vst [vmem:[#allocation57_spill] sm:$0xff] %v17969_v62  ;;  %v5771_v45 = vadd.f32 %v22913_v9, %v22912_v60 }
 0x4a8   :  { %v6532_v34 = vpop.f32.mrf.mxu2 }
 0x4a9   :  { %v6027_v37 = vpop.f32.mrf.mxu0 }
 0x4aa   :  { %v6266_v25 = vpop.f32.mrf.mxu1  ;;  %6733 = vmatmul.bf16.gmra.mxu3 %v11150_v6  ;;  %v17993_v49 = vadd.f32 %v6027_v37, %v5769_v4  ;;  %v11706_v6 = vor.u32 %v13502_v5, %v11703_v20  ;;  %v13522_v37 = vld [vmem:[%s22633_s3 + $0x57c] sm:$0xf]  ;;  %v11673_v5 = vld [vmem:[%s22633_s3 + $0x4a0] sm:$0xf]  ;;  %v22916_v20 = vld [vmem:[#allocation100_spill] sm:$0xff] }
 0x4ab   :  { %v6267_v2 = vadd.f32 %v6266_v25, %v17825_v14  ;;  %v11177_v14 = vld [vmem:[%s22633_s3 + $0xb8] sm:$0xf] }
 0x4ac   :  { %6066 = vmatmul.bf16.gmra.mxu0 %v11754_v11 }
 0x4ad   :  { %v17996_v62 = vadd.f32 %v6525_v1, %v6267_v2  ;;  %v17998_v26 = vpop.f32.mrf.mxu3  ;;  %6305 = vmatmul.bf16.gmra.mxu1 %v11646_v44  ;;  %6574 = vmatmul.bf16.gmra.mxu2 %v11706_v6  ;;  %v13373_v1 = vld [vmem:[%s22633_s3 + $0xd0] sm:$0xf0]  ;;  %v22917_v6 = vld [vmem:[#allocation98_spill] sm:$0xff] }
 0x4ae   :  { %22911 = vst [vmem:[#allocation8_spill] sm:$0xff] %v17998_v26  ;;  %v11178_v25 = vor.u32 %v13373_v1, %v11177_v14  ;;  %v5774_v60 = vadd.f32 %v22917_v6, %v22916_v20  ;;  %v11731_v14 = vld [vmem:[%s22633_s3 + $0x52c] sm:$0xf0] }
 0x4af   :  { %22910 = vst [vmem:[#allocation53_spill] sm:$0xff] %v17996_v62 }
 0x4b0   :  { %v6535_v2 = vpop.f32.mrf.mxu2 }
 0x4b1   :  { %v6029_v47 = vpop.f32.mrf.mxu0 }
 0x4b2   :  { %v6268_v15 = vpop.f32.mrf.mxu1  ;;  %v18002_v31 = vadd.f32 %v6029_v47, %v5771_v45 }
 0x4b3   :  { %v6269_v4 = vadd.f32 %v6268_v15, %v17834_v29  ;;  %v11779_v29 = vld [vmem:[%s22633_s3 + $0x594] sm:$0xf0] }
 0x4b4   :  { %v11782_v9 = vor.u32 %v13522_v37, %v11779_v29  ;;  %v22920_v29 = vld [vmem:[#allocation99_spill] sm:$0xff] }
 0x4b5   :  { %v18011_v11 = vadd.f32 %v6527_v18, %v6269_v4  ;;  %v18013_v44 = vpop.f32.mrf.mxu3  ;;  %v13498_v18 = vld [vmem:[%s22633_s3 + $0x4b8] sm:$0xf0]  ;;  %v13509_v4 = vld [vmem:[%s22633_s3 + $0x514] sm:$0xf] }
 0x4b6   :  { %22915 = vst [vmem:[#allocation12_spill] sm:$0xff] %v18013_v44  ;;  %v11674_v45 = vor.u32 %v13498_v18, %v11673_v5  ;;  %v22921_v5 = vld [vmem:[#allocation30_spill] sm:$0xff] }
 0x4b7   :  { %22914 = vst [vmem:[#allocation60_spill] sm:$0xff] %v18011_v11  ;;  %v5776_v18 = vadd.f32 %v22921_v5, %v22920_v29 }
 0x4b8   :  { %v6537_v26 = vpop.f32.mrf.mxu2 }
 0x4b9   :  { %v6032_v47 = vpop.f32.mrf.mxu0 }
 0x4ba   :  { %v6271_v15 = vpop.f32.mrf.mxu1  ;;  %6738 = vmatmul.bf16.gmra.mxu3 %v11178_v25  ;;  %v18035_v1 = vadd.f32 %v6032_v47, %v5774_v60  ;;  %v11734_v25 = vor.u32 %v13509_v4, %v11731_v14  ;;  %v13529_v47 = vld [vmem:[%s22633_s3 + $0x5b4] sm:$0xf]  ;;  %v11701_v4 = vld [vmem:[%s22633_s3 + $0x4d8] sm:$0xf] }
 0x4bb   :  { %v6272_v44 = vadd.f32 %v6271_v15, %v17867_v21  ;;  %v11205_v21 = vld [vmem:[%s22633_s3 + $0xf0] sm:$0xf] }
 0x4bc   :  { %6071 = vmatmul.bf16.gmra.mxu0 %v11782_v9  ;;  %v22924_v14 = vld [vmem:[#allocation97_spill] sm:$0xff] }
 0x4bd   :  { %v18038_v11 = vadd.f32 %v6530_v16, %v6272_v44  ;;  %v18040_v37 = vpop.f32.mrf.mxu3  ;;  %6310 = vmatmul.bf16.gmra.mxu1 %v11674_v45  ;;  %6579 = vmatmul.bf16.gmra.mxu2 %v11734_v25  ;;  %v13380_v16 = vld [vmem:[%s22633_s3 + $0x108] sm:$0xf0]  ;;  %v22925_v25 = vld [vmem:[#allocation25_spill] sm:$0xff] }
 0x4be   :  { %22919 = vst [vmem:[#allocation9_spill] sm:$0xff] %v18040_v37  ;;  %v11206_v15 = vor.u32 %v13380_v16, %v11205_v21  ;;  %v5779_v29 = vadd.f32 %v22925_v25, %v22924_v14  ;;  %v11759_v21 = vld [vmem:[%s22633_s3 + $0x564] sm:$0xf0] }
 0x4bf   :  { %22918 = vst [vmem:[#allocation55_spill] sm:$0xff] %v18038_v11 }
 0x4c0   :  { %v6540_v44 = vpop.f32.mrf.mxu2 }
 0x4c1   :  { %v6034_v20 = vpop.f32.mrf.mxu0 }
 0x4c2   :  { %v6273_v6 = vpop.f32.mrf.mxu1  ;;  %v18044_v62 = vadd.f32 %v6034_v20, %v5776_v18 }
 0x4c3   :  { %v6274_v60 = vadd.f32 %v6273_v6, %v17876_v43  ;;  %v11807_v43 = vld [vmem:[%s22633_s3 + $0x5cc] sm:$0xf0] }
 0x4c4   :  { %v11810_v5 = vor.u32 %v13529_v47, %v11807_v43  ;;  %v22928_v43 = vld [vmem:[#allocation31_spill] sm:$0xff] }
 0x4c5   :  { %v18053_v9 = vadd.f32 %v6532_v34, %v6274_v60  ;;  %v18055_v45 = vpop.f32.mrf.mxu3  ;;  %v13505_v34 = vld [vmem:[%s22633_s3 + $0x4f0] sm:$0xf0]  ;;  %v13516_v60 = vld [vmem:[%s22633_s3 + $0x54c] sm:$0xf] }
 0x4c6   :  { %22923 = vst [vmem:[#allocation41_spill] sm:$0xff] %v18055_v45  ;;  %v11702_v18 = vor.u32 %v13505_v34, %v11701_v4  ;;  %v22929_v4 = vld [vmem:[#allocation102_spill] sm:$0xff] }
 0x4c7   :  { %22922 = vst [vmem:[#allocation54_spill] sm:$0xff] %v18053_v9  ;;  %v5781_v34 = vadd.f32 %v22929_v4, %v22928_v43  ;;  %v22933_v43 = vld [vmem:[#allocation91_spill] sm:$0xff]  ;;  %v22934_v4 = vld [vmem:[#allocation106_spill] sm:$0xff] }
 0x4c8   :  { %v6542_v37 = vpop.f32.mrf.mxu2 }
 0x4c9   :  { %v6037_v20 = vpop.f32.mrf.mxu0 }
 0x4ca   :  { %v6276_v6 = vpop.f32.mrf.mxu1  ;;  %6743 = vmatmul.bf16.gmra.mxu3 %v11206_v15  ;;  %v18077_v16 = vadd.f32 %v6037_v20, %v5779_v29  ;;  %v11762_v15 = vor.u32 %v13516_v60, %v11759_v21  ;;  %v11835_v60 = vld [vmem:[%s22633_s3 + $0x604] sm:$0xf0]  ;;  %v11729_v21 = vld [vmem:[%s22633_s3 + $0x510] sm:$0xf] }
 0x4cb   :  { %v6277_v45 = vadd.f32 %v6276_v6, %v17909_v53  ;;  %v11233_v53 = vld [vmem:[%s22633_s3 + $0x128] sm:$0xf]  ;;  %v13536_v6 = vld [vmem:[%s22633_s3 + $0x5ec] sm:$0xf] }
 0x4cc   :  { %6076 = vmatmul.bf16.gmra.mxu0 %v11810_v5  ;;  %v18095_v5 = vpop.permute.xlu0 %3670 }
 0x4cd   :  { %v18080_v9 = vadd.f32 %v6535_v2, %v6277_v45  ;;  %v18082_v47 = vpop.f32.mrf.mxu3  ;;  %6315 = vmatmul.bf16.gmra.mxu1 %v11702_v18  ;;  %6584 = vmatmul.bf16.gmra.mxu2 %v11762_v15  ;;  %v13387_v2 = vld [vmem:[%s22633_s3 + $0x140] sm:$0xf0]  ;;  %22930 = vst [vmem:[#allocation49_spill] sm:$0xff] %v18095_v5  ;;  %v18113_v15 = vpop.permute.xlu2 %3580 }
 0x4ce   :  { %22927 = vst [vmem:[#allocation42_spill] sm:$0xff] %v18082_v47 }
 0x4cf   :  { %22926 = vst [vmem:[#allocation50_spill] sm:$0xff] %v18080_v9 }
 0x4d0   :  { %v6545_v45 = vpop.f32.mrf.mxu2 }
 0x4d1   :  { %v6039_v14 = vpop.f32.mrf.mxu0 }
 0x4d2   :  { %v6278_v25 = vpop.f32.mrf.mxu1  ;;  %v18086_v11 = vadd.f32 %v6039_v14, %v5781_v34  ;;  %v5784_v34 = vadd.f32 %v22934_v4, %v22933_v43  ;;  %v11838_v14 = vor.u32 %v13536_v6, %v11835_v60  ;;  %v22939_v43 = vld [vmem:[#allocation107_spill] sm:$0xff] }
 0x4d3   :  { %v6279_v29 = vadd.f32 %v6278_v25, %v17918_v38  ;;  %v11234_v38 = vor.u32 %v13387_v2, %v11233_v53  ;;  %v13523_v2 = vld [vmem:[%s22633_s3 + $0x584] sm:$0xf] }
 0x4d4   :  { %v18130_v60 = vpop.permute.xlu0 %3585 }
 0x4d5   :  { %v18097_v18 = vadd.f32 %v6537_v26, %v6279_v29  ;;  %v18099_v20 = vpop.f32.mrf.mxu3  ;;  %v13512_v26 = vld [vmem:[%s22633_s3 + $0x528] sm:$0xf0] }
 0x4d6   :  { %22932 = vst [vmem:[#allocation47_spill] sm:$0xff] %v18099_v20  ;;  %v11730_v25 = vor.u32 %v13512_v26, %v11729_v21  ;;  %v11787_v20 = vld [vmem:[%s22633_s3 + $0x59c] sm:$0xf0]  ;;  %v18132_v21 = vpop.permute.xlu2 %3665 }
 0x4d7   :  { %22931 = vst [vmem:[#allocation45_spill] sm:$0xff] %v18097_v18  ;;  %v22938_v26 = vld [vmem:[#allocation35_spill] sm:$0xff] }
 0x4d8   :  { %v6547_v18 = vpop.f32.mrf.mxu2  ;;  %22937 = vst [vmem:[#allocation56_spill] sm:$0xff] %v18132_v21  ;;  %v5786_v4 = vadd.f32 %v22939_v43, %v22938_v26  ;;  %v22942_v43 = vld [vmem:[#allocation88_spill] sm:$0xff] }
 0x4d9   :  { %v6042_v29 = vpop.f32.mrf.mxu0 }
 0x4da   :  { %v6281_v53 = vpop.f32.mrf.mxu1  ;;  %6748 = vmatmul.bf16.gmra.mxu3 %v11234_v38  ;;  %v18123_v47 = vadd.f32 %v6042_v29, %v5784_v34  ;;  %v11790_v38 = vor.u32 %v13523_v2, %v11787_v20 }
 0x4db   :  { %v6282_v5 = vadd.f32 %v6281_v53, %v17951_v59  ;;  %v13543_v53 = vld [vmem:[%s22633_s3 + $0x624] sm:$0xf] }
 0x4dc   :  { %6081 = vmatmul.bf16.gmra.mxu0 %v11838_v14  ;;  %v18161_v26 = vpop.permute.xlu0 %3570 }
 0x4dd   :  { %v18126_v9 = vadd.f32 %v6540_v44, %v6282_v5  ;;  %v18128_v6 = vpop.f32.mrf.mxu3  ;;  %6320 = vmatmul.bf16.gmra.mxu1 %v11730_v25  ;;  %6589 = vmatmul.bf16.gmra.mxu2 %v11790_v38  ;;  %v11261_v44 = vld [vmem:[%s22633_s3 + $0x160] sm:$0xf]  ;;  %v13394_v5 = vld [vmem:[%s22633_s3 + $0x178] sm:$0xf0]  ;;  %v11757_v38 = vld [vmem:[%s22633_s3 + $0x548] sm:$0xf] }
 0x4de   :  { %22936 = vst [vmem:[#allocation52_spill] sm:$0xff] %v18128_v6  ;;  %v11262_v2 = vor.u32 %v13394_v5, %v11261_v44  ;;  %v11815_v6 = vld [vmem:[%s22633_s3 + $0x5d4] sm:$0xf0]  ;;  %v18171_v21 = vpop.permute.xlu2 %3650 }
 0x4df   :  { %22935 = vst [vmem:[#allocation48_spill] sm:$0xff] %v18126_v9 }
 0x4e0   :  { %v6550_v20 = vpop.f32.mrf.mxu2  ;;  %22944 = vst [vmem:[#allocation94_spill] sm:$0xff] %v18171_v21 }
 0x4e1   :  { %v6044_v34 = vpop.f32.mrf.mxu0 }
 0x4e2   :  { %v6283_v29 = vpop.f32.mrf.mxu1  ;;  %v18136_v0 = vadd.f32 %v6044_v34, %v5786_v4  ;;  %v22943_v4 = vld [vmem:[#allocation108_spill] sm:$0xff] }
 0x4e3   :  { %v6284_v59 = vadd.f32 %v6283_v29, %v17960_v56  ;;  %v11863_v56 = vld [vmem:[%s22633_s3 + $0x63c] sm:$0xf0]  ;;  %v5789_v34 = vadd.f32 %v22943_v4, %v22942_v43  ;;  %v22949_v4 = vld [vmem:[#allocation109_spill] sm:$0xff] }
 0x4e4   :  { %v11866_v29 = vor.u32 %v13543_v53, %v11863_v56 }
 0x4e5   :  { %v18145_v14 = vadd.f32 %v6542_v37, %v6284_v59  ;;  %v18147_v25 = vpop.f32.mrf.mxu3  ;;  %v13519_v37 = vld [vmem:[%s22633_s3 + $0x560] sm:$0xf0] }
 0x4e6   :  { %22941 = vst [vmem:[#allocation59_spill] sm:$0xff] %v18147_v25  ;;  %v11758_v59 = vor.u32 %v13519_v37, %v11757_v38  ;;  %v13530_v25 = vld [vmem:[%s22633_s3 + $0x5bc] sm:$0xf]  ;;  %v18180_v38 = vpop.permute.xlu1 %3675 }
 0x4e7   :  { %22940 = vst [vmem:[#allocation95_spill] sm:$0xff] %v18145_v14  ;;  %v22948_v37 = vld [vmem:[#allocation34_spill] sm:$0xff] }
 0x4e8   :  { %v6552_v43 = vpop.f32.mrf.mxu2  ;;  %22947 = vst [vmem:[#allocation65_spill] sm:$0xff] %v18180_v38  ;;  %v5791_v7 = vadd.f32 %v22949_v4, %v22948_v37 }
 0x4e9   :  { %v6047_v44 = vpop.f32.mrf.mxu0 }
 0x4ea   :  { %v6286_v5 = vpop.f32.mrf.mxu1  ;;  %6753 = vmatmul.bf16.gmra.mxu3 %v11262_v2  ;;  %v18173_v14 = vadd.f32 %v6047_v44, %v5789_v34  ;;  %v11818_v2 = vor.u32 %v13530_v25, %v11815_v6  ;;  %v18184_v34 = vpop.permute.xlu0 %3655 }
 0x4eb   :  { %v6287_v9 = vadd.f32 %v6286_v5, %v17993_v49  ;;  %22950 = vst [vmem:[#allocation92_spill] sm:$0xff] %v18184_v34  ;;  %v18195_v25 = vpop.permute.xlu2 %3565  ;;  %v22953_v5 = vld [vmem:[#allocation86_spill] sm:$0xff] }
 0x4ec   :  { %6086 = vmatmul.bf16.gmra.mxu0 %v11866_v29 }
 0x4ed   :  { %v18176_v53 = vadd.f32 %v6545_v45, %v6287_v9  ;;  %v18178_v56 = vpop.f32.mrf.mxu3  ;;  %6325 = vmatmul.bf16.gmra.mxu1 %v11758_v59  ;;  %6594 = vmatmul.bf16.gmra.mxu2 %v11818_v2  ;;  %v11289_v9 = vld [vmem:[%s22633_s3 + $0x198] sm:$0xf]  ;;  %v13401_v45 = vld [vmem:[%s22633_s3 + $0x1b0] sm:$0xf0]  ;;  %v5794_v2 = vadd.f32 %v17002_v61, %v22953_v5 }
 0x4ee   :  { %22946 = vst [vmem:[#allocation93_spill] sm:$0xff] %v18178_v56  ;;  %v18221_v56 = vpop.permute.xlu1 %3660  ;;  %v22958_v5 = vld [vmem:[#allocation85_spill] sm:$0xff] }
 0x4ef   :  { %22945 = vst [vmem:[#allocation62_spill] sm:$0xff] %v18176_v53  ;;  %v5796_v53 = vadd.f32 %v17024_v35, %v22958_v5 }
 0x4f0   :  { %v6555_v6 = vpop.f32.mrf.mxu2  ;;  %22954 = vst [vmem:[#allocation70_spill] sm:$0xff] %v18221_v56 }
 0x4f1   :  { %v6049_v27 = vpop.f32.mrf.mxu0 }
 0x4f2   :  { %v6288_v21 = vpop.f32.mrf.mxu1  ;;  %v18186_v44 = vadd.f32 %v6049_v27, %v5791_v7  ;;  %v13550_v7 = vld [vmem:[%s22633_s3 + $0x65c] sm:$0xf]  ;;  %v11290_v27 = vor.u32 %v13401_v45, %v11289_v9  ;;  %v13537_v9 = vld [vmem:[%s22633_s3 + $0x5f4] sm:$0xf]  ;;  %v11843_v45 = vld [vmem:[%s22633_s3 + $0x60c] sm:$0xf0] }
 0x4f3   :  { %v6289_v49 = vadd.f32 %v6288_v21, %v18002_v31  ;;  %v11891_v31 = vld [vmem:[%s22633_s3 + $0x674] sm:$0xf0]  ;;  %v11785_v21 = vld [vmem:[%s22633_s3 + $0x580] sm:$0xf] }
 0x4f4   :  { %v11894_v37 = vor.u32 %v13550_v7, %v11891_v31  ;;  %v18226_v7 = vpop.permute.xlu0 %3640 }
 0x4f5   :  { %v18197_v29 = vadd.f32 %v6547_v18, %v6289_v49  ;;  %v18199_v59 = vpop.f32.mrf.mxu3  ;;  %v13526_v18 = vld [vmem:[%s22633_s3 + $0x598] sm:$0xf0]  ;;  %22955 = vst [vmem:[#allocation90_spill] sm:$0xff] %v18226_v7 }
 0x4f6   :  { %22952 = vst [vmem:[#allocation84_spill] sm:$0xff] %v18199_v59  ;;  %v11786_v4 = vor.u32 %v13526_v18, %v11785_v21  ;;  %v11846_v21 = vor.u32 %v13537_v9, %v11843_v45  ;;  %v18232_v18 = vpop.permute.xlu2 %3550  ;;  %v11919_v9 = vld [vmem:[%s22633_s3 + $0x6ac] sm:$0xf0]  ;;  %v11813_v45 = vld [vmem:[%s22633_s3 + $0x5b8] sm:$0xf] }
 0x4f7   :  { %22951 = vst [vmem:[#allocation68_spill] sm:$0xff] %v18197_v29 }
 0x4f8   :  { %v6557_v61 = vpop.f32.mrf.mxu2 }
 0x4f9   :  { %v6052_v49 = vpop.f32.mrf.mxu0 }
 0x4fa   :  { %v6291_v59 = vpop.f32.mrf.mxu1  ;;  %6758 = vmatmul.bf16.gmra.mxu3 %v11290_v27  ;;  %v18223_v38 = vadd.f32 %v6052_v49, %v5794_v2 }
 0x4fb   :  { %v6292_v29 = vadd.f32 %v6291_v59, %v18035_v1 }
 0x4fc   :  { %6091 = vmatmul.bf16.gmra.mxu0 %v11894_v37  ;;  %v18245_v37 = vpop.permute.xlu1 %3575 }
 0x4fd   :  { %v18228_v31 = vadd.f32 %v6550_v20, %v6292_v29  ;;  %v18230_v27 = vpop.f32.mrf.mxu3  ;;  %6330 = vmatmul.bf16.gmra.mxu1 %v11786_v4  ;;  %6599 = vmatmul.bf16.gmra.mxu2 %v11846_v21  ;;  %v11317_v20 = vld [vmem:[%s22633_s3 + $0x1d0] sm:$0xf]  ;;  %v13408_v29 = vld [vmem:[%s22633_s3 + $0x1e8] sm:$0xf0]  ;;  %v18263_v21 = vpop.permute.xlu0 %3555 }
 0x4fe   :  { %22957 = vst [vmem:[#allocation81_spill] sm:$0xff] %v18230_v27  ;;  %v18265_v5 = vpop.permute.xlu2 %3635  ;;  %v13544_v27 = vld [vmem:[%s22633_s3 + $0x62c] sm:$0xf] }
 0x4ff   :  { %22956 = vst [vmem:[#allocation73_spill] sm:$0xff] %v18228_v31 }
 0x500   :  { %v6560_v59 = vpop.f32.mrf.mxu2  ;;  %22961 = vst [vmem:[#allocation79_spill] sm:$0xff] %v18265_v5 }
 0x501   :  { %v6054_v2 = vpop.f32.mrf.mxu0 }
 0x502   :  { %v6293_v49 = vpop.f32.mrf.mxu1  ;;  %v18236_v56 = vadd.f32 %v6054_v2, %v5796_v53  ;;  %v13557_v53 = vld [vmem:[%s22633_s3 + $0x694] sm:$0xf]  ;;  %v22962_v2 = vld [vmem:[#allocation75_spill] sm:$0xff] }
 0x503   :  { %v6294_v1 = vadd.f32 %v6293_v49, %v18044_v62  ;;  %v11318_v62 = vor.u32 %v13408_v29, %v11317_v20  ;;  %v5799_v49 = vadd.f32 %v17057_v23, %v22962_v2 }
 0x505   :  { %v18247_v4 = vadd.f32 %v6552_v43, %v6294_v1  ;;  %v18249_v35 = vpop.f32.mrf.mxu3  ;;  %v13533_v43 = vld [vmem:[%s22633_s3 + $0x5d0] sm:$0xf0]  ;;  %v11922_v1 = vor.u32 %v13557_v53, %v11919_v9  ;;  %v18283_v9 = vpop.permute.xlu1 %3560 }
 0x506   :  { %22960 = vst [vmem:[#allocation80_spill] sm:$0xff] %v18249_v35  ;;  %v11814_v20 = vor.u32 %v13533_v43, %v11813_v45  ;;  %v18285_v45 = vpop.permute.xlu0 %3540  ;;  %v22965_v43 = vld [vmem:[#allocation82_spill] sm:$0xff] }
 0x507   :  { %22959 = vst [vmem:[#allocation76_spill] sm:$0xff] %v18247_v4  ;;  %v11871_v4 = vld [vmem:[%s22633_s3 + $0x644] sm:$0xf0]  ;;  %v5801_v2 = vadd.f32 %v17071_v28, %v22965_v43 }
 0x508   :  { %v6562_v7 = vpop.f32.mrf.mxu2  ;;  %v11874_v53 = vor.u32 %v13544_v27, %v11871_v4  ;;  %v18298_v27 = vpop.permute.xlu2 %3620 }
 0x509   :  { %v6057_v29 = vpop.f32.mrf.mxu0 }
 0x50a   :  { %v6296_v35 = vpop.f32.mrf.mxu1  ;;  %6763 = vmatmul.bf16.gmra.mxu3 %v11318_v62  ;;  %v18275_v31 = vadd.f32 %v6057_v29, %v5799_v49 }
 0x50b   :  { %v6297_v34 = vadd.f32 %v6296_v35, %v18077_v16 }
 0x50c   :  { %6096 = vmatmul.bf16.gmra.mxu0 %v11922_v1 }
 0x50d   :  { %v18278_v5 = vadd.f32 %v6555_v6, %v6297_v34  ;;  %6335 = vmatmul.bf16.gmra.mxu1 %v11814_v20  ;;  %v6724_v23 = vpop.f32.mrf.mxu3  ;;  %6604 = vmatmul.bf16.gmra.mxu2 %v11874_v53  ;;  %v11345_v6 = vld [vmem:[%s22633_s3 + $0x208] sm:$0xf]  ;;  %v13564_v20 = vld [vmem:[%s22633_s3 + $0x6cc] sm:$0xf]  ;;  %v11841_v53 = vld [vmem:[%s22633_s3 + $0x5f0] sm:$0xf]  ;;  %v18317_v43 = vpop.permute.xlu1 %3645 }
 0x50e   :  { %v18281_v62 = vadd.f32 %v6724_v23, %v17491_v33  ;;  %v13415_v33 = vld [vmem:[%s22633_s3 + $0x220] sm:$0xf0]  ;;  %v11947_v23 = vld [vmem:[%s22633_s3 + $0x6e4] sm:$0xf0] }
 0x50f   :  { %22963 = vst [vmem:[#allocation78_spill] sm:$0xff] %v18278_v5  ;;  %v11346_v29 = vor.u32 %v13415_v33, %v11345_v6  ;;  %v13551_v33 = vld [vmem:[%s22633_s3 + $0x664] sm:$0xf] }
 0x510   :  { %22964 = vst [vmem:[#allocation83_spill] sm:$0xff] %v18281_v62  ;;  %v6565_v4 = vpop.f32.mrf.mxu2 }
 0x511   :  { %v6059_v49 = vpop.f32.mrf.mxu0 }
 0x512   :  { %v6298_v16 = vpop.f32.mrf.mxu1  ;;  %v18289_v35 = vadd.f32 %v6059_v49, %v5801_v2  ;;  %v22968_v2 = vld [vmem:[#allocation72_spill] sm:$0xff] }
 0x513   :  { %v6299_v34 = vadd.f32 %v6298_v16, %v18086_v11  ;;  %v5804_v49 = vadd.f32 %v17099_v57, %v22968_v2  ;;  %v22971_v2 = vld [vmem:[#allocation71_spill] sm:$0xff] }
 0x515   :  { %v18300_v1 = vadd.f32 %v6557_v61, %v6299_v34  ;;  %v6726_v28 = vpop.f32.mrf.mxu3  ;;  %v13540_v61 = vld [vmem:[%s22633_s3 + $0x608] sm:$0xf0] }
 0x516   :  { %v18306_v11 = vadd.f32 %v6726_v28, %v17507_v52  ;;  %v11950_v52 = vor.u32 %v13564_v20, %v11947_v23  ;;  %v11842_v16 = vor.u32 %v13540_v61, %v11841_v53  ;;  %v11899_v28 = vld [vmem:[%s22633_s3 + $0x67c] sm:$0xf0]  ;;  %v18334_v53 = vpop.permute.xlu2 %3535 }
 0x517   :  { %22966 = vst [vmem:[#allocation77_spill] sm:$0xff] %v18300_v1  ;;  %v18330_v1 = vpop.permute.xlu0 %3625  ;;  %v11902_v23 = vor.u32 %v13551_v33, %v11899_v28  ;;  %v13571_v28 = vld [vmem:[%s22633_s3 + $0x704] sm:$0xf] }
 0x518   :  { %22967 = vst [vmem:[#allocation87_spill] sm:$0xff] %v18306_v11  ;;  %v6567_v57 = vpop.f32.mrf.mxu2 }
 0x519   :  { %v6062_v34 = vpop.f32.mrf.mxu0 }
 0x51a   :  { %v6301_v6 = vpop.f32.mrf.mxu1  ;;  %6768 = vmatmul.bf16.gmra.mxu3 %v11346_v29  ;;  %v18327_v11 = vadd.f32 %v6062_v34, %v5804_v49  ;;  %v5806_v49 = vadd.f32 %v17113_v8, %v22971_v2  ;;  %v11975_v2 = vld [vmem:[%s22633_s3 + $0x71c] sm:$0xf0] }
 0x51b   :  { %v6302_v62 = vadd.f32 %v6301_v6, %v18123_v47 }
 0x51c   :  { %6101 = vmatmul.bf16.gmra.mxu0 %v11950_v52  ;;  %v13422_v52 = vld [vmem:[%s22633_s3 + $0x258] sm:$0xf0] }
 0x51d   :  { %v18332_v20 = vadd.f32 %v6560_v59, %v6302_v62  ;;  %6340 = vmatmul.bf16.gmra.mxu1 %v11842_v16  ;;  %v6729_v29 = vpop.f32.mrf.mxu3  ;;  %6609 = vmatmul.bf16.gmra.mxu2 %v11902_v23  ;;  %v11373_v62 = vld [vmem:[%s22633_s3 + $0x240] sm:$0xf] }
 0x51e   :  { %v18337_v61 = vadd.f32 %v6729_v29, %v17534_v46  ;;  %v18350_v46 = vpop.permute.xlu1 %3630  ;;  %v11374_v23 = vor.u32 %v13422_v52, %v11373_v62  ;;  %v13558_v62 = vld [vmem:[%s22633_s3 + $0x69c] sm:$0xf]  ;;  %v11927_v52 = vld [vmem:[%s22633_s3 + $0x6b4] sm:$0xf0] }
 0x51f   :  { %22969 = vst [vmem:[#allocation69_spill] sm:$0xff] %v18332_v20  ;;  %v18357_v29 = vpop.permute.xlu0 %3610 }
 0x520   :  { %22970 = vst [vmem:[#allocation89_spill] sm:$0xff] %v18337_v61  ;;  %v6570_v16 = vpop.f32.mrf.mxu2 }
 0x521   :  { %v6064_v34 = vpop.f32.mrf.mxu0 }
 0x522   :  { %v6303_v47 = vpop.f32.mrf.mxu1  ;;  %v18341_v6 = vadd.f32 %v6064_v34, %v5806_v49  ;;  %v13547_v49 = vld [vmem:[%s22633_s3 + $0x640] sm:$0xf0]  ;;  %v3521_v34 = vpop.permute.xlu2 %3520 }
 0x523   :  { %v6304_v59 = vadd.f32 %v6303_v47, %v18136_v0  ;;  %v5809_v47 = vadd.f32 %v17138_v12, %v3521_v34 }
 0x525   :  { %v18352_v33 = vadd.f32 %v6562_v7, %v6304_v59  ;;  %v6731_v8 = vpop.f32.mrf.mxu3  ;;  %v11869_v7 = vld [vmem:[%s22633_s3 + $0x628] sm:$0xf]  ;;  %v11978_v59 = vor.u32 %v13571_v28, %v11975_v2  ;;  %v11930_v28 = vor.u32 %v13558_v62, %v11927_v52  ;;  %v12003_v62 = vld [vmem:[%s22633_s3 + $0x754] sm:$0xf0]  ;;  %v11897_v52 = vld [vmem:[%s22633_s3 + $0x660] sm:$0xf] }
 0x526   :  { %v18360_v0 = vadd.f32 %v6731_v8, %v17549_v30  ;;  %v11870_v61 = vor.u32 %v13547_v49, %v11869_v7 }
 0x527   :  { %22972 = vst [vmem:[#allocation74_spill] sm:$0xff] %v18352_v33  ;;  %v3526_v7 = vpop.permute.xlu0 %3525 }
 0x528   :  { %22973 = vst [vmem:[#allocation33_spill] sm:$0xff] %v18360_v0  ;;  %v6572_v20 = vpop.f32.mrf.mxu2  ;;  %v5811_v49 = vadd.f32 %v17150_v55, %v3526_v7  ;;  %v13578_v55 = vld [vmem:[%s22633_s3 + $0x73c] sm:$0xf] }
 0x529   :  { %v6067_v30 = vpop.f32.mrf.mxu0  ;;  %v12006_v7 = vor.u32 %v13578_v55, %v12003_v62  ;;  %v5816_v62 = vadd.f32 %v17192_v58, %v18334_v53  ;;  %v13585_v58 = vld [vmem:[%s22633_s3 + $0x774] sm:$0xf] }
 0x52a   :  { %v6306_v8 = vpop.f32.mrf.mxu1  ;;  %6773 = vmatmul.bf16.gmra.mxu3 %v11374_v23  ;;  %v18378_v0 = vadd.f32 %v6067_v30, %v5809_v47  ;;  %v18383_v23 = vpop.permute.xlu1 %3545 }
 0x52b   :  { %v6307_v33 = vadd.f32 %v6306_v8, %v18173_v14 }
 0x52c   :  { %6106 = vmatmul.bf16.gmra.mxu0 %v11978_v59 }
 0x52d   :  { %v18381_v5 = vadd.f32 %v6565_v4, %v6307_v33  ;;  %6345 = vmatmul.bf16.gmra.mxu1 %v11870_v61  ;;  %v6734_v12 = vpop.f32.mrf.mxu3  ;;  %6614 = vmatmul.bf16.gmra.mxu2 %v11930_v28  ;;  %v11401_v4 = vld [vmem:[%s22633_s3 + $0x278] sm:$0xf]  ;;  %v13429_v61 = vld [vmem:[%s22633_s3 + $0x290] sm:$0xf0] }
 0x52e   :  { %v18386_v2 = vadd.f32 %v6734_v12, %v17576_v40 }
 0x530   :  { %22974 = vst [vmem:[#allocation101_spill] sm:$0xff] %v18386_v2  ;;  %v6575_v40 = vpop.f32.mrf.mxu2 }
 0x531   :  { %v6069_v34 = vpop.f32.mrf.mxu0 }
 0x532   :  { %v6308_v47 = vpop.f32.mrf.mxu1  ;;  %v18389_v30 = vadd.f32 %v6069_v34, %v5811_v49  ;;  %v3531_v12 = vpop.permute.xlu1 %3530 }
 0x533   :  { %v6309_v14 = vadd.f32 %v6308_v47, %v18186_v44  ;;  %v11402_v44 = vor.u32 %v13429_v61, %v11401_v4  ;;  %v5814_v28 = vadd.f32 %v17178_v32, %v3531_v12  ;;  %v13565_v47 = vld [vmem:[%s22633_s3 + $0x6d4] sm:$0xf] }
 0x535   :  { %v18398_v33 = vadd.f32 %v6567_v57, %v6309_v14  ;;  %v6736_v59 = vpop.f32.mrf.mxu3  ;;  %v13554_v57 = vld [vmem:[%s22633_s3 + $0x678] sm:$0xf0]  ;;  %v11955_v14 = vld [vmem:[%s22633_s3 + $0x6ec] sm:$0xf0] }
 0x536   :  { %v18404_v8 = vadd.f32 %v6736_v59, %v17591_v10  ;;  %v11898_v49 = vor.u32 %v13554_v57, %v11897_v52  ;;  %v11958_v55 = vor.u32 %v13565_v47, %v11955_v14  ;;  %v5819_v47 = vadd.f32 %v17221_v54, %v18285_v45 }
 0x538   :  { %22975 = vst [vmem:[#allocation28_spill] sm:$0xff] %v18404_v8  ;;  %v6577_v59 = vpop.f32.mrf.mxu2 }
 0x539   :  { %v6072_v10 = vpop.f32.mrf.mxu0 }
 0x53a   :  { %v6311_v34 = vpop.f32.mrf.mxu1  ;;  %6778 = vmatmul.bf16.gmra.mxu3 %v11402_v44  ;;  %v18422_v4 = vadd.f32 %v6072_v10, %v5814_v28  ;;  %v13436_v28 = vld [vmem:[%s22633_s3 + $0x2c8] sm:$0xf0]  ;;  %v12031_v10 = vld [vmem:[%s22633_s3 + $0x78c] sm:$0xf0] }
 0x53b   :  { %v6312_v61 = vadd.f32 %v6311_v34, %v18223_v38  ;;  %v11925_v34 = vld [vmem:[%s22633_s3 + $0x698] sm:$0xf]  ;;  %v12034_v14 = vor.u32 %v13585_v58, %v12031_v10 }
 0x53c   :  { %6111 = vmatmul.bf16.gmra.mxu0 %v12006_v7 }
 0x53d   :  { %v18425_v8 = vadd.f32 %v6570_v16, %v6312_v61  ;;  %6350 = vmatmul.bf16.gmra.mxu1 %v11898_v49  ;;  %v6739_v32 = vpop.f32.mrf.mxu3  ;;  %6619 = vmatmul.bf16.gmra.mxu2 %v11958_v55  ;;  %v11429_v16 = vld [vmem:[%s22633_s3 + $0x2b0] sm:$0xf]  ;;  %v13572_v55 = vld [vmem:[%s22633_s3 + $0x70c] sm:$0xf] }
 0x53e   :  { %v18428_v44 = vadd.f32 %v6739_v32, %v17618_v22 }
 0x540   :  { %22976 = vst [vmem:[#allocation105_spill] sm:$0xff] %v18428_v44  ;;  %v6580_v22 = vpop.f32.mrf.mxu2 }
 0x541   :  { %v6074_v52 = vpop.f32.mrf.mxu0 }
 0x542   :  { %v6313_v57 = vpop.f32.mrf.mxu1  ;;  %v18432_v12 = vadd.f32 %v6074_v52, %v5816_v62  ;;  %v11983_v62 = vld [vmem:[%s22633_s3 + $0x724] sm:$0xf0] }
 0x543   :  { %v6314_v38 = vadd.f32 %v6313_v57, %v18236_v56  ;;  %v11430_v56 = vor.u32 %v13436_v28, %v11429_v16  ;;  %v11986_v45 = vor.u32 %v13572_v55, %v11983_v62  ;;  %v22981_v55 = vld [vmem:[#allocation21_spill] sm:$0xff] }
 0x544   :  { %v5824_v62 = vadd.f32 %v22981_v55, %v18232_v18  ;;  %v13450_v55 = vld [vmem:[%s22633_s3 + $0x338] sm:$0xf0] }
 0x545   :  { %v18441_v7 = vadd.f32 %v6572_v20, %v6314_v38  ;;  %v6741_v49 = vpop.f32.mrf.mxu3  ;;  %v13561_v20 = vld [vmem:[%s22633_s3 + $0x6b0] sm:$0xf0] }
 0x546   :  { %v18447_v53 = vadd.f32 %v6741_v49, %v17633_v41  ;;  %v11926_v61 = vor.u32 %v13561_v20, %v11925_v34  ;;  %v22979_v49 = vld [vmem:[#allocation19_spill] sm:$0xff] }
 0x547   :  { %v5821_v58 = vadd.f32 %v22979_v49, %v18383_v23  ;;  %v13443_v20 = vld [vmem:[%s22633_s3 + $0x300] sm:$0xf0]  ;;  %v13592_v23 = vld [vmem:[%s22633_s3 + $0x7ac] sm:$0xf] }
 0x548   :  { %22977 = vst [vmem:[#allocation96_spill] sm:$0xff] %v18447_v53  ;;  %v6582_v38 = vpop.f32.mrf.mxu2  ;;  %v13579_v49 = vld [vmem:[%s22633_s3 + $0x744] sm:$0xf]  ;;  %v23067_v53 = vld [vmem:[#allocation64_spill] sm:$0xff] }
 0x549   :  { %v6077_v41 = vpop.f32.mrf.mxu0 }
 0x54a   :  { %v6316_v32 = vpop.f32.mrf.mxu1  ;;  %6783 = vmatmul.bf16.gmra.mxu3 %v11430_v56  ;;  %v18466_v52 = vadd.f32 %v6077_v41, %v5819_v47  ;;  %v12059_v41 = vld [vmem:[%s22633_s3 + $0x7c4] sm:$0xf0] }
 0x54b   :  { %v6317_v57 = vadd.f32 %v6316_v32, %v18275_v31  ;;  %v11953_v32 = vld [vmem:[%s22633_s3 + $0x6d0] sm:$0xf] }
 0x54c   :  { %6116 = vmatmul.bf16.gmra.mxu0 %v12034_v14 }
 0x54d   :  { %v18469_v16 = vadd.f32 %v6575_v40, %v6317_v57  ;;  %6355 = vmatmul.bf16.gmra.mxu1 %v11926_v61  ;;  %v6744_v54 = vpop.f32.mrf.mxu3  ;;  %6624 = vmatmul.bf16.gmra.mxu2 %v11986_v45  ;;  %v11457_v40 = vld [vmem:[%s22633_s3 + $0x2e8] sm:$0xf]  ;;  %v12062_v57 = vor.u32 %v13592_v23, %v12059_v41  ;;  %v22983_v23 = vld [vmem:[#allocation22_spill] sm:$0xff] }
 0x54e   :  { %v18472_v28 = vadd.f32 %v6744_v54, %v17660_v48 }
 0x550   :  { %22978 = vst [vmem:[#allocation100_spill] sm:$0xff] %v18472_v28  ;;  %v6585_v48 = vpop.f32.mrf.mxu2 }
 0x551   :  { %v6079_v56 = vpop.f32.mrf.mxu0 }
 0x552   :  { %v6318_v10 = vpop.f32.mrf.mxu1  ;;  %v18476_v34 = vadd.f32 %v6079_v56, %v5821_v58  ;;  %v12011_v58 = vld [vmem:[%s22633_s3 + $0x75c] sm:$0xf0] }
 0x553   :  { %v6319_v31 = vadd.f32 %v6318_v10, %v18289_v35  ;;  %v11458_v35 = vor.u32 %v13443_v20, %v11457_v40  ;;  %v12014_v20 = vor.u32 %v13579_v49, %v12011_v58  ;;  %v22985_v49 = vld [vmem:[#allocation18_spill] sm:$0xff] }
 0x554   :  { %v5829_v58 = vadd.f32 %v22985_v49, %v18283_v9  ;;  %v13457_v49 = vld [vmem:[%s22633_s3 + $0x370] sm:$0xf0] }
 0x555   :  { %v18485_v47 = vadd.f32 %v6577_v59, %v6319_v31  ;;  %v6746_v14 = vpop.f32.mrf.mxu3  ;;  %v13568_v59 = vld [vmem:[%s22633_s3 + $0x6e8] sm:$0xf0] }
 0x556   :  { %v18491_v61 = vadd.f32 %v6746_v14, %v17675_v36  ;;  %v11954_v54 = vor.u32 %v13568_v59, %v11953_v32 }
 0x558   :  { %22980 = vst [vmem:[#allocation98_spill] sm:$0xff] %v18491_v61  ;;  %v6587_v31 = vpop.f32.mrf.mxu2  ;;  %v23057_v61 = vld [vmem:[#allocation67_spill] sm:$0xff] }
 0x559   :  { %v6082_v36 = vpop.f32.mrf.mxu0 }
 0x55a   :  { %v6321_v45 = vpop.f32.mrf.mxu1  ;;  %6788 = vmatmul.bf16.gmra.mxu3 %v11458_v35  ;;  %v18510_v56 = vadd.f32 %v6082_v36, %v5824_v62  ;;  %v5826_v35 = vadd.f32 %v22983_v23, %v18263_v21  ;;  %v13599_v21 = vld [vmem:[%s22633_s3 + $0x7e4] sm:$0xf]  ;;  %v12087_v36 = vld [vmem:[%s22633_s3 + $0x7fc] sm:$0xf0]  ;;  %v13586_v23 = vld [vmem:[%s22633_s3 + $0x77c] sm:$0xf] }
 0x55b   :  { %v6322_v10 = vadd.f32 %v6321_v45, %v18327_v11  ;;  %v11981_v45 = vld [vmem:[%s22633_s3 + $0x708] sm:$0xf] }
 0x55c   :  { %6121 = vmatmul.bf16.gmra.mxu0 %v12062_v57 }
 0x55d   :  { %v18513_v40 = vadd.f32 %v6580_v22, %v6322_v10  ;;  %6360 = vmatmul.bf16.gmra.mxu1 %v11954_v54  ;;  %v6749_v18 = vpop.f32.mrf.mxu3  ;;  %6629 = vmatmul.bf16.gmra.mxu2 %v12014_v20  ;;  %v11485_v22 = vld [vmem:[%s22633_s3 + $0x320] sm:$0xf]  ;;  %v12090_v10 = vor.u32 %v13599_v21, %v12087_v36 }
 0x55e   :  { %v18516_v14 = vadd.f32 %v6749_v18, %v17702_v39  ;;  %v22987_v21 = vld [vmem:[#allocation27_spill] sm:$0xff] }
 0x560   :  { %22982 = vst [vmem:[#allocation99_spill] sm:$0xff] %v18516_v14  ;;  %v6590_v39 = vpop.f32.mrf.mxu2 }
 0x561   :  { %v6084_v41 = vpop.f32.mrf.mxu0 }
 0x562   :  { %v6323_v32 = vpop.f32.mrf.mxu1  ;;  %v18520_v59 = vadd.f32 %v6084_v41, %v5826_v35  ;;  %v12039_v35 = vld [vmem:[%s22633_s3 + $0x794] sm:$0xf0] }
 0x563   :  { %v6324_v11 = vadd.f32 %v6323_v32, %v18341_v6  ;;  %v11486_v6 = vor.u32 %v13450_v55, %v11485_v22  ;;  %v12042_v55 = vor.u32 %v13586_v23, %v12039_v35  ;;  %v22989_v23 = vld [vmem:[#allocation13_spill] sm:$0xff] }
 0x564   :  { %v5834_v35 = vadd.f32 %v22989_v23, %v18161_v26 }
 0x565   :  { %v18529_v62 = vadd.f32 %v6582_v38, %v6324_v11  ;;  %v6751_v57 = vpop.f32.mrf.mxu3  ;;  %v13575_v38 = vld [vmem:[%s22633_s3 + $0x720] sm:$0xf0] }
 0x566   :  { %v18535_v54 = vadd.f32 %v6751_v57, %v17717_v63  ;;  %v11982_v18 = vor.u32 %v13575_v38, %v11981_v45 }
 0x568   :  { %22984 = vst [vmem:[#allocation30_spill] sm:$0xff] %v18535_v54  ;;  %v6592_v11 = vpop.f32.mrf.mxu2 }
 0x569   :  { %v6087_v63 = vpop.f32.mrf.mxu0 }
 0x56a   :  { %v6326_v20 = vpop.f32.mrf.mxu1  ;;  %6793 = vmatmul.bf16.gmra.mxu3 %v11486_v6  ;;  %v18554_v41 = vadd.f32 %v6087_v63, %v5829_v58  ;;  %v5831_v6 = vadd.f32 %v22987_v21, %v18195_v25  ;;  %v13606_v25 = vld [vmem:[%s22633_s3 + $0x81c] sm:$0xf]  ;;  %v12115_v63 = vld [vmem:[%s22633_s3 + $0x834] sm:$0xf0]  ;;  %v13593_v21 = vld [vmem:[%s22633_s3 + $0x7b4] sm:$0xf] }
 0x56b   :  { %v6327_v32 = vadd.f32 %v6326_v20, %v18378_v0  ;;  %v12009_v20 = vld [vmem:[%s22633_s3 + $0x740] sm:$0xf] }
 0x56c   :  { %6126 = vmatmul.bf16.gmra.mxu0 %v12090_v10 }
 0x56d   :  { %v18557_v22 = vadd.f32 %v6585_v48, %v6327_v32  ;;  %6365 = vmatmul.bf16.gmra.mxu1 %v11982_v18  ;;  %v6754_v9 = vpop.f32.mrf.mxu3  ;;  %6634 = vmatmul.bf16.gmra.mxu2 %v12042_v55  ;;  %v11513_v48 = vld [vmem:[%s22633_s3 + $0x358] sm:$0xf]  ;;  %v12118_v32 = vor.u32 %v13606_v25, %v12115_v63  ;;  %v5836_v25 = vadd.f32 %v17359_v50, %v18245_v37  ;;  %v13613_v50 = vld [vmem:[%s22633_s3 + $0x854] sm:$0xf] }
 0x56e   :  { %v18560_v57 = vadd.f32 %v6754_v9, %v17744_v42 }
 0x570   :  { %22986 = vst [vmem:[#allocation97_spill] sm:$0xff] %v18560_v57  ;;  %v6595_v42 = vpop.f32.mrf.mxu2 }
 0x571   :  { %v6089_v36 = vpop.f32.mrf.mxu0 }
 0x572   :  { %v6328_v45 = vpop.f32.mrf.mxu1  ;;  %v18564_v38 = vadd.f32 %v6089_v36, %v5831_v6  ;;  %v12067_v6 = vld [vmem:[%s22633_s3 + $0x7cc] sm:$0xf0] }
 0x573   :  { %v6329_v0 = vadd.f32 %v6328_v45, %v18389_v30  ;;  %v11514_v30 = vor.u32 %v13457_v49, %v11513_v48  ;;  %v12070_v49 = vor.u32 %v13593_v21, %v12067_v6 }
 0x575   :  { %v18573_v58 = vadd.f32 %v6587_v31, %v6329_v0  ;;  %v6756_v10 = vpop.f32.mrf.mxu3  ;;  %v13582_v31 = vld [vmem:[%s22633_s3 + $0x758] sm:$0xf0] }
 0x576   :  { %v18579_v18 = vadd.f32 %v6756_v10, %v17759_v51  ;;  %v12010_v9 = vor.u32 %v13582_v31, %v12009_v20  ;;  %v13464_v31 = vld [vmem:[%s22633_s3 + $0x3a8] sm:$0xf0] }
 0x578   :  { %22988 = vst [vmem:[#allocation25_spill] sm:$0xff] %v18579_v18  ;;  %v6597_v0 = vpop.f32.mrf.mxu2 }
 0x579   :  { %v6092_v51 = vpop.f32.mrf.mxu0 }
 0x57a   :  { %v6331_v55 = vpop.f32.mrf.mxu1  ;;  %6798 = vmatmul.bf16.gmra.mxu3 %v11514_v30  ;;  %v18598_v36 = vadd.f32 %v6092_v51, %v5834_v35  ;;  %v5839_v51 = vadd.f32 %v17395_v24, %v18113_v15 }
 0x57b   :  { %v6332_v45 = vadd.f32 %v6331_v55, %v18422_v4 }
 0x57c   :  { %6131 = vmatmul.bf16.gmra.mxu0 %v12118_v32  ;;  %v12143_v32 = vld [vmem:[%s22633_s3 + $0x86c] sm:$0xf0] }
 0x57d   :  { %v18601_v48 = vadd.f32 %v6590_v39, %v6332_v45  ;;  %6370 = vmatmul.bf16.gmra.mxu1 %v12010_v9  ;;  %v6759_v26 = vpop.f32.mrf.mxu3  ;;  %6639 = vmatmul.bf16.gmra.mxu2 %v12070_v49  ;;  %v11541_v39 = vld [vmem:[%s22633_s3 + $0x390] sm:$0xf]  ;;  %v12037_v9 = vld [vmem:[%s22633_s3 + $0x778] sm:$0xf]  ;;  %v12146_v55 = vor.u32 %v13613_v50, %v12143_v32  ;;  %v13600_v45 = vld [vmem:[%s22633_s3 + $0x7ec] sm:$0xf] }
 0x57e   :  { %v18604_v10 = vadd.f32 %v6759_v26, %v17786_v17  ;;  %v12095_v26 = vld [vmem:[%s22633_s3 + $0x804] sm:$0xf0] }
 0x57f   :  { %v12098_v15 = vor.u32 %v13600_v45, %v12095_v26 }
 0x580   :  { %22990 = vst [vmem:[#allocation31_spill] sm:$0xff] %v18604_v10  ;;  %v6600_v17 = vpop.f32.mrf.mxu2 }
 0x581   :  { %v6094_v30 = vpop.f32.mrf.mxu0 }
 0x582   :  { %v6333_v63 = vpop.f32.mrf.mxu1  ;;  %v18608_v20 = vadd.f32 %v6094_v30, %v5836_v25 }
 0x583   :  { %v6334_v4 = vadd.f32 %v6333_v63, %v18432_v12  ;;  %v11542_v12 = vor.u32 %v13464_v31, %v11541_v39  ;;  %v5841_v39 = vadd.f32 %v17410_v3, %v18130_v60  ;;  %v13620_v3 = vld [vmem:[%s22633_s3 + $0x88c] sm:$0xf] }
 0x584   :  { %v22993_v60 = vld [vmem:[#allocation44_spill] sm:$0xff] }
 0x585   :  { %v18617_v23 = vadd.f32 %v6592_v11, %v6334_v4  ;;  %v6761_v35 = vpop.f32.mrf.mxu3  ;;  %v13589_v11 = vld [vmem:[%s22633_s3 + $0x790] sm:$0xf0] }
 0x586   :  { %v18623_v37 = vadd.f32 %v6761_v35, %v17801_v13  ;;  %v12038_v21 = vor.u32 %v13589_v11, %v12037_v9 }
 0x588   :  { %22991 = vst [vmem:[#allocation102_spill] sm:$0xff] %v18623_v37  ;;  %v6602_v30 = vpop.f32.mrf.mxu2 }
 0x589   :  { %v6097_v13 = vpop.f32.mrf.mxu0 }
 0x58a   :  { %v6336_v6 = vpop.f32.mrf.mxu1  ;;  %6803 = vmatmul.bf16.gmra.mxu3 %v11542_v12  ;;  %v18642_v49 = vadd.f32 %v6097_v13, %v5839_v51  ;;  %v13471_v12 = vld [vmem:[%s22633_s3 + $0x3e0] sm:$0xf0]  ;;  %v12171_v51 = vld [vmem:[%s22633_s3 + $0x8a4] sm:$0xf0] }
 0x58b   :  { %v6337_v25 = vadd.f32 %v6336_v6, %v18466_v52  ;;  %v22996_v13 = vld [vmem:[#allocation24_spill] sm:$0xff]  ;;  %v12174_v45 = vor.u32 %v13620_v3, %v12171_v51  ;;  %v18691_v3 = vpop.permute.xlu1 %3615  ;;  %v22999_v51 = vld [vmem:[#allocation103_spill] sm:$0xff] }
 0x58c   :  { %6136 = vmatmul.bf16.gmra.mxu0 %v12146_v55  ;;  %v12065_v55 = vld [vmem:[%s22633_s3 + $0x7b0] sm:$0xf] }
 0x58d   :  { %v18645_v63 = vadd.f32 %v6595_v42, %v6337_v25  ;;  %6375 = vmatmul.bf16.gmra.mxu1 %v12038_v21  ;;  %v6764_v24 = vpop.f32.mrf.mxu3  ;;  %6644 = vmatmul.bf16.gmra.mxu2 %v12098_v15  ;;  %v11569_v42 = vld [vmem:[%s22633_s3 + $0x3c8] sm:$0xf]  ;;  %v13607_v15 = vld [vmem:[%s22633_s3 + $0x824] sm:$0xf] }
 0x58e   :  { %v18648_v4 = vadd.f32 %v6764_v24, %v17828_v19  ;;  %v22995_v21 = vld [vmem:[#allocation104_spill] sm:$0xff] }
 0x58f   :  { %v5844_v6 = vadd.f32 %v22996_v13, %v22995_v21 }
 0x590   :  { %22992 = vst [vmem:[#allocation91_spill] sm:$0xff] %v18648_v4  ;;  %v6605_v19 = vpop.f32.mrf.mxu2 }
 0x591   :  { %v6099_v31 = vpop.f32.mrf.mxu0 }
 0x592   :  { %v6338_v35 = vpop.f32.mrf.mxu1  ;;  %v18652_v50 = vadd.f32 %v6099_v31, %v5841_v39  ;;  %v12123_v39 = vld [vmem:[%s22633_s3 + $0x83c] sm:$0xf0] }
 0x593   :  { %v6339_v52 = vadd.f32 %v6338_v35, %v18476_v34  ;;  %v11570_v34 = vor.u32 %v13471_v12, %v11569_v42 }
 0x595   :  { %v18661_v32 = vadd.f32 %v6597_v0, %v6339_v52  ;;  %v6766_v9 = vpop.f32.mrf.mxu3  ;;  %v13596_v0 = vld [vmem:[%s22633_s3 + $0x7c8] sm:$0xf0] }
 0x596   :  { %v18667_v11 = vadd.f32 %v6766_v9, %v22993_v60  ;;  %v12066_v26 = vor.u32 %v13596_v0, %v12065_v55  ;;  %v12126_v9 = vor.u32 %v13607_v15, %v12123_v39  ;;  %v22997_v60 = vld [vmem:[#allocation51_spill] sm:$0xff] }
 0x597   :  { %v23000_v55 = vld [vmem:[#allocation15_spill] sm:$0xff] }
 0x598   :  { %22994 = vst [vmem:[#allocation106_spill] sm:$0xff] %v18667_v11  ;;  %v6607_v52 = vpop.f32.mrf.mxu2  ;;  %v5846_v0 = vadd.f32 %v23000_v55, %v22999_v51  ;;  %v13627_v15 = vld [vmem:[%s22633_s3 + $0x8c4] sm:$0xf]  ;;  %v23003_v51 = vld [vmem:[#allocation16_spill] sm:$0xff] }
 0x599   :  { %v6102_v25 = vpop.f32.mrf.mxu0  ;;  %v23001_v39 = vld [vmem:[#allocation43_spill] sm:$0xff] }
 0x59a   :  { %v6341_v24 = vpop.f32.mrf.mxu1  ;;  %6808 = vmatmul.bf16.gmra.mxu3 %v11570_v34  ;;  %v18686_v31 = vadd.f32 %v6102_v25, %v5844_v6  ;;  %v12319_v11 = vld [vmem:[%s22633_s3 + $0x9c4] sm:$0xf0] }
 0x59b   :  { %v6342_v35 = vadd.f32 %v6341_v24, %v18510_v56 }
 0x59c   :  { %6141 = vmatmul.bf16.gmra.mxu0 %v12174_v45  ;;  %v13478_v45 = vld [vmem:[%s22633_s3 + $0x418] sm:$0xf0] }
 0x59d   :  { %v18689_v42 = vadd.f32 %v6600_v17, %v6342_v35  ;;  %6380 = vmatmul.bf16.gmra.mxu1 %v12066_v26  ;;  %v6769_v12 = vpop.f32.mrf.mxu3  ;;  %6649 = vmatmul.bf16.gmra.mxu2 %v12126_v9  ;;  %v11597_v17 = vld [vmem:[%s22633_s3 + $0x400] sm:$0xf]  ;;  %v12093_v9 = vld [vmem:[%s22633_s3 + $0x7e8] sm:$0xf] }
 0x59e   :  { %v18694_v34 = vadd.f32 %v6769_v12, %v22997_v60  ;;  %v12199_v12 = vld [vmem:[%s22633_s3 + $0x8dc] sm:$0xf0]  ;;  %v3601_v60 = vpop.permute.xlu1 %3600 }
 0x59f   :  { %v5849_v55 = vadd.f32 %v23003_v51, %v3601_v60  ;;  %v23006_v60 = vld [vmem:[#allocation17_spill] sm:$0xff] }
 0x5a0   :  { %22998 = vst [vmem:[#allocation35_spill] sm:$0xff] %v18694_v34  ;;  %v6610_v26 = vpop.f32.mrf.mxu2  ;;  %v23047_v34 = vld [vmem:[#allocation61_spill] sm:$0xff] }
 0x5a1   :  { %v6104_v21 = vpop.f32.mrf.mxu0 }
 0x5a2   :  { %v6343_v13 = vpop.f32.mrf.mxu1  ;;  %v18698_v6 = vadd.f32 %v6104_v21, %v5846_v0  ;;  %v12202_v0 = vor.u32 %v13627_v15, %v12199_v12 }
 0x5a3   :  { %v6344_v56 = vadd.f32 %v6343_v13, %v18520_v59  ;;  %v11598_v59 = vor.u32 %v13478_v45, %v11597_v17  ;;  %v13614_v17 = vld [vmem:[%s22633_s3 + $0x85c] sm:$0xf]  ;;  %v12151_v45 = vld [vmem:[%s22633_s3 + $0x874] sm:$0xf0] }
 0x5a4   :  { %v12154_v12 = vor.u32 %v13614_v17, %v12151_v45  ;;  %v13634_v17 = vld [vmem:[%s22633_s3 + $0x8fc] sm:$0xf] }
 0x5a5   :  { %v18707_v25 = vadd.f32 %v6602_v30, %v6344_v56  ;;  %v6771_v24 = vpop.f32.mrf.mxu3  ;;  %v13603_v30 = vld [vmem:[%s22633_s3 + $0x800] sm:$0xf0] }
 0x5a6   :  { %v18713_v35 = vadd.f32 %v6771_v24, %v23001_v39  ;;  %v12094_v21 = vor.u32 %v13603_v30, %v12093_v9  ;;  %v3606_v30 = vpop.permute.xlu2 %3605 }
 0x5a7   :  { %v5851_v51 = vadd.f32 %v23006_v60, %v3606_v30 }
 0x5a8   :  { %23002 = vst [vmem:[#allocation107_spill] sm:$0xff] %v18713_v35  ;;  %v6612_v37 = vpop.f32.mrf.mxu2 }
 0x5a9   :  { %v6107_v13 = vpop.f32.mrf.mxu0 }
 0x5aa   :  { %v6346_v56 = vpop.f32.mrf.mxu1  ;;  %6813 = vmatmul.bf16.gmra.mxu3 %v11598_v59  ;;  %v18731_v24 = vadd.f32 %v6107_v13, %v5849_v55  ;;  %v23004_v59 = vld [vmem:[#allocation46_spill] sm:$0xff] }
 0x5ab   :  { %v6347_v39 = vadd.f32 %v6346_v56, %v18554_v41 }
 0x5ac   :  { %6146 = vmatmul.bf16.gmra.mxu0 %v12202_v0  ;;  %v13485_v0 = vld [vmem:[%s22633_s3 + $0x450] sm:$0xf0] }
 0x5ad   :  { %v18734_v10 = vadd.f32 %v6605_v19, %v6347_v39  ;;  %6385 = vmatmul.bf16.gmra.mxu1 %v12094_v21  ;;  %v6774_v15 = vpop.f32.mrf.mxu3  ;;  %6654 = vmatmul.bf16.gmra.mxu2 %v12154_v12  ;;  %v11625_v19 = vld [vmem:[%s22633_s3 + $0x438] sm:$0xf]  ;;  %v12121_v39 = vld [vmem:[%s22633_s3 + $0x820] sm:$0xf] }
 0x5ae   :  { %v18737_v9 = vadd.f32 %v6774_v15, %v23004_v59  ;;  %v23009_v15 = vld [vmem:[#allocation37_spill] sm:$0xff]  ;;  %v18955_v14 = vpop.permute.xlu2 %3740 }
 0x5af   :  { %v5854_v12 = vadd.f32 %v23009_v15, %v18357_v29 }
 0x5b0   :  { %23005 = vst [vmem:[#allocation88_spill] sm:$0xff] %v18737_v9  ;;  %v6615_v21 = vpop.f32.mrf.mxu2 }
 0x5b1   :  { %v6109_v18 = vpop.f32.mrf.mxu0 }
 0x5b2   :  { %v6348_v57 = vpop.f32.mrf.mxu1  ;;  %v18740_v55 = vadd.f32 %v6109_v18, %v5851_v51  ;;  %v23007_v18 = vld [vmem:[#allocation63_spill] sm:$0xff] }
 0x5b3   :  { %v6349_v41 = vadd.f32 %v6348_v57, %v18564_v38  ;;  %v11626_v57 = vor.u32 %v13485_v0, %v11625_v19  ;;  %v12227_v38 = vld [vmem:[%s22633_s3 + $0x914] sm:$0xf0]  ;;  %v12179_v19 = vld [vmem:[%s22633_s3 + $0x8ac] sm:$0xf0] }
 0x5b4   :  { %v12230_v59 = vor.u32 %v13634_v17, %v12227_v38 }
 0x5b5   :  { %v18749_v13 = vadd.f32 %v6607_v52, %v6349_v41  ;;  %v6776_v56 = vpop.f32.mrf.mxu3  ;;  %v13610_v52 = vld [vmem:[%s22633_s3 + $0x838] sm:$0xf0]  ;;  %v13621_v41 = vld [vmem:[%s22633_s3 + $0x894] sm:$0xf] }
 0x5b6   :  { %v18755_v45 = vadd.f32 %v6776_v56, %v23007_v18  ;;  %v12122_v30 = vor.u32 %v13610_v52, %v12121_v39  ;;  %v12182_v17 = vor.u32 %v13621_v41, %v12179_v19  ;;  %v23012_v39 = vld [vmem:[#allocation39_spill] sm:$0xff]  ;;  %v23013_v41 = vld [vmem:[#allocation57_spill] sm:$0xff] }
 0x5b7   :  { %v5856_v52 = vadd.f32 %v23012_v39, %v18691_v3  ;;  %v13641_v3 = vld [vmem:[%s22633_s3 + $0x934] sm:$0xf] }
 0x5b8   :  { %23008 = vst [vmem:[#allocation108_spill] sm:$0xff] %v18755_v45  ;;  %v6617_v18 = vpop.f32.mrf.mxu2 }
 0x5b9   :  { %v6112_v60 = vpop.f32.mrf.mxu0 }
 0x5ba   :  { %v6351_v51 = vpop.f32.mrf.mxu1  ;;  %6818 = vmatmul.bf16.gmra.mxu3 %v11626_v57  ;;  %v18774_v0 = vadd.f32 %v6112_v60, %v5854_v12  ;;  %v23010_v57 = vld [vmem:[#allocation58_spill] sm:$0xff] }
 0x5bb   :  { %v6352_v56 = vadd.f32 %v6351_v51, %v18598_v36 }
 0x5bc   :  { %6151 = vmatmul.bf16.gmra.mxu0 %v12230_v59  ;;  %v13492_v59 = vld [vmem:[%s22633_s3 + $0x488] sm:$0xf0] }
 0x5bd   :  { %v18777_v45 = vadd.f32 %v6610_v26, %v6352_v56  ;;  %6390 = vmatmul.bf16.gmra.mxu1 %v12122_v30  ;;  %v6779_v29 = vpop.f32.mrf.mxu3  ;;  %6659 = vmatmul.bf16.gmra.mxu2 %v12182_v17  ;;  %v11653_v26 = vld [vmem:[%s22633_s3 + $0x470] sm:$0xf]  ;;  %v12149_v56 = vld [vmem:[%s22633_s3 + $0x858] sm:$0xf] }
 0x5be   :  { %v18780_v38 = vadd.f32 %v6779_v29, %v23010_v57  ;;  %v23015_v29 = vld [vmem:[#allocation66_spill] sm:$0xff] }
 0x5bf   :  { %v5859_v17 = vadd.f32 %v23015_v29, %v18298_v27 }
 0x5c0   :  { %23011 = vst [vmem:[#allocation34_spill] sm:$0xff] %v18780_v38  ;;  %v6620_v30 = vpop.f32.mrf.mxu2 }
 0x5c1   :  { %v6114_v15 = vpop.f32.mrf.mxu0 }
 0x5c2   :  { %v6353_v9 = vpop.f32.mrf.mxu1  ;;  %v18784_v12 = vadd.f32 %v6114_v15, %v5856_v52 }
 0x5c3   :  { %v6354_v36 = vadd.f32 %v6353_v9, %v18608_v20  ;;  %v11654_v20 = vor.u32 %v13492_v59, %v11653_v26  ;;  %v12255_v9 = vld [vmem:[%s22633_s3 + $0x94c] sm:$0xf0]  ;;  %v12207_v26 = vld [vmem:[%s22633_s3 + $0x8e4] sm:$0xf0] }
 0x5c4   :  { %v12258_v57 = vor.u32 %v13641_v3, %v12255_v9 }
 0x5c5   :  { %v18793_v60 = vadd.f32 %v6612_v37, %v6354_v36  ;;  %v6781_v51 = vpop.f32.mrf.mxu3  ;;  %v13617_v37 = vld [vmem:[%s22633_s3 + $0x870] sm:$0xf0]  ;;  %v13628_v36 = vld [vmem:[%s22633_s3 + $0x8cc] sm:$0xf] }
 0x5c6   :  { %v18799_v19 = vadd.f32 %v6781_v51, %v23013_v41  ;;  %v12150_v39 = vor.u32 %v13617_v37, %v12149_v56  ;;  %v12210_v3 = vor.u32 %v13628_v36, %v12207_v26  ;;  %v23019_v56 = vld [vmem:[#allocation20_spill] sm:$0xff] }
 0x5c7   :  { %v5861_v37 = vadd.f32 %v23019_v56, %v18330_v1  ;;  %v13648_v1 = vld [vmem:[%s22633_s3 + $0x96c] sm:$0xf] }
 0x5c8   :  { %23014 = vst [vmem:[#allocation109_spill] sm:$0xff] %v18799_v19  ;;  %v6622_v41 = vpop.f32.mrf.mxu2  ;;  %v23021_v36 = vld [vmem:[#allocation60_spill] sm:$0xff] }
 0x5c9   :  { %v6117_v52 = vpop.f32.mrf.mxu0 }
 0x5ca   :  { %v6356_v15 = vpop.f32.mrf.mxu1  ;;  %6823 = vmatmul.bf16.gmra.mxu3 %v11654_v20  ;;  %v18818_v59 = vadd.f32 %v6117_v52, %v5859_v17  ;;  %v23017_v20 = vld [vmem:[#allocation53_spill] sm:$0xff] }
 0x5cb   :  { %v6357_v51 = vadd.f32 %v6356_v15, %v18642_v49 }
 0x5cc   :  { %6156 = vmatmul.bf16.gmra.mxu0 %v12258_v57  ;;  %v13499_v57 = vld [vmem:[%s22633_s3 + $0x4c0] sm:$0xf0] }
 0x5cd   :  { %v18821_v19 = vadd.f32 %v6615_v21, %v6357_v51  ;;  %6395 = vmatmul.bf16.gmra.mxu1 %v12150_v39  ;;  %v6784_v27 = vpop.f32.mrf.mxu3  ;;  %6664 = vmatmul.bf16.gmra.mxu2 %v12210_v3  ;;  %v11681_v21 = vld [vmem:[%s22633_s3 + $0x4a8] sm:$0xf]  ;;  %v12177_v51 = vld [vmem:[%s22633_s3 + $0x890] sm:$0xf] }
 0x5ce   :  { %v18824_v9 = vadd.f32 %v6784_v27, %v23017_v20  ;;  %v23023_v27 = vld [vmem:[#allocation40_spill] sm:$0xff] }
 0x5cf   :  { %23016 = vst [vmem:[#allocation86_spill] sm:$0xff] %v18821_v19  ;;  %v5864_v3 = vadd.f32 %v23023_v27, %v18350_v46 }
 0x5d0   :  { %23018 = vst [vmem:[#allocation85_spill] sm:$0xff] %v18824_v9  ;;  %v6625_v39 = vpop.f32.mrf.mxu2 }
 0x5d1   :  { %v6119_v29 = vpop.f32.mrf.mxu0 }
 0x5d2   :  { %v6358_v38 = vpop.f32.mrf.mxu1  ;;  %v18828_v17 = vadd.f32 %v6119_v29, %v5861_v37 }
 0x5d3   :  { %v6359_v49 = vadd.f32 %v6358_v38, %v18652_v50  ;;  %v11682_v50 = vor.u32 %v13499_v57, %v11681_v21  ;;  %v12283_v38 = vld [vmem:[%s22633_s3 + $0x984] sm:$0xf0]  ;;  %v12235_v21 = vld [vmem:[%s22633_s3 + $0x91c] sm:$0xf0] }
 0x5d4   :  { %v12286_v20 = vor.u32 %v13648_v1, %v12283_v38 }
 0x5d5   :  { %v18837_v52 = vadd.f32 %v6617_v18, %v6359_v49  ;;  %v6786_v15 = vpop.f32.mrf.mxu3  ;;  %v13624_v18 = vld [vmem:[%s22633_s3 + $0x8a8] sm:$0xf0]  ;;  %v13635_v49 = vld [vmem:[%s22633_s3 + $0x904] sm:$0xf] }
 0x5d6   :  { %v18843_v26 = vadd.f32 %v6786_v15, %v23021_v36  ;;  %v12178_v56 = vor.u32 %v13624_v18, %v12177_v51  ;;  %v12238_v1 = vor.u32 %v13635_v49, %v12235_v21  ;;  %v23027_v51 = vld [vmem:[#allocation79_spill] sm:$0xff] }
 0x5d7   :  { %23020 = vst [vmem:[#allocation75_spill] sm:$0xff] %v18837_v52  ;;  %v23028_v18 = vld [vmem:[#allocation7_spill] sm:$0xff] }
 0x5d8   :  { %23022 = vst [vmem:[#allocation82_spill] sm:$0xff] %v18843_v26  ;;  %v6627_v36 = vpop.f32.mrf.mxu2  ;;  %v5866_v27 = vadd.f32 %v23028_v18, %v23027_v51  ;;  %v13655_v49 = vld [vmem:[%s22633_s3 + $0x9a4] sm:$0xf] }
 0x5d9   :  { %v6122_v37 = vpop.f32.mrf.mxu0 }
 0x5da   :  { %v6361_v29 = vpop.f32.mrf.mxu1  ;;  %6828 = vmatmul.bf16.gmra.mxu3 %v11682_v50  ;;  %v18862_v57 = vadd.f32 %v6122_v37, %v5864_v3  ;;  %v23025_v50 = vld [vmem:[#allocation55_spill] sm:$0xff] }
 0x5db   :  { %v6362_v15 = vadd.f32 %v6361_v29, %v18686_v31 }
 0x5dc   :  { %6161 = vmatmul.bf16.gmra.mxu0 %v12286_v20  ;;  %v13506_v20 = vld [vmem:[%s22633_s3 + $0x4f8] sm:$0xf0] }
 0x5dd   :  { %v18865_v26 = vadd.f32 %v6620_v30, %v6362_v15  ;;  %6400 = vmatmul.bf16.gmra.mxu1 %v12178_v56  ;;  %v6789_v46 = vpop.f32.mrf.mxu3  ;;  %6669 = vmatmul.bf16.gmra.mxu2 %v12238_v1  ;;  %v11709_v30 = vld [vmem:[%s22633_s3 + $0x4e0] sm:$0xf]  ;;  %v12205_v15 = vld [vmem:[%s22633_s3 + $0x8c8] sm:$0xf] }
 0x5de   :  { %v18868_v38 = vadd.f32 %v6789_v46, %v23025_v50  ;;  %v23032_v46 = vld [vmem:[#allocation90_spill] sm:$0xff]  ;;  %v23033_v1 = vld [vmem:[#allocation11_spill] sm:$0xff] }
 0x5df   :  { %23024 = vst [vmem:[#allocation72_spill] sm:$0xff] %v18865_v26  ;;  %v5869_v50 = vadd.f32 %v23033_v1, %v23032_v46 }
 0x5e0   :  { %23026 = vst [vmem:[#allocation71_spill] sm:$0xff] %v18868_v38  ;;  %v6630_v56 = vpop.f32.mrf.mxu2 }
 0x5e1   :  { %v6124_v9 = vpop.f32.mrf.mxu0 }
 0x5e2   :  { %v6363_v35 = vpop.f32.mrf.mxu1  ;;  %v18872_v3 = vadd.f32 %v6124_v9, %v5866_v27  ;;  %v23030_v9 = vld [vmem:[#allocation54_spill] sm:$0xff] }
 0x5e3   :  { %v6364_v31 = vadd.f32 %v6363_v35, %v18698_v6  ;;  %v11710_v6 = vor.u32 %v13506_v20, %v11709_v30  ;;  %v12311_v35 = vld [vmem:[%s22633_s3 + $0x9bc] sm:$0xf0]  ;;  %v13642_v30 = vld [vmem:[%s22633_s3 + $0x93c] sm:$0xf]  ;;  %v12263_v20 = vld [vmem:[%s22633_s3 + $0x954] sm:$0xf0] }
 0x5e4   :  { %v12314_v51 = vor.u32 %v13655_v49, %v12311_v35  ;;  %v12266_v35 = vor.u32 %v13642_v30, %v12263_v20  ;;  %v13662_v30 = vld [vmem:[%s22633_s3 + $0x9dc] sm:$0xf]  ;;  %v23039_v20 = vld [vmem:[#allocation45_spill] sm:$0xff] }
 0x5e5   :  { %v18881_v37 = vadd.f32 %v6622_v41, %v6364_v31  ;;  %v6791_v29 = vpop.f32.mrf.mxu3  ;;  %v13631_v41 = vld [vmem:[%s22633_s3 + $0x8e0] sm:$0xf0] }
 0x5e6   :  { %v18887_v21 = vadd.f32 %v6791_v29, %v23030_v9  ;;  %v12206_v18 = vor.u32 %v13631_v41, %v12205_v15  ;;  %v23037_v41 = vld [vmem:[#allocation10_spill] sm:$0xff] }
 0x5e7   :  { %23029 = vst [vmem:[#allocation19_spill] sm:$0xff] %v18881_v37  ;;  %v5871_v46 = vadd.f32 %v23037_v41, %v18317_v43  ;;  %v23066_v37 = vld [vmem:[#allocation65_spill] sm:$0xff] }
 0x5e8   :  { %23031 = vst [vmem:[#allocation21_spill] sm:$0xff] %v18887_v21  ;;  %v6632_v21 = vpop.f32.mrf.mxu2 }
 0x5e9   :  { %v6127_v27 = vpop.f32.mrf.mxu0 }
 0x5ea   :  { %v6366_v31 = vpop.f32.mrf.mxu1  ;;  %6833 = vmatmul.bf16.gmra.mxu3 %v11710_v6  ;;  %v18906_v29 = vadd.f32 %v6127_v27, %v5869_v50  ;;  %v23035_v6 = vld [vmem:[#allocation50_spill] sm:$0xff]  ;;  %v18925_v27 = vpop.permute.xlu1 %3755 }
 0x5eb   :  { %v6367_v9 = vadd.f32 %v6366_v31, %v18731_v24 }
 0x5ec   :  { %6166 = vmatmul.bf16.gmra.mxu0 %v12314_v51  ;;  %v13513_v51 = vld [vmem:[%s22633_s3 + $0x530] sm:$0xf0] }
 0x5ed   :  { %v18909_v38 = vadd.f32 %v6625_v39, %v6367_v9  ;;  %6405 = vmatmul.bf16.gmra.mxu1 %v12206_v18  ;;  %v6794_v49 = vpop.f32.mrf.mxu3  ;;  %6674 = vmatmul.bf16.gmra.mxu2 %v12266_v35  ;;  %v11737_v39 = vld [vmem:[%s22633_s3 + $0x518] sm:$0xf] }
 0x5ee   :  { %v18912_v15 = vadd.f32 %v6794_v49, %v23035_v6  ;;  %v12339_v9 = vld [vmem:[%s22633_s3 + $0x9f4] sm:$0xf0]  ;;  %v12233_v49 = vld [vmem:[%s22633_s3 + $0x900] sm:$0xf] }
 0x5ef   :  { %23034 = vst [vmem:[#allocation22_spill] sm:$0xff] %v18909_v38  ;;  %v23041_v35 = vld [vmem:[#allocation94_spill] sm:$0xff] }
 0x5f0   :  { %23036 = vst [vmem:[#allocation18_spill] sm:$0xff] %v18912_v15  ;;  %v6635_v18 = vpop.f32.mrf.mxu2  ;;  %v23042_v6 = vld [vmem:[#allocation14_spill] sm:$0xff] }
 0x5f1   :  { %v6129_v1 = vpop.f32.mrf.mxu0  ;;  %v5874_v41 = vadd.f32 %v23042_v6, %v23041_v35  ;;  %v23046_v6 = vld [vmem:[#allocation92_spill] sm:$0xff] }
 0x5f2   :  { %v6368_v54 = vpop.f32.mrf.mxu1  ;;  %v18916_v50 = vadd.f32 %v6129_v1, %v5871_v46  ;;  %v12342_v46 = vor.u32 %v13662_v30, %v12339_v9  ;;  %v18962_v35 = vpop.permute.xlu1 %3730 }
 0x5f3   :  { %v6369_v24 = vadd.f32 %v6368_v54, %v18740_v55  ;;  %v11738_v55 = vor.u32 %v13513_v51, %v11737_v39  ;;  %v13649_v39 = vld [vmem:[%s22633_s3 + $0x974] sm:$0xf]  ;;  %v12291_v51 = vld [vmem:[%s22633_s3 + $0x98c] sm:$0xf0] }
 0x5f4   :  { %v12294_v9 = vor.u32 %v13649_v39, %v12291_v51 }
 0x5f5   :  { %v18927_v31 = vadd.f32 %v6627_v36, %v6369_v24  ;;  %v6796_v43 = vpop.f32.mrf.mxu3  ;;  %v13638_v36 = vld [vmem:[%s22633_s3 + $0x918] sm:$0xf0] }
 0x5f6   :  { %v18933_v54 = vadd.f32 %v6796_v43, %v23039_v20  ;;  %v12234_v1 = vor.u32 %v13638_v36, %v12233_v49  ;;  %v23044_v49 = vld [vmem:[#allocation48_spill] sm:$0xff] }
 0x5f7   :  { %23038 = vst [vmem:[#allocation27_spill] sm:$0xff] %v18927_v31 }
 0x5f8   :  { %23040 = vst [vmem:[#allocation13_spill] sm:$0xff] %v18933_v54  ;;  %v6637_v15 = vpop.f32.mrf.mxu2 }
 0x5f9   :  { %v6132_v24 = vpop.f32.mrf.mxu0 }
 0x5fa   :  { %v6371_v43 = vpop.f32.mrf.mxu1  ;;  %6838 = vmatmul.bf16.gmra.mxu3 %v11738_v55  ;;  %v18952_v20 = vadd.f32 %v6132_v24, %v5874_v41  ;;  %v5876_v41 = vadd.f32 %v23047_v34, %v23046_v6  ;;  %v13669_v34 = vld [vmem:[%s22633_s3 + $0xa14] sm:$0xf]  ;;  %v12261_v6 = vld [vmem:[%s22633_s3 + $0x938] sm:$0xf] }
 0x5fb   :  { %v6372_v54 = vadd.f32 %v6371_v43, %v18774_v0 }
 0x5fc   :  { %6171 = vmatmul.bf16.gmra.mxu0 %v12342_v46  ;;  %v13520_v46 = vld [vmem:[%s22633_s3 + $0x568] sm:$0xf0] }
 0x5fd   :  { %v18957_v30 = vadd.f32 %v6630_v56, %v6372_v54  ;;  %6410 = vmatmul.bf16.gmra.mxu1 %v12234_v1  ;;  %v6799_v55 = vpop.f32.mrf.mxu3  ;;  %6679 = vmatmul.bf16.gmra.mxu2 %v12294_v9  ;;  %v11765_v54 = vld [vmem:[%s22633_s3 + $0x550] sm:$0xf] }
 0x5fe   :  { %v18960_v36 = vadd.f32 %v6799_v55, %v23044_v49  ;;  %v23049_v55 = vld [vmem:[#allocation95_spill] sm:$0xff]  ;;  %v12367_v49 = vld [vmem:[%s22633_s3 + $0xa2c] sm:$0xf0] }
 0x5ff   :  { %23043 = vst [vmem:[#allocation44_spill] sm:$0xff] %v18957_v30 }
 0x600   :  { %23045 = vst [vmem:[#allocation104_spill] sm:$0xff] %v18960_v36  ;;  %v6640_v1 = vpop.f32.mrf.mxu2  ;;  %v13656_v36 = vld [vmem:[%s22633_s3 + $0x9ac] sm:$0xf] }
 0x601   :  { %v6134_v24 = vpop.f32.mrf.mxu0 }
 0x602   :  { %v6373_v0 = vpop.f32.mrf.mxu1  ;;  %v18966_v43 = vadd.f32 %v6134_v24, %v5876_v41  ;;  %v18992_v41 = vpop.permute.xlu2 %3735 }
 0x603   :  { %v6374_v56 = vadd.f32 %v6373_v0, %v18784_v12  ;;  %v11766_v12 = vor.u32 %v13520_v46, %v11765_v54  ;;  %v18994_v24 = vpop.permute.xlu1 %3725  ;;  %v23051_v0 = vld [vmem:[#allocation70_spill] sm:$0xff]  ;;  %v12370_v54 = vor.u32 %v13669_v34, %v12367_v49  ;;  %v12322_v49 = vor.u32 %v13656_v36, %v12319_v11  ;;  %v11793_v11 = vld [vmem:[%s22633_s3 + $0x588] sm:$0xf]  ;;  %v13527_v36 = vld [vmem:[%s22633_s3 + $0x5a0] sm:$0xf0] }
 0x605   :  { %v18975_v39 = vadd.f32 %v6632_v21, %v6374_v56  ;;  %v6801_v51 = vpop.f32.mrf.mxu3  ;;  %v13645_v21 = vld [vmem:[%s22633_s3 + $0x950] sm:$0xf0]  ;;  %v23052_v56 = vld [vmem:[#allocation23_spill] sm:$0xff] }
 0x606   :  { %v18981_v9 = vadd.f32 %v6801_v51, %v23049_v55  ;;  %v5879_v51 = vadd.f32 %v23052_v56, %v23051_v0  ;;  %v12262_v46 = vor.u32 %v13645_v21, %v12261_v6  ;;  %v19012_v21 = vpop.permute.xlu0 %3750  ;;  %v23056_v56 = vld [vmem:[#allocation56_spill] sm:$0xff] }
 0x607   :  { %23048 = vst [vmem:[#allocation24_spill] sm:$0xff] %v18975_v39 }
 0x608   :  { %23050 = vst [vmem:[#allocation51_spill] sm:$0xff] %v18981_v9  ;;  %v6642_v30 = vpop.f32.mrf.mxu2 }
 0x609   :  { %v6137_v55 = vpop.f32.mrf.mxu0 }
 0x60a   :  { %v6376_v9 = vpop.f32.mrf.mxu1  ;;  %6843 = vmatmul.bf16.gmra.mxu3 %v11766_v12  ;;  %v19004_v4 = vadd.f32 %v6137_v55, %v5879_v51  ;;  %v23054_v12 = vld [vmem:[#allocation62_spill] sm:$0xff]  ;;  %v19014_v0 = vpop.permute.xlu2 %3710  ;;  %v5881_v51 = vadd.f32 %v23057_v61, %v23056_v56  ;;  %v12395_v56 = vld [vmem:[%s22633_s3 + $0xa64] sm:$0xf0] }
 0x60b   :  { %v6377_v39 = vadd.f32 %v6376_v9, %v18818_v59 }
 0x60c   :  { %6176 = vmatmul.bf16.gmra.mxu0 %v12370_v54 }
 0x60d   :  { %v19007_v31 = vadd.f32 %v6635_v18, %v6377_v39  ;;  %6415 = vmatmul.bf16.gmra.mxu1 %v12262_v46  ;;  %v6804_v34 = vpop.f32.mrf.mxu3  ;;  %6684 = vmatmul.bf16.gmra.mxu2 %v12322_v49  ;;  %v19027_v39 = vpop.permute.xlu1 %3700  ;;  %v23059_v49 = vld [vmem:[#allocation68_spill] sm:$0xff] }
 0x60e   :  { %v19010_v6 = vadd.f32 %v6804_v34, %v23054_v12  ;;  %v13676_v34 = vld [vmem:[%s22633_s3 + $0xa4c] sm:$0xf]  ;;  %v11794_v12 = vor.u32 %v13527_v36, %v11793_v11 }
 0x60f   :  { %23053 = vst [vmem:[#allocation103_spill] sm:$0xff] %v19007_v31 }
 0x610   :  { %23055 = vst [vmem:[#allocation15_spill] sm:$0xff] %v19010_v6  ;;  %v6645_v54 = vpop.f32.mrf.mxu2 }
 0x611   :  { %v6139_v55 = vpop.f32.mrf.mxu0 }
 0x612   :  { %v6378_v59 = vpop.f32.mrf.mxu1  ;;  %v19018_v9 = vadd.f32 %v6139_v55, %v5881_v51  ;;  %v12289_v51 = vld [vmem:[%s22633_s3 + $0x970] sm:$0xf]  ;;  %v19046_v55 = vpop.permute.xlu0 %3745 }
 0x613   :  { %v6379_v18 = vadd.f32 %v6378_v59, %v18828_v17  ;;  %v23061_v59 = vld [vmem:[#allocation49_spill] sm:$0xff]  ;;  %v19059_v28 = vpop.permute.xlu2 %3705 }
 0x615   :  { %v19029_v46 = vadd.f32 %v6637_v15, %v6379_v18  ;;  %v6806_v61 = vpop.f32.mrf.mxu3  ;;  %v13652_v15 = vld [vmem:[%s22633_s3 + $0x988] sm:$0xf0]  ;;  %v23062_v18 = vld [vmem:[#allocation26_spill] sm:$0xff] }
 0x616   :  { %v19035_v17 = vadd.f32 %v6806_v61, %v23059_v49  ;;  %v5884_v6 = vadd.f32 %v23062_v18, %v23061_v59  ;;  %v12398_v61 = vor.u32 %v13676_v34, %v12395_v56  ;;  %v12290_v49 = vor.u32 %v13652_v15, %v12289_v51  ;;  %v19063_v51 = vpop.permute.xlu1 %3695  ;;  %v23064_v15 = vld [vmem:[#allocation73_spill] sm:$0xff] }
 0x617   :  { %23058 = vst [vmem:[#allocation43_spill] sm:$0xff] %v19029_v46  ;;  %v12347_v46 = vld [vmem:[%s22633_s3 + $0x9fc] sm:$0xf0] }
 0x618   :  { %23060 = vst [vmem:[#allocation16_spill] sm:$0xff] %v19035_v17  ;;  %v13663_v17 = vld [vmem:[%s22633_s3 + $0x9e4] sm:$0xf]  ;;  %v6647_v59 = vpop.f32.mrf.mxu2 }
 0x619   :  { %v6142_v11 = vpop.f32.mrf.mxu0  ;;  %v12350_v56 = vor.u32 %v13663_v17, %v12347_v46  ;;  %v13534_v46 = vld [vmem:[%s22633_s3 + $0x5d8] sm:$0xf0] }
 0x61a   :  { %v6381_v36 = vpop.f32.mrf.mxu1  ;;  %6848 = vmatmul.bf16.gmra.mxu3 %v11794_v12  ;;  %v19056_v31 = vadd.f32 %v6142_v11, %v5884_v6  ;;  %v5886_v6 = vadd.f32 %v23067_v53, %v23066_v37  ;;  %v19079_v17 = vpop.permute.xlu0 %3720  ;;  %v13683_v37 = vld [vmem:[%s22633_s3 + $0xa84] sm:$0xf] }
 0x61b   :  { %v6382_v38 = vadd.f32 %v6381_v36, %v18862_v57 }
 0x61c   :  { %6181 = vmatmul.bf16.gmra.mxu0 %v12398_v61 }
 0x61d   :  { %v19061_v34 = vadd.f32 %v6640_v1, %v6382_v38  ;;  %6420 = vmatmul.bf16.gmra.mxu1 %v12290_v49  ;;  %v6809_v12 = vpop.f32.mrf.mxu3  ;;  %6689 = vmatmul.bf16.gmra.mxu2 %v12350_v56  ;;  %v11821_v1 = vld [vmem:[%s22633_s3 + $0x5c0] sm:$0xf] }
 0x61e   :  { %v19066_v18 = vadd.f32 %v6809_v12, %v23064_v15  ;;  %v19086_v12 = vpop.permute.xlu2 %3770  ;;  %v11822_v15 = vor.u32 %v13534_v46, %v11821_v1  ;;  %v13670_v1 = vld [vmem:[%s22633_s3 + $0xa1c] sm:$0xf]  ;;  %v12375_v46 = vld [vmem:[%s22633_s3 + $0xa34] sm:$0xf0] }
 0x61f   :  { %23063 = vst [vmem:[#allocation46_spill] sm:$0xff] %v19061_v34 }
 0x620   :  { %23065 = vst [vmem:[#allocation17_spill] sm:$0xff] %v19066_v18  ;;  %v6650_v61 = vpop.f32.mrf.mxu2 }
 0x621   :  { %v6144_v11 = vpop.f32.mrf.mxu0 }
 0x622   :  { %v6383_v57 = vpop.f32.mrf.mxu1  ;;  %v19070_v36 = vadd.f32 %v6144_v11, %v5886_v6  ;;  %v12423_v6 = vld [vmem:[%s22633_s3 + $0xa9c] sm:$0xf0]  ;;  %v13659_v11 = vld [vmem:[%s22633_s3 + $0x9c0] sm:$0xf0] }
 0x623   :  { %v6384_v38 = vadd.f32 %v6383_v57, %v18872_v3  ;;  %v23069_v3 = vld [vmem:[#allocation76_spill] sm:$0xff]  ;;  %v3681_v57 = vpop.permute.xlu1 %3680 }
 0x625   :  { %v19081_v49 = vadd.f32 %v6642_v30, %v6384_v38  ;;  %v6811_v53 = vpop.f32.mrf.mxu3  ;;  %v12317_v30 = vld [vmem:[%s22633_s3 + $0x9a8] sm:$0xf]  ;;  %v23071_v38 = vld [vmem:[#allocation29_spill] sm:$0xff] }
 0x626   :  { %v19089_v56 = vadd.f32 %v6811_v53, %v23069_v3  ;;  %v5889_v18 = vadd.f32 %v23071_v38, %v3681_v57  ;;  %v12318_v34 = vor.u32 %v13659_v11, %v12317_v30  ;;  %v23072_v30 = vld [vmem:[#allocation78_spill] sm:$0xff]  ;;  %v3686_v57 = vpop.permute.xlu2 %3685  ;;  %v23074_v38 = vld [vmem:[#allocation5_spill] sm:$0xff] }
 0x627   :  { %23068 = vst [vmem:[#allocation63_spill] sm:$0xff] %v19081_v49  ;;  %v12426_v49 = vor.u32 %v13683_v37, %v12423_v6  ;;  %v12378_v6 = vor.u32 %v13670_v1, %v12375_v46  ;;  %v5891_v19 = vadd.f32 %v23074_v38, %v3686_v57  ;;  %v13690_v1 = vld [vmem:[%s22633_s3 + $0xabc] sm:$0xf]  ;;  %v23078_v57 = vld [vmem:[#allocation4_spill] sm:$0xff] }
 0x628   :  { %23070 = vst [vmem:[#allocation37_spill] sm:$0xff] %v19089_v56  ;;  %v6652_v44 = vpop.f32.mrf.mxu2 }
 0x629   :  { %v6147_v53 = vpop.f32.mrf.mxu0 }
 0x62a   :  { %v6386_v3 = vpop.f32.mrf.mxu1  ;;  %6853 = vmatmul.bf16.gmra.mxu3 %v11822_v15  ;;  %v19107_v56 = vadd.f32 %v6147_v53, %v5889_v18  ;;  %v19112_v15 = vpop.permute.xlu0 %3715 }
 0x62b   :  { %v6387_v26 = vadd.f32 %v6386_v3, %v18906_v29  ;;  %v11849_v29 = vld [vmem:[%s22633_s3 + $0x5f8] sm:$0xf] }
 0x62c   :  { %6186 = vmatmul.bf16.gmra.mxu0 %v12426_v49 }
 0x62d   :  { %v19110_v52 = vadd.f32 %v6645_v54, %v6387_v26  ;;  %6425 = vmatmul.bf16.gmra.mxu1 %v12318_v34  ;;  %v6814_v37 = vpop.f32.mrf.mxu3  ;;  %6694 = vmatmul.bf16.gmra.mxu2 %v12378_v6  ;;  %v13541_v54 = vld [vmem:[%s22633_s3 + $0x610] sm:$0xf0]  ;;  %v12345_v6 = vld [vmem:[%s22633_s3 + $0x9e0] sm:$0xf] }
 0x62e   :  { %v19115_v11 = vadd.f32 %v6814_v37, %v23072_v30  ;;  %v12451_v37 = vld [vmem:[%s22633_s3 + $0xad4] sm:$0xf0] }
 0x630   :  { %23073 = vst [vmem:[#allocation58_spill] sm:$0xff] %v19115_v11  ;;  %v6655_v34 = vpop.f32.mrf.mxu2 }
 0x631   :  { %v6149_v18 = vpop.f32.mrf.mxu0 }
 0x632   :  { %v6388_v53 = vpop.f32.mrf.mxu1  ;;  %v19118_v2 = vadd.f32 %v6149_v18, %v5891_v19  ;;  %v23076_v19 = vld [vmem:[#allocation77_spill] sm:$0xff]  ;;  %v3691_v30 = vpop.permute.xlu0 %3690  ;;  %v12454_v18 = vor.u32 %v13690_v1, %v12451_v37 }
 0x633   :  { %v6389_v26 = vadd.f32 %v6388_v53, %v18916_v50  ;;  %v11850_v50 = vor.u32 %v13541_v54, %v11849_v29  ;;  %v5894_v38 = vadd.f32 %v23078_v57, %v3691_v30  ;;  %v13677_v29 = vld [vmem:[%s22633_s3 + $0xa54] sm:$0xf]  ;;  %v12403_v54 = vld [vmem:[%s22633_s3 + $0xa6c] sm:$0xf0] }
 0x634   :  { %v23080_v37 = vld [vmem:[#allocation69_spill] sm:$0xff] }
 0x635   :  { %v19127_v49 = vadd.f32 %v6647_v59, %v6389_v26  ;;  %v6816_v3 = vpop.f32.mrf.mxu3  ;;  %v13666_v59 = vld [vmem:[%s22633_s3 + $0x9f8] sm:$0xf0] }
 0x636   :  { %v19133_v46 = vadd.f32 %v6816_v3, %v23076_v19  ;;  %v12346_v53 = vor.u32 %v13666_v59, %v12345_v6  ;;  %v23081_v59 = vld [vmem:[#allocation6_spill] sm:$0xff] }
 0x637   :  { %23075 = vst [vmem:[#allocation39_spill] sm:$0xff] %v19127_v49  ;;  %v5896_v57 = vadd.f32 %v23081_v59, %v19063_v51  ;;  %v12373_v51 = vld [vmem:[%s22633_s3 + $0xa18] sm:$0xf] }
 0x638   :  { %23077 = vst [vmem:[#allocation57_spill] sm:$0xff] %v19133_v46  ;;  %v19154_v11 = vpop.f32.mrf.mxu2 }
 0x639   :  { %v6152_v26 = vpop.f32.mrf.mxu0  ;;  %23079 = vst [vmem:[#allocation66_spill] sm:$0xff] %v19154_v11 }
 0x63a   :  { %v6391_v3 = vpop.f32.mrf.mxu1  ;;  %6858 = vmatmul.bf16.gmra.mxu3 %v11850_v50  ;;  %v19151_v19 = vadd.f32 %v6152_v26, %v5894_v38  ;;  %v12406_v50 = vor.u32 %v13677_v29, %v12403_v54  ;;  %v13673_v54 = vld [vmem:[%s22633_s3 + $0xa30] sm:$0xf0] }
 0x63b   :  { %v6392_v46 = vadd.f32 %v6391_v3, %v18952_v20  ;;  %v12374_v59 = vor.u32 %v13673_v54, %v12373_v51 }
 0x63c   :  { %6191 = vmatmul.bf16.gmra.mxu0 %v12454_v18 }
 0x63d   :  { %v19156_v30 = vadd.f32 %v6650_v61, %v6392_v46  ;;  %6430 = vmatmul.bf16.gmra.mxu1 %v12346_v53  ;;  %v6819_v1 = vpop.f32.mrf.mxu3  ;;  %6699 = vmatmul.bf16.gmra.mxu2 %v12406_v50  ;;  %v11877_v61 = vld [vmem:[%s22633_s3 + $0x630] sm:$0xf]  ;;  %v13548_v46 = vld [vmem:[%s22633_s3 + $0x648] sm:$0xf0]  ;;  %v23083_v50 = vld [vmem:[#allocation3_spill] sm:$0xff] }
 0x63e   :  { %v19159_v6 = vadd.f32 %v6819_v1, %v23080_v37  ;;  %v13349_v1 = vld [vmem:[%s22633_s3 + $0x14] sm:$0xf]  ;;  %v5899_v37 = vadd.f32 %v23083_v50, %v19027_v39 }
 0x640   :  { %v6660_v18 = vpop.f32.mrf.mxu2 }
 0x641   :  { %v6154_v49 = vpop.f32.mrf.mxu0 }
 0x642   :  { %v6393_v38 = vpop.f32.mrf.mxu1  ;;  %v19163_v26 = vadd.f32 %v6154_v49, %v5896_v57  ;;  %v23082_v49 = vld [vmem:[#allocation74_spill] sm:$0xff] }
 0x643   :  { %v6394_v20 = vadd.f32 %v6393_v38, %v18966_v43  ;;  %v11878_v43 = vor.u32 %v13548_v46, %v11877_v61  ;;  %v13684_v61 = vld [vmem:[%s22633_s3 + $0xa8c] sm:$0xf]  ;;  %v12431_v46 = vld [vmem:[%s22633_s3 + $0xaa4] sm:$0xf0] }
 0x645   :  { %v19172_v53 = vadd.f32 %v6652_v44, %v6394_v20  ;;  %v6821_v3 = vpop.f32.mrf.mxu3  ;;  %v11095_v44 = vld [vmem:[%s22633_s3 + $0x2c] sm:$0xf0] }
 0x646   :  { %v19178_v29 = vadd.f32 %v6821_v3, %v23082_v49  ;;  %v11098_v57 = vor.u32 %v13349_v1, %v11095_v44  ;;  %v23085_v1 = vld [vmem:[#allocation32_spill] sm:$0xff] }
 0x647   :  { %v5901_v44 = vadd.f32 %v23085_v1, %v19059_v28  ;;  %v12401_v28 = vld [vmem:[%s22633_s3 + $0xa50] sm:$0xf] }
 0x648   :  { %v19200_v11 = vpop.f32.mrf.mxu2 }
 0x649   :  { %v6157_v38 = vpop.f32.mrf.mxu0  ;;  %23084 = vst [vmem:[#allocation53_spill] sm:$0xff] %v19200_v11 }
 0x64a   :  { %v6396_v20 = vpop.f32.mrf.mxu1  ;;  %6863 = vmatmul.bf16.gmra.mxu3 %v11878_v43  ;;  %v19197_v3 = vadd.f32 %v6157_v38, %v5899_v37  ;;  %v12434_v43 = vor.u32 %v13684_v61, %v12431_v46  ;;  %v13356_v46 = vld [vmem:[%s22633_s3 + $0x4c] sm:$0xf] }
 0x64b   :  { %v6397_v49 = vadd.f32 %v6396_v20, %v19004_v4 }
 0x64c   :  { %6982 = vmatmul.bf16.vlgmr.msra.gmra.mxu0 %v11098_v57 }
 0x64d   :  { %v19202_v39 = vadd.f32 %v6655_v34, %v6397_v49  ;;  %6435 = vmatmul.bf16.gmra.mxu1 %v12374_v59  ;;  %v6824_v51 = vpop.f32.mrf.mxu3  ;;  %6704 = vmatmul.bf16.gmra.mxu2 %v12434_v43  ;;  %v11905_v34 = vld [vmem:[%s22633_s3 + $0x668] sm:$0xf] }
 0x64e   :  { %v19205_v54 = vadd.f32 %v6824_v51, %v18381_v5  ;;  %v13555_v5 = vld [vmem:[%s22633_s3 + $0x680] sm:$0xf0]  ;;  %v11123_v49 = vld [vmem:[%s22633_s3 + $0x64] sm:$0xf0] }
 0x64f   :  { %v11906_v61 = vor.u32 %v13555_v5, %v11905_v34  ;;  %v23087_v51 = vld [vmem:[#allocation36_spill] sm:$0xff]  ;;  %v12459_v34 = vld [vmem:[%s22633_s3 + $0xadc] sm:$0xf0] }
 0x650   :  { %v6665_v59 = vpop.f32.mrf.mxu2  ;;  %v5904_v43 = vadd.f32 %v23087_v51, %v19014_v0 }
 0x651   :  { %v6159_v50 = vpop.f32.mrf.mxu0 }
 0x652   :  { %v6398_v37 = vpop.f32.mrf.mxu1  ;;  %v19209_v38 = vadd.f32 %v6159_v50, %v5901_v44  ;;  %v11126_v44 = vor.u32 %v13356_v46, %v11123_v49  ;;  %v23089_v46 = vld [vmem:[#allocation38_spill] sm:$0xff] }
 0x653   :  { %v19212_v4 = vadd.f32 %v6398_v37, %v19018_v9  ;;  %v13680_v9 = vld [vmem:[%s22633_s3 + $0xa68] sm:$0xf0]  ;;  %v13691_v37 = vld [vmem:[%s22633_s3 + $0xac4] sm:$0xf]  ;;  %v5906_v49 = vadd.f32 %v23089_v46, %v19112_v15  ;;  %v12429_v15 = vld [vmem:[%s22633_s3 + $0xa88] sm:$0xf] }
 0x654   :  { %v12402_v1 = vor.u32 %v13680_v9, %v12401_v28 }
 0x655   :  { %23086 = vst [vmem:[#allocation20_spill] sm:$0xff] %v19212_v4  ;;  %v6826_v57 = vpop.f32.mrf.mxu3 }
 0x656   :  { %v19224_v20 = vadd.f32 %v6826_v57, %v18398_v33 }
 0x658   :  { %v19246_v11 = vpop.f32.mrf.mxu2 }
 0x659   :  { %v6162_v33 = vpop.f32.mrf.mxu0  ;;  %23088 = vst [vmem:[#allocation60_spill] sm:$0xff] %v19246_v11 }
 0x65a   :  { %v6401_v50 = vpop.f32.mrf.mxu1  ;;  %6868 = vmatmul.bf16.gmra.mxu3 %v11906_v61  ;;  %v19243_v5 = vadd.f32 %v6162_v33, %v5904_v43  ;;  %v12462_v61 = vor.u32 %v13691_v37, %v12459_v34  ;;  %v13363_v34 = vld [vmem:[%s22633_s3 + $0x84] sm:$0xf] }
 0x65b   :  { %v6402_v57 = vadd.f32 %v6401_v50, %v19056_v31 }
 0x65c   :  { %6987 = vmatmul.bf16.gmra.mxu0 %v11126_v44 }
 0x65d   :  { %v19248_v0 = vadd.f32 %v6660_v18, %v6402_v57  ;;  %6440 = vmatmul.bf16.gmra.mxu1 %v12402_v1  ;;  %v6829_v28 = vpop.f32.mrf.mxu3  ;;  %6709 = vmatmul.bf16.gmra.mxu2 %v12462_v61  ;;  %v11933_v18 = vld [vmem:[%s22633_s3 + $0x6a0] sm:$0xf] }
 0x65e   :  { %v19251_v9 = vadd.f32 %v6829_v28, %v18425_v8  ;;  %v13562_v8 = vld [vmem:[%s22633_s3 + $0x6b8] sm:$0xf0]  ;;  %v11151_v57 = vld [vmem:[%s22633_s3 + $0x9c] sm:$0xf0]  ;;  %v23091_v28 = vld [vmem:[#allocation8_spill] sm:$0xff] }
 0x65f   :  { %v11934_v37 = vor.u32 %v13562_v8, %v11933_v18  ;;  %v5909_v61 = vadd.f32 %v23091_v28, %v19079_v17  ;;  %v23093_v17 = vld [vmem:[#allocation12_spill] sm:$0xff] }
 0x660   :  { %v6670_v1 = vpop.f32.mrf.mxu2 }
 0x661   :  { %v6164_v51 = vpop.f32.mrf.mxu0 }
 0x662   :  { %v6403_v43 = vpop.f32.mrf.mxu1  ;;  %v19255_v33 = vadd.f32 %v6164_v51, %v5906_v49  ;;  %v11154_v49 = vor.u32 %v13363_v34, %v11151_v57 }
 0x663   :  { %v19258_v31 = vadd.f32 %v6403_v43, %v19070_v36  ;;  %v13687_v36 = vld [vmem:[%s22633_s3 + $0xaa0] sm:$0xf0] }
 0x664   :  { %v12430_v46 = vor.u32 %v13687_v36, %v12429_v15  ;;  %v5911_v15 = vadd.f32 %v23093_v17, %v18994_v24  ;;  %v12457_v24 = vld [vmem:[%s22633_s3 + $0xac0] sm:$0xf] }
 0x665   :  { %23090 = vst [vmem:[#allocation40_spill] sm:$0xff] %v19258_v31  ;;  %v6831_v44 = vpop.f32.mrf.mxu3 }
 0x666   :  { %v19270_v50 = vadd.f32 %v6831_v44, %v18441_v7 }
 0x668   :  { %v19286_v8 = vpop.f32.mrf.mxu2 }
 0x669   :  { %v6167_v7 = vpop.f32.mrf.mxu0  ;;  %23092 = vst [vmem:[#allocation55_spill] sm:$0xff] %v19286_v8 }
 0x66a   :  { %v6406_v51 = vpop.f32.mrf.mxu1  ;;  %6873 = vmatmul.bf16.gmra.mxu3 %v11934_v37  ;;  %v19283_v43 = vadd.f32 %v6167_v7, %v5909_v61  ;;  %v23095_v7 = vld [vmem:[#allocation9_spill] sm:$0xff] }
 0x66b   :  { %v6407_v18 = vadd.f32 %v6406_v51, %v19107_v56  ;;  %v11961_v56 = vld [vmem:[%s22633_s3 + $0x6d8] sm:$0xf]  ;;  %v5914_v51 = vadd.f32 %v23095_v7, %v18962_v35 }
 0x66c   :  { %6992 = vmatmul.bf16.gmra.mxu0 %v11154_v49  ;;  %v11179_v49 = vld [vmem:[%s22633_s3 + $0xd4] sm:$0xf0] }
 0x66d   :  { %v19288_v44 = vadd.f32 %v6665_v59, %v6407_v18  ;;  %6445 = vmatmul.bf16.gmra.mxu1 %v12430_v46  ;;  %v6834_v11 = vpop.f32.mrf.mxu3  ;;  %v13569_v59 = vld [vmem:[%s22633_s3 + $0x6f0] sm:$0xf0]  ;;  %v13370_v46 = vld [vmem:[%s22633_s3 + $0xbc] sm:$0xf] }
 0x66e   :  { %v19291_v31 = vadd.f32 %v6834_v11, %v18469_v16  ;;  %v11962_v61 = vor.u32 %v13569_v59, %v11961_v56  ;;  %v11182_v17 = vor.u32 %v13370_v46, %v11179_v49  ;;  %v23097_v35 = vld [vmem:[#allocation41_spill] sm:$0xff] }
 0x670   :  { %v6675_v16 = vpop.f32.mrf.mxu2 }
 0x671   :  { %v6169_v36 = vpop.f32.mrf.mxu0 }
 0x672   :  { %v6408_v34 = vpop.f32.mrf.mxu1  ;;  %v19295_v37 = vadd.f32 %v6169_v36, %v5911_v15 }
 0x673   :  { %v19298_v57 = vadd.f32 %v6408_v34, %v19118_v2  ;;  %v13694_v2 = vld [vmem:[%s22633_s3 + $0xad8] sm:$0xf0] }
 0x674   :  { %v12458_v18 = vor.u32 %v13694_v2, %v12457_v24  ;;  %v5916_v24 = vadd.f32 %v23097_v35, %v18992_v41  ;;  %v13377_v41 = vld [vmem:[%s22633_s3 + $0xf4] sm:$0xf] }
 0x675   :  { %23094 = vst [vmem:[#allocation79_spill] sm:$0xff] %v19298_v57  ;;  %v6836_v11 = vpop.f32.mrf.mxu3 }
 0x676   :  { %v19310_v28 = vadd.f32 %v6836_v11, %v18485_v47 }
 0x678   :  { %v19326_v56 = vpop.f32.mrf.mxu2 }
 0x679   :  { %v6172_v47 = vpop.f32.mrf.mxu0  ;;  %23096 = vst [vmem:[#allocation7_spill] sm:$0xff] %v19326_v56 }
 0x67a   :  { %v6411_v15 = vpop.f32.mrf.mxu1  ;;  %6878 = vmatmul.bf16.gmra.mxu3 %v11962_v61  ;;  %v19323_v36 = vadd.f32 %v6172_v47, %v5914_v51  ;;  %v13353_v47 = vld [vmem:[%s22633_s3 + $0x30] sm:$0xf0] }
 0x67b   :  { %v6412_v34 = vadd.f32 %v6411_v15, %v19151_v19  ;;  %v11989_v19 = vld [vmem:[%s22633_s3 + $0x710] sm:$0xf]  ;;  %v23099_v15 = vld [vmem:[#allocation42_spill] sm:$0xff] }
 0x67c   :  { %6997 = vmatmul.bf16.gmra.mxu0 %v11182_v17  ;;  %v11101_v17 = vld [vmem:[%s22633_s3 + $0x18] sm:$0xf] }
 0x67d   :  { %v19328_v59 = vadd.f32 %v6670_v1, %v6412_v34  ;;  %6450 = vmatmul.bf16.gmra.mxu1 %v12458_v18  ;;  %v6839_v11 = vpop.f32.mrf.mxu3  ;;  %v13576_v1 = vld [vmem:[%s22633_s3 + $0x728] sm:$0xf0]  ;;  %v5919_v34 = vadd.f32 %v23099_v15, %v18955_v14  ;;  %v11102_v35 = vor.u32 %v13353_v47, %v11101_v17  ;;  %v13583_v15 = vld [vmem:[%s22633_s3 + $0x760] sm:$0xf0] }
 0x67e   :  { %v19331_v8 = vadd.f32 %v6839_v11, %v18513_v40  ;;  %v11990_v18 = vor.u32 %v13576_v1, %v11989_v19 }
 0x680   :  { %v6680_v40 = vpop.f32.mrf.mxu2 }
 0x681   :  { %v6174_v2 = vpop.f32.mrf.mxu0 }
 0x682   :  { %v6413_v46 = vpop.f32.mrf.mxu1  ;;  %v19335_v61 = vadd.f32 %v6174_v2, %v5916_v24 }
 0x683   :  { %v19338_v49 = vadd.f32 %v6413_v46, %v19163_v26  ;;  %v11207_v26 = vld [vmem:[%s22633_s3 + $0x10c] sm:$0xf0] }
 0x684   :  { %v11210_v11 = vor.u32 %v13377_v41, %v11207_v26  ;;  %v23101_v41 = vld [vmem:[#allocation47_spill] sm:$0xff] }
 0x685   :  { %23098 = vst [vmem:[#allocation54_spill] sm:$0xff] %v19338_v49  ;;  %v6841_v7 = vpop.f32.mrf.mxu3  ;;  %v5921_v26 = vadd.f32 %v23101_v41, %v19046_v55  ;;  %v13384_v55 = vld [vmem:[%s22633_s3 + $0x12c] sm:$0xf] }
 0x686   :  { %v19350_v51 = vadd.f32 %v6841_v7, %v18529_v62  ;;  %v23133_v49 = vld [vmem:[#allocation72_spill] sm:$0xff] }
 0x688   :  { %v19366_v19 = vpop.f32.mrf.mxu2 }
 0x689   :  { %v6177_v62 = vpop.f32.mrf.mxu0  ;;  %23100 = vst [vmem:[#allocation90_spill] sm:$0xff] %v19366_v19  ;;  %v3776_v19 = vpop.permute.xlu0 %3775 }
 0x68a   :  { %v6416_v24 = vpop.f32.mrf.mxu1  ;;  %6883 = vmatmul.bf16.gmra.mxu3 %v11990_v18  ;;  %v19363_v2 = vadd.f32 %v6177_v62, %v5919_v34  ;;  %v11129_v62 = vld [vmem:[%s22633_s3 + $0x50] sm:$0xf] }
 0x68b   :  { %v6417_v46 = vadd.f32 %v6416_v24, %v19197_v3  ;;  %v13360_v24 = vld [vmem:[%s22633_s3 + $0x68] sm:$0xf0] }
 0x68c   :  { %7002 = vmatmul.bf16.gmra.mxu0 %v11210_v11 }
 0x68d   :  { %v19368_v1 = vadd.f32 %v6675_v16, %v6417_v46  ;;  %v6844_v7 = vpop.f32.mrf.mxu3  ;;  %12475 = vmatmul.msk.bf16.vlgmr.msrb.gmra.mxu1 %vm5528_vm0, %v11102_v35  ;;  %v12017_v16 = vld [vmem:[%s22633_s3 + $0x748] sm:$0xf] }
 0x68e   :  { %v19372_v14 = vadd.f32 %v6844_v7, %v18557_v22  ;;  %v12018_v35 = vor.u32 %v13583_v15, %v12017_v16  ;;  %v23103_v46 = vld [vmem:[#allocation52_spill] sm:$0xff] }
 0x68f   :  { %v5924_v7 = vadd.f32 %v23103_v46, %v19012_v21 }
 0x690   :  { %v6685_v34 = vpop.f32.mrf.mxu2 }
 0x691   :  { %v6179_v18 = vpop.f32.mrf.mxu0 }
 0x692   :  { %v6418_v17 = vpop.f32.mrf.mxu1  ;;  %v19376_v47 = vadd.f32 %v6179_v18, %v5921_v26  ;;  %v11130_v26 = vor.u32 %v13360_v24, %v11129_v62 }
 0x693   :  { %v19379_v3 = vadd.f32 %v6418_v17, %v19209_v38  ;;  %v11235_v38 = vld [vmem:[%s22633_s3 + $0x144] sm:$0xf0] }
 0x694   :  { %v11238_v41 = vor.u32 %v13384_v55, %v11235_v38  ;;  %v23105_v55 = vld [vmem:[#allocation59_spill] sm:$0xff] }
 0x695   :  { %23102 = vst [vmem:[#allocation11_spill] sm:$0xff] %v19379_v3  ;;  %v6846_v22 = vpop.f32.mrf.mxu3  ;;  %v5926_v38 = vadd.f32 %v23105_v55, %v18925_v27  ;;  %v13391_v27 = vld [vmem:[%s22633_s3 + $0x164] sm:$0xf] }
 0x696   :  { %v19391_v11 = vadd.f32 %v6846_v22, %v18573_v58 }
 0x698   :  { %v19413_v21 = vpop.f32.mrf.mxu2 }
 0x699   :  { %v6182_v58 = vpop.f32.mrf.mxu0  ;;  %23104 = vst [vmem:[#allocation50_spill] sm:$0xff] %v19413_v21 }
 0x69a   :  { %v6421_v18 = vpop.f32.mrf.mxu1  ;;  %6888 = vmatmul.bf16.gmra.mxu3 %v12018_v35  ;;  %v19404_v17 = vadd.f32 %v6182_v58, %v5924_v7  ;;  %v13367_v58 = vld [vmem:[%s22633_s3 + $0xa0] sm:$0xf0] }
 0x69b   :  { %v6422_v16 = vadd.f32 %v6421_v18, %v19243_v5  ;;  %v3761_v18 = vpop.permute.xlu0 %3760 }
 0x69c   :  { %7007 = vmatmul.bf16.gmra.mxu0 %v11238_v41 }
 0x69d   :  { %v19407_v15 = vadd.f32 %v6680_v40, %v6422_v16  ;;  %v6849_v22 = vpop.f32.mrf.mxu3  ;;  %12476 = vmatmul.msk.bf16.gmra.mxu1 %vm5528_vm0, %v11130_v26  ;;  %v12045_v40 = vld [vmem:[%s22633_s3 + $0x780] sm:$0xf]  ;;  %v11157_v26 = vld [vmem:[%s22633_s3 + $0x88] sm:$0xf]  ;;  %v23107_v16 = vld [vmem:[#allocation93_spill] sm:$0xff] }
 0x69e   :  { %v19411_v56 = vadd.f32 %v6849_v22, %v18601_v48  ;;  %v13590_v48 = vld [vmem:[%s22633_s3 + $0x798] sm:$0xf0]  ;;  %v5929_v22 = vadd.f32 %v23107_v16, %v3761_v18  ;;  %v3766_v18 = vpop.permute.xlu1 %3765 }
 0x69f   :  { %v12046_v41 = vor.u32 %v13590_v48, %v12045_v40 }
 0x6a1   :  { %v6184_v35 = vpop.f32.mrf.mxu0 }
 0x6a2   :  { %v6423_v62 = vpop.f32.mrf.mxu1  ;;  %v19417_v24 = vadd.f32 %v6184_v35, %v5926_v38  ;;  %v11158_v38 = vor.u32 %v13367_v58, %v11157_v26 }
 0x6a3   :  { %v19420_v5 = vadd.f32 %v6423_v62, %v19255_v33  ;;  %v11263_v33 = vld [vmem:[%s22633_s3 + $0x17c] sm:$0xf0] }
 0x6a4   :  { %v11266_v55 = vor.u32 %v13391_v27, %v11263_v33  ;;  %v23108_v27 = vld [vmem:[#allocation84_spill] sm:$0xff] }
 0x6a5   :  { %23106 = vst [vmem:[#allocation10_spill] sm:$0xff] %v19420_v5  ;;  %v6851_v46 = vpop.f32.mrf.mxu3  ;;  %v5931_v33 = vadd.f32 %v23108_v27, %v3766_v18 }
 0x6a6   :  { %v19432_v7 = vadd.f32 %v6851_v46, %v18617_v23  ;;  %v6690_v23 = vpop.f32.mrf.mxu2 }
 0x6a9   :  { %v6187_v35 = vpop.f32.mrf.mxu0 }
 0x6aa   :  { %v6426_v62 = vpop.f32.mrf.mxu1  ;;  %6893 = vmatmul.bf16.gmra.mxu3 %v12046_v41  ;;  %v19444_v40 = vadd.f32 %v6187_v35, %v5929_v22  ;;  %v13398_v22 = vld [vmem:[%s22633_s3 + $0x19c] sm:$0xf]  ;;  %v11185_v35 = vld [vmem:[%s22633_s3 + $0xc0] sm:$0xf] }
 0x6ab   :  { %v6427_v48 = vadd.f32 %v6426_v62, %v19283_v43  ;;  %v12073_v43 = vld [vmem:[%s22633_s3 + $0x7b8] sm:$0xf]  ;;  %v13374_v62 = vld [vmem:[%s22633_s3 + $0xd8] sm:$0xf0] }
 0x6ac   :  { %7012 = vmatmul.bf16.gmra.mxu0 %v11266_v55 }
 0x6ad   :  { %v19447_v46 = vadd.f32 %v6685_v34, %v6427_v48  ;;  %v6854_v21 = vpop.f32.mrf.mxu3  ;;  %12477 = vmatmul.msk.bf16.gmra.mxu1 %vm5528_vm0, %v11158_v38  ;;  %v13597_v34 = vld [vmem:[%s22633_s3 + $0x7d0] sm:$0xf0]  ;;  %v11291_v38 = vld [vmem:[%s22633_s3 + $0x1b4] sm:$0xf0] }
 0x6ae   :  { %v19451_v5 = vadd.f32 %v6854_v21, %v18645_v63  ;;  %v19465_v63 = vpop.f32.mrf.mxu2  ;;  %v23111_v48 = vld [vmem:[#allocation81_spill] sm:$0xff]  ;;  %v11294_v27 = vor.u32 %v13398_v22, %v11291_v38 }
 0x6af   :  { %23110 = vst [vmem:[#allocation94_spill] sm:$0xff] %v19465_v63  ;;  %v5934_v18 = vadd.f32 %v23111_v48, %v19086_v12  ;;  %v23112_v12 = vld [vmem:[#allocation80_spill] sm:$0xff] }
 0x6b0   :  { %v5936_v22 = vadd.f32 %v23112_v12, %v3776_v19 }
 0x6b1   :  { %v6189_v26 = vpop.f32.mrf.mxu0 }
 0x6b2   :  { %v6428_v58 = vpop.f32.mrf.mxu1  ;;  %v19454_v16 = vadd.f32 %v6189_v26, %v5931_v33  ;;  %v11186_v33 = vor.u32 %v13374_v62, %v11185_v35 }
 0x6b3   :  { %v19457_v41 = vadd.f32 %v6428_v58, %v19295_v37  ;;  %v12074_v37 = vor.u32 %v13597_v34, %v12073_v43 }
 0x6b5   :  { %23109 = vst [vmem:[#allocation45_spill] sm:$0xff] %v19457_v41  ;;  %v6856_v21 = vpop.f32.mrf.mxu3 }
 0x6b6   :  { %v19471_v55 = vadd.f32 %v6856_v21, %v18661_v32  ;;  %v6695_v63 = vpop.f32.mrf.mxu2 }
 0x6b9   :  { %v6192_v32 = vpop.f32.mrf.mxu0 }
 0x6ba   :  { %v6431_v26 = vpop.f32.mrf.mxu1  ;;  %6898 = vmatmul.bf16.gmra.mxu3 %v12074_v37  ;;  %v19484_v58 = vadd.f32 %v6192_v32, %v5934_v18 }
 0x6bb   :  { %v6432_v43 = vadd.f32 %v6431_v26, %v19323_v36  ;;  %v12101_v36 = vld [vmem:[%s22633_s3 + $0x7f0] sm:$0xf] }
 0x6bc   :  { %7017 = vmatmul.bf16.gmra.mxu0 %v11294_v27  ;;  %v11213_v27 = vld [vmem:[%s22633_s3 + $0xf8] sm:$0xf] }
 0x6bd   :  { %v19487_v34 = vadd.f32 %v6690_v23, %v6432_v43  ;;  %v6859_v21 = vpop.f32.mrf.mxu3  ;;  %12478 = vmatmul.msk.bf16.gmra.mxu1 %vm5528_vm0, %v11186_v33  ;;  %v13604_v23 = vld [vmem:[%s22633_s3 + $0x808] sm:$0xf0]  ;;  %v13381_v33 = vld [vmem:[%s22633_s3 + $0x110] sm:$0xf0] }
 0x6be   :  { %v19491_v41 = vadd.f32 %v6859_v21, %v18689_v42  ;;  %v13405_v42 = vld [vmem:[%s22633_s3 + $0x1d4] sm:$0xf]  ;;  %v12102_v18 = vor.u32 %v13604_v23, %v12101_v36  ;;  %v19520_v32 = vpop.f32.mrf.mxu2  ;;  %v11214_v43 = vor.u32 %v13381_v33, %v11213_v27  ;;  %v23117_v27 = vld [vmem:[#allocation87_spill] sm:$0xff] }
 0x6bf   :  { %23114 = vst [vmem:[#allocation48_spill] sm:$0xff] %v19520_v32  ;;  %v13611_v33 = vld [vmem:[%s22633_s3 + $0x840] sm:$0xf0] }
 0x6c1   :  { %v6194_v38 = vpop.f32.mrf.mxu0 }
 0x6c2   :  { %v6433_v35 = vpop.f32.mrf.mxu1  ;;  %v19494_v62 = vadd.f32 %v6194_v38, %v5936_v22  ;;  %v23115_v22 = vld [vmem:[#allocation83_spill] sm:$0xff] }
 0x6c3   :  { %v19497_v37 = vadd.f32 %v6433_v35, %v19335_v61  ;;  %v11319_v61 = vld [vmem:[%s22633_s3 + $0x1ec] sm:$0xf0] }
 0x6c4   :  { %v11322_v26 = vor.u32 %v13405_v42, %v11319_v61 }
 0x6c5   :  { %23113 = vst [vmem:[#allocation14_spill] sm:$0xff] %v19497_v37  ;;  %v6861_v48 = vpop.f32.mrf.mxu3 }
 0x6c6   :  { %v19509_v19 = vadd.f32 %v6861_v48, %v18707_v25  ;;  %v6700_v48 = vpop.f32.mrf.mxu2 }
 0x6c9   :  { %v6983_v25 = vpop.f32.mrf.mxu0 }
 0x6ca   :  { %v6436_v21 = vpop.f32.mrf.mxu1  ;;  %6903 = vmatmul.bf16.gmra.mxu3 %v12102_v18  ;;  %v19524_v38 = vadd.f32 %v6983_v25, %v23115_v22  ;;  %v11241_v25 = vld [vmem:[%s22633_s3 + $0x130] sm:$0xf] }
 0x6cb   :  { %v6437_v12 = vadd.f32 %v6436_v21, %v19363_v2  ;;  %v11347_v21 = vld [vmem:[%s22633_s3 + $0x224] sm:$0xf0] }
 0x6cc   :  { %7022 = vmatmul.bf16.gmra.mxu0 %v11322_v26 }
 0x6cd   :  { %v19526_v35 = vadd.f32 %v6695_v63, %v6437_v12  ;;  %v6864_v36 = vpop.f32.mrf.mxu3  ;;  %12479 = vmatmul.msk.bf16.gmra.mxu1 %vm5528_vm0, %v11214_v43  ;;  %v12129_v63 = vld [vmem:[%s22633_s3 + $0x828] sm:$0xf]  ;;  %v13388_v12 = vld [vmem:[%s22633_s3 + $0x148] sm:$0xf0] }
 0x6ce   :  { %v19530_v23 = vadd.f32 %v6864_v36, %v18734_v10  ;;  %v13412_v10 = vld [vmem:[%s22633_s3 + $0x20c] sm:$0xf]  ;;  %v11242_v36 = vor.u32 %v13388_v12, %v11241_v25  ;;  %v13618_v12 = vld [vmem:[%s22633_s3 + $0x878] sm:$0xf0] }
 0x6cf   :  { %v11350_v22 = vor.u32 %v13412_v10, %v11347_v21 }
 0x6d1   :  { %v6985_v61 = vpop.f32.mrf.mxu0 }
 0x6d2   :  { %v6438_v42 = vpop.f32.mrf.mxu1  ;;  %v19536_v2 = vadd.f32 %v6985_v61, %v23117_v27  ;;  %v23118_v27 = vld [vmem:[#allocation89_spill] sm:$0xff] }
 0x6d3   :  { %v19533_v18 = vadd.f32 %v6438_v42, %v19376_v47  ;;  %v12130_v47 = vor.u32 %v13611_v33, %v12129_v63  ;;  %v19563_v33 = vpop.f32.mrf.mxu2 }
 0x6d4   :  { %23119 = vst [vmem:[#allocation61_spill] sm:$0xff] %v19563_v33 }
 0x6d5   :  { %23116 = vst [vmem:[#allocation92_spill] sm:$0xff] %v19533_v18  ;;  %v6866_v26 = vpop.f32.mrf.mxu3 }
 0x6d6   :  { %v19548_v43 = vadd.f32 %v6866_v26, %v18749_v13 }
 0x6d9   :  { %v6988_v61 = vpop.f32.mrf.mxu0 }
 0x6da   :  { %v6441_v42 = vpop.f32.mrf.mxu1  ;;  %6908 = vmatmul.bf16.gmra.mxu3 %v12130_v47  ;;  %v19561_v63 = vadd.f32 %v6988_v61, %v23118_v27  ;;  %v11269_v61 = vld [vmem:[%s22633_s3 + $0x168] sm:$0xf] }
 0x6db   :  { %v6442_v13 = vadd.f32 %v6441_v42, %v19404_v17  ;;  %v23122_v17 = vld [vmem:[#allocation33_spill] sm:$0xff]  ;;  %v11375_v42 = vld [vmem:[%s22633_s3 + $0x25c] sm:$0xf0] }
 0x6dc   :  { %7027 = vmatmul.bf16.gmra.mxu0 %v11350_v22 }
 0x6dd   :  { %v19565_v26 = vadd.f32 %v6700_v48, %v6442_v13  ;;  %v6869_v32 = vpop.f32.mrf.mxu3  ;;  %12480 = vmatmul.msk.bf16.gmra.mxu1 %vm5528_vm0, %v11242_v36  ;;  %v12157_v48 = vld [vmem:[%s22633_s3 + $0x860] sm:$0xf]  ;;  %v6705_v36 = vpop.f32.mrf.mxu2  ;;  %v13395_v13 = vld [vmem:[%s22633_s3 + $0x180] sm:$0xf0] }
 0x6de   :  { %v19569_v18 = vadd.f32 %v6869_v32, %v18777_v45  ;;  %v13419_v45 = vld [vmem:[%s22633_s3 + $0x244] sm:$0xf]  ;;  %v12158_v32 = vor.u32 %v13618_v12, %v12157_v48  ;;  %v23124_v48 = vld [vmem:[#allocation101_spill] sm:$0xff] }
 0x6df   :  { %v11378_v27 = vor.u32 %v13419_v45, %v11375_v42 }
 0x6e0   :  { %23120 = vst [vmem:[#allocation95_spill] sm:$0xff] %v19569_v18 }
 0x6e1   :  { %v6990_v21 = vpop.f32.mrf.mxu0 }
 0x6e2   :  { %v6443_v10 = vpop.f32.mrf.mxu1  ;;  %v19575_v25 = vadd.f32 %v6990_v21, %v23122_v17 }
 0x6e3   :  { %v19572_v47 = vadd.f32 %v6443_v10, %v19417_v24  ;;  %v11270_v10 = vor.u32 %v13395_v13, %v11269_v61  ;;  %v13625_v13 = vld [vmem:[%s22633_s3 + $0x8b0] sm:$0xf0] }
 0x6e5   :  { %23121 = vst [vmem:[#allocation70_spill] sm:$0xff] %v19572_v47  ;;  %v6871_v22 = vpop.f32.mrf.mxu3  ;;  %v23125_v47 = vld [vmem:[#allocation86_spill] sm:$0xff]  ;;  %v19608_v3 = vpop.f32.mrf.mxu2 }
 0x6e6   :  { %v19587_v24 = vadd.f32 %v6871_v22, %v18793_v60  ;;  %23127 = vst [vmem:[#allocation56_spill] sm:$0xff] %v19608_v3 }
 0x6e8   :  { %23123 = vst [vmem:[#allocation23_spill] sm:$0xff] %v19587_v24 }
 0x6e9   :  { %v6993_v17 = vpop.f32.mrf.mxu0 }
 0x6ea   :  { %v6446_v21 = vpop.f32.mrf.mxu1  ;;  %6913 = vmatmul.bf16.gmra.mxu3 %v12158_v32  ;;  %v19600_v12 = vadd.f32 %v6993_v17, %v23124_v48  ;;  %v11297_v17 = vld [vmem:[%s22633_s3 + $0x1a0] sm:$0xf] }
 0x6eb   :  { %v6447_v60 = vadd.f32 %v6446_v21, %v19444_v40  ;;  %v23129_v40 = vld [vmem:[#allocation28_spill] sm:$0xff]  ;;  %v11403_v21 = vld [vmem:[%s22633_s3 + $0x294] sm:$0xf0] }
 0x6ec   :  { %7032 = vmatmul.bf16.gmra.mxu0 %v11378_v27  ;;  %v23130_v27 = vld [vmem:[#allocation75_spill] sm:$0xff] }
 0x6ed   :  { %v19602_v22 = vadd.f32 %v6705_v36, %v6447_v60  ;;  %v6874_v33 = vpop.f32.mrf.mxu3  ;;  %12481 = vmatmul.msk.bf16.gmra.mxu1 %vm5528_vm0, %v11270_v10  ;;  %v12185_v36 = vld [vmem:[%s22633_s3 + $0x898] sm:$0xf]  ;;  %v13402_v60 = vld [vmem:[%s22633_s3 + $0x1b8] sm:$0xf0]  ;;  %v6710_v48 = vpop.f32.mrf.mxu2 }
 0x6ee   :  { %v19606_v37 = vadd.f32 %v6874_v33, %v23125_v47  ;;  %v13426_v47 = vld [vmem:[%s22633_s3 + $0x27c] sm:$0xf] }
 0x6f0   :  { %23126 = vst [vmem:[#allocation62_spill] sm:$0xff] %v19606_v37 }
 0x6f1   :  { %v6995_v42 = vpop.f32.mrf.mxu0 }
 0x6f2   :  { %v6448_v45 = vpop.f32.mrf.mxu1  ;;  %v19614_v61 = vadd.f32 %v6995_v42, %v23129_v40  ;;  %v11298_v42 = vor.u32 %v13402_v60, %v11297_v17  ;;  %v13632_v60 = vld [vmem:[%s22633_s3 + $0x8e8] sm:$0xf0] }
 0x6f3   :  { %v19611_v32 = vadd.f32 %v6448_v45, %v19454_v16  ;;  %v12186_v16 = vor.u32 %v13625_v13, %v12185_v36  ;;  %v11406_v45 = vor.u32 %v13426_v47, %v11403_v21  ;;  %v23132_v13 = vld [vmem:[#allocation105_spill] sm:$0xff] }
 0x6f5   :  { %23128 = vst [vmem:[#allocation67_spill] sm:$0xff] %v19611_v32  ;;  %v6876_v33 = vpop.f32.mrf.mxu3 }
 0x6f6   :  { %v19626_v10 = vadd.f32 %v6876_v33, %v23130_v27 }
 0x6f8   :  { %23131 = vst [vmem:[#allocation68_spill] sm:$0xff] %v19626_v10  ;;  %v23142_v10 = vld [vmem:[#allocation98_spill] sm:$0xff] }
 0x6f9   :  { %v6998_v33 = vpop.f32.mrf.mxu0 }
 0x6fa   :  { %v6451_v40 = vpop.f32.mrf.mxu1  ;;  %6918 = vmatmul.bf16.gmra.mxu3 %v12186_v16  ;;  %v19639_v27 = vadd.f32 %v6998_v33, %v23132_v13  ;;  %v23136_v16 = vld [vmem:[#allocation96_spill] sm:$0xff] }
 0x6fb   :  { %v6452_v36 = vadd.f32 %v6451_v40, %v19484_v58  ;;  %v12213_v58 = vld [vmem:[%s22633_s3 + $0x8d0] sm:$0xf]  ;;  %v13409_v40 = vld [vmem:[%s22633_s3 + $0x1f0] sm:$0xf0] }
 0x6fc   :  { %7037 = vmatmul.bf16.gmra.mxu0 %v11406_v45 }
 0x6fd   :  { %v19641_v3 = vadd.f32 %v6710_v48, %v6452_v36  ;;  %v6879_v32 = vpop.f32.mrf.mxu3  ;;  %12482 = vmatmul.msk.bf16.gmra.mxu1 %vm5528_vm0, %v11298_v42  ;;  %v11325_v42 = vld [vmem:[%s22633_s3 + $0x1d8] sm:$0xf] }
 0x6fe   :  { %v19645_v57 = vadd.f32 %v6879_v32, %v23133_v49  ;;  %v13433_v49 = vld [vmem:[%s22633_s3 + $0x2b4] sm:$0xf]  ;;  %v23137_v32 = vld [vmem:[#allocation19_spill] sm:$0xff]  ;;  %v11326_v36 = vor.u32 %v13409_v40, %v11325_v42 }
 0x700   :  { %23134 = vst [vmem:[#allocation49_spill] sm:$0xff] %v19645_v57 }
 0x701   :  { %v7000_v47 = vpop.f32.mrf.mxu0 }
 0x702   :  { %v6453_v4 = vpop.f32.mrf.mxu1  ;;  %v19651_v17 = vadd.f32 %v7000_v47, %v23136_v16  ;;  %v23139_v16 = vld [vmem:[#allocation100_spill] sm:$0xff] }
 0x703   :  { %v19648_v21 = vadd.f32 %v6453_v4, %v19494_v62  ;;  %v12214_v4 = vor.u32 %v13632_v60, %v12213_v58  ;;  %v11431_v62 = vld [vmem:[%s22633_s3 + $0x2cc] sm:$0xf0] }
 0x704   :  { %v11434_v33 = vor.u32 %v13433_v49, %v11431_v62  ;;  %v12241_v62 = vld [vmem:[%s22633_s3 + $0x908] sm:$0xf] }
 0x705   :  { %23135 = vst [vmem:[#allocation26_spill] sm:$0xff] %v19648_v21  ;;  %v6881_v48 = vpop.f32.mrf.mxu3 }
 0x706   :  { %v19663_v45 = vadd.f32 %v6881_v48, %v23137_v32  ;;  %v23140_v32 = vld [vmem:[#allocation22_spill] sm:$0xff] }
 0x708   :  { %23138 = vst [vmem:[#allocation73_spill] sm:$0xff] %v19663_v45 }
 0x709   :  { %v7003_v13 = vpop.f32.mrf.mxu0 }
 0x70a   :  { %6923 = vmatmul.bf16.gmra.mxu3 %v12214_v4  ;;  %v7242_v47 = vpop.f32.mrf.mxu1  ;;  %v19675_v48 = vadd.f32 %v7003_v13, %v23139_v16  ;;  %v23143_v13 = vld [vmem:[#allocation27_spill] sm:$0xff] }
 0x70b   :  { %v7243_v58 = vadd.f32 %v7242_v47, %v19524_v38  ;;  %v13639_v38 = vld [vmem:[%s22633_s3 + $0x920] sm:$0xf0]  ;;  %v13416_v47 = vld [vmem:[%s22633_s3 + $0x228] sm:$0xf0] }
 0x70c   :  { %7042 = vmatmul.bf16.gmra.mxu0 %v11434_v33 }
 0x70d   :  { %v6884_v60 = vpop.f32.mrf.mxu3  ;;  %12483 = vmatmul.msk.bf16.gmra.mxu1 %vm5528_vm0, %v11326_v36  ;;  %v7492_v42 = vmax.f32 %v7243_v58, 0.0  ;;  %v13440_v36 = vld [vmem:[%s22633_s3 + $0x2ec] sm:$0xf] }
 0x70e   :  { %v19680_v21 = vadd.f32 %v6884_v60, %v23140_v32 }
 0x710   :  { %23141 = vst [vmem:[#allocation65_spill] sm:$0xff] %v19680_v21 }
 0x711   :  { %v7005_v45 = vpop.f32.mrf.mxu0 }
 0x712   :  { %v7244_v57 = vpop.f32.mrf.mxu1  ;;  %v19683_v49 = vadd.f32 %v7005_v45, %v23142_v10  ;;  %v12242_v45 = vor.u32 %v13639_v38, %v12241_v62 }
 0x713   :  { %v7245_v4 = vadd.f32 %v7244_v57, %v19536_v2  ;;  %v11459_v57 = vld [vmem:[%s22633_s3 + $0x304] sm:$0xf0]  ;;  %v11353_v2 = vld [vmem:[%s22633_s3 + $0x210] sm:$0xf] }
 0x714   :  { %v11462_v58 = vor.u32 %v13440_v36, %v11459_v57  ;;  %v11354_v60 = vor.u32 %v13416_v47, %v11353_v2  ;;  %v13447_v2 = vld [vmem:[%s22633_s3 + $0x324] sm:$0xf]  ;;  %v23147_v47 = vld [vmem:[#allocation24_spill] sm:$0xff] }
 0x715   :  { %v7493_v40 = vmax.f32 %v7245_v4, 0.0  ;;  %v6886_v33 = vpop.f32.mrf.mxu3 }
 0x716   :  { %v19696_v10 = vadd.f32 %v6886_v33, %v23143_v13  ;;  %v23145_v33 = vld [vmem:[#allocation44_spill] sm:$0xff] }
 0x717   :  { %v19707_v16 = vpack.c.bf16 %v7493_v40, %v7492_v42  ;;  %v12269_v40 = vld [vmem:[%s22633_s3 + $0x940] sm:$0xf] }
 0x718   :  { %23144 = vst [vmem:[#allocation64_spill] sm:$0xff] %v19696_v10 }
 0x719   :  { %v19709_v32 = vpop.f32.mrf.mxu0 }
 0x71a   :  { %6928 = vmatmul.bf16.gmra.mxu3 %v12242_v45  ;;  %v7247_v4 = vpop.f32.mrf.mxu1 }
 0x71b   :  { %v7248_v62 = vadd.f32 %v7247_v4, %v19561_v63  ;;  %v13646_v63 = vld [vmem:[%s22633_s3 + $0x958] sm:$0xf0]  ;;  %v13423_v4 = vld [vmem:[%s22633_s3 + $0x260] sm:$0xf0] }
 0x71c   :  { %7047 = vmatmul.bf16.gmra.mxu0 %v11462_v58 }
 0x71d   :  { %v6889_v38 = vpop.f32.mrf.mxu3  ;;  %12484 = vmatmul.msk.bf16.gmra.mxu1 %vm5528_vm0, %v11354_v60  ;;  %v7494_v36 = vmax.f32 %v7248_v62, 0.0  ;;  %v12270_v60 = vor.u32 %v13646_v63, %v12269_v40 }
 0x71e   :  { %v19714_v13 = vadd.f32 %v6889_v38, %v23145_v33 }
 0x720   :  { %23146 = vst [vmem:[#allocation76_spill] sm:$0xff] %v19714_v13 }
 0x721   :  { %v19716_v37 = vpop.f32.mrf.mxu0 }
 0x722   :  { %v7249_v24 = vpop.f32.mrf.mxu1 }
 0x723   :  { %v7250_v42 = vadd.f32 %v7249_v24, %v19575_v25  ;;  %v11487_v25 = vld [vmem:[%s22633_s3 + $0x33c] sm:$0xf0]  ;;  %v11381_v24 = vld [vmem:[%s22633_s3 + $0x248] sm:$0xf] }
 0x724   :  { %v11490_v38 = vor.u32 %v13447_v2, %v11487_v25  ;;  %v11382_v33 = vor.u32 %v13423_v4, %v11381_v24  ;;  %v13454_v24 = vld [vmem:[%s22633_s3 + $0x35c] sm:$0xf]  ;;  %v23151_v4 = vld [vmem:[#allocation43_spill] sm:$0xff] }
 0x725   :  { %v7495_v45 = vmax.f32 %v7250_v42, 0.0  ;;  %v6891_v57 = vpop.f32.mrf.mxu3 }
 0x726   :  { %v19729_v58 = vadd.f32 %v6891_v57, %v23147_v47  ;;  %v23149_v47 = vld [vmem:[#allocation103_spill] sm:$0xff] }
 0x727   :  { %v19740_v62 = vpack.c.bf16 %v7495_v45, %v7494_v36  ;;  %v12297_v45 = vld [vmem:[%s22633_s3 + $0x978] sm:$0xf] }
 0x728   :  { %23148 = vst [vmem:[#allocation29_spill] sm:$0xff] %v19729_v58 }
 0x729   :  { %v19742_v42 = vpop.f32.mrf.mxu0 }
 0x72a   :  { %6933 = vmatmul.bf16.gmra.mxu3 %v12270_v60  ;;  %v7252_v40 = vpop.f32.mrf.mxu1 }
 0x72b   :  { %v7253_v63 = vadd.f32 %v7252_v40, %v19600_v12  ;;  %v13653_v12 = vld [vmem:[%s22633_s3 + $0x990] sm:$0xf0]  ;;  %v13430_v40 = vld [vmem:[%s22633_s3 + $0x298] sm:$0xf0] }
 0x72c   :  { %7052 = vmatmul.bf16.gmra.mxu0 %v11490_v38 }
 0x72d   :  { %v6894_v57 = vpop.f32.mrf.mxu3  ;;  %12485 = vmatmul.msk.bf16.gmra.mxu1 %vm5528_vm0, %v11382_v33  ;;  %v7496_v2 = vmax.f32 %v7253_v63, 0.0  ;;  %v12298_v33 = vor.u32 %v13653_v12, %v12297_v45 }
 0x72e   :  { %v19747_v58 = vadd.f32 %v6894_v57, %v23149_v47 }
 0x730   :  { %23150 = vst [vmem:[#allocation78_spill] sm:$0xff] %v19747_v58 }
 0x731   :  { %v19749_v18 = vpop.f32.mrf.mxu0 }
 0x732   :  { %v7254_v13 = vpop.f32.mrf.mxu1 }
 0x733   :  { %v7255_v36 = vadd.f32 %v7254_v13, %v19614_v61  ;;  %v11515_v61 = vld [vmem:[%s22633_s3 + $0x374] sm:$0xf0]  ;;  %v11409_v13 = vld [vmem:[%s22633_s3 + $0x280] sm:$0xf] }
 0x734   :  { %v11518_v57 = vor.u32 %v13454_v24, %v11515_v61  ;;  %v11410_v47 = vor.u32 %v13430_v40, %v11409_v13  ;;  %v13461_v13 = vld [vmem:[%s22633_s3 + $0x394] sm:$0xf]  ;;  %v23155_v40 = vld [vmem:[#allocation63_spill] sm:$0xff] }
 0x735   :  { %v7497_v60 = vmax.f32 %v7255_v36, 0.0  ;;  %v6896_v25 = vpop.f32.mrf.mxu3 }
 0x736   :  { %v19762_v38 = vadd.f32 %v6896_v25, %v23151_v4  ;;  %v23153_v4 = vld [vmem:[#allocation46_spill] sm:$0xff] }
 0x737   :  { %v19773_v63 = vpack.c.bf16 %v7497_v60, %v7496_v2  ;;  %v12325_v60 = vld [vmem:[%s22633_s3 + $0x9b0] sm:$0xf] }
 0x738   :  { %23152 = vst [vmem:[#allocation5_spill] sm:$0xff] %v19762_v38 }
 0x739   :  { %v19775_v36 = vpop.f32.mrf.mxu0 }
 0x73a   :  { %6938 = vmatmul.bf16.gmra.mxu3 %v12298_v33  ;;  %v7257_v45 = vpop.f32.mrf.mxu1 }
 0x73b   :  { %v7258_v12 = vadd.f32 %v7257_v45, %v19639_v27  ;;  %v13660_v27 = vld [vmem:[%s22633_s3 + $0x9c8] sm:$0xf0]  ;;  %v13437_v45 = vld [vmem:[%s22633_s3 + $0x2d0] sm:$0xf0] }
 0x73c   :  { %7057 = vmatmul.bf16.gmra.mxu0 %v11518_v57 }
 0x73d   :  { %v6899_v25 = vpop.f32.mrf.mxu3  ;;  %12486 = vmatmul.msk.bf16.gmra.mxu1 %vm5528_vm0, %v11410_v47  ;;  %v7498_v24 = vmax.f32 %v7258_v12, 0.0  ;;  %v12326_v47 = vor.u32 %v13660_v27, %v12325_v60  ;;  %v23157_v60 = vld [vmem:[#allocation91_spill] sm:$0xff] }
 0x73e   :  { %v19780_v38 = vadd.f32 %v6899_v25, %v23153_v4 }
 0x740   :  { %23154 = vst [vmem:[#allocation77_spill] sm:$0xff] %v19780_v38 }
 0x741   :  { %v19782_v58 = vpop.f32.mrf.mxu0 }
 0x742   :  { %v7259_v10 = vpop.f32.mrf.mxu1 }
 0x743   :  { %v7260_v2 = vadd.f32 %v7259_v10, %v19651_v17  ;;  %v11543_v17 = vld [vmem:[%s22633_s3 + $0x3ac] sm:$0xf0]  ;;  %v11437_v10 = vld [vmem:[%s22633_s3 + $0x2b8] sm:$0xf] }
 0x744   :  { %v11546_v25 = vor.u32 %v13461_v13, %v11543_v17  ;;  %v11438_v4 = vor.u32 %v13437_v45, %v11437_v10  ;;  %v12353_v17 = vld [vmem:[%s22633_s3 + $0x9e8] sm:$0xf] }
 0x745   :  { %v7499_v33 = vmax.f32 %v7260_v2, 0.0  ;;  %v6901_v61 = vpop.f32.mrf.mxu3 }
 0x746   :  { %v19795_v57 = vadd.f32 %v6901_v61, %v23155_v40 }
 0x747   :  { %v19806_v12 = vpack.c.bf16 %v7499_v33, %v7498_v24  ;;  %v23159_v33 = vld [vmem:[#allocation106_spill] sm:$0xff] }
 0x748   :  { %23156 = vst [vmem:[#allocation4_spill] sm:$0xff] %v19795_v57 }
 0x749   :  { %v7023_v2 = vpop.f32.mrf.mxu0 }
 0x74a   :  { %6943 = vmatmul.bf16.gmra.mxu3 %v12326_v47  ;;  %v7262_v61 = vpop.f32.mrf.mxu1  ;;  %v19809_v27 = vadd.f32 %v7023_v2, %v23157_v60  ;;  %v11465_v2 = vld [vmem:[%s22633_s3 + $0x2f0] sm:$0xf] }
 0x74b   :  { %v7263_v40 = vadd.f32 %v7262_v61, %v19675_v48  ;;  %v13667_v48 = vld [vmem:[%s22633_s3 + $0xa00] sm:$0xf0]  ;;  %v13444_v61 = vld [vmem:[%s22633_s3 + $0x308] sm:$0xf0] }
 0x74c   :  { %7062 = vmatmul.bf16.gmra.mxu0 %v11546_v25 }
 0x74d   :  { %v6904_v57 = vpop.f32.mrf.mxu3  ;;  %12487 = vmatmul.msk.bf16.gmra.mxu1 %vm5528_vm0, %v11438_v4  ;;  %v7500_v10 = vmax.f32 %v7263_v40, 0.0  ;;  %v12354_v4 = vor.u32 %v13667_v48, %v12353_v17  ;;  %v23162_v17 = vld [vmem:[#allocation35_spill] sm:$0xff] }
 0x74e   :  { %v19814_v38 = vadd.f32 %v6904_v57, %v19110_v52  ;;  %v13468_v52 = vld [vmem:[%s22633_s3 + $0x3cc] sm:$0xf]  ;;  %v23160_v57 = vld [vmem:[#allocation39_spill] sm:$0xff] }
 0x750   :  { %23158 = vst [vmem:[#allocation69_spill] sm:$0xff] %v19814_v38 }
 0x751   :  { %v7025_v21 = vpop.f32.mrf.mxu0 }
 0x752   :  { %v7264_v24 = vpop.f32.mrf.mxu1  ;;  %v19817_v13 = vadd.f32 %v7025_v21, %v23159_v33 }
 0x753   :  { %v7265_v47 = vadd.f32 %v7264_v24, %v19683_v49  ;;  %v11571_v49 = vld [vmem:[%s22633_s3 + $0x3e4] sm:$0xf0]  ;;  %v11466_v24 = vor.u32 %v13444_v61, %v11465_v2 }
 0x754   :  { %v11574_v40 = vor.u32 %v13468_v52, %v11571_v49  ;;  %v23166_v2 = vld [vmem:[#allocation107_spill] sm:$0xff] }
 0x755   :  { %v7501_v45 = vmax.f32 %v7265_v47, 0.0  ;;  %v6906_v25 = vpop.f32.mrf.mxu3 }
 0x756   :  { %v19830_v21 = vadd.f32 %v6906_v25, %v23160_v57 }
 0x757   :  { %v19841_v60 = vpack.c.bf16 %v7501_v45, %v7500_v10  ;;  %v23165_v10 = vld [vmem:[#allocation30_spill] sm:$0xff] }
 0x758   :  { %23161 = vst [vmem:[#allocation6_spill] sm:$0xff] %v19830_v21  ;;  %v23164_v21 = vld [vmem:[#allocation99_spill] sm:$0xff]  ;;  %v7011_v45 = vadd.f32 %v19716_v37, %v23165_v10 }
 0x759   :  { %v7028_v33 = vpop.f32.mrf.mxu0  ;;  %v7009_v38 = vadd.f32 %v19709_v32, %v23164_v21  ;;  %v13475_v37 = vld [vmem:[%s22633_s3 + $0x404] sm:$0xf] }
 0x75a   :  { %6948 = vmatmul.bf16.gmra.mxu3 %v12354_v4  ;;  %v7267_v47 = vpop.f32.mrf.mxu1  ;;  %v19844_v48 = vadd.f32 %v7028_v33, %v23162_v17  ;;  %v11599_v17 = vld [vmem:[%s22633_s3 + $0x41c] sm:$0xf0]  ;;  %v13451_v10 = vld [vmem:[%s22633_s3 + $0x340] sm:$0xf0] }
 0x75b   :  { %v7268_v52 = vadd.f32 %v7267_v47, %v7009_v38 }
 0x75c   :  { %7067 = vmatmul.bf16.gmra.mxu0 %v11574_v40  ;;  %v12381_v40 = vld [vmem:[%s22633_s3 + $0xa20] sm:$0xf] }
 0x75d   :  { %v6909_v25 = vpop.f32.mrf.mxu3  ;;  %12488 = vmatmul.msk.bf16.gmra.mxu1 %vm5528_vm0, %v11466_v24  ;;  %v7502_v24 = vmax.f32 %v7268_v52, 0.0  ;;  %v11602_v52 = vor.u32 %v13475_v37, %v11599_v17 }
 0x75e   :  { %v19848_v57 = vadd.f32 %v6909_v25, %v19156_v30  ;;  %v13674_v30 = vld [vmem:[%s22633_s3 + $0xa38] sm:$0xf0]  ;;  %v11493_v25 = vld [vmem:[%s22633_s3 + $0x328] sm:$0xf] }
 0x75f   :  { %v12382_v47 = vor.u32 %v13674_v30, %v12381_v40 }
 0x760   :  { %23163 = vst [vmem:[#allocation74_spill] sm:$0xff] %v19848_v57  ;;  %v23177_v57 = vld [vmem:[#allocation102_spill] sm:$0xff] }
 0x761   :  { %v7030_v4 = vpop.f32.mrf.mxu0 }
 0x762   :  { %v7269_v49 = vpop.f32.mrf.mxu1  ;;  %v19855_v61 = vadd.f32 %v7030_v4, %v23166_v2  ;;  %v11494_v4 = vor.u32 %v13451_v10, %v11493_v25  ;;  %v23168_v2 = vld [vmem:[#allocation88_spill] sm:$0xff] }
 0x763   :  { %v7270_v33 = vadd.f32 %v7269_v49, %v7011_v45  ;;  %v23172_v25 = vld [vmem:[#allocation108_spill] sm:$0xff] }
 0x765   :  { %v7503_v32 = vmax.f32 %v7270_v33, 0.0  ;;  %v6911_v21 = vpop.f32.mrf.mxu3 }
 0x766   :  { %v19867_v38 = vadd.f32 %v6911_v21, %v19172_v53  ;;  %v23170_v21 = vld [vmem:[#allocation97_spill] sm:$0xff] }
 0x767   :  { %v19878_v45 = vpack.c.bf16 %v7503_v32, %v7502_v24  ;;  %v23171_v24 = vld [vmem:[#allocation25_spill] sm:$0xff] }
 0x768   :  { %23167 = vst [vmem:[#allocation3_spill] sm:$0xff] %v19867_v38  ;;  %v7014_v38 = vadd.f32 %v19742_v42, %v23170_v21  ;;  %v7016_v32 = vadd.f32 %v19749_v18, %v23171_v24  ;;  %v13482_v18 = vld [vmem:[%s22633_s3 + $0x43c] sm:$0xf] }
 0x769   :  { %v7033_v53 = vpop.f32.mrf.mxu0  ;;  %v13458_v21 = vld [vmem:[%s22633_s3 + $0x378] sm:$0xf0] }
 0x76a   :  { %6953 = vmatmul.bf16.gmra.mxu3 %v12382_v47  ;;  %v7272_v49 = vpop.f32.mrf.mxu1  ;;  %v19881_v33 = vadd.f32 %v7033_v53, %v23168_v2 }
 0x76b   :  { %v7273_v37 = vadd.f32 %v7272_v49, %v7014_v38  ;;  %v11627_v49 = vld [vmem:[%s22633_s3 + $0x454] sm:$0xf0] }
 0x76c   :  { %7072 = vmatmul.bf16.gmra.mxu0 %v11602_v52  ;;  %v12409_v52 = vld [vmem:[%s22633_s3 + $0xa58] sm:$0xf] }
 0x76d   :  { %v6914_v40 = vpop.f32.mrf.mxu3  ;;  %12489 = vmatmul.msk.bf16.gmra.mxu1 %vm5528_vm0, %v11494_v4  ;;  %v7504_v4 = vmax.f32 %v7273_v37, 0.0 }
 0x76e   :  { %v19885_v30 = vadd.f32 %v6914_v40, %v19202_v39  ;;  %v13681_v39 = vld [vmem:[%s22633_s3 + $0xa70] sm:$0xf0]  ;;  %v11521_v40 = vld [vmem:[%s22633_s3 + $0x360] sm:$0xf] }
 0x76f   :  { %v12410_v38 = vor.u32 %v13681_v39, %v12409_v52  ;;  %v11522_v37 = vor.u32 %v13458_v21, %v11521_v40 }
 0x770   :  { %23169 = vst [vmem:[#allocation32_spill] sm:$0xff] %v19885_v30  ;;  %v23176_v30 = vld [vmem:[#allocation31_spill] sm:$0xff] }
 0x771   :  { %v7035_v47 = vpop.f32.mrf.mxu0 }
 0x772   :  { %v7274_v17 = vpop.f32.mrf.mxu1  ;;  %v19892_v10 = vadd.f32 %v7035_v47, %v23172_v25  ;;  %v23174_v25 = vld [vmem:[#allocation34_spill] sm:$0xff] }
 0x773   :  { %v7275_v53 = vadd.f32 %v7274_v17, %v7016_v32  ;;  %v11630_v32 = vor.u32 %v13482_v18, %v11627_v49  ;;  %v23178_v49 = vld [vmem:[#allocation109_spill] sm:$0xff] }
 0x775   :  { %v7505_v42 = vmax.f32 %v7275_v53, 0.0  ;;  %v19900_v2 = vpop.f32.mrf.mxu3 }
 0x776   :  { %23173 = vst [vmem:[#allocation36_spill] sm:$0xff] %v19900_v2  ;;  %v7019_v2 = vadd.f32 %v19775_v36, %v23176_v30 }
 0x777   :  { %v7726_v24 = vpack.c.bf16 %v7505_v42, %v7504_v4  ;;  %v7021_v4 = vadd.f32 %v19782_v58, %v23177_v57  ;;  %v13489_v58 = vld [vmem:[%s22633_s3 + $0x474] sm:$0xf] }
 0x779   :  { %v7038_v47 = vpop.f32.mrf.mxu0 }
 0x77a   :  { %6958 = vmatmul.bf16.gmra.mxu3 %v12410_v38  ;;  %v7277_v17 = vpop.f32.mrf.mxu1  ;;  %v19915_v53 = vadd.f32 %v7038_v47, %v23174_v25  ;;  %v11549_v47 = vld [vmem:[%s22633_s3 + $0x398] sm:$0xf] }
 0x77b   :  { %v7278_v42 = vadd.f32 %v7277_v17, %v7019_v2  ;;  %v11655_v2 = vld [vmem:[%s22633_s3 + $0x48c] sm:$0xf0]  ;;  %v13465_v17 = vld [vmem:[%s22633_s3 + $0x3b0] sm:$0xf0] }
 0x77c   :  { %7077 = vmatmul.bf16.gmra.mxu0 %v11630_v32  ;;  %v12437_v32 = vld [vmem:[%s22633_s3 + $0xa90] sm:$0xf] }
 0x77d   :  { %v6919_v52 = vpop.f32.mrf.mxu3  ;;  %12490 = vmatmul.msk.bf16.gmra.mxu1 %vm5528_vm0, %v11522_v37  ;;  %v7506_v37 = vmax.f32 %v7278_v42, 0.0 }
 0x77e   :  { %v19919_v39 = vadd.f32 %v6919_v52, %v19248_v0  ;;  %v13688_v0 = vld [vmem:[%s22633_s3 + $0xaa8] sm:$0xf0]  ;;  %v11658_v52 = vor.u32 %v13489_v58, %v11655_v2  ;;  %v23181_v58 = vld [vmem:[#allocation82_spill] sm:$0xff] }
 0x77f   :  { %v12438_v57 = vor.u32 %v13688_v0, %v12437_v32 }
 0x780   :  { %23175 = vst [vmem:[#allocation38_spill] sm:$0xff] %v19919_v39 }
 0x781   :  { %v7040_v18 = vpop.f32.mrf.mxu0 }
 0x782   :  { %v7279_v38 = vpop.f32.mrf.mxu1  ;;  %v19926_v40 = vadd.f32 %v7040_v18, %v23178_v49 }
 0x783   :  { %v7280_v21 = vadd.f32 %v7279_v38, %v7021_v4  ;;  %v11550_v4 = vor.u32 %v13465_v17, %v11549_v47  ;;  %v23180_v38 = vld [vmem:[#allocation85_spill] sm:$0xff]  ;;  %v13695_v47 = vld [vmem:[%s22633_s3 + $0xae0] sm:$0xf0] }
 0x785   :  { %v7507_v36 = vmax.f32 %v7280_v21, 0.0  ;;  %v19934_v30 = vpop.f32.mrf.mxu3 }
 0x786   :  { %23179 = vst [vmem:[#allocation8_spill] sm:$0xff] %v19934_v30 }
 0x787   :  { %v7727_v25 = vpack.c.bf16 %v7507_v36, %v7506_v37 }
 0x789   :  { %8570 = vmatpush.bf16.msra.mxu2 %v7727_v25  ;;  %v7043_v42 = vpop.f32.mrf.mxu0 }
 0x78a   :  { %6963 = vmatmul.bf16.gmra.mxu3 %v12438_v57  ;;  %v7282_v18 = vpop.f32.mrf.mxu1  ;;  %v19949_v49 = vadd.f32 %v7043_v42, %v23180_v38 }
 0x78b   :  { %v7283_v21 = vadd.f32 %v7282_v18, %v19809_v27  ;;  %v12465_v27 = vld [vmem:[%s22633_s3 + $0xac8] sm:$0xf] }
 0x78c   :  { %7082 = vmatmul.bf16.gmra.mxu0 %v11658_v52  ;;  %v12466_v25 = vor.u32 %v13695_v47, %v12465_v27  ;;  %v11577_v52 = vld [vmem:[%s22633_s3 + $0x3d0] sm:$0xf] }
 0x78d   :  { %v6924_v32 = vpop.f32.mrf.mxu3  ;;  %12491 = vmatmul.msk.bf16.gmra.mxu1 %vm5528_vm0, %v11550_v4  ;;  %8571 = vmatpush.bf16.msra.mxu2 %v7726_v24  ;;  %v13472_v4 = vld [vmem:[%s22633_s3 + $0x3e8] sm:$0xf0] }
 0x78e   :  { %v19954_v0 = vadd.f32 %v6924_v32, %v19288_v44  ;;  %v7508_v44 = vmax.f32 %v7283_v21, 0.0  ;;  %v11578_v38 = vor.u32 %v13472_v4, %v11577_v52 }
 0x791   :  { %8572 = vmatpush.bf16.msra.mxu2 %v19878_v45  ;;  %v7045_v37 = vpop.f32.mrf.mxu0  ;;  %v13496_v45 = vld [vmem:[%s22633_s3 + $0x4ac] sm:$0xf] }
 0x792   :  { %v7284_v36 = vpop.f32.mrf.mxu1  ;;  %v19958_v57 = vadd.f32 %v7045_v37, %v23181_v58 }
 0x793   :  { %v7285_v2 = vadd.f32 %v7284_v36, %v19817_v13  ;;  %v11683_v13 = vld [vmem:[%s22633_s3 + $0x4c4] sm:$0xf0] }
 0x794   :  { %v11686_v18 = vor.u32 %v13496_v45, %v11683_v13  ;;  %v11605_v45 = vld [vmem:[%s22633_s3 + $0x408] sm:$0xf] }
 0x795   :  { %v7509_v17 = vmax.f32 %v7285_v2, 0.0  ;;  %v19967_v24 = vpop.f32.mrf.mxu3  ;;  %8573 = vmatpush.bf16.msra.mxu2 %v19841_v60  ;;  %v12527_v2 = vld [vmem:[%s22640_s5] sm:$0xf] }
 0x796   :  { %23182 = vst [vmem:[#allocation12_spill] sm:$0xff] %v19967_v24 }
 0x797   :  { %v19982_v42 = vpack.c.bf16 %v7509_v17, %v7508_v44  ;;  %v11711_v17 = vld [vmem:[%s22633_s3 + $0x4fc] sm:$0xf0] }
 0x799   :  { %8574 = vmatpush.bf16.msra.mxu2 %v19806_v12  ;;  %v19985_v60 = vpop.f32.mrf.mxu0 }
 0x79a   :  { %6968 = vmatmul.bf16.gmra.mxu3 %v12466_v25  ;;  %v7287_v21 = vpop.f32.mrf.mxu1 }
 0x79b   :  { %v7288_v32 = vadd.f32 %v7287_v21, %v19844_v48  ;;  %v13700_v48 = vld [vmem:[%s22640_s5 + $0x18] sm:$0xf0] }
 0x79c   :  { %7087 = vmatmul.bf16.gmra.mxu0 %v11686_v18 }
 0x79d   :  { %v6929_v37 = vpop.f32.mrf.mxu3  ;;  %12492 = vmatmul.msk.bf16.gmra.mxu1 %vm5528_vm0, %v11578_v38  ;;  %8575 = vmatpush.bf16.msra.mxu2 %v19773_v63  ;;  %v7510_v47 = vmax.f32 %v7288_v32, 0.0  ;;  %v12528_v63 = vor.u32 %v13700_v48, %v12527_v2  ;;  %v13707_v2 = vld [vmem:[%s22640_s5 + $0x50] sm:$0xf0] }
 0x79e   :  { %v19990_v36 = vadd.f32 %v6929_v37, %v19328_v59 }
 0x7a0   :  { %23183 = vst [vmem:[#allocation9_spill] sm:$0xff] %v19990_v36 }
 0x7a1   :  { %8576 = vmatpush.bf16.msra.mxu2 %v19740_v62  ;;  %v19994_v58 = vpop.f32.mrf.mxu0  ;;  %v13503_v62 = vld [vmem:[%s22633_s3 + $0x4e4] sm:$0xf] }
 0x7a2   :  { %v7289_v12 = vpop.f32.mrf.mxu1  ;;  %v11714_v13 = vor.u32 %v13503_v62, %v11711_v17  ;;  %v11633_v62 = vld [vmem:[%s22633_s3 + $0x440] sm:$0xf] }
 0x7a3   :  { %v7290_v27 = vadd.f32 %v7289_v12, %v19855_v61  ;;  %v13479_v61 = vld [vmem:[%s22633_s3 + $0x420] sm:$0xf0]  ;;  %v12555_v12 = vld [vmem:[%s22640_s5 + $0x38] sm:$0xf] }
 0x7a4   :  { %v11606_v52 = vor.u32 %v13479_v61, %v11605_v45 }
 0x7a5   :  { %v7511_v59 = vmax.f32 %v7290_v27, 0.0  ;;  %v20003_v44 = vpop.f32.mrf.mxu3  ;;  %8577 = vmatpush.bf16.msra.mxu2 %v19707_v16 }
 0x7a6   :  { %23184 = vst [vmem:[#allocation41_spill] sm:$0xff] %v20003_v44 }
 0x7a7   :  { %v20018_v25 = vpack.c.bf16 %v7511_v59, %v7510_v47  ;;  %v12556_v59 = vor.u32 %v13707_v2, %v12555_v12  ;;  %v12583_v2 = vld [vmem:[%s22640_s5 + $0x70] sm:$0xf] }
 0x7a8   :  { %8578 = vmatmul.bf16.vlgmr.msra.gmra.mxu2 %v12528_v63  ;;  %v11739_v63 = vld [vmem:[%s22633_s3 + $0x534] sm:$0xf0] }
 0x7a9   :  { %v20020_v4 = vpop.f32.mrf.mxu0 }
 0x7aa   :  { %v7292_v16 = vpop.f32.mrf.mxu1 }
 0x7ab   :  { %v7293_v18 = vadd.f32 %v7292_v16, %v19881_v33 }
 0x7ac   :  { %7092 = vmatmul.bf16.gmra.mxu0 %v11714_v13 }
 0x7ad   :  { %v6934_v38 = vpop.f32.mrf.mxu3  ;;  %12493 = vmatmul.msk.bf16.gmra.mxu1 %vm5528_vm0, %v11606_v52  ;;  %v7512_v48 = vmax.f32 %v7293_v18, 0.0 }
 0x7ae   :  { %v20025_v21 = vadd.f32 %v6934_v38, %v19368_v1  ;;  %v13510_v1 = vld [vmem:[%s22633_s3 + $0x51c] sm:$0xf] }
 0x7af   :  { %v11742_v45 = vor.u32 %v13510_v1, %v11739_v63  ;;  %v11767_v63 = vld [vmem:[%s22633_s3 + $0x56c] sm:$0xf0] }
 0x7b0   :  { %23185 = vst [vmem:[#allocation42_spill] sm:$0xff] %v20025_v21 }
 0x7b1   :  { %v20027_v32 = vpop.f32.mrf.mxu0 }
 0x7b2   :  { %v7294_v37 = vpop.f32.mrf.mxu1 }
 0x7b3   :  { %v7295_v33 = vadd.f32 %v7294_v37, %v19892_v10  ;;  %v13486_v10 = vld [vmem:[%s22633_s3 + $0x458] sm:$0xf0] }
 0x7b4   :  { %v11634_v61 = vor.u32 %v13486_v10, %v11633_v62  ;;  %v11661_v62 = vld [vmem:[%s22633_s3 + $0x478] sm:$0xf] }
 0x7b5   :  { %v7513_v27 = vmax.f32 %v7295_v33, 0.0  ;;  %v20036_v47 = vpop.f32.mrf.mxu3  ;;  %v13714_v33 = vld [vmem:[%s22640_s5 + $0x88] sm:$0xf0] }
 0x7b6   :  { %23186 = vst [vmem:[#allocation47_spill] sm:$0xff] %v20036_v47  ;;  %v12584_v1 = vor.u32 %v13714_v33, %v12583_v2 }
 0x7b7   :  { %v20050_v17 = vpack.c.bf16 %v7513_v27, %v7512_v48 }
 0x7b8   :  { %8583 = vmatmul.bf16.gmra.mxu2 %v12556_v59 }
 0x7b9   :  { %v20052_v13 = vpop.f32.mrf.mxu0 }
 0x7ba   :  { %v7297_v52 = vpop.f32.mrf.mxu1 }
 0x7bb   :  { %v7298_v16 = vadd.f32 %v7297_v52, %v19915_v53 }
 0x7bc   :  { %7097 = vmatmul.bf16.gmra.mxu0 %v11742_v45 }
 0x7bd   :  { %v6939_v18 = vpop.f32.mrf.mxu3  ;;  %12494 = vmatmul.msk.bf16.gmra.mxu1 %vm5528_vm0, %v11634_v61  ;;  %v7514_v48 = vmax.f32 %v7298_v16, 0.0 }
 0x7be   :  { %v20057_v38 = vadd.f32 %v6939_v18, %v19407_v15  ;;  %v13517_v15 = vld [vmem:[%s22633_s3 + $0x554] sm:$0xf]  ;;  %v23189_v18 = vld [vmem:[#allocation15_spill] sm:$0xff] }
 0x7bf   :  { %v11770_v45 = vor.u32 %v13517_v15, %v11767_v63  ;;  %v23191_v15 = vld [vmem:[#allocation16_spill] sm:$0xff] }
 0x7c0   :  { %23187 = vst [vmem:[#allocation52_spill] sm:$0xff] %v20057_v38 }
 0x7c1   :  { %v20059_v37 = vpop.f32.mrf.mxu0 }
 0x7c2   :  { %v7299_v12 = vpop.f32.mrf.mxu1 }
 0x7c3   :  { %v7300_v53 = vadd.f32 %v7299_v12, %v19926_v40  ;;  %v13493_v40 = vld [vmem:[%s22633_s3 + $0x490] sm:$0xf0] }
 0x7c4   :  { %v11662_v61 = vor.u32 %v13493_v40, %v11661_v62 }
 0x7c5   :  { %v7515_v27 = vmax.f32 %v7300_v53, 0.0  ;;  %v20068_v59 = vpop.f32.mrf.mxu3 }
 0x7c6   :  { %23188 = vst [vmem:[#allocation59_spill] sm:$0xff] %v20068_v59 }
 0x7c7   :  { %v20082_v10 = vpack.c.bf16 %v7515_v27, %v7514_v48  ;;  %v12611_v27 = vld [vmem:[%s22640_s5 + $0xa8] sm:$0xf] }
 0x7c8   :  { %8588 = vmatmul.bf16.gmra.mxu2 %v12584_v1  ;;  %v13721_v1 = vld [vmem:[%s22640_s5 + $0xc0] sm:$0xf0] }
 0x7c9   :  { %v7063_v52 = vpop.f32.mrf.mxu0 }
 0x7ca   :  { %v7302_v16 = vpop.f32.mrf.mxu1  ;;  %v20085_v12 = vadd.f32 %v7063_v52, %v23189_v18  ;;  %v11795_v52 = vld [vmem:[%s22633_s3 + $0x5a4] sm:$0xf0] }
 0x7cb   :  { %v7303_v2 = vadd.f32 %v7302_v16, %v19949_v49 }
 0x7cc   :  { %7102 = vmatmul.bf16.gmra.mxu0 %v11770_v45 }
 0x7cd   :  { %v6944_v33 = vpop.f32.mrf.mxu3  ;;  %12495 = vmatmul.msk.bf16.gmra.mxu1 %vm5528_vm0, %v11662_v61  ;;  %v7516_v62 = vmax.f32 %v7303_v2, 0.0  ;;  %v13524_v61 = vld [vmem:[%s22633_s3 + $0x58c] sm:$0xf] }
 0x7ce   :  { %v20090_v53 = vadd.f32 %v6944_v33, %v19447_v46  ;;  %v12612_v46 = vor.u32 %v13721_v1, %v12611_v27  ;;  %v11798_v18 = vor.u32 %v13524_v61, %v11795_v52  ;;  %v23193_v27 = vld [vmem:[#allocation17_spill] sm:$0xff] }
 0x7d0   :  { %23190 = vst [vmem:[#allocation93_spill] sm:$0xff] %v20090_v53 }
 0x7d1   :  { %v7065_v59 = vpop.f32.mrf.mxu0 }
 0x7d2   :  { %v7304_v48 = vpop.f32.mrf.mxu1  ;;  %v20099_v63 = vadd.f32 %v7065_v59, %v23191_v15  ;;  %v11689_v59 = vld [vmem:[%s22633_s3 + $0x4b0] sm:$0xf] }
 0x7d3   :  { %v7305_v49 = vadd.f32 %v7304_v48, %v19958_v57  ;;  %v13500_v57 = vld [vmem:[%s22633_s3 + $0x4c8] sm:$0xf0] }
 0x7d4   :  { %v11690_v2 = vor.u32 %v13500_v57, %v11689_v59  ;;  %v12639_v59 = vld [vmem:[%s22640_s5 + $0xe0] sm:$0xf]  ;;  %v13728_v57 = vld [vmem:[%s22640_s5 + $0xf8] sm:$0xf0] }
 0x7d5   :  { %v7517_v40 = vmax.f32 %v7305_v49, 0.0  ;;  %v20102_v45 = vpop.f32.mrf.mxu3 }
 0x7d6   :  { %23192 = vst [vmem:[#allocation84_spill] sm:$0xff] %v20102_v45  ;;  %v23195_v45 = vld [vmem:[#allocation71_spill] sm:$0xff] }
 0x7d7   :  { %v20116_v16 = vpack.c.bf16 %v7517_v40, %v7516_v62  ;;  %v7049_v47 = vadd.f32 %v19985_v60, %v23195_v45  ;;  %v23196_v62 = vld [vmem:[#allocation21_spill] sm:$0xff] }
 0x7d8   :  { %8593 = vmatmul.bf16.gmra.mxu2 %v12612_v46  ;;  %v7051_v40 = vadd.f32 %v19994_v58, %v23196_v62  ;;  %v12640_v58 = vor.u32 %v13728_v57, %v12639_v59  ;;  %v23199_v59 = vld [vmem:[#allocation58_spill] sm:$0xff] }
 0x7d9   :  { %v7068_v33 = vpop.f32.mrf.mxu0 }
 0x7da   :  { %v7307_v48 = vpop.f32.mrf.mxu1  ;;  %v20119_v1 = vadd.f32 %v7068_v33, %v23193_v27  ;;  %v11717_v27 = vld [vmem:[%s22633_s3 + $0x4e8] sm:$0xf] }
 0x7db   :  { %v7308_v46 = vadd.f32 %v7307_v48, %v7049_v47  ;;  %v13531_v47 = vld [vmem:[%s22633_s3 + $0x5c4] sm:$0xf]  ;;  %v11823_v48 = vld [vmem:[%s22633_s3 + $0x5dc] sm:$0xf0] }
 0x7dc   :  { %7107 = vmatmul.bf16.gmra.mxu0 %v11798_v18  ;;  %v23197_v18 = vld [vmem:[#allocation37_spill] sm:$0xff] }
 0x7dd   :  { %v6949_v15 = vpop.f32.mrf.mxu3  ;;  %12496 = vmatmul.msk.bf16.gmra.mxu1 %vm5528_vm0, %v11690_v2  ;;  %v7518_v33 = vmax.f32 %v7308_v46, 0.0 }
 0x7de   :  { %v20123_v49 = vadd.f32 %v6949_v15, %v19487_v34  ;;  %v13507_v15 = vld [vmem:[%s22633_s3 + $0x500] sm:$0xf0] }
 0x7df   :  { %v11718_v46 = vor.u32 %v13507_v15, %v11717_v27  ;;  %v12667_v27 = vld [vmem:[%s22640_s5 + $0x118] sm:$0xf]  ;;  %v13735_v15 = vld [vmem:[%s22640_s5 + $0x130] sm:$0xf0] }
 0x7e0   :  { %23194 = vst [vmem:[#allocation81_spill] sm:$0xff] %v20123_v49  ;;  %v23201_v49 = vld [vmem:[#allocation18_spill] sm:$0xff] }
 0x7e1   :  { %v7070_v61 = vpop.f32.mrf.mxu0 }
 0x7e2   :  { %v7309_v52 = vpop.f32.mrf.mxu1  ;;  %v20136_v34 = vadd.f32 %v7070_v61, %v23197_v18 }
 0x7e3   :  { %v7310_v2 = vadd.f32 %v7309_v52, %v7051_v40  ;;  %v11826_v40 = vor.u32 %v13531_v47, %v11823_v48 }
 0x7e5   :  { %v7519_v60 = vmax.f32 %v7310_v2, 0.0  ;;  %v20138_v45 = vpop.f32.mrf.mxu3 }
 0x7e6   :  { %23198 = vst [vmem:[#allocation80_spill] sm:$0xff] %v20138_v45  ;;  %v7054_v45 = vadd.f32 %v20020_v4, %v23201_v49 }
 0x7e7   :  { %v20152_v62 = vpack.c.bf16 %v7519_v60, %v7518_v33  ;;  %v23202_v33 = vld [vmem:[#allocation13_spill] sm:$0xff] }
 0x7e8   :  { %8598 = vmatmul.bf16.gmra.mxu2 %v12640_v58  ;;  %v7056_v60 = vadd.f32 %v20027_v32, %v23202_v33  ;;  %v12668_v32 = vor.u32 %v13735_v15, %v12667_v27 }
 0x7e9   :  { %v7073_v61 = vpop.f32.mrf.mxu0 }
 0x7ea   :  { %v7312_v52 = vpop.f32.mrf.mxu1  ;;  %v20155_v57 = vadd.f32 %v7073_v61, %v23199_v59  ;;  %v11745_v59 = vld [vmem:[%s22633_s3 + $0x520] sm:$0xf] }
 0x7eb   :  { %v7313_v58 = vadd.f32 %v7312_v52, %v7054_v45  ;;  %v13538_v45 = vld [vmem:[%s22633_s3 + $0x5fc] sm:$0xf]  ;;  %v11851_v52 = vld [vmem:[%s22633_s3 + $0x614] sm:$0xf0] }
 0x7ec   :  { %7112 = vmatmul.bf16.gmra.mxu0 %v11826_v40  ;;  %v23203_v40 = vld [vmem:[#allocation57_spill] sm:$0xff] }
 0x7ed   :  { %v6954_v18 = vpop.f32.mrf.mxu3  ;;  %12497 = vmatmul.msk.bf16.gmra.mxu1 %vm5528_vm0, %v11718_v46  ;;  %v7520_v61 = vmax.f32 %v7313_v58, 0.0 }
 0x7ee   :  { %v20159_v2 = vadd.f32 %v6954_v18, %v19526_v35  ;;  %v13514_v18 = vld [vmem:[%s22633_s3 + $0x538] sm:$0xf0] }
 0x7ef   :  { %v11746_v58 = vor.u32 %v13514_v18, %v11745_v59 }
 0x7f0   :  { %23200 = vst [vmem:[#allocation83_spill] sm:$0xff] %v20159_v2 }
 0x7f1   :  { %v7075_v47 = vpop.f32.mrf.mxu0 }
 0x7f2   :  { %v7314_v48 = vpop.f32.mrf.mxu1  ;;  %v20172_v35 = vadd.f32 %v7075_v47, %v23203_v40 }
 0x7f3   :  { %v7315_v46 = vadd.f32 %v7314_v48, %v7056_v60  ;;  %v11854_v60 = vor.u32 %v13538_v45, %v11851_v52  ;;  %v13742_v52 = vld [vmem:[%s22640_s5 + $0x168] sm:$0xf0] }
 0x7f5   :  { %v7521_v4 = vmax.f32 %v7315_v46, 0.0  ;;  %v20174_v49 = vpop.f32.mrf.mxu3  ;;  %v23206_v46 = vld [vmem:[#allocation104_spill] sm:$0xff] }
 0x7f6   :  { %23204 = vst [vmem:[#allocation87_spill] sm:$0xff] %v20174_v49  ;;  %v7059_v2 = vadd.f32 %v20052_v13, %v23206_v46  ;;  %v23207_v49 = vld [vmem:[#allocation51_spill] sm:$0xff] }
 0x7f7   :  { %v7734_v33 = vpack.c.bf16 %v7521_v4, %v7520_v61  ;;  %v7061_v61 = vadd.f32 %v20059_v37, %v23207_v49  ;;  %v11879_v49 = vld [vmem:[%s22633_s3 + $0x64c] sm:$0xf0] }
 0x7f8   :  { %8603 = vmatmul.bf16.gmra.mxu2 %v12668_v32 }
 0x7f9   :  { %v7078_v47 = vpop.f32.mrf.mxu0 }
 0x7fa   :  { %v7317_v48 = vpop.f32.mrf.mxu1  ;;  %v20189_v27 = vadd.f32 %v7078_v47, %v19159_v6  ;;  %v12695_v6 = vld [vmem:[%s22640_s5 + $0x150] sm:$0xf] }
 0x7fb   :  { %v7318_v4 = vadd.f32 %v7317_v48, %v7059_v2  ;;  %v12696_v37 = vor.u32 %v13742_v52, %v12695_v6  ;;  %v13545_v2 = vld [vmem:[%s22633_s3 + $0x634] sm:$0xf] }
 0x7fc   :  { %7117 = vmatmul.bf16.gmra.mxu0 %v11854_v60  ;;  %v11882_v48 = vor.u32 %v13545_v2, %v11879_v49  ;;  %v13552_v2 = vld [vmem:[%s22633_s3 + $0x66c] sm:$0xf]  ;;  %v11907_v49 = vld [vmem:[%s22633_s3 + $0x684] sm:$0xf0] }
 0x7fd   :  { %v6959_v15 = vpop.f32.mrf.mxu3  ;;  %12498 = vmatmul.msk.bf16.gmra.mxu1 %vm5528_vm0, %v11746_v58  ;;  %v7522_v18 = vmax.f32 %v7318_v4, 0.0  ;;  %v11773_v58 = vld [vmem:[%s22633_s3 + $0x558] sm:$0xf] }
 0x7fe   :  { %v20193_v40 = vadd.f32 %v6959_v15, %v19565_v26 }
 0x800   :  { %23205 = vst [vmem:[#allocation89_spill] sm:$0xff] %v20193_v40 }
 0x801   :  { %v7080_v32 = vpop.f32.mrf.mxu0 }
 0x802   :  { %v7319_v45 = vpop.f32.mrf.mxu1  ;;  %v20206_v26 = vadd.f32 %v7080_v32, %v19178_v29  ;;  %v13521_v29 = vld [vmem:[%s22633_s3 + $0x570] sm:$0xf0] }
 0x803   :  { %v7320_v59 = vadd.f32 %v7319_v45, %v7061_v61  ;;  %v11774_v15 = vor.u32 %v13521_v29, %v11773_v58  ;;  %v11910_v29 = vor.u32 %v13552_v2, %v11907_v49 }
 0x805   :  { %v7523_v13 = vmax.f32 %v7320_v59, 0.0  ;;  %v20208_v60 = vpop.f32.mrf.mxu3 }
 0x806   :  { %23208 = vst [vmem:[#allocation33_spill] sm:$0xff] %v20208_v60  ;;  %v12103_v60 = vld [vmem:[%s22633_s3 + $0x80c] sm:$0xf0] }
 0x807   :  { %v7735_v47 = vpack.c.bf16 %v7523_v13, %v7522_v18  ;;  %v12723_v18 = vld [vmem:[%s22640_s5 + $0x188] sm:$0xf] }
 0x808   :  { %8608 = vmatmul.bf16.gmra.mxu2 %v12696_v37 }
 0x809   :  { %8659 = vmatpush.bf16.msra.mxu3 %v7735_v47  ;;  %v7083_v46 = vpop.f32.mrf.mxu0 }
 0x80a   :  { %v7322_v61 = vpop.f32.mrf.mxu1  ;;  %v20223_v4 = vadd.f32 %v7083_v46, %v19205_v54  ;;  %v13749_v54 = vld [vmem:[%s22640_s5 + $0x1a0] sm:$0xf0] }
 0x80b   :  { %v7323_v32 = vadd.f32 %v7322_v61, %v20085_v12 }
 0x80c   :  { %7122 = vmatmul.bf16.gmra.mxu0 %v11882_v48 }
 0x80d   :  { %v6964_v45 = vpop.f32.mrf.mxu3  ;;  %12499 = vmatmul.msk.bf16.gmra.mxu1 %vm5528_vm0, %v11774_v15  ;;  %8660 = vmatpush.bf16.msra.mxu3 %v7734_v33 }
 0x80e   :  { %v20228_v6 = vadd.f32 %v6964_v45, %v19602_v22  ;;  %v7524_v22 = vmax.f32 %v7323_v32, 0.0  ;;  %v12751_v32 = vld [vmem:[%s22640_s5 + $0x1c0] sm:$0xf] }
 0x810   :  { %23209 = vst [vmem:[#allocation101_spill] sm:$0xff] %v20228_v6  ;;  %v12075_v6 = vld [vmem:[%s22633_s3 + $0x7d4] sm:$0xf0] }
 0x811   :  { %8661 = vmatpush.bf16.msra.mxu3 %v20152_v62  ;;  %v7085_v52 = vpop.f32.mrf.mxu0  ;;  %v12724_v62 = vor.u32 %v13749_v54, %v12723_v18 }
 0x812   :  { %v7324_v59 = vpop.f32.mrf.mxu1  ;;  %v20238_v12 = vadd.f32 %v7085_v52, %v19224_v20  ;;  %v11801_v20 = vld [vmem:[%s22633_s3 + $0x590] sm:$0xf] }
 0x813   :  { %v7325_v13 = vadd.f32 %v7324_v59, %v20099_v63  ;;  %v13528_v63 = vld [vmem:[%s22633_s3 + $0x5a8] sm:$0xf0]  ;;  %v20283_v59 = vpop.f32.mrf.mxu2 }
 0x814   :  { %v11802_v47 = vor.u32 %v13528_v63, %v11801_v20  ;;  %23212 = vst [vmem:[#allocation75_spill] sm:$0xff] %v20283_v59 }
 0x815   :  { %v7525_v37 = vmax.f32 %v7325_v13, 0.0  ;;  %v20241_v33 = vpop.f32.mrf.mxu3  ;;  %8662 = vmatpush.bf16.msra.mxu3 %v20116_v16 }
 0x816   :  { %23210 = vst [vmem:[#allocation86_spill] sm:$0xff] %v20241_v33  ;;  %v20512_v33 = vpop.permute.xlu1 %7864 }
 0x817   :  { %v20256_v58 = vpack.c.bf16 %v7525_v37, %v7524_v22  ;;  %v13559_v22 = vld [vmem:[%s22633_s3 + $0x6a4] sm:$0xf]  ;;  %v11935_v37 = vld [vmem:[%s22633_s3 + $0x6bc] sm:$0xf0] }
 0x818   :  { %8613 = vmatmul.bf16.gmra.mxu2 %v12724_v62  ;;  %v13535_v62 = vld [vmem:[%s22633_s3 + $0x5e0] sm:$0xf0]  ;;  %v11938_v49 = vor.u32 %v13559_v22, %v11935_v37  ;;  %v11857_v22 = vld [vmem:[%s22633_s3 + $0x600] sm:$0xf] }
 0x819   :  { %8663 = vmatpush.bf16.msra.mxu3 %v20082_v10  ;;  %v20259_v16 = vpop.f32.mrf.mxu0 }
 0x81a   :  { %v7327_v48 = vpop.f32.mrf.mxu1 }
 0x81b   :  { %v7328_v15 = vadd.f32 %v7327_v48, %v20119_v1  ;;  %v13756_v1 = vld [vmem:[%s22640_s5 + $0x1d8] sm:$0xf0]  ;;  %v12779_v48 = vld [vmem:[%s22640_s5 + $0x1f8] sm:$0xf] }
 0x81c   :  { %7127 = vmatmul.bf16.gmra.mxu0 %v11910_v29  ;;  %v12752_v54 = vor.u32 %v13756_v1, %v12751_v32  ;;  %v13763_v32 = vld [vmem:[%s22640_s5 + $0x210] sm:$0xf0] }
 0x81d   :  { %v6969_v46 = vpop.f32.mrf.mxu3  ;;  %12500 = vmatmul.msk.bf16.gmra.mxu1 %vm5528_vm0, %v11802_v47  ;;  %8664 = vmatpush.bf16.msra.mxu3 %v20050_v17  ;;  %v12529_v17 = vld [vmem:[%s22640_s5 + $0x1c] sm:$0xf0] }
 0x81e   :  { %v20264_v61 = vadd.f32 %v6969_v46, %v19641_v3  ;;  %v13697_v3 = vld [vmem:[%s22640_s5 + $0x4] sm:$0xf] }
 0x81f   :  { %v12532_v13 = vor.u32 %v13697_v3, %v12529_v17 }
 0x820   :  { %23211 = vst [vmem:[#allocation28_spill] sm:$0xff] %v20264_v61  ;;  %v12047_v61 = vld [vmem:[%s22633_s3 + $0x79c] sm:$0xf0] }
 0x821   :  { %8665 = vmatpush.bf16.msra.mxu3 %v20018_v25  ;;  %v20271_v10 = vpop.f32.mrf.mxu0  ;;  %v7526_v25 = vmax.f32 %v7328_v15, 0.0 }
 0x822   :  { %v7329_v45 = vpop.f32.mrf.mxu1 }
 0x823   :  { %v7330_v52 = vadd.f32 %v7329_v45, %v20136_v34  ;;  %v11829_v34 = vld [vmem:[%s22633_s3 + $0x5c8] sm:$0xf]  ;;  %v12557_v45 = vld [vmem:[%s22640_s5 + $0x54] sm:$0xf0] }
 0x824   :  { %v11830_v20 = vor.u32 %v13535_v62, %v11829_v34 }
 0x825   :  { %v7527_v18 = vmax.f32 %v7330_v52, 0.0  ;;  %8666 = vmatpush.bf16.msra.mxu3 %v19982_v42 }
 0x827   :  { %v20298_v2 = vpack.c.bf16 %v7527_v18, %v7526_v25  ;;  %v12780_v25 = vor.u32 %v13763_v32, %v12779_v48  ;;  %v12807_v48 = vld [vmem:[%s22640_s5 + $0x230] sm:$0xf] }
 0x828   :  { %8618 = vmatmul.bf16.gmra.mxu2 %v12752_v54  ;;  %8667 = vmatmul.bf16.vlgmr.msra.gmra.mxu3 %v12532_v13  ;;  %v13566_v54 = vld [vmem:[%s22633_s3 + $0x6dc] sm:$0xf]  ;;  %v11963_v13 = vld [vmem:[%s22633_s3 + $0x6f4] sm:$0xf0] }
 0x829   :  { %v20300_v63 = vpop.f32.mrf.mxu0  ;;  %v11966_v34 = vor.u32 %v13566_v54, %v11963_v13  ;;  %v13573_v13 = vld [vmem:[%s22633_s3 + $0x714] sm:$0xf] }
 0x82a   :  { %v7332_v42 = vpop.f32.mrf.mxu1 }
 0x82b   :  { %v7333_v29 = vadd.f32 %v7332_v42, %v20155_v57  ;;  %v20303_v47 = vpop.f32.mrf.mxu2  ;;  %v13704_v57 = vld [vmem:[%s22640_s5 + $0x3c] sm:$0xf] }
 0x82c   :  { %7132 = vmatmul.bf16.gmra.mxu0 %v11938_v49  ;;  %v12560_v18 = vor.u32 %v13704_v57, %v12557_v45  ;;  %v13770_v57 = vld [vmem:[%s22640_s5 + $0x248] sm:$0xf0]  ;;  %v12585_v45 = vld [vmem:[%s22640_s5 + $0x8c] sm:$0xf0] }
 0x82d   :  { %12501 = vmatmul.msk.bf16.gmra.mxu1 %vm5528_vm0, %v11830_v20  ;;  %v7528_v17 = vmax.f32 %v7333_v29, 0.0 }
 0x831   :  { %v20309_v15 = vpop.f32.mrf.mxu0 }
 0x832   :  { %v7334_v46 = vpop.f32.mrf.mxu1 }
 0x833   :  { %v7335_v1 = vadd.f32 %v7334_v46, %v20172_v35  ;;  %v20321_v3 = vpop.f32.mrf.mxu2  ;;  %v13542_v35 = vld [vmem:[%s22633_s3 + $0x618] sm:$0xf0] }
 0x834   :  { %v11858_v62 = vor.u32 %v13542_v35, %v11857_v22  ;;  %v11991_v22 = vld [vmem:[%s22633_s3 + $0x72c] sm:$0xf0]  ;;  %v11885_v35 = vld [vmem:[%s22633_s3 + $0x638] sm:$0xf] }
 0x835   :  { %v7529_v52 = vmax.f32 %v7335_v1, 0.0 }
 0x837   :  { %v20335_v37 = vpack.c.bf16 %v7529_v52, %v7528_v17 }
 0x838   :  { %8623 = vmatmul.bf16.gmra.mxu2 %v12780_v25  ;;  %8672 = vmatmul.bf16.gmra.mxu3 %v12560_v18  ;;  %v12808_v18 = vor.u32 %v13770_v57, %v12807_v48 }
 0x839   :  { %v20337_v49 = vpop.f32.mrf.mxu0 }
 0x83a   :  { %v7337_v20 = vpop.f32.mrf.mxu1 }
 0x83b   :  { %v7338_v42 = vadd.f32 %v7337_v20, %v20189_v27  ;;  %v20340_v29 = vpop.f32.mrf.mxu2  ;;  %v13711_v27 = vld [vmem:[%s22640_s5 + $0x74] sm:$0xf] }
 0x83c   :  { %7137 = vmatmul.bf16.gmra.mxu0 %v11966_v34  ;;  %v12588_v54 = vor.u32 %v13711_v27, %v12585_v45  ;;  %v12835_v45 = vld [vmem:[%s22640_s5 + $0x268] sm:$0xf] }
 0x83d   :  { %12502 = vmatmul.msk.bf16.gmra.mxu1 %vm5528_vm0, %v11858_v62  ;;  %v7530_v52 = vmax.f32 %v7338_v42, 0.0  ;;  %v11994_v62 = vor.u32 %v13573_v13, %v11991_v22 }
 0x841   :  { %v20346_v46 = vpop.f32.mrf.mxu0 }
 0x842   :  { %v7339_v32 = vpop.f32.mrf.mxu1 }
 0x843   :  { %v7340_v1 = vadd.f32 %v7339_v32, %v20206_v26  ;;  %v20358_v17 = vpop.f32.mrf.mxu2  ;;  %v13549_v26 = vld [vmem:[%s22633_s3 + $0x650] sm:$0xf0] }
 0x844   :  { %v11886_v20 = vor.u32 %v13549_v26, %v11885_v35 }
 0x845   :  { %v7531_v25 = vmax.f32 %v7340_v1, 0.0 }
 0x847   :  { %v20372_v34 = vpack.c.bf16 %v7531_v25, %v7530_v52  ;;  %v13777_v25 = vld [vmem:[%s22640_s5 + $0x280] sm:$0xf0] }
 0x848   :  { %8628 = vmatmul.bf16.gmra.mxu2 %v12808_v18  ;;  %8677 = vmatmul.bf16.gmra.mxu3 %v12588_v54  ;;  %v12836_v26 = vor.u32 %v13777_v25, %v12835_v45 }
 0x849   :  { %v7103_v42 = vpop.f32.mrf.mxu0 }
 0x84a   :  { %v7342_v48 = vpop.f32.mrf.mxu1  ;;  %v20375_v32 = vadd.f32 %v7103_v42, %v19372_v14  ;;  %v13718_v14 = vld [vmem:[%s22640_s5 + $0xac] sm:$0xf]  ;;  %v12019_v42 = vld [vmem:[%s22633_s3 + $0x764] sm:$0xf0] }
 0x84b   :  { %v7343_v57 = vadd.f32 %v7342_v48, %v20223_v4  ;;  %v20378_v27 = vpop.f32.mrf.mxu2  ;;  %v12613_v4 = vld [vmem:[%s22640_s5 + $0xc4] sm:$0xf0] }
 0x84c   :  { %7142 = vmatmul.bf16.gmra.mxu0 %v11994_v62  ;;  %v12616_v62 = vor.u32 %v13718_v14, %v12613_v4 }
 0x84d   :  { %12503 = vmatmul.msk.bf16.gmra.mxu1 %vm5528_vm0, %v11886_v20  ;;  %v7532_v22 = vmax.f32 %v7343_v57, 0.0  ;;  %v13580_v20 = vld [vmem:[%s22633_s3 + $0x74c] sm:$0xf]  ;;  %v20413_v57 = vpop.permute.xlu2 %7874 }
 0x84e   :  { %v12022_v45 = vor.u32 %v13580_v20, %v12019_v42  ;;  %v13784_v42 = vld [vmem:[%s22640_s5 + $0x2b8] sm:$0xf0] }
 0x851   :  { %v7105_v1 = vpop.f32.mrf.mxu0 }
 0x852   :  { %v7344_v52 = vpop.f32.mrf.mxu1  ;;  %v20394_v18 = vadd.f32 %v7105_v1, %v19391_v11  ;;  %v11913_v11 = vld [vmem:[%s22633_s3 + $0x670] sm:$0xf] }
 0x853   :  { %v7345_v54 = vadd.f32 %v7344_v52, %v20238_v12  ;;  %v20397_v13 = vpop.f32.mrf.mxu2  ;;  %v13556_v12 = vld [vmem:[%s22633_s3 + $0x688] sm:$0xf0] }
 0x854   :  { %v11914_v1 = vor.u32 %v13556_v12, %v11913_v11 }
 0x855   :  { %v7533_v35 = vmax.f32 %v7345_v54, 0.0  ;;  %v7089_v54 = vadd.f32 %v20259_v16, %v19251_v9  ;;  %v13725_v9 = vld [vmem:[%s22640_s5 + $0xe4] sm:$0xf]  ;;  %v12641_v16 = vld [vmem:[%s22640_s5 + $0xfc] sm:$0xf0] }
 0x857   :  { %v20411_v48 = vpack.c.bf16 %v7533_v35, %v7532_v22  ;;  %v20423_v22 = vpop.permute.xlu0 %7879  ;;  %v7091_v35 = vadd.f32 %v20271_v10, %v19270_v50  ;;  %v20439_v50 = vpop.permute.xlu2 %7869 }
 0x858   :  { %8633 = vmatmul.bf16.gmra.mxu2 %v12836_v26  ;;  %8682 = vmatmul.bf16.gmra.mxu3 %v12616_v62  ;;  %v12863_v62 = vld [vmem:[%s22640_s5 + $0x2a0] sm:$0xf] }
 0x859   :  { %v7108_v52 = vpop.f32.mrf.mxu0 }
 0x85a   :  { %v7347_v25 = vpop.f32.mrf.mxu1  ;;  %v20416_v14 = vadd.f32 %v7108_v52, %v19411_v56  ;;  %v12864_v52 = vor.u32 %v13784_v42, %v12863_v62 }
 0x85b   :  { %v20418_v4 = vpop.f32.mrf.mxu2  ;;  %v7348_v26 = vadd.f32 %v7347_v25, %v7089_v54  ;;  %v12644_v25 = vor.u32 %v13725_v9, %v12641_v16  ;;  %v13587_v54 = vld [vmem:[%s22633_s3 + $0x784] sm:$0xf] }
 0x85c   :  { %7147 = vmatmul.bf16.gmra.mxu0 %v12022_v45  ;;  %v12050_v62 = vor.u32 %v13587_v54, %v12047_v61  ;;  %v7096_v61 = vadd.f32 %v20309_v15, %v19310_v28  ;;  %v13791_v54 = vld [vmem:[%s22640_s5 + $0x2f0] sm:$0xf0] }
 0x85d   :  { %12504 = vmatmul.msk.bf16.gmra.mxu1 %vm5528_vm0, %v11914_v1  ;;  %v7534_v45 = vmax.f32 %v7348_v26, 0.0 }
 0x85f   :  { %v20460_v9 = vpop.permute.xlu0 %7854  ;;  %v20467_v59 = vpop.permute.xlu2 %7954 }
 0x860   :  { %23213 = vst [vmem:[#allocation105_spill] sm:$0xff] %v20467_v59 }
 0x861   :  { %v7110_v56 = vpop.f32.mrf.mxu0 }
 0x862   :  { %v7349_v20 = vpop.f32.mrf.mxu1  ;;  %v20442_v10 = vadd.f32 %v7110_v56, %v19432_v7  ;;  %v11941_v7 = vld [vmem:[%s22633_s3 + $0x6a8] sm:$0xf] }
 0x863   :  { %v7350_v11 = vadd.f32 %v7349_v20, %v7091_v35  ;;  %v20444_v12 = vpop.f32.mrf.mxu2  ;;  %v13563_v35 = vld [vmem:[%s22633_s3 + $0x6c0] sm:$0xf0] }
 0x864   :  { %v11942_v56 = vor.u32 %v13563_v35, %v11941_v7  ;;  %v13732_v7 = vld [vmem:[%s22640_s5 + $0x11c] sm:$0xf] }
 0x865   :  { %v7535_v1 = vmax.f32 %v7350_v11, 0.0 }
 0x867   :  { %v20458_v26 = vpack.c.bf16 %v7535_v1, %v7534_v45  ;;  %v7094_v45 = vadd.f32 %v20300_v63, %v19291_v31  ;;  %v12669_v31 = vld [vmem:[%s22640_s5 + $0x134] sm:$0xf0]  ;;  %v20491_v35 = vpop.permute.xlu0 %7959 }
 0x868   :  { %8638 = vmatmul.bf16.gmra.mxu2 %v12864_v52  ;;  %8687 = vmatmul.bf16.gmra.mxu3 %v12644_v25  ;;  %v12891_v52 = vld [vmem:[%s22640_s5 + $0x2d8] sm:$0xf]  ;;  %23214 = vst [vmem:[#allocation72_spill] sm:$0xff] %v20491_v35 }
 0x869   :  { %v7113_v20 = vpop.f32.mrf.mxu0 }
 0x86a   :  { %v7352_v42 = vpop.f32.mrf.mxu1  ;;  %v20463_v16 = vadd.f32 %v7113_v20, %v19451_v5  ;;  %v12892_v20 = vor.u32 %v13791_v54, %v12891_v52 }
 0x86b   :  { %v20465_v11 = vpop.f32.mrf.mxu2  ;;  %v7353_v1 = vadd.f32 %v7352_v42, %v7094_v45  ;;  %v12672_v42 = vor.u32 %v13732_v7, %v12669_v31  ;;  %v13594_v45 = vld [vmem:[%s22633_s3 + $0x7bc] sm:$0xf] }
 0x86c   :  { %7152 = vmatmul.bf16.gmra.mxu0 %v12050_v62 }
 0x86d   :  { %12505 = vmatmul.msk.bf16.gmra.mxu1 %vm5528_vm0, %v11942_v56  ;;  %v7536_v62 = vmax.f32 %v7353_v1, 0.0  ;;  %v20505_v1 = vpop.permute.xlu2 %7849 }
 0x86f   :  { %v20515_v40 = vpop.permute.xlu0 %7944 }
 0x870   :  { %23215 = vst [vmem:[#allocation96_spill] sm:$0xff] %v20515_v40 }
 0x871   :  { %v7115_v5 = vpop.f32.mrf.mxu0 }
 0x872   :  { %v7354_v25 = vpop.f32.mrf.mxu1  ;;  %v20487_v28 = vadd.f32 %v7115_v5, %v19471_v55  ;;  %v11969_v55 = vld [vmem:[%s22633_s3 + $0x6e0] sm:$0xf]  ;;  %v12078_v5 = vor.u32 %v13594_v45, %v12075_v6  ;;  %v7101_v6 = vadd.f32 %v20346_v46, %v19350_v51 }
 0x873   :  { %v7355_v63 = vadd.f32 %v7354_v25, %v7096_v61  ;;  %v20489_v15 = vpop.f32.mrf.mxu2  ;;  %v13570_v61 = vld [vmem:[%s22633_s3 + $0x6f8] sm:$0xf0] }
 0x874   :  { %v11970_v25 = vor.u32 %v13570_v61, %v11969_v55  ;;  %v13798_v55 = vld [vmem:[%s22640_s5 + $0x328] sm:$0xf0] }
 0x875   :  { %v7537_v56 = vmax.f32 %v7355_v63, 0.0 }
 0x877   :  { %v7742_v52 = vpack.c.bf16 %v7537_v56, %v7536_v62  ;;  %v7099_v62 = vadd.f32 %v20337_v49, %v19331_v8  ;;  %v20519_v56 = vpop.permute.xlu2 %7834  ;;  %v13739_v8 = vld [vmem:[%s22640_s5 + $0x154] sm:$0xf]  ;;  %v12697_v49 = vld [vmem:[%s22640_s5 + $0x16c] sm:$0xf0] }
 0x878   :  { %8643 = vmatmul.bf16.gmra.mxu2 %v12892_v20  ;;  %8692 = vmatmul.bf16.gmra.mxu3 %v12672_v42 }
 0x879   :  { %v7118_v54 = vpop.f32.mrf.mxu0 }
 0x87a   :  { %v7357_v7 = vpop.f32.mrf.mxu1  ;;  %v20508_v31 = vadd.f32 %v7118_v54, %v19491_v41  ;;  %v12919_v41 = vld [vmem:[%s22640_s5 + $0x310] sm:$0xf] }
 0x87b   :  { %v20510_v63 = vpop.f32.mrf.mxu2  ;;  %v7358_v20 = vadd.f32 %v7357_v7, %v7099_v62  ;;  %v12920_v54 = vor.u32 %v13798_v55, %v12919_v41  ;;  %v12700_v7 = vor.u32 %v13739_v8, %v12697_v49  ;;  %v13601_v62 = vld [vmem:[%s22633_s3 + $0x7f4] sm:$0xf] }
 0x87c   :  { %7157 = vmatmul.bf16.gmra.mxu0 %v12078_v5 }
 0x87d   :  { %12506 = vmatmul.msk.bf16.gmra.mxu1 %vm5528_vm0, %v11970_v25  ;;  %v7538_v5 = vmax.f32 %v7358_v20, 0.0  ;;  %v20552_v20 = vpop.permute.xlu1 %7859 }
 0x881   :  { %v7120_v42 = vpop.f32.mrf.mxu0 }
 0x882   :  { %v7359_v45 = vpop.f32.mrf.mxu1  ;;  %v20536_v51 = vadd.f32 %v7120_v42, %v19509_v19  ;;  %v11997_v19 = vld [vmem:[%s22633_s3 + $0x718] sm:$0xf]  ;;  %v20554_v42 = vpop.permute.xlu0 %7839 }
 0x883   :  { %v7360_v46 = vadd.f32 %v7359_v45, %v7101_v6  ;;  %v20538_v61 = vpop.f32.mrf.mxu2  ;;  %v13577_v6 = vld [vmem:[%s22633_s3 + $0x730] sm:$0xf0]  ;;  %v12106_v45 = vor.u32 %v13601_v62, %v12103_v60  ;;  %v12947_v60 = vld [vmem:[%s22640_s5 + $0x348] sm:$0xf] }
 0x884   :  { %v11998_v55 = vor.u32 %v13577_v6, %v11997_v19 }
 0x885   :  { %v7539_v25 = vmax.f32 %v7360_v46, 0.0  ;;  %v20556_v46 = vpop.permute.xlu2 %7939 }
 0x886   :  { %23216 = vst [vmem:[#allocation19_spill] sm:$0xff] %v20556_v46 }
 0x887   :  { %v7743_v41 = vpack.c.bf16 %v7539_v25, %v7538_v5  ;;  %v20565_v5 = vpop.permute.xlu1 %7844 }
 0x888   :  { %8648 = vmatmul.bf16.gmra.mxu2 %v12920_v54  ;;  %8697 = vmatmul.bf16.gmra.mxu3 %v12700_v7 }
 0x889   :  { %8748 = vmatpush.bf16.msrb.mxu2 %v7743_v41  ;;  %v7123_v8 = vpop.f32.mrf.mxu0 }
 0x88a   :  { %v7362_v49 = vpop.f32.mrf.mxu1  ;;  %v20559_v35 = vadd.f32 %v7123_v8, %v19530_v23  ;;  %v13805_v23 = vld [vmem:[%s22640_s5 + $0x360] sm:$0xf0]  ;;  %v20580_v7 = vpop.permute.xlu0 %7824 }
 0x88b   :  { %v7363_v44 = vadd.f32 %v7362_v49, %v20375_v32  ;;  %v20562_v59 = vpop.f32.mrf.mxu2  ;;  %v13746_v32 = vld [vmem:[%s22640_s5 + $0x18c] sm:$0xf] }
 0x88c   :  { %7162 = vmatmul.bf16.gmra.mxu0 %v12106_v45  ;;  %v13608_v49 = vld [vmem:[%s22633_s3 + $0x82c] sm:$0xf] }
 0x88d   :  { %12507 = vmatmul.msk.bf16.gmra.mxu1 %vm5528_vm0, %v11998_v55  ;;  %8749 = vmatpush.bf16.msrb.mxu2 %v7742_v52  ;;  %v12725_v52 = vld [vmem:[%s22640_s5 + $0x1a4] sm:$0xf0]  ;;  %v20588_v6 = vpop.permute.xlu2 %7924  ;;  %v7540_v41 = vmax.f32 %v7363_v44, 0.0  ;;  %v12948_v55 = vor.u32 %v13805_v23, %v12947_v60  ;;  %v13584_v44 = vld [vmem:[%s22633_s3 + $0x768] sm:$0xf0] }
 0x88e   :  { %23217 = vst [vmem:[#allocation100_spill] sm:$0xff] %v20588_v6  ;;  %v12728_v8 = vor.u32 %v13746_v32, %v12725_v52  ;;  %v12215_v6 = vld [vmem:[%s22633_s3 + $0x8ec] sm:$0xf0] }
 0x88f   :  { %v20608_v32 = vpop.permute.xlu1 %7949 }
 0x890   :  { %23218 = vst [vmem:[#allocation22_spill] sm:$0xff] %v20608_v32  ;;  %v13615_v32 = vld [vmem:[%s22633_s3 + $0x864] sm:$0xf] }
 0x891   :  { %8750 = vmatpush.bf16.msrb.mxu2 %v20458_v26  ;;  %v7125_v25 = vpop.f32.mrf.mxu0 }
 0x892   :  { %v7364_v54 = vpop.f32.mrf.mxu1  ;;  %v20583_v62 = vadd.f32 %v7125_v25, %v19548_v43  ;;  %v12131_v43 = vld [vmem:[%s22633_s3 + $0x844] sm:$0xf0]  ;;  %v20613_v24 = vpop.permute.xlu0 %7929 }
 0x893   :  { %v7365_v26 = vadd.f32 %v7364_v54, %v20394_v18  ;;  %v20586_v19 = vpop.f32.mrf.mxu2  ;;  %v12025_v18 = vld [vmem:[%s22633_s3 + $0x750] sm:$0xf]  ;;  %v12134_v25 = vor.u32 %v13608_v49, %v12131_v43  ;;  %23219 = vst [vmem:[#allocation98_spill] sm:$0xff] %v20613_v24  ;;  %v20635_v43 = vpop.f32.mrf.mxu3  ;;  %v12187_v24 = vld [vmem:[%s22633_s3 + $0x8b4] sm:$0xf0] }
 0x894   :  { %v12026_v54 = vor.u32 %v13584_v44, %v12025_v18  ;;  %23220 = vst [vmem:[#allocation27_spill] sm:$0xff] %v20635_v43 }
 0x895   :  { %v7541_v45 = vmax.f32 %v7365_v26, 0.0  ;;  %8751 = vmatpush.bf16.msrb.mxu2 %v20411_v48 }
 0x897   :  { %v20603_v60 = vpack.c.bf16 %v7541_v45, %v7540_v41  ;;  %v20617_v41 = vpop.permute.xlu2 %7819  ;;  %v20639_v18 = vpop.permute.xlu1 %7934 }
 0x898   :  { %8653 = vmatmul.bf16.gmra.mxu2 %v12948_v55  ;;  %8702 = vmatmul.bf16.gmra.mxu3 %v12728_v8  ;;  %v12753_v55 = vld [vmem:[%s22640_s5 + $0x1dc] sm:$0xf0]  ;;  %v12535_v8 = vld [vmem:[%s22640_s5 + $0x8] sm:$0xf]  ;;  %23221 = vst [vmem:[#allocation44_spill] sm:$0xff] %v20639_v18 }
 0x899   :  { %8752 = vmatpush.bf16.msrb.mxu2 %v20372_v34  ;;  %v20606_v48 = vpop.f32.mrf.mxu0  ;;  %v13753_v34 = vld [vmem:[%s22640_s5 + $0x1c4] sm:$0xf]  ;;  %v13622_v18 = vld [vmem:[%s22633_s3 + $0x89c] sm:$0xf] }
 0x89a   :  { %v7367_v23 = vpop.f32.mrf.mxu1 }
 0x89b   :  { %v7368_v52 = vadd.f32 %v7367_v23, %v20416_v14  ;;  %v20611_v26 = vpop.f32.mrf.mxu2 }
 0x89c   :  { %7167 = vmatmul.bf16.gmra.mxu0 %v12134_v25 }
 0x89d   :  { %12508 = vmatmul.msk.bf16.gmra.mxu1 %vm5528_vm0, %v12026_v54  ;;  %8753 = vmatpush.bf16.msrb.mxu2 %v20335_v37  ;;  %v13701_v37 = vld [vmem:[%s22640_s5 + $0x20] sm:$0xf0]  ;;  %v7542_v44 = vmax.f32 %v7368_v52, 0.0  ;;  %v12756_v54 = vor.u32 %v13753_v34, %v12753_v55  ;;  %v20654_v34 = vpop.permute.xlu0 %7914 }
 0x89e   :  { %v12536_v23 = vor.u32 %v13701_v37, %v12535_v8  ;;  %v13591_v52 = vld [vmem:[%s22633_s3 + $0x7a0] sm:$0xf0]  ;;  %23222 = vst [vmem:[#allocation24_spill] sm:$0xff] %v20654_v34 }
 0x89f   :  { %v7805_v8 = vpop.permute.xlu2 %7804 }
 0x8a0   :  { %v8580_v53 = vadd.f32 %v20303_v47, %v7805_v8  ;;  %v12781_v47 = vld [vmem:[%s22640_s5 + $0x214] sm:$0xf0] }
 0x8a1   :  { %8754 = vmatpush.bf16.msrb.mxu2 %v20298_v2  ;;  %v20623_v45 = vpop.f32.mrf.mxu0 }
 0x8a2   :  { %v7369_v14 = vpop.f32.mrf.mxu1 }
 0x8a3   :  { %v7370_v49 = vadd.f32 %v7369_v14, %v20442_v10  ;;  %v20637_v2 = vpop.f32.mrf.mxu2  ;;  %v12159_v10 = vld [vmem:[%s22633_s3 + $0x87c] sm:$0xf0]  ;;  %v12053_v14 = vld [vmem:[%s22633_s3 + $0x788] sm:$0xf] }
 0x8a4   :  { %v12054_v37 = vor.u32 %v13591_v52, %v12053_v14 }
 0x8a5   :  { %v7543_v25 = vmax.f32 %v7370_v49, 0.0  ;;  %8755 = vmatpush.bf16.msrb.mxu2 %v20256_v58  ;;  %v12162_v58 = vor.u32 %v13615_v32, %v12159_v10  ;;  %v13760_v32 = vld [vmem:[%s22640_s5 + $0x1fc] sm:$0xf] }
 0x8a6   :  { %v12784_v52 = vor.u32 %v13760_v32, %v12781_v47  ;;  %v12190_v32 = vor.u32 %v13622_v18, %v12187_v24  ;;  %v13767_v24 = vld [vmem:[%s22640_s5 + $0x234] sm:$0xf] }
 0x8a7   :  { %v20656_v55 = vpack.c.bf16 %v7543_v25, %v7542_v44  ;;  %v20667_v44 = vpop.permute.xlu1 %7829  ;;  %v7810_v25 = vpop.permute.xlu0 %7809 }
 0x8a8   :  { %8707 = vmatmul.bf16.gmra.mxu3 %v12756_v54  ;;  %8756 = vmatmul.bf16.vlgmr.msrb.gmra.mxu2 %v12536_v23  ;;  %v8582_v54 = vadd.f32 %v20321_v3, %v7810_v25  ;;  %v12081_v3 = vld [vmem:[%s22633_s3 + $0x7c0] sm:$0xf] }
 0x8a9   :  { %v20658_v49 = vpop.f32.mrf.mxu0 }
 0x8aa   :  { %v7372_v43 = vpop.f32.mrf.mxu1 }
 0x8ab   :  { %v7373_v40 = vadd.f32 %v7372_v43, %v20463_v16  ;;  %v20662_v46 = vpop.f32.mrf.mxu2  ;;  %v8668_v39 = vpop.f32.mrf.mxu3 }
 0x8ac   :  { %v20664_v30 = vadd.f32 %v8668_v39, %v8580_v53  ;;  %7172 = vmatmul.bf16.gmra.mxu0 %v12162_v58  ;;  %v12563_v39 = vld [vmem:[%s22640_s5 + $0x40] sm:$0xf]  ;;  %v13708_v53 = vld [vmem:[%s22640_s5 + $0x58] sm:$0xf0] }
 0x8ad   :  { %12509 = vmatmul.msk.bf16.gmra.mxu1 %vm5528_vm0, %v12054_v37  ;;  %v7544_v8 = vmax.f32 %v7373_v40, 0.0  ;;  %v12564_v38 = vor.u32 %v13708_v53, %v12563_v39  ;;  %v13598_v40 = vld [vmem:[%s22633_s3 + $0x7d8] sm:$0xf0] }
 0x8ae   :  { %v12082_v47 = vor.u32 %v13598_v40, %v12081_v3 }
 0x8af   :  { %v7815_v25 = vpop.permute.xlu1 %7814 }
 0x8b0   :  { %v8585_v53 = vadd.f32 %v20340_v29, %v7815_v25 }
 0x8b1   :  { %v20675_v16 = vpop.f32.mrf.mxu0 }
 0x8b2   :  { %v7374_v43 = vpop.f32.mrf.mxu1 }
 0x8b3   :  { %v7375_v23 = vadd.f32 %v7374_v43, %v20487_v28  ;;  %v20685_v10 = vpop.f32.mrf.mxu2  ;;  %v8670_v14 = vpop.f32.mrf.mxu3 }
 0x8b4   :  { %v20687_v37 = vadd.f32 %v8670_v14, %v8582_v54 }
 0x8b5   :  { %v7545_v58 = vmax.f32 %v7375_v23, 0.0 }
 0x8b7   :  { %v20701_v28 = vpack.c.bf16 %v7545_v58, %v7544_v8  ;;  %v8587_v8 = vadd.f32 %v20358_v17, %v20617_v41  ;;  %v12109_v17 = vld [vmem:[%s22633_s3 + $0x7f8] sm:$0xf] }
 0x8b8   :  { %8712 = vmatmul.bf16.gmra.mxu3 %v12784_v52  ;;  %8761 = vmatmul.bf16.gmra.mxu2 %v12564_v38  ;;  %v12809_v38 = vld [vmem:[%s22640_s5 + $0x24c] sm:$0xf0]  ;;  %v13715_v52 = vld [vmem:[%s22640_s5 + $0x90] sm:$0xf0] }
 0x8b9   :  { %v20703_v43 = vpop.f32.mrf.mxu0  ;;  %v12812_v25 = vor.u32 %v13767_v24, %v12809_v38 }
 0x8ba   :  { %v7377_v39 = vpop.f32.mrf.mxu1 }
 0x8bb   :  { %v7378_v54 = vadd.f32 %v7377_v39, %v20508_v31  ;;  %v20707_v23 = vpop.f32.mrf.mxu2  ;;  %v8673_v14 = vpop.f32.mrf.mxu3  ;;  %v12591_v31 = vld [vmem:[%s22640_s5 + $0x78] sm:$0xf] }
 0x8bc   :  { %v20709_v21 = vadd.f32 %v8673_v14, %v8585_v53  ;;  %7177 = vmatmul.bf16.gmra.mxu0 %v12190_v32  ;;  %v12592_v53 = vor.u32 %v13715_v52, %v12591_v31  ;;  %v13629_v14 = vld [vmem:[%s22633_s3 + $0x8d4] sm:$0xf]  ;;  %v8590_v31 = vadd.f32 %v20378_v27, %v20580_v7  ;;  %v12837_v27 = vld [vmem:[%s22640_s5 + $0x284] sm:$0xf0] }
 0x8bd   :  { %12510 = vmatmul.msk.bf16.gmra.mxu1 %vm5528_vm0, %v12082_v47  ;;  %v7546_v32 = vmax.f32 %v7378_v54, 0.0  ;;  %v12218_v54 = vor.u32 %v13629_v14, %v12215_v6  ;;  %v23223_v52 = vld [vmem:[#allocation65_spill] sm:$0xff]  ;;  %v13774_v6 = vld [vmem:[%s22640_s5 + $0x26c] sm:$0xf] }
 0x8c1   :  { %v20718_v18 = vpop.f32.mrf.mxu0 }
 0x8c2   :  { %v7379_v29 = vpop.f32.mrf.mxu1 }
 0x8c3   :  { %v7380_v58 = vadd.f32 %v7379_v29, %v20536_v51  ;;  %v20729_v3 = vpop.f32.mrf.mxu2  ;;  %v8675_v40 = vpop.f32.mrf.mxu3  ;;  %v13605_v51 = vld [vmem:[%s22633_s3 + $0x810] sm:$0xf0] }
 0x8c4   :  { %v20731_v39 = vadd.f32 %v8675_v40, %v8587_v8  ;;  %v12110_v24 = vor.u32 %v13605_v51, %v12109_v17 }
 0x8c5   :  { %v7547_v47 = vmax.f32 %v7380_v58, 0.0 }
 0x8c7   :  { %v20745_v41 = vpack.c.bf16 %v7547_v47, %v7546_v32  ;;  %v8592_v32 = vadd.f32 %v20397_v13, %v20667_v44  ;;  %v23224_v47 = vld [vmem:[#allocation64_spill] sm:$0xff] }
 0x8c8   :  { %8717 = vmatmul.bf16.gmra.mxu3 %v12812_v25  ;;  %8766 = vmatmul.bf16.gmra.mxu2 %v12592_v53  ;;  %v12243_v13 = vld [vmem:[%s22633_s3 + $0x924] sm:$0xf0]  ;;  %v13612_v44 = vld [vmem:[%s22633_s3 + $0x848] sm:$0xf0] }
 0x8c9   :  { %v7143_v38 = vpop.f32.mrf.mxu0 }
 0x8ca   :  { %v7382_v29 = vpop.f32.mrf.mxu1  ;;  %v20750_v8 = vadd.f32 %v7143_v38, %v23223_v52  ;;  %v13636_v52 = vld [vmem:[%s22633_s3 + $0x90c] sm:$0xf] }
 0x8cb   :  { %v7383_v58 = vadd.f32 %v7382_v29, %v20559_v35  ;;  %v20753_v40 = vpop.f32.mrf.mxu2  ;;  %v8678_v36 = vpop.f32.mrf.mxu3  ;;  %v12619_v35 = vld [vmem:[%s22640_s5 + $0xb0] sm:$0xf] }
 0x8cc   :  { %v20755_v34 = vadd.f32 %v8678_v36, %v8590_v31  ;;  %7182 = vmatmul.bf16.gmra.mxu0 %v12218_v54  ;;  %v13722_v36 = vld [vmem:[%s22640_s5 + $0xc8] sm:$0xf0]  ;;  %v12840_v54 = vor.u32 %v13774_v6, %v12837_v27  ;;  %v12246_v6 = vor.u32 %v13636_v52, %v12243_v13 }
 0x8cd   :  { %12511 = vmatmul.msk.bf16.gmra.mxu1 %vm5528_vm0, %v12110_v24  ;;  %v7548_v24 = vmax.f32 %v7383_v58, 0.0  ;;  %v12620_v31 = vor.u32 %v13722_v36, %v12619_v35  ;;  %v8595_v35 = vadd.f32 %v20418_v4, %v20519_v56  ;;  %v23225_v36 = vld [vmem:[#allocation76_spill] sm:$0xff]  ;;  %v13781_v4 = vld [vmem:[%s22640_s5 + $0x2a4] sm:$0xf]  ;;  %v12865_v56 = vld [vmem:[%s22640_s5 + $0x2bc] sm:$0xf0] }
 0x8d1   :  { %v7145_v7 = vpop.f32.mrf.mxu0 }
 0x8d2   :  { %v7384_v25 = vpop.f32.mrf.mxu1  ;;  %v20773_v53 = vadd.f32 %v7145_v7, %v23224_v47 }
 0x8d3   :  { %v7385_v14 = vadd.f32 %v7384_v25, %v20583_v62  ;;  %v20776_v17 = vpop.f32.mrf.mxu2  ;;  %v8680_v51 = vpop.f32.mrf.mxu3  ;;  %v12137_v62 = vld [vmem:[%s22633_s3 + $0x830] sm:$0xf] }
 0x8d4   :  { %v20778_v29 = vadd.f32 %v8680_v51, %v8592_v32  ;;  %v12138_v27 = vor.u32 %v13612_v44, %v12137_v62  ;;  %v12647_v44 = vld [vmem:[%s22640_s5 + $0xe8] sm:$0xf] }
 0x8d5   :  { %v7549_v38 = vmax.f32 %v7385_v14, 0.0 }
 0x8d7   :  { %v20792_v58 = vpack.c.bf16 %v7549_v38, %v7548_v24  ;;  %v23228_v38 = vld [vmem:[#allocation23_spill] sm:$0xff] }
 0x8d8   :  { %8722 = vmatmul.bf16.gmra.mxu3 %v12840_v54  ;;  %8771 = vmatmul.bf16.gmra.mxu2 %v12620_v31  ;;  %v23227_v54 = vld [vmem:[#allocation95_spill] sm:$0xff]  ;;  %v7131_v31 = vadd.f32 %v20623_v45, %v23228_v38  ;;  %v8597_v45 = vadd.f32 %v20444_v12, %v20554_v42 }
 0x8d9   :  { %v7148_v7 = vpop.f32.mrf.mxu0  ;;  %v7129_v24 = vadd.f32 %v20606_v48, %v23227_v54  ;;  %v13729_v48 = vld [vmem:[%s22640_s5 + $0x100] sm:$0xf0]  ;;  %v12271_v12 = vld [vmem:[%s22633_s3 + $0x95c] sm:$0xf0]  ;;  %v12165_v42 = vld [vmem:[%s22633_s3 + $0x868] sm:$0xf] }
 0x8da   :  { %v7387_v25 = vpop.f32.mrf.mxu1  ;;  %v20797_v32 = vadd.f32 %v7148_v7, %v23225_v36  ;;  %v12868_v36 = vor.u32 %v13781_v4, %v12865_v56  ;;  %v12648_v38 = vor.u32 %v13729_v48, %v12647_v44  ;;  %v8600_v44 = vadd.f32 %v20465_v11, %v20565_v5  ;;  %v23230_v48 = vld [vmem:[#allocation78_spill] sm:$0xff] }
 0x8db   :  { %v20799_v47 = vpop.f32.mrf.mxu2  ;;  %v8683_v14 = vpop.f32.mrf.mxu3  ;;  %v7388_v52 = vadd.f32 %v7387_v25, %v7129_v24  ;;  %v13788_v11 = vld [vmem:[%s22640_s5 + $0x2dc] sm:$0xf]  ;;  %v12893_v5 = vld [vmem:[%s22640_s5 + $0x2f4] sm:$0xf0] }
 0x8dc   :  { %v20801_v51 = vadd.f32 %v8683_v14, %v8595_v35  ;;  %7187 = vmatmul.bf16.gmra.mxu0 %v12246_v6  ;;  %v23229_v6 = vld [vmem:[#allocation29_spill] sm:$0xff] }
 0x8dd   :  { %12512 = vmatmul.msk.bf16.gmra.mxu1 %vm5528_vm0, %v12138_v27  ;;  %v7550_v14 = vmax.f32 %v7388_v52, 0.0 }
 0x8de   :  { %23226 = vst [vmem:[#allocation103_spill] sm:$0xff] %v20801_v51  ;;  %v13643_v51 = vld [vmem:[%s22633_s3 + $0x944] sm:$0xf] }
 0x8df   :  { %v12274_v4 = vor.u32 %v13643_v51, %v12271_v12 }
 0x8e1   :  { %v7150_v13 = vpop.f32.mrf.mxu0 }
 0x8e2   :  { %v7389_v62 = vpop.f32.mrf.mxu1  ;;  %v20823_v27 = vadd.f32 %v7150_v13, %v23229_v6 }
 0x8e3   :  { %v7390_v7 = vadd.f32 %v7389_v62, %v7131_v31  ;;  %v20825_v25 = vpop.f32.mrf.mxu2  ;;  %v8685_v35 = vpop.f32.mrf.mxu3  ;;  %v13619_v31 = vld [vmem:[%s22633_s3 + $0x880] sm:$0xf0] }
 0x8e4   :  { %v20827_v24 = vadd.f32 %v8685_v35, %v8597_v45  ;;  %v12166_v56 = vor.u32 %v13619_v31, %v12165_v42  ;;  %v12675_v31 = vld [vmem:[%s22640_s5 + $0x120] sm:$0xf] }
 0x8e5   :  { %v7551_v54 = vmax.f32 %v7390_v7, 0.0 }
 0x8e7   :  { %v20841_v52 = vpack.c.bf16 %v7551_v54, %v7550_v14  ;;  %v23233_v14 = vld [vmem:[#allocation68_spill] sm:$0xff] }
 0x8e8   :  { %8727 = vmatmul.bf16.gmra.mxu3 %v12868_v36  ;;  %8776 = vmatmul.bf16.gmra.mxu2 %v12648_v38  ;;  %v23232_v36 = vld [vmem:[#allocation62_spill] sm:$0xff]  ;;  %v7136_v54 = vadd.f32 %v20675_v16, %v23233_v14  ;;  %v8602_v16 = vadd.f32 %v20489_v15, %v20505_v1 }
 0x8e9   :  { %v7153_v13 = vpop.f32.mrf.mxu0  ;;  %v7134_v51 = vadd.f32 %v20658_v49, %v23232_v36  ;;  %v13736_v49 = vld [vmem:[%s22640_s5 + $0x138] sm:$0xf0]  ;;  %v12299_v15 = vld [vmem:[%s22633_s3 + $0x994] sm:$0xf0]  ;;  %v12193_v1 = vld [vmem:[%s22633_s3 + $0x8a0] sm:$0xf] }
 0x8ea   :  { %v7392_v62 = vpop.f32.mrf.mxu1  ;;  %v20846_v45 = vadd.f32 %v7153_v13, %v23230_v48  ;;  %v12896_v48 = vor.u32 %v13788_v11, %v12893_v5  ;;  %v12676_v14 = vor.u32 %v13736_v49, %v12675_v31  ;;  %v8605_v31 = vadd.f32 %v20510_v63, %v20460_v9  ;;  %v23235_v49 = vld [vmem:[#allocation77_spill] sm:$0xff] }
 0x8eb   :  { %v20848_v6 = vpop.f32.mrf.mxu2  ;;  %v8688_v7 = vpop.f32.mrf.mxu3  ;;  %v7393_v38 = vadd.f32 %v7392_v62, %v7134_v51  ;;  %v13795_v9 = vld [vmem:[%s22640_s5 + $0x314] sm:$0xf]  ;;  %v12921_v63 = vld [vmem:[%s22640_s5 + $0x32c] sm:$0xf0] }
 0x8ec   :  { %v20850_v35 = vadd.f32 %v8688_v7, %v8600_v44  ;;  %7192 = vmatmul.bf16.gmra.mxu0 %v12274_v4  ;;  %v23234_v4 = vld [vmem:[#allocation5_spill] sm:$0xff] }
 0x8ed   :  { %12513 = vmatmul.msk.bf16.gmra.mxu1 %vm5528_vm0, %v12166_v56  ;;  %v7552_v7 = vmax.f32 %v7393_v38, 0.0 }
 0x8ee   :  { %23231 = vst [vmem:[#allocation43_spill] sm:$0xff] %v20850_v35  ;;  %v13650_v35 = vld [vmem:[%s22633_s3 + $0x97c] sm:$0xf] }
 0x8ef   :  { %v12302_v11 = vor.u32 %v13650_v35, %v12299_v15 }
 0x8f1   :  { %v7155_v12 = vpop.f32.mrf.mxu0 }
 0x8f2   :  { %v7394_v42 = vpop.f32.mrf.mxu1  ;;  %v20872_v56 = vadd.f32 %v7155_v12, %v23234_v4 }
 0x8f3   :  { %v7395_v13 = vadd.f32 %v7394_v42, %v7136_v54  ;;  %v20874_v62 = vpop.f32.mrf.mxu2  ;;  %v8690_v44 = vpop.f32.mrf.mxu3  ;;  %v13626_v54 = vld [vmem:[%s22633_s3 + $0x8b8] sm:$0xf0] }
 0x8f4   :  { %v20876_v51 = vadd.f32 %v8690_v44, %v8602_v16  ;;  %v12194_v5 = vor.u32 %v13626_v54, %v12193_v1  ;;  %v12703_v54 = vld [vmem:[%s22640_s5 + $0x158] sm:$0xf] }
 0x8f5   :  { %v7553_v36 = vmax.f32 %v7395_v13, 0.0 }
 0x8f7   :  { %v7750_v38 = vpack.c.bf16 %v7553_v36, %v7552_v7  ;;  %v23238_v7 = vld [vmem:[#allocation73_spill] sm:$0xff] }
 0x8f8   :  { %8732 = vmatmul.bf16.gmra.mxu3 %v12896_v48  ;;  %8781 = vmatmul.bf16.gmra.mxu2 %v12676_v14  ;;  %v23237_v48 = vld [vmem:[#allocation49_spill] sm:$0xff]  ;;  %v7141_v36 = vadd.f32 %v20718_v18, %v23238_v7  ;;  %v8607_v18 = vadd.f32 %v20538_v61, %v20552_v20 }
 0x8f9   :  { %v7158_v12 = vpop.f32.mrf.mxu0  ;;  %v7139_v35 = vadd.f32 %v20703_v43, %v23237_v48  ;;  %v13743_v43 = vld [vmem:[%s22640_s5 + $0x170] sm:$0xf0]  ;;  %v12327_v61 = vld [vmem:[%s22633_s3 + $0x9cc] sm:$0xf0]  ;;  %v12221_v20 = vld [vmem:[%s22633_s3 + $0x8d8] sm:$0xf] }
 0x8fa   :  { %v7397_v42 = vpop.f32.mrf.mxu1  ;;  %v20893_v16 = vadd.f32 %v7158_v12, %v23235_v49  ;;  %v12924_v49 = vor.u32 %v13795_v9, %v12921_v63  ;;  %v12704_v7 = vor.u32 %v13743_v43, %v12703_v54  ;;  %v8610_v54 = vadd.f32 %v20562_v59, %v20512_v33  ;;  %v23241_v43 = vld [vmem:[#allocation69_spill] sm:$0xff]  ;;  %v12949_v33 = vld [vmem:[%s22640_s5 + $0x364] sm:$0xf0] }
 0x8fb   :  { %v20895_v4 = vpop.f32.mrf.mxu2  ;;  %v8693_v13 = vpop.f32.mrf.mxu3  ;;  %v7398_v14 = vadd.f32 %v7397_v42, %v7139_v35 }
 0x8fc   :  { %v20897_v44 = vadd.f32 %v8693_v13, %v8605_v31  ;;  %7197 = vmatmul.bf16.gmra.mxu0 %v12302_v11  ;;  %v23239_v11 = vld [vmem:[#allocation4_spill] sm:$0xff] }
 0x8fd   :  { %12514 = vmatmul.msk.bf16.gmra.mxu1 %vm5528_vm0, %v12194_v5  ;;  %v7554_v13 = vmax.f32 %v7398_v14, 0.0 }
 0x8fe   :  { %23236 = vst [vmem:[#allocation46_spill] sm:$0xff] %v20897_v44  ;;  %v13657_v44 = vld [vmem:[%s22633_s3 + $0x9b4] sm:$0xf] }
 0x8ff   :  { %v12330_v9 = vor.u32 %v13657_v44, %v12327_v61  ;;  %v13802_v44 = vld [vmem:[%s22640_s5 + $0x34c] sm:$0xf] }
 0x901   :  { %v7160_v15 = vpop.f32.mrf.mxu0 }
 0x902   :  { %v7399_v1 = vpop.f32.mrf.mxu1  ;;  %v20919_v5 = vadd.f32 %v7160_v15, %v23239_v11 }
 0x903   :  { %v7400_v12 = vadd.f32 %v7399_v1, %v7141_v36  ;;  %v20921_v42 = vpop.f32.mrf.mxu2  ;;  %v8695_v31 = vpop.f32.mrf.mxu3  ;;  %v13633_v36 = vld [vmem:[%s22633_s3 + $0x8f0] sm:$0xf0] }
 0x904   :  { %v20923_v35 = vadd.f32 %v8695_v31, %v8607_v18  ;;  %v12222_v63 = vor.u32 %v13633_v36, %v12221_v20  ;;  %v12952_v36 = vor.u32 %v13802_v44, %v12949_v33  ;;  %v8615_v44 = vadd.f32 %v20611_v26, %v20413_v57  ;;  %v13757_v57 = vld [vmem:[%s22640_s5 + $0x1e0] sm:$0xf0] }
 0x905   :  { %v7555_v48 = vmax.f32 %v7400_v12, 0.0 }
 0x906   :  { %23240 = vst [vmem:[#allocation63_spill] sm:$0xff] %v20923_v35 }
 0x907   :  { %v7751_v14 = vpack.c.bf16 %v7555_v48, %v7554_v13  ;;  %v8612_v13 = vadd.f32 %v20586_v19, %v20439_v50  ;;  %v23242_v48 = vld [vmem:[#allocation6_spill] sm:$0xff]  ;;  %v12355_v50 = vld [vmem:[%s22633_s3 + $0xa04] sm:$0xf0]  ;;  %v12249_v19 = vld [vmem:[%s22633_s3 + $0x910] sm:$0xf] }
 0x908   :  { %8737 = vmatmul.bf16.gmra.mxu3 %v12924_v49  ;;  %8786 = vmatmul.bf16.gmra.mxu2 %v12704_v7  ;;  %v12731_v49 = vld [vmem:[%s22640_s5 + $0x190] sm:$0xf] }
 0x909   :  { %8837 = vmatpush.bf16.msrb.mxu3 %v7751_v14  ;;  %v7163_v15 = vpop.f32.mrf.mxu0 }
 0x90a   :  { %v7402_v1 = vpop.f32.mrf.mxu1  ;;  %v20940_v18 = vadd.f32 %v7163_v15, %v23241_v43 }
 0x90b   :  { %v7403_v11 = vadd.f32 %v7402_v1, %v20750_v8  ;;  %v20943_v12 = vpop.f32.mrf.mxu2  ;;  %v8698_v31 = vpop.f32.mrf.mxu3  ;;  %v13664_v1 = vld [vmem:[%s22633_s3 + $0x9ec] sm:$0xf] }
 0x90c   :  { %v20945_v35 = vadd.f32 %v8698_v31, %v8610_v54  ;;  %7202 = vmatmul.bf16.gmra.mxu0 %v12330_v9  ;;  %v12358_v43 = vor.u32 %v13664_v1, %v12355_v50  ;;  %v13671_v50 = vld [vmem:[%s22633_s3 + $0xa24] sm:$0xf] }
 0x90d   :  { %12515 = vmatmul.msk.bf16.gmra.mxu1 %vm5528_vm0, %v12222_v63  ;;  %8838 = vmatpush.bf16.msrb.mxu3 %v7750_v38  ;;  %v13750_v38 = vld [vmem:[%s22640_s5 + $0x1a8] sm:$0xf0]  ;;  %v7556_v14 = vmax.f32 %v7403_v11, 0.0 }
 0x90e   :  { %v12732_v15 = vor.u32 %v13750_v38, %v12731_v49  ;;  %v20998_v38 = vpop.permute.xlu2 %7909 }
 0x911   :  { %8839 = vmatpush.bf16.msrb.mxu3 %v20841_v52  ;;  %v7165_v59 = vpop.f32.mrf.mxu0 }
 0x912   :  { %v7404_v8 = vpop.f32.mrf.mxu1  ;;  %v20964_v7 = vadd.f32 %v7165_v59, %v23242_v48  ;;  %v8617_v48 = vadd.f32 %v20637_v2, %v20423_v22  ;;  %v12383_v22 = vld [vmem:[%s22633_s3 + $0xa3c] sm:$0xf0]  ;;  %v12277_v2 = vld [vmem:[%s22633_s3 + $0x948] sm:$0xf] }
 0x913   :  { %v7405_v61 = vadd.f32 %v7404_v8, %v20773_v53  ;;  %v20967_v20 = vpop.f32.mrf.mxu2  ;;  %v8700_v52 = vpop.f32.mrf.mxu3  ;;  %v13640_v53 = vld [vmem:[%s22633_s3 + $0x928] sm:$0xf0] }
 0x914   :  { %v20969_v63 = vadd.f32 %v8700_v52, %v8612_v13  ;;  %v12250_v11 = vor.u32 %v13640_v53, %v12249_v19  ;;  %v13698_v13 = vld [vmem:[%s22640_s5 + $0xc] sm:$0xf]  ;;  %v7895_v19 = vpop.permute.xlu0 %7894 }
 0x915   :  { %v7557_v9 = vmax.f32 %v7405_v61, 0.0  ;;  %8840 = vmatpush.bf16.msrb.mxu3 %v20792_v58 }
 0x917   :  { %v20984_v54 = vpack.c.bf16 %v7557_v9, %v7556_v14 }
 0x918   :  { %8742 = vmatmul.bf16.gmra.mxu3 %v12952_v36  ;;  %8791 = vmatmul.bf16.gmra.mxu2 %v12732_v15 }
 0x919   :  { %8841 = vmatpush.bf16.msrb.mxu3 %v20745_v41  ;;  %v20987_v58 = vpop.f32.mrf.mxu0  ;;  %v12759_v41 = vld [vmem:[%s22640_s5 + $0x1c8] sm:$0xf] }
 0x91a   :  { %v7407_v31 = vpop.f32.mrf.mxu1 }
 0x91b   :  { %v7408_v33 = vadd.f32 %v7407_v31, %v20797_v32  ;;  %v20992_v59 = vpop.f32.mrf.mxu2  ;;  %v8703_v8 = vpop.f32.mrf.mxu3 }
 0x91c   :  { %v20994_v49 = vadd.f32 %v8703_v8, %v8615_v44  ;;  %7207 = vmatmul.bf16.gmra.mxu0 %v12358_v43  ;;  %v7885_v43 = vpop.permute.xlu2 %7884 }
 0x91d   :  { %12516 = vmatmul.msk.bf16.gmra.mxu1 %vm5528_vm0, %v12250_v11  ;;  %8842 = vmatpush.bf16.msrb.mxu3 %v20701_v28  ;;  %v12537_v28 = vld [vmem:[%s22640_s5 + $0x24] sm:$0xf0]  ;;  %v7558_v14 = vmax.f32 %v7408_v33, 0.0  ;;  %v12386_v11 = vor.u32 %v13671_v50, %v12383_v22  ;;  %v8620_v33 = vadd.f32 %v20662_v46, %v7885_v43  ;;  %v13764_v46 = vld [vmem:[%s22640_s5 + $0x218] sm:$0xf0] }
 0x91e   :  { %v12540_v1 = vor.u32 %v13698_v13, %v12537_v28 }
 0x921   :  { %8843 = vmatpush.bf16.msrb.mxu3 %v20656_v55  ;;  %v21007_v26 = vpop.f32.mrf.mxu0  ;;  %v12760_v55 = vor.u32 %v13757_v57, %v12759_v41 }
 0x922   :  { %v7409_v32 = vpop.f32.mrf.mxu1 }
 0x923   :  { %v7410_v61 = vadd.f32 %v7409_v32, %v20823_v27  ;;  %v21018_v52 = vpop.f32.mrf.mxu2  ;;  %v8705_v36 = vpop.f32.mrf.mxu3  ;;  %v13647_v27 = vld [vmem:[%s22633_s3 + $0x960] sm:$0xf0] }
 0x924   :  { %v21020_v15 = vadd.f32 %v8705_v36, %v8617_v48  ;;  %v21041_v32 = vpop.permute.xlu1 %7919  ;;  %v12787_v48 = vld [vmem:[%s22640_s5 + $0x200] sm:$0xf] }
 0x925   :  { %v7559_v9 = vmax.f32 %v7410_v61, 0.0  ;;  %8844 = vmatpush.bf16.msrb.mxu3 %v20603_v60  ;;  %v12278_v60 = vor.u32 %v13647_v27, %v12277_v2  ;;  %v7890_v61 = vpop.permute.xlu0 %7889  ;;  %v12788_v22 = vor.u32 %v13764_v46, %v12787_v48  ;;  %v8625_v46 = vadd.f32 %v20707_v23, %v7895_v19  ;;  %v13771_v23 = vld [vmem:[%s22640_s5 + $0x250] sm:$0xf0] }
 0x927   :  { %v21035_v53 = vpack.c.bf16 %v7559_v9, %v7558_v14  ;;  %v8622_v14 = vadd.f32 %v20685_v10, %v7890_v61  ;;  %v12411_v10 = vld [vmem:[%s22633_s3 + $0xa74] sm:$0xf0] }
 0x928   :  { %8796 = vmatmul.bf16.gmra.mxu2 %v12760_v55  ;;  %8845 = vmatmul.bf16.vlgmr.msrb.gmra.mxu3 %v12540_v1 }
 0x929   :  { %v21037_v31 = vpop.f32.mrf.mxu0 }
 0x92a   :  { %v7412_v44 = vpop.f32.mrf.mxu1 }
 0x92b   :  { %v7413_v8 = vadd.f32 %v7412_v44, %v20846_v45  ;;  %v8708_v41 = vpop.f32.mrf.mxu3  ;;  %v8757_v57 = vpop.f32.mrf.mxu2  ;;  %v13705_v45 = vld [vmem:[%s22640_s5 + $0x44] sm:$0xf]  ;;  %v13678_v44 = vld [vmem:[%s22633_s3 + $0xa5c] sm:$0xf] }
 0x92c   :  { %v21043_v13 = vadd.f32 %v8708_v41, %v8620_v33  ;;  %v21046_v28 = vadd.f32 %v8757_v57, %v20664_v30  ;;  %7212 = vmatmul.bf16.gmra.mxu0 %v12386_v11  ;;  %v12565_v30 = vld [vmem:[%s22640_s5 + $0x5c] sm:$0xf0]  ;;  %v13654_v33 = vld [vmem:[%s22633_s3 + $0x998] sm:$0xf0] }
 0x92d   :  { %12517 = vmatmul.msk.bf16.gmra.mxu1 %vm5528_vm0, %v12278_v60  ;;  %v12568_v2 = vor.u32 %v13705_v45, %v12565_v30  ;;  %v7560_v27 = vmax.f32 %v7413_v8, 0.0  ;;  %v7905_v8 = vpop.permute.xlu1 %7904 }
 0x931   :  { %v21061_v36 = vpop.f32.mrf.mxu0 }
 0x932   :  { %v7414_v55 = vpop.f32.mrf.mxu1 }
 0x933   :  { %v7415_v9 = vadd.f32 %v7414_v55, %v20872_v56  ;;  %v8710_v1 = vpop.f32.mrf.mxu3  ;;  %v8759_v50 = vpop.f32.mrf.mxu2  ;;  %v12305_v56 = vld [vmem:[%s22633_s3 + $0x980] sm:$0xf] }
 0x934   :  { %v21065_v11 = vadd.f32 %v8710_v1, %v8622_v14  ;;  %v21068_v60 = vadd.f32 %v8759_v50, %v20687_v37  ;;  %v12414_v37 = vor.u32 %v13678_v44, %v12411_v10  ;;  %v12306_v57 = vor.u32 %v13654_v33, %v12305_v56  ;;  %v12815_v1 = vld [vmem:[%s22640_s5 + $0x238] sm:$0xf] }
 0x935   :  { %v7561_v43 = vmax.f32 %v7415_v9, 0.0  ;;  %v7900_v50 = vpop.permute.xlu1 %7899  ;;  %v12816_v10 = vor.u32 %v13771_v23, %v12815_v1  ;;  %v8630_v23 = vadd.f32 %v20753_v40, %v7905_v8  ;;  %v13719_v40 = vld [vmem:[%s22640_s5 + $0xb4] sm:$0xf] }
 0x937   :  { %v21082_v41 = vpack.c.bf16 %v7561_v43, %v7560_v27 }
 0x938   :  { %8801 = vmatmul.bf16.gmra.mxu2 %v12788_v22  ;;  %8850 = vmatmul.bf16.gmra.mxu3 %v12568_v2  ;;  %v8627_v2 = vadd.f32 %v20729_v3, %v7900_v50  ;;  %v12439_v3 = vld [vmem:[%s22633_s3 + $0xaac] sm:$0xf0] }
 0x939   :  { %v21084_v48 = vpop.f32.mrf.mxu0 }
 0x93a   :  { %v7417_v61 = vpop.f32.mrf.mxu1 }
 0x93b   :  { %v7418_v45 = vadd.f32 %v7417_v61, %v20893_v16  ;;  %v8713_v30 = vpop.f32.mrf.mxu3  ;;  %v8762_v55 = vpop.f32.mrf.mxu2  ;;  %v13712_v16 = vld [vmem:[%s22640_s5 + $0x7c] sm:$0xf] }
 0x93c   :  { %v21088_v14 = vadd.f32 %v8713_v30, %v8625_v46  ;;  %v21091_v9 = vadd.f32 %v8762_v55, %v20709_v21  ;;  %7217 = vmatmul.bf16.gmra.mxu0 %v12414_v37  ;;  %v12593_v21 = vld [vmem:[%s22640_s5 + $0x94] sm:$0xf0]  ;;  %v13685_v46 = vld [vmem:[%s22633_s3 + $0xa94] sm:$0xf] }
 0x93d   :  { %12518 = vmatmul.msk.bf16.gmra.mxu1 %vm5528_vm0, %v12306_v57  ;;  %v12596_v56 = vor.u32 %v13712_v16, %v12593_v21  ;;  %v7562_v33 = vmax.f32 %v7418_v45, 0.0  ;;  %v13661_v45 = vld [vmem:[%s22633_s3 + $0x9d0] sm:$0xf0] }
 0x941   :  { %v21106_v19 = vpop.f32.mrf.mxu0 }
 0x942   :  { %v7419_v22 = vpop.f32.mrf.mxu1 }
 0x943   :  { %v7420_v27 = vadd.f32 %v7419_v22, %v20919_v5  ;;  %v8715_v43 = vpop.f32.mrf.mxu3  ;;  %v8764_v44 = vpop.f32.mrf.mxu2  ;;  %v12333_v5 = vld [vmem:[%s22633_s3 + $0x9b8] sm:$0xf] }
 0x944   :  { %v21110_v57 = vadd.f32 %v8715_v43, %v8627_v2  ;;  %v21113_v61 = vadd.f32 %v8764_v44, %v20731_v39  ;;  %v12442_v39 = vor.u32 %v13685_v46, %v12439_v3  ;;  %v12334_v55 = vor.u32 %v13661_v45, %v12333_v5  ;;  %v12843_v44 = vld [vmem:[%s22640_s5 + $0x270] sm:$0xf] }
 0x945   :  { %v7563_v37 = vmax.f32 %v7420_v27, 0.0 }
 0x947   :  { %v21127_v30 = vpack.c.bf16 %v7563_v37, %v7562_v33 }
 0x948   :  { %8806 = vmatmul.bf16.gmra.mxu2 %v12816_v10  ;;  %8855 = vmatmul.bf16.gmra.mxu3 %v12596_v56  ;;  %v8632_v10 = vadd.f32 %v20776_v17, %v20998_v38  ;;  %v12467_v17 = vld [vmem:[%s22633_s3 + $0xae4] sm:$0xf0]  ;;  %v13668_v38 = vld [vmem:[%s22633_s3 + $0xa08] sm:$0xf0] }
 0x949   :  { %v7183_v1 = vpop.f32.mrf.mxu0 }
 0x94a   :  { %v7422_v50 = vpop.f32.mrf.mxu1  ;;  %v21131_v16 = vadd.f32 %v7183_v1, %v19954_v0  ;;  %v13778_v0 = vld [vmem:[%s22640_s5 + $0x288] sm:$0xf0] }
 0x94b   :  { %v7423_v21 = vadd.f32 %v7422_v50, %v20940_v18  ;;  %v8718_v22 = vpop.f32.mrf.mxu3  ;;  %v8767_v2 = vpop.f32.mrf.mxu2  ;;  %v12844_v46 = vor.u32 %v13778_v0, %v12843_v44  ;;  %v13692_v1 = vld [vmem:[%s22633_s3 + $0xacc] sm:$0xf]  ;;  %v23244_v0 = vld [vmem:[#allocation9_spill] sm:$0xff] }
 0x94c   :  { %v21134_v27 = vadd.f32 %v8718_v22, %v8630_v23  ;;  %v21137_v43 = vadd.f32 %v8767_v2, %v20755_v34  ;;  %7222 = vmatmul.bf16.gmra.mxu0 %v12442_v39  ;;  %v12621_v34 = vld [vmem:[%s22640_s5 + $0xcc] sm:$0xf0] }
 0x94d   :  { %12519 = vmatmul.msk.bf16.gmra.mxu1 %vm5528_vm0, %v12334_v55  ;;  %v12624_v3 = vor.u32 %v13719_v40, %v12621_v34  ;;  %v7564_v5 = vmax.f32 %v7423_v21, 0.0  ;;  %v23243_v2 = vld [vmem:[#allocation24_spill] sm:$0xff] }
 0x94e   :  { %v8635_v44 = vadd.f32 %v20799_v47, %v23243_v2  ;;  %v12871_v47 = vld [vmem:[%s22640_s5 + $0x2a8] sm:$0xf] }
 0x951   :  { %v21152_v18 = vpop.f32.mrf.mxu0 }
 0x952   :  { %v7424_v8 = vpop.f32.mrf.mxu1 }
 0x953   :  { %v7425_v56 = vadd.f32 %v7424_v8, %v20964_v7  ;;  %v8720_v33 = vpop.f32.mrf.mxu3  ;;  %v8769_v37 = vpop.f32.mrf.mxu2  ;;  %v12361_v7 = vld [vmem:[%s22633_s3 + $0x9f0] sm:$0xf] }
 0x954   :  { %v21157_v39 = vadd.f32 %v8720_v33, %v8632_v10  ;;  %v21160_v55 = vadd.f32 %v8769_v37, %v20778_v29  ;;  %v12470_v29 = vor.u32 %v13692_v1, %v12467_v17  ;;  %v12362_v23 = vor.u32 %v13668_v38, %v12361_v7  ;;  %v23246_v37 = vld [vmem:[#allocation74_spill] sm:$0xff]  ;;  %v13785_v1 = vld [vmem:[%s22640_s5 + $0x2c0] sm:$0xf0]  ;;  %v13726_v17 = vld [vmem:[%s22640_s5 + $0xec] sm:$0xf] }
 0x955   :  { %v7565_v45 = vmax.f32 %v7425_v56, 0.0  ;;  %v23245_v56 = vld [vmem:[#allocation103_spill] sm:$0xff] }
 0x957   :  { %v21174_v50 = vpack.c.bf16 %v7565_v45, %v7564_v5 }
 0x958   :  { %8811 = vmatmul.bf16.gmra.mxu2 %v12844_v46  ;;  %8860 = vmatmul.bf16.gmra.mxu3 %v12624_v3  ;;  %v7169_v46 = vadd.f32 %v20987_v58, %v23246_v37  ;;  %v23247_v3 = vld [vmem:[#allocation3_spill] sm:$0xff] }
 0x959   :  { %v7188_v21 = vpop.f32.mrf.mxu0  ;;  %v7171_v5 = vadd.f32 %v21007_v26, %v23247_v3  ;;  %v12649_v58 = vld [vmem:[%s22640_s5 + $0x104] sm:$0xf0] }
 0x95a   :  { %v7427_v22 = vpop.f32.mrf.mxu1  ;;  %v21179_v40 = vadd.f32 %v7188_v21, %v23244_v0  ;;  %v12652_v2 = vor.u32 %v13726_v17, %v12649_v58  ;;  %v23248_v3 = vld [vmem:[#allocation100_spill] sm:$0xff] }
 0x95b   :  { %v8723_v34 = vpop.f32.mrf.mxu3  ;;  %v8772_v8 = vpop.f32.mrf.mxu2  ;;  %v7428_v45 = vadd.f32 %v7427_v22, %v7169_v46  ;;  %v12872_v22 = vor.u32 %v13785_v1, %v12871_v47  ;;  %v23250_v58 = vld [vmem:[#allocation20_spill] sm:$0xff] }
 0x95c   :  { %v21181_v10 = vadd.f32 %v8723_v34, %v8635_v44  ;;  %v21184_v33 = vadd.f32 %v8772_v8, %v23245_v56  ;;  %7227 = vmatmul.bf16.gmra.mxu0 %v12470_v29  ;;  %v8637_v29 = vadd.f32 %v20825_v25, %v21041_v32  ;;  %v12389_v56 = vld [vmem:[%s22633_s3 + $0xa28] sm:$0xf]  ;;  %v13675_v25 = vld [vmem:[%s22633_s3 + $0xa40] sm:$0xf0] }
 0x95d   :  { %12520 = vmatmul.msk.bf16.gmra.mxu1 %vm5528_vm0, %v12362_v23  ;;  %v7566_v44 = vmax.f32 %v7428_v45, 0.0  ;;  %v12390_v37 = vor.u32 %v13675_v25, %v12389_v56 }
 0x961   :  { %v21203_v7 = vpop.f32.mrf.mxu0 }
 0x962   :  { %v7429_v38 = vpop.f32.mrf.mxu1 }
 0x963   :  { %v7430_v26 = vadd.f32 %v7429_v38, %v7171_v5  ;;  %v8725_v23 = vpop.f32.mrf.mxu3  ;;  %v8774_v21 = vpop.f32.mrf.mxu2  ;;  %v8640_v5 = vadd.f32 %v20848_v6, %v23248_v3  ;;  %v23251_v38 = vld [vmem:[#allocation66_spill] sm:$0xff] }
 0x964   :  { %v21207_v34 = vadd.f32 %v8725_v23, %v8637_v29  ;;  %v21210_v8 = vadd.f32 %v8774_v21, %v20827_v24  ;;  %v23249_v24 = vld [vmem:[#allocation42_spill] sm:$0xff]  ;;  %v6658_v29 = vadd.f32 %v23251_v38, %v23250_v58  ;;  %v23252_v23 = vld [vmem:[#allocation43_spill] sm:$0xff] }
 0x965   :  { %v7567_v0 = vmax.f32 %v7430_v26, 0.0  ;;  %v12677_v3 = vld [vmem:[%s22640_s5 + $0x13c] sm:$0xf0] }
 0x967   :  { %v21218_v32 = vpack.c.bf16 %v7567_v0, %v7566_v44  ;;  %v23254_v44 = vld [vmem:[#allocation32_spill] sm:$0xff]  ;;  %v12899_v0 = vld [vmem:[%s22640_s5 + $0x2e0] sm:$0xf] }
 0x968   :  { %8816 = vmatmul.bf16.gmra.mxu2 %v12872_v22  ;;  %8865 = vmatmul.bf16.gmra.mxu3 %v12652_v2  ;;  %v23253_v22 = vld [vmem:[#allocation36_spill] sm:$0xff]  ;;  %v7174_v6 = vadd.f32 %v21037_v31, %v23254_v44  ;;  %v12417_v44 = vld [vmem:[%s22633_s3 + $0xa60] sm:$0xf] }
 0x969   :  { %v7193_v46 = vpop.f32.mrf.mxu0  ;;  %v6917_v2 = vadd.f32 %v23253_v22, %v6658_v29 }
 0x96a   :  { %v7432_v47 = vpop.f32.mrf.mxu1  ;;  %v21223_v45 = vadd.f32 %v7193_v46, %v23249_v24  ;;  %v13792_v46 = vld [vmem:[%s22640_s5 + $0x2f8] sm:$0xf0] }
 0x96b   :  { %v8728_v1 = vpop.f32.mrf.mxu3  ;;  %v8777_v17 = vpop.f32.mrf.mxu2  ;;  %v7176_v56 = vadd.f32 %v21061_v36, %v6917_v2  ;;  %v7433_v25 = vadd.f32 %v7432_v47, %v7174_v6  ;;  %v23255_v24 = vld [vmem:[#allocation98_spill] sm:$0xff]  ;;  %v12900_v58 = vor.u32 %v13792_v46, %v12899_v0  ;;  %v23257_v46 = vld [vmem:[#allocation44_spill] sm:$0xff] }
 0x96c   :  { %v21227_v26 = vadd.f32 %v8728_v1, %v8640_v5  ;;  %v21230_v21 = vadd.f32 %v8777_v17, %v23252_v23  ;;  %v8642_v1 = vadd.f32 %v20874_v62, %v23255_v24  ;;  %v13682_v62 = vld [vmem:[%s22633_s3 + $0xa78] sm:$0xf0] }
 0x96d   :  { %12521 = vmatmul.msk.bf16.gmra.mxu1 %vm5528_vm0, %v12390_v37  ;;  %v13733_v37 = vld [vmem:[%s22640_s5 + $0x124] sm:$0xf]  ;;  %v7568_v29 = vmax.f32 %v7433_v25, 0.0  ;;  %v12418_v0 = vor.u32 %v13682_v62, %v12417_v44  ;;  %v12927_v44 = vld [vmem:[%s22640_s5 + $0x318] sm:$0xf] }
 0x96e   :  { %v12680_v38 = vor.u32 %v13733_v37, %v12677_v3  ;;  %v8645_v37 = vadd.f32 %v20895_v4, %v23257_v46  ;;  %v23258_v3 = vld [vmem:[#allocation52_spill] sm:$0xff]  ;;  %v13799_v46 = vld [vmem:[%s22640_s5 + $0x330] sm:$0xf0] }
 0x971   :  { %v21249_v31 = vpop.f32.mrf.mxu0 }
 0x972   :  { %v7434_v5 = vpop.f32.mrf.mxu1 }
 0x973   :  { %v7435_v36 = vadd.f32 %v7434_v5, %v7176_v56  ;;  %v8730_v47 = vpop.f32.mrf.mxu3  ;;  %v8779_v17 = vpop.f32.mrf.mxu2 }
 0x974   :  { %v21253_v22 = vadd.f32 %v8730_v47, %v8642_v1  ;;  %v21256_v2 = vadd.f32 %v8779_v17, %v20876_v51  ;;  %v23259_v1 = vld [vmem:[#allocation40_spill] sm:$0xff] }
 0x975   :  { %v7569_v23 = vmax.f32 %v7435_v36, 0.0  ;;  %v23260_v36 = vld [vmem:[#allocation53_spill] sm:$0xff] }
 0x976   :  { %23256 = vst [vmem:[#allocation91_spill] sm:$0xff] %v21256_v2  ;;  %v6663_v47 = vadd.f32 %v23260_v36, %v23259_v1  ;;  %v23261_v2 = vld [vmem:[#allocation46_spill] sm:$0xff]  ;;  %v12928_v1 = vor.u32 %v13799_v46, %v12927_v44 }
 0x977   :  { %v7758_v6 = vpack.c.bf16 %v7569_v23, %v7568_v29  ;;  %v23264_v23 = vld [vmem:[#allocation38_spill] sm:$0xff] }
 0x978   :  { %8821 = vmatmul.bf16.gmra.mxu2 %v12900_v58  ;;  %8870 = vmatmul.bf16.gmra.mxu3 %v12680_v38  ;;  %v23263_v58 = vld [vmem:[#allocation8_spill] sm:$0xff]  ;;  %v7179_v4 = vadd.f32 %v21084_v48, %v23264_v23  ;;  %v23266_v23 = vld [vmem:[#allocation63_spill] sm:$0xff] }
 0x979   :  { %v7198_v56 = vpop.f32.mrf.mxu0  ;;  %v6922_v38 = vadd.f32 %v23263_v58, %v6663_v47 }
 0x97a   :  { %v7437_v25 = vpop.f32.mrf.mxu1  ;;  %v21267_v51 = vadd.f32 %v7198_v56, %v23258_v3  ;;  %v23265_v3 = vld [vmem:[#allocation19_spill] sm:$0xff] }
 0x97b   :  { %v8733_v5 = vpop.f32.mrf.mxu3  ;;  %v8782_v24 = vpop.f32.mrf.mxu2  ;;  %v7181_v62 = vadd.f32 %v21106_v19, %v6922_v38  ;;  %v7438_v56 = vadd.f32 %v7437_v25, %v7179_v4 }
 0x97c   :  { %v21271_v17 = vadd.f32 %v8733_v5, %v8645_v37  ;;  %v21274_v29 = vadd.f32 %v8782_v24, %v23261_v2  ;;  %v13740_v2 = vld [vmem:[%s22640_s5 + $0x15c] sm:$0xf]  ;;  %v8647_v5 = vadd.f32 %v20921_v42, %v23265_v3  ;;  %v13689_v42 = vld [vmem:[%s22633_s3 + $0xab0] sm:$0xf0] }
 0x97d   :  { %12522 = vmatmul.msk.bf16.gmra.mxu1 %vm5528_vm0, %v12418_v0  ;;  %v12705_v0 = vld [vmem:[%s22640_s5 + $0x174] sm:$0xf0]  ;;  %v7570_v47 = vmax.f32 %v7438_v56, 0.0 }
 0x97e   :  { %23262 = vst [vmem:[#allocation106_spill] sm:$0xff] %v21274_v29  ;;  %v12708_v36 = vor.u32 %v13740_v2, %v12705_v0  ;;  %v12445_v29 = vld [vmem:[%s22633_s3 + $0xa98] sm:$0xf]  ;;  %v23268_v2 = vld [vmem:[#allocation96_spill] sm:$0xff] }
 0x97f   :  { %v12446_v44 = vor.u32 %v13689_v42, %v12445_v29  ;;  %v8650_v0 = vadd.f32 %v20943_v12, %v23268_v2  ;;  %v23273_v42 = vld [vmem:[#allocation22_spill] sm:$0xff] }
 0x981   :  { %v21293_v48 = vpop.f32.mrf.mxu0 }
 0x982   :  { %v7439_v37 = vpop.f32.mrf.mxu1 }
 0x983   :  { %v7440_v19 = vadd.f32 %v7439_v37, %v7181_v62  ;;  %v8735_v25 = vpop.f32.mrf.mxu3  ;;  %v8784_v24 = vpop.f32.mrf.mxu2  ;;  %v23269_v37 = vld [vmem:[#allocation93_spill] sm:$0xff] }
 0x984   :  { %v21297_v38 = vadd.f32 %v8735_v25, %v8647_v5  ;;  %v21300_v4 = vadd.f32 %v8784_v24, %v23266_v23  ;;  %v23270_v24 = vld [vmem:[#allocation79_spill] sm:$0xff]  ;;  %v23271_v23 = vld [vmem:[#allocation60_spill] sm:$0xff] }
 0x985   :  { %v7571_v58 = vmax.f32 %v7440_v19, 0.0 }
 0x986   :  { %23267 = vst [vmem:[#allocation39_spill] sm:$0xff] %v21300_v4  ;;  %v6668_v4 = vadd.f32 %v23271_v23, %v23270_v24 }
 0x987   :  { %v7759_v62 = vpack.c.bf16 %v7571_v58, %v7570_v47  ;;  %v13806_v58 = vld [vmem:[%s22640_s5 + $0x368] sm:$0xf0] }
 0x988   :  { %8826 = vmatmul.bf16.gmra.mxu2 %v12928_v1  ;;  %8875 = vmatmul.bf16.gmra.mxu3 %v12708_v36  ;;  %v23272_v1 = vld [vmem:[#allocation12_spill] sm:$0xff] }
 0x989   :  { %8926 = vmatpush.bf16.msra.mxu2 %v7759_v62  ;;  %v7203_v56 = vpop.f32.mrf.mxu0  ;;  %v6927_v12 = vadd.f32 %v23272_v1, %v6668_v4  ;;  %v12955_v36 = vld [vmem:[%s22640_s5 + $0x350] sm:$0xf]  ;;  %v8652_v62 = vadd.f32 %v20967_v20, %v23273_v42  ;;  %v13696_v20 = vld [vmem:[%s22633_s3 + $0xae8] sm:$0xf0] }
 0x98a   :  { %v7442_v46 = vpop.f32.mrf.mxu1  ;;  %v21311_v3 = vadd.f32 %v7203_v56, %v23269_v37 }
 0x98b   :  { %v7443_v5 = vadd.f32 %v7442_v46, %v21131_v16  ;;  %v8738_v19 = vpop.f32.mrf.mxu3  ;;  %v8787_v25 = vpop.f32.mrf.mxu2  ;;  %v7186_v16 = vadd.f32 %v21152_v18, %v6927_v12  ;;  %v12956_v46 = vor.u32 %v13806_v58, %v12955_v36  ;;  %v23276_v58 = vld [vmem:[#allocation55_spill] sm:$0xff] }
 0x98c   :  { %v21316_v47 = vadd.f32 %v8738_v19, %v8650_v0  ;;  %v21319_v29 = vadd.f32 %v8787_v25, %v20945_v35  ;;  %v13747_v35 = vld [vmem:[%s22640_s5 + $0x194] sm:$0xf] }
 0x98d   :  { %12523 = vmatmul.msk.bf16.gmra.mxu1 %vm5528_vm0, %v12446_v44  ;;  %8927 = vmatpush.bf16.msra.mxu2 %v7758_v6  ;;  %v12733_v6 = vld [vmem:[%s22640_s5 + $0x1ac] sm:$0xf0]  ;;  %v7572_v0 = vmax.f32 %v7443_v5, 0.0 }
 0x98e   :  { %v12736_v2 = vor.u32 %v13747_v35, %v12733_v6 }
 0x991   :  { %8928 = vmatpush.bf16.msra.mxu2 %v21218_v32  ;;  %v12473_v32 = vld [vmem:[%s22633_s3 + $0xad0] sm:$0xf] }
 0x992   :  { %v7444_v4 = vpop.f32.mrf.mxu1  ;;  %v12474_v5 = vor.u32 %v13696_v20, %v12473_v32 }
 0x993   :  { %v7445_v44 = vadd.f32 %v7444_v4, %v7186_v16  ;;  %v8740_v18 = vpop.f32.mrf.mxu3  ;;  %v8789_v56 = vpop.f32.mrf.mxu2  ;;  %v23275_v16 = vld [vmem:[#allocation54_spill] sm:$0xff] }
 0x994   :  { %v21339_v19 = vadd.f32 %v8740_v18, %v8652_v62  ;;  %v21342_v25 = vadd.f32 %v8789_v56, %v20969_v63  ;;  %v23274_v63 = vld [vmem:[#allocation105_spill] sm:$0xff]  ;;  %v6673_v35 = vadd.f32 %v23276_v58, %v23275_v16  ;;  %v12761_v62 = vld [vmem:[%s22640_s5 + $0x1e4] sm:$0xf0] }
 0x995   :  { %v7573_v37 = vmax.f32 %v7445_v44, 0.0  ;;  %8929 = vmatpush.bf16.msra.mxu2 %v21174_v50  ;;  %v8655_v1 = vadd.f32 %v20992_v59, %v23274_v63  ;;  %v13754_v59 = vld [vmem:[%s22640_s5 + $0x1cc] sm:$0xf]  ;;  %v23280_v16 = vld [vmem:[#allocation7_spill] sm:$0xff] }
 0x996   :  { %v23278_v18 = vld [vmem:[#allocation72_spill] sm:$0xff] }
 0x997   :  { %v21351_v24 = vpack.c.bf16 %v7573_v37, %v7572_v0  ;;  %v8657_v56 = vadd.f32 %v21018_v52, %v23278_v18  ;;  %v12764_v0 = vor.u32 %v13754_v59, %v12761_v62 }
 0x998   :  { %8831 = vmatmul.bf16.gmra.mxu2 %v12956_v46  ;;  %8880 = vmatmul.bf16.gmra.mxu3 %v12736_v2 }
 0x999   :  { %8930 = vmatpush.bf16.msra.mxu2 %v21127_v30  ;;  %v23277_v30 = vld [vmem:[#allocation41_spill] sm:$0xff] }
 0x99a   :  { %v7447_v23 = vpop.f32.mrf.mxu1  ;;  %v6932_v42 = vadd.f32 %v23277_v30, %v6673_v35  ;;  %v23281_v35 = vld [vmem:[#allocation47_spill] sm:$0xff] }
 0x99b   :  { %v7448_v50 = vadd.f32 %v7447_v23, %v21179_v40  ;;  %v8743_v12 = vpop.f32.mrf.mxu3  ;;  %v8792_v36 = vpop.f32.mrf.mxu2  ;;  %v13761_v30 = vld [vmem:[%s22640_s5 + $0x204] sm:$0xf] }
 0x99c   :  { %v21359_v6 = vadd.f32 %v8743_v12, %v8655_v1  ;;  %v21362_v4 = vadd.f32 %v8792_v36, %v20994_v49  ;;  %v7191_v40 = vadd.f32 %v21203_v7, %v6932_v42  ;;  %v12543_v49 = vld [vmem:[%s22640_s5 + $0x10] sm:$0xf]  ;;  %v23279_v36 = vld [vmem:[#allocation11_spill] sm:$0xff] }
 0x99d   :  { %12524 = vmatmul.msk.bf16.gmra.mxu1 %vm5528_vm0, %v12474_v5  ;;  %8931 = vmatpush.bf16.msra.mxu2 %v21082_v41  ;;  %v13702_v41 = vld [vmem:[%s22640_s5 + $0x28] sm:$0xf0]  ;;  %v7574_v32 = vmax.f32 %v7448_v50, 0.0  ;;  %v6678_v50 = vadd.f32 %v23280_v16, %v23279_v36  ;;  %v13768_v16 = vld [vmem:[%s22640_s5 + $0x23c] sm:$0xf] }
 0x99e   :  { %v12544_v37 = vor.u32 %v13702_v41, %v12543_v49 }
 0x9a1   :  { %8932 = vmatpush.bf16.msra.mxu2 %v21035_v53 }
 0x9a2   :  { %v7449_v44 = vpop.f32.mrf.mxu1 }
 0x9a3   :  { %v7450_v46 = vadd.f32 %v7449_v44, %v7191_v40  ;;  %v8745_v7 = vpop.f32.mrf.mxu3  ;;  %v8794_v2 = vpop.f32.mrf.mxu2 }
 0x9a4   :  { %v21383_v5 = vadd.f32 %v8745_v7, %v8657_v56  ;;  %v21386_v23 = vadd.f32 %v8794_v2, %v21020_v15  ;;  %v7205_v2 = vpop.f32.mrf.mxu0 }
 0x9a5   :  { %v7575_v20 = vmax.f32 %v7450_v46, 0.0  ;;  %8933 = vmatpush.bf16.msra.mxu2 %v20984_v54  ;;  %v6937_v54 = vadd.f32 %v23281_v35, %v6678_v50 }
 0x9a7   :  { %v21389_v63 = vpack.c.bf16 %v7575_v20, %v7574_v32  ;;  %v7196_v42 = vadd.f32 %v21249_v31, %v6937_v54 }
 0x9a8   :  { %8885 = vmatmul.bf16.gmra.mxu3 %v12764_v0  ;;  %8934 = vmatmul.bf16.vlgmr.msra.gmra.mxu2 %v12544_v37 }
 0x9aa   :  { %v7452_v53 = vpop.f32.mrf.mxu1 }
 0x9ab   :  { %v7453_v52 = vadd.f32 %v7452_v53, %v21223_v45  ;;  %v8797_v1 = vpop.f32.mrf.mxu2  ;;  %v8846_v12 = vpop.f32.mrf.mxu3  ;;  %v12789_v45 = vld [vmem:[%s22640_s5 + $0x21c] sm:$0xf0] }
 0x9ac   :  { %v21395_v58 = vadd.f32 %v8797_v1, %v21043_v13  ;;  %v21398_v15 = vadd.f32 %v8846_v12, %v21046_v28  ;;  %v12571_v13 = vld [vmem:[%s22640_s5 + $0x48] sm:$0xf]  ;;  %v13709_v28 = vld [vmem:[%s22640_s5 + $0x60] sm:$0xf0]  ;;  %v12792_v41 = vor.u32 %v13761_v30, %v12789_v45  ;;  %v23282_v53 = vld [vmem:[#allocation10_spill] sm:$0xff]  ;;  %v7208_v54 = vpop.f32.mrf.mxu0 }
 0x9ad   :  { %v12572_v44 = vor.u32 %v13709_v28, %v12571_v13  ;;  %v7576_v18 = vmax.f32 %v7453_v52, 0.0  ;;  %v23283_v1 = vld [vmem:[#allocation90_spill] sm:$0xff] }
 0x9ae   :  { %v6683_v52 = vadd.f32 %v23283_v1, %v23282_v53 }
 0x9b2   :  { %v7454_v59 = vpop.f32.mrf.mxu1 }
 0x9b3   :  { %v7455_v40 = vadd.f32 %v7454_v59, %v7196_v42  ;;  %v8799_v62 = vpop.f32.mrf.mxu2  ;;  %v8848_v49 = vpop.f32.mrf.mxu3 }
 0x9b4   :  { %v21415_v56 = vadd.f32 %v8799_v62, %v21065_v11  ;;  %v21418_v46 = vadd.f32 %v8848_v49, %v21068_v60  ;;  %v23284_v60 = vld [vmem:[#allocation59_spill] sm:$0xff] }
 0x9b5   :  { %v7577_v31 = vmax.f32 %v7455_v40, 0.0  ;;  %v6942_v36 = vadd.f32 %v23284_v60, %v6683_v52  ;;  %v13775_v52 = vld [vmem:[%s22640_s5 + $0x274] sm:$0xf] }
 0x9b7   :  { %v21420_v7 = vpack.c.bf16 %v7577_v31, %v7576_v18  ;;  %v7201_v50 = vadd.f32 %v21293_v48, %v6942_v36  ;;  %v12627_v36 = vld [vmem:[%s22640_s5 + $0xb8] sm:$0xf] }
 0x9b8   :  { %8890 = vmatmul.bf16.gmra.mxu3 %v12792_v41  ;;  %8939 = vmatmul.bf16.gmra.mxu2 %v12572_v44 }
 0x9ba   :  { %v7457_v0 = vpop.f32.mrf.mxu1 }
 0x9bb   :  { %v7458_v37 = vadd.f32 %v7457_v0, %v21267_v51  ;;  %v8802_v32 = vpop.f32.mrf.mxu2  ;;  %v8851_v20 = vpop.f32.mrf.mxu3  ;;  %v12817_v51 = vld [vmem:[%s22640_s5 + $0x254] sm:$0xf0] }
 0x9bc   :  { %v21426_v12 = vadd.f32 %v8802_v32, %v21088_v14  ;;  %v21429_v11 = vadd.f32 %v8851_v20, %v21091_v9  ;;  %v12599_v14 = vld [vmem:[%s22640_s5 + $0x80] sm:$0xf]  ;;  %v13716_v9 = vld [vmem:[%s22640_s5 + $0x98] sm:$0xf0]  ;;  %v12820_v13 = vor.u32 %v13768_v16, %v12817_v51  ;;  %v23285_v0 = vld [vmem:[#allocation45_spill] sm:$0xff] }
 0x9bd   :  { %v12600_v28 = vor.u32 %v13716_v9, %v12599_v14  ;;  %v7578_v48 = vmax.f32 %v7458_v37, 0.0  ;;  %v23286_v32 = vld [vmem:[#allocation50_spill] sm:$0xff]  ;;  %v7210_v37 = vpop.f32.mrf.mxu0 }
 0x9be   :  { %v6688_v20 = vadd.f32 %v23286_v32, %v23285_v0  ;;  %v23290_v0 = vld [vmem:[#allocation80_spill] sm:$0xff]  ;;  %v23291_v32 = vld [vmem:[#allocation81_spill] sm:$0xff] }
 0x9c2   :  { %v7459_v35 = vpop.f32.mrf.mxu1 }
 0x9c3   :  { %v7460_v30 = vadd.f32 %v7459_v35, %v7201_v50  ;;  %v8804_v42 = vpop.f32.mrf.mxu2  ;;  %v8853_v45 = vpop.f32.mrf.mxu3 }
 0x9c4   :  { %v21446_v40 = vadd.f32 %v8804_v42, %v21110_v57  ;;  %v21449_v62 = vadd.f32 %v8853_v45, %v21113_v61  ;;  %v23287_v61 = vld [vmem:[#allocation84_spill] sm:$0xff] }
 0x9c5   :  { %v7579_v59 = vmax.f32 %v7460_v30, 0.0  ;;  %v6947_v1 = vadd.f32 %v23287_v61, %v6688_v20  ;;  %v7213_v45 = vpop.f32.mrf.mxu0  ;;  %v7209_v20 = vadd.f32 %v7208_v54, %v23291_v32  ;;  %v13782_v61 = vld [vmem:[%s22640_s5 + $0x2ac] sm:$0xf]  ;;  %v23295_v32 = vld [vmem:[#allocation83_spill] sm:$0xff] }
 0x9c7   :  { %v21451_v49 = vpack.c.bf16 %v7579_v59, %v7578_v48  ;;  %v7206_v60 = vadd.f32 %v7205_v2, %v6947_v1 }
 0x9c8   :  { %8895 = vmatmul.bf16.gmra.mxu3 %v12820_v13  ;;  %8944 = vmatmul.bf16.gmra.mxu2 %v12600_v28 }
 0x9ca   :  { %v7462_v41 = vpop.f32.mrf.mxu1 }
 0x9cb   :  { %v7463_v44 = vadd.f32 %v7462_v41, %v21311_v3  ;;  %v8807_v18 = vpop.f32.mrf.mxu2  ;;  %v8856_v31 = vpop.f32.mrf.mxu3  ;;  %v12845_v3 = vld [vmem:[%s22640_s5 + $0x28c] sm:$0xf0]  ;;  %v23288_v41 = vld [vmem:[#allocation14_spill] sm:$0xff] }
 0x9cc   :  { %v21457_v53 = vadd.f32 %v8807_v18, %v21134_v27  ;;  %v21460_v57 = vadd.f32 %v8856_v31, %v21137_v43  ;;  %v13723_v27 = vld [vmem:[%s22640_s5 + $0xd0] sm:$0xf0]  ;;  %v12848_v14 = vor.u32 %v13775_v52, %v12845_v3  ;;  %v23289_v18 = vld [vmem:[#allocation94_spill] sm:$0xff]  ;;  %v12873_v3 = vld [vmem:[%s22640_s5 + $0x2c4] sm:$0xf0] }
 0x9cd   :  { %v12628_v9 = vor.u32 %v13723_v27, %v12627_v36  ;;  %v7580_v35 = vmax.f32 %v7463_v44, 0.0  ;;  %v6693_v31 = vadd.f32 %v23289_v18, %v23288_v41  ;;  %v7215_v52 = vpop.f32.mrf.mxu0  ;;  %v23292_v41 = vld [vmem:[#allocation92_spill] sm:$0xff] }
 0x9ce   :  { %v23293_v18 = vld [vmem:[#allocation48_spill] sm:$0xff] }
 0x9d2   :  { %v7464_v43 = vpop.f32.mrf.mxu1 }
 0x9d3   :  { %v7465_v16 = vadd.f32 %v7464_v43, %v7206_v60  ;;  %v8809_v50 = vpop.f32.mrf.mxu2  ;;  %v8858_v51 = vpop.f32.mrf.mxu3 }
 0x9d4   :  { %v21476_v30 = vadd.f32 %v8809_v50, %v21157_v39  ;;  %v21479_v42 = vadd.f32 %v8858_v51, %v21160_v55  ;;  %v6952_v55 = vadd.f32 %v23290_v0, %v6693_v31  ;;  %v6698_v31 = vadd.f32 %v23293_v18, %v23292_v41  ;;  %v23297_v18 = vld [vmem:[#allocation70_spill] sm:$0xff] }
 0x9d5   :  { %v7581_v2 = vmax.f32 %v7465_v16, 0.0  ;;  %v12876_v16 = vor.u32 %v13782_v61, %v12873_v3  ;;  %v13789_v61 = vld [vmem:[%s22640_s5 + $0x2e4] sm:$0xf]  ;;  %v12901_v3 = vld [vmem:[%s22640_s5 + $0x2fc] sm:$0xf0] }
 0x9d6   :  { %v7211_v1 = vadd.f32 %v7210_v37, %v6952_v55  ;;  %v23294_v55 = vld [vmem:[#allocation87_spill] sm:$0xff] }
 0x9d7   :  { %v21481_v13 = vpack.c.bf16 %v7581_v2, %v7580_v35 }
 0x9d8   :  { %8900 = vmatmul.bf16.gmra.mxu3 %v12848_v14  ;;  %8949 = vmatmul.bf16.gmra.mxu2 %v12628_v9 }
 0x9da   :  { %v7467_v28 = vpop.f32.mrf.mxu1 }
 0x9db   :  { %v8812_v48 = vpop.f32.mrf.mxu2  ;;  %v8861_v59 = vpop.f32.mrf.mxu3  ;;  %v7468_v60 = vadd.f32 %v7467_v28, %v7209_v20  ;;  %v7214_v20 = vadd.f32 %v7213_v45, %v23295_v32  ;;  %v23299_v32 = vld [vmem:[#allocation106_spill] sm:$0xff] }
 0x9dc   :  { %v21486_v44 = vadd.f32 %v8812_v48, %v21181_v10  ;;  %v21489_v39 = vadd.f32 %v8861_v59, %v21184_v33  ;;  %v12655_v10 = vld [vmem:[%s22640_s5 + $0xf0] sm:$0xf]  ;;  %v13730_v33 = vld [vmem:[%s22640_s5 + $0x108] sm:$0xf0]  ;;  %v7218_v28 = vpop.f32.mrf.mxu0 }
 0x9dd   :  { %v12656_v37 = vor.u32 %v13730_v33, %v12655_v10  ;;  %v7582_v50 = vmax.f32 %v7468_v60, 0.0 }
 0x9e2   :  { %v7469_v54 = vpop.f32.mrf.mxu1 }
 0x9e3   :  { %v7470_v36 = vadd.f32 %v7469_v54, %v7211_v1  ;;  %v8814_v27 = vpop.f32.mrf.mxu2  ;;  %v8863_v43 = vpop.f32.mrf.mxu3 }
 0x9e4   :  { %v21506_v14 = vadd.f32 %v8814_v27, %v21207_v34  ;;  %v21509_v9 = vadd.f32 %v8863_v43, %v21210_v8  ;;  %v6957_v8 = vadd.f32 %v23294_v55, %v6698_v31  ;;  %v23298_v31 = vld [vmem:[#allocation61_spill] sm:$0xff] }
 0x9e5   :  { %v7583_v51 = vmax.f32 %v7470_v36, 0.0  ;;  %v12904_v36 = vor.u32 %v13789_v61, %v12901_v3  ;;  %v6703_v55 = vadd.f32 %v23298_v31, %v23297_v18 }
 0x9e6   :  { %v7216_v1 = vadd.f32 %v7215_v52, %v6957_v8  ;;  %v7220_v52 = vpop.f32.mrf.mxu0 }
 0x9e7   :  { %v21511_v35 = vpack.c.bf16 %v7583_v51, %v7582_v50  ;;  %v23296_v50 = vld [vmem:[#allocation91_spill] sm:$0xff] }
 0x9e8   :  { %8905 = vmatmul.bf16.gmra.mxu3 %v12876_v16  ;;  %8954 = vmatmul.bf16.gmra.mxu2 %v12656_v37 }
 0x9ea   :  { %v7472_v2 = vpop.f32.mrf.mxu1 }
 0x9eb   :  { %v8817_v48 = vpop.f32.mrf.mxu2  ;;  %v8866_v59 = vpop.f32.mrf.mxu3  ;;  %v7473_v60 = vadd.f32 %v7472_v2, %v7214_v20 }
 0x9ec   :  { %v21516_v0 = vadd.f32 %v8817_v48, %v21227_v26  ;;  %v21519_v34 = vadd.f32 %v8866_v59, %v21230_v21  ;;  %v12683_v26 = vld [vmem:[%s22640_s5 + $0x128] sm:$0xf]  ;;  %v13737_v21 = vld [vmem:[%s22640_s5 + $0x140] sm:$0xf0] }
 0x9ed   :  { %v12684_v27 = vor.u32 %v13737_v21, %v12683_v26  ;;  %v7584_v43 = vmax.f32 %v7473_v60, 0.0  ;;  %v13796_v26 = vld [vmem:[%s22640_s5 + $0x31c] sm:$0xf] }
 0x9ee   :  { %v7223_v3 = vpop.f32.mrf.mxu0 }
 0x9f2   :  { %v7474_v10 = vpop.f32.mrf.mxu1 }
 0x9f3   :  { %v7475_v45 = vadd.f32 %v7474_v10, %v7216_v1  ;;  %v8819_v33 = vpop.f32.mrf.mxu2  ;;  %v8868_v54 = vpop.f32.mrf.mxu3  ;;  %v23301_v1 = vld [vmem:[#allocation89_spill] sm:$0xff] }
 0x9f4   :  { %v21536_v37 = vadd.f32 %v8819_v33, %v21253_v22  ;;  %v21539_v51 = vadd.f32 %v8868_v54, %v23296_v50  ;;  %v23300_v22 = vld [vmem:[#allocation33_spill] sm:$0xff]  ;;  %v7219_v60 = vadd.f32 %v7218_v28, %v23301_v1  ;;  %v13744_v33 = vld [vmem:[%s22640_s5 + $0x178] sm:$0xf0]  ;;  %v23304_v1 = vld [vmem:[#allocation56_spill] sm:$0xff] }
 0x9f5   :  { %v7585_v16 = vmax.f32 %v7475_v45, 0.0  ;;  %v6962_v61 = vadd.f32 %v23300_v22, %v6703_v55  ;;  %v12929_v45 = vld [vmem:[%s22640_s5 + $0x334] sm:$0xf0] }
 0x9f6   :  { %v7225_v31 = vpop.f32.mrf.mxu0 }
 0x9f7   :  { %v7766_v2 = vpack.c.bf16 %v7585_v16, %v7584_v43  ;;  %v7221_v21 = vadd.f32 %v7220_v52, %v6962_v61  ;;  %v12932_v43 = vor.u32 %v13796_v26, %v12929_v45  ;;  %v23303_v61 = vld [vmem:[#allocation67_spill] sm:$0xff]  ;;  %v23306_v45 = vld [vmem:[#allocation101_spill] sm:$0xff] }
 0x9f8   :  { %8910 = vmatmul.bf16.gmra.mxu3 %v12904_v36  ;;  %8959 = vmatmul.bf16.gmra.mxu2 %v12684_v27 }
 0x9fa   :  { %v7477_v48 = vpop.f32.mrf.mxu1 }
 0x9fb   :  { %v8822_v59 = vpop.f32.mrf.mxu2  ;;  %v8871_v41 = vpop.f32.mrf.mxu3  ;;  %v7478_v10 = vadd.f32 %v7477_v48, %v7219_v60  ;;  %v6708_v60 = vadd.f32 %v23304_v1, %v23303_v61  ;;  %v23307_v1 = vld [vmem:[#allocation26_spill] sm:$0xff] }
 0x9fc   :  { %v21544_v8 = vadd.f32 %v8822_v59, %v21271_v17  ;;  %v21547_v20 = vadd.f32 %v8871_v41, %v23299_v32  ;;  %v12711_v17 = vld [vmem:[%s22640_s5 + $0x160] sm:$0xf] }
 0x9fd   :  { %v12712_v16 = vor.u32 %v13744_v33, %v12711_v17  ;;  %v7586_v52 = vmax.f32 %v7478_v10, 0.0  ;;  %v23302_v59 = vld [vmem:[#allocation39_spill] sm:$0xff]  ;;  %v7224_v17 = vadd.f32 %v7223_v3, %v23306_v45  ;;  %v13803_v33 = vld [vmem:[%s22640_s5 + $0x354] sm:$0xf] }
 0x9fe   :  { %v7228_v3 = vpop.f32.mrf.mxu0 }
 0xa02   :  { %v7479_v28 = vpop.f32.mrf.mxu1 }
 0xa03   :  { %v7480_v54 = vadd.f32 %v7479_v28, %v7221_v21  ;;  %v8824_v36 = vpop.f32.mrf.mxu2  ;;  %v8873_v27 = vpop.f32.mrf.mxu3  ;;  %v23305_v21 = vld [vmem:[#allocation86_spill] sm:$0xff] }
 0xa04   :  { %v21564_v48 = vadd.f32 %v8824_v36, %v21297_v38  ;;  %v21567_v41 = vadd.f32 %v8873_v27, %v23302_v59  ;;  %v6967_v10 = vadd.f32 %v23305_v21, %v6708_v60  ;;  %v12957_v36 = vld [vmem:[%s22640_s5 + $0x36c] sm:$0xf0]  ;;  %v23308_v60 = vld [vmem:[#allocation75_spill] sm:$0xff] }
 0xa05   :  { %v7587_v50 = vmax.f32 %v7480_v54, 0.0  ;;  %v6713_v21 = vadd.f32 %v23308_v60, %v23307_v1 }
 0xa06   :  { %v7226_v28 = vadd.f32 %v7225_v31, %v6967_v10 }
 0xa07   :  { %v7767_v18 = vpack.c.bf16 %v7587_v50, %v7586_v52  ;;  %v12960_v52 = vor.u32 %v13803_v33, %v12957_v36 }
 0xa08   :  { %8915 = vmatmul.bf16.gmra.mxu3 %v12932_v43  ;;  %8964 = vmatmul.bf16.gmra.mxu2 %v12712_v16 }
 0xa09   :  { %9015 = vmatpush.bf16.msra.mxu3 %v7767_v18 }
 0xa0a   :  { %v7482_v55 = vpop.f32.mrf.mxu1 }
 0xa0b   :  { %v8827_v32 = vpop.f32.mrf.mxu2  ;;  %v8876_v22 = vpop.f32.mrf.mxu3  ;;  %v7483_v54 = vadd.f32 %v7482_v55, %v7224_v17  ;;  %v23310_v17 = vld [vmem:[#allocation28_spill] sm:$0xff] }
 0xa0c   :  { %v21572_v26 = vadd.f32 %v8827_v32, %v21316_v47  ;;  %v21575_v38 = vadd.f32 %v8876_v22, %v21319_v29  ;;  %v12739_v47 = vld [vmem:[%s22640_s5 + $0x198] sm:$0xf]  ;;  %v13751_v29 = vld [vmem:[%s22640_s5 + $0x1b0] sm:$0xf0]  ;;  %v7229_v33 = vadd.f32 %v7228_v3, %v23310_v17 }
 0xa0d   :  { %9016 = vmatpush.bf16.msra.mxu3 %v7766_v2  ;;  %v12740_v50 = vor.u32 %v13751_v29, %v12739_v47  ;;  %v7588_v59 = vmax.f32 %v7483_v54, 0.0 }
 0xa11   :  { %9017 = vmatpush.bf16.msra.mxu3 %v21511_v35 }
 0xa12   :  { %v7484_v2 = vpop.f32.mrf.mxu1 }
 0xa13   :  { %v7485_v27 = vadd.f32 %v7484_v2, %v7226_v28  ;;  %v8829_v43 = vpop.f32.mrf.mxu2  ;;  %v8878_v16 = vpop.f32.mrf.mxu3 }
 0xa14   :  { %v21593_v31 = vadd.f32 %v8829_v43, %v21339_v19  ;;  %v21596_v55 = vadd.f32 %v8878_v16, %v21342_v25  ;;  %v7230_v25 = vpop.f32.mrf.mxu0 }
 0xa15   :  { %v7589_v18 = vmax.f32 %v7485_v27, 0.0  ;;  %9018 = vmatpush.bf16.msra.mxu3 %v21481_v13  ;;  %v23309_v13 = vld [vmem:[#allocation27_spill] sm:$0xff] }
 0xa16   :  { %v6972_v45 = vadd.f32 %v23309_v13, %v6713_v21 }
 0xa17   :  { %v7768_v32 = vpack.c.bf16 %v7589_v18, %v7588_v59 }
 0xa18   :  { %8920 = vmatmul.bf16.gmra.mxu3 %v12960_v52  ;;  %8969 = vmatmul.bf16.gmra.mxu2 %v12740_v50  ;;  %v7231_v28 = vadd.f32 %v7230_v25, %v6972_v45 }
 0xa19   :  { %9019 = vmatpush.bf16.msra.mxu3 %v21451_v49  ;;  %v12767_v49 = vld [vmem:[%s22640_s5 + $0x1d0] sm:$0xf] }
 0xa1a   :  { %v7487_v35 = vpop.f32.mrf.mxu1 }
 0xa1b   :  { %v8832_v22 = vpop.f32.mrf.mxu2  ;;  %v8881_v61 = vpop.f32.mrf.mxu3  ;;  %v7488_v54 = vadd.f32 %v7487_v35, %v7229_v33  ;;  %v13713_v33 = vld [vmem:[%s22640_s5 + $0x84] sm:$0xf] }
 0xa1c   :  { %v21603_v10 = vadd.f32 %v8832_v22, %v21359_v6  ;;  %v21606_v19 = vadd.f32 %v8881_v61, %v21362_v4  ;;  %v13758_v6 = vld [vmem:[%s22640_s5 + $0x1e8] sm:$0xf0]  ;;  %v13699_v4 = vld [vmem:[%s22640_s5 + $0x14] sm:$0xf] }
 0xa1d   :  { %9020 = vmatpush.bf16.msra.mxu3 %v21420_v7  ;;  %v12545_v7 = vld [vmem:[%s22640_s5 + $0x2c] sm:$0xf0]  ;;  %v12768_v3 = vor.u32 %v13758_v6, %v12767_v49  ;;  %v7590_v43 = vmax.f32 %v7488_v54, 0.0 }
 0xa1e   :  { %v12548_v27 = vor.u32 %v13699_v4, %v12545_v7 }
 0xa21   :  { %9021 = vmatpush.bf16.msra.mxu3 %v21389_v63 }
 0xa22   :  { %v7489_v36 = vpop.f32.mrf.mxu1 }
 0xa23   :  { %v7490_v47 = vadd.f32 %v7489_v36, %v7231_v28  ;;  %v8834_v29 = vpop.f32.mrf.mxu2  ;;  %v8883_v2 = vpop.f32.mrf.mxu3 }
 0xa24   :  { %v21625_v52 = vadd.f32 %v8834_v29, %v21383_v5  ;;  %v21628_v50 = vadd.f32 %v8883_v2, %v21386_v23  ;;  %v12795_v5 = vld [vmem:[%s22640_s5 + $0x208] sm:$0xf]  ;;  %v13706_v23 = vld [vmem:[%s22640_s5 + $0x4c] sm:$0xf]  ;;  %v13720_v2 = vld [vmem:[%s22640_s5 + $0xbc] sm:$0xf] }
 0xa25   :  { %v7591_v16 = vmax.f32 %v7490_v47, 0.0  ;;  %9022 = vmatpush.bf16.msra.mxu3 %v21351_v24  ;;  %v13765_v24 = vld [vmem:[%s22640_s5 + $0x220] sm:$0xf0] }
 0xa26   :  { %v12796_v60 = vor.u32 %v13765_v24, %v12795_v5 }
 0xa27   :  { %v7769_v59 = vpack.c.bf16 %v7591_v16, %v7590_v43 }
 0xa28   :  { %8974 = vmatmul.bf16.gmra.mxu2 %v12768_v3  ;;  %9023 = vmatmul.bf16.vlgmr.msra.gmra.mxu3 %v12548_v27 }
 0xa29   :  { %9110 = vmatpush.bf16.msrb.mxu2 %v7769_v59 }
 0xa2b   :  { %v8886_v63 = vpop.f32.mrf.mxu3  ;;  %v8935_v18 = vpop.f32.mrf.mxu2 }
 0xa2c   :  { %v21632_v35 = vadd.f32 %v8886_v63, %v21395_v58  ;;  %v21635_v22 = vadd.f32 %v8935_v18, %v21398_v15  ;;  %v12573_v58 = vld [vmem:[%s22640_s5 + $0x64] sm:$0xf0] }
 0xa2d   :  { %9111 = vmatpush.bf16.msrb.mxu2 %v7768_v32  ;;  %v12576_v21 = vor.u32 %v13706_v23, %v12573_v58  ;;  %v13727_v23 = vld [vmem:[%s22640_s5 + $0xf4] sm:$0xf] }
 0xa33   :  { %v8888_v61 = vpop.f32.mrf.mxu3  ;;  %v8937_v15 = vpop.f32.mrf.mxu2 }
 0xa34   :  { %v21650_v32 = vadd.f32 %v8888_v61, %v21415_v56  ;;  %v21653_v1 = vadd.f32 %v8937_v15, %v21418_v46  ;;  %v12823_v56 = vld [vmem:[%s22640_s5 + $0x240] sm:$0xf]  ;;  %v13772_v46 = vld [vmem:[%s22640_s5 + $0x258] sm:$0xf0] }
 0xa35   :  { %v12824_v6 = vor.u32 %v13772_v46, %v12823_v56 }
 0xa38   :  { %8979 = vmatmul.bf16.gmra.mxu2 %v12796_v60  ;;  %9028 = vmatmul.bf16.gmra.mxu3 %v12576_v21 }
 0xa3b   :  { %v8891_v25 = vpop.f32.mrf.mxu3  ;;  %v8940_v13 = vpop.f32.mrf.mxu2 }
 0xa3c   :  { %v21656_v45 = vadd.f32 %v8891_v25, %v21426_v12  ;;  %v21659_v17 = vadd.f32 %v8940_v13, %v21429_v11  ;;  %v12601_v12 = vld [vmem:[%s22640_s5 + $0x9c] sm:$0xf0] }
 0xa3d   :  { %v12604_v4 = vor.u32 %v13713_v33, %v12601_v12  ;;  %v13734_v33 = vld [vmem:[%s22640_s5 + $0x12c] sm:$0xf] }
 0xa43   :  { %v8893_v49 = vpop.f32.mrf.mxu3  ;;  %v8942_v28 = vpop.f32.mrf.mxu2 }
 0xa44   :  { %v21674_v11 = vadd.f32 %v8893_v49, %v21446_v40  ;;  %v21677_v54 = vadd.f32 %v8942_v28, %v21449_v62  ;;  %v12851_v40 = vld [vmem:[%s22640_s5 + $0x278] sm:$0xf]  ;;  %v13779_v62 = vld [vmem:[%s22640_s5 + $0x290] sm:$0xf0] }
 0xa45   :  { %v12852_v16 = vor.u32 %v13779_v62, %v12851_v40 }
 0xa48   :  { %8984 = vmatmul.bf16.gmra.mxu2 %v12824_v6  ;;  %9033 = vmatmul.bf16.gmra.mxu3 %v12604_v4 }
 0xa4b   :  { %v8896_v7 = vpop.f32.mrf.mxu3  ;;  %v8945_v36 = vpop.f32.mrf.mxu2 }
 0xa4c   :  { %v21680_v47 = vadd.f32 %v8896_v7, %v21457_v53  ;;  %v21683_v29 = vadd.f32 %v8945_v36, %v21460_v57  ;;  %v12629_v53 = vld [vmem:[%s22640_s5 + $0xd4] sm:$0xf0] }
 0xa4d   :  { %v12632_v59 = vor.u32 %v13720_v2, %v12629_v53  ;;  %v13741_v2 = vld [vmem:[%s22640_s5 + $0x164] sm:$0xf] }
 0xa53   :  { %v8898_v3 = vpop.f32.mrf.mxu3  ;;  %v8947_v27 = vpop.f32.mrf.mxu2 }
 0xa54   :  { %v21698_v57 = vadd.f32 %v8898_v3, %v21476_v30  ;;  %v21701_v43 = vadd.f32 %v8947_v27, %v21479_v42  ;;  %v12879_v30 = vld [vmem:[%s22640_s5 + $0x2b0] sm:$0xf]  ;;  %v13786_v42 = vld [vmem:[%s22640_s5 + $0x2c8] sm:$0xf0] }
 0xa55   :  { %v12880_v60 = vor.u32 %v13786_v42, %v12879_v30 }
 0xa58   :  { %8989 = vmatmul.bf16.gmra.mxu2 %v12852_v16  ;;  %9038 = vmatmul.bf16.gmra.mxu3 %v12632_v59 }
 0xa5b   :  { %v8901_v63 = vpop.f32.mrf.mxu3  ;;  %v8950_v18 = vpop.f32.mrf.mxu2 }
 0xa5c   :  { %v21704_v5 = vadd.f32 %v8901_v63, %v21486_v44  ;;  %v21707_v24 = vadd.f32 %v8950_v18, %v21489_v39  ;;  %v12657_v44 = vld [vmem:[%s22640_s5 + $0x10c] sm:$0xf0] }
 0xa5d   :  { %v12660_v21 = vor.u32 %v13727_v23, %v12657_v44  ;;  %v13748_v23 = vld [vmem:[%s22640_s5 + $0x19c] sm:$0xf] }
 0xa63   :  { %v8903_v58 = vpop.f32.mrf.mxu3  ;;  %v8952_v61 = vpop.f32.mrf.mxu2 }
 0xa64   :  { %v21722_v39 = vadd.f32 %v8903_v58, %v21506_v14  ;;  %v21725_v15 = vadd.f32 %v8952_v61, %v21509_v9  ;;  %v12907_v14 = vld [vmem:[%s22640_s5 + $0x2e8] sm:$0xf]  ;;  %v13793_v9 = vld [vmem:[%s22640_s5 + $0x300] sm:$0xf0] }
 0xa65   :  { %v12908_v6 = vor.u32 %v13793_v9, %v12907_v14 }
 0xa68   :  { %8994 = vmatmul.bf16.gmra.mxu2 %v12880_v60  ;;  %9043 = vmatmul.bf16.gmra.mxu3 %v12660_v21 }
 0xa6b   :  { %v8906_v25 = vpop.f32.mrf.mxu3  ;;  %v8955_v13 = vpop.f32.mrf.mxu2 }
 0xa6c   :  { %v21728_v56 = vadd.f32 %v8906_v25, %v21516_v0  ;;  %v21731_v46 = vadd.f32 %v8955_v13, %v21519_v34  ;;  %v12685_v0 = vld [vmem:[%s22640_s5 + $0x144] sm:$0xf0] }
 0xa6d   :  { %v12688_v4 = vor.u32 %v13734_v33, %v12685_v0  ;;  %v12551_v33 = vld [vmem:[%s22640_s5 + $0x18] sm:$0xf] }
 0xa73   :  { %v8908_v12 = vpop.f32.mrf.mxu3  ;;  %v8957_v49 = vpop.f32.mrf.mxu2 }
 0xa74   :  { %v21746_v34 = vadd.f32 %v8908_v12, %v21536_v37  ;;  %v21749_v28 = vadd.f32 %v8957_v49, %v21539_v51  ;;  %v12935_v37 = vld [vmem:[%s22640_s5 + $0x320] sm:$0xf]  ;;  %v13800_v51 = vld [vmem:[%s22640_s5 + $0x338] sm:$0xf0] }
 0xa75   :  { %v12936_v16 = vor.u32 %v13800_v51, %v12935_v37 }
 0xa78   :  { %8999 = vmatmul.bf16.gmra.mxu2 %v12908_v6  ;;  %9048 = vmatmul.bf16.gmra.mxu3 %v12688_v4 }
 0xa7b   :  { %v8911_v7 = vpop.f32.mrf.mxu3  ;;  %v8960_v36 = vpop.f32.mrf.mxu2 }
 0xa7c   :  { %v21752_v40 = vadd.f32 %v8911_v7, %v21544_v8  ;;  %v21755_v62 = vadd.f32 %v8960_v36, %v21547_v20  ;;  %v12713_v8 = vld [vmem:[%s22640_s5 + $0x17c] sm:$0xf0] }
 0xa7d   :  { %v12716_v59 = vor.u32 %v13741_v2, %v12713_v8  ;;  %v12579_v2 = vld [vmem:[%s22640_s5 + $0x50] sm:$0xf] }
 0xa83   :  { %v8913_v53 = vpop.f32.mrf.mxu3  ;;  %v8962_v3 = vpop.f32.mrf.mxu2 }
 0xa84   :  { %v21770_v20 = vadd.f32 %v8913_v53, %v21564_v48  ;;  %v21773_v27 = vadd.f32 %v8962_v3, %v21567_v41  ;;  %v12963_v48 = vld [vmem:[%s22640_s5 + $0x358] sm:$0xf]  ;;  %v13807_v41 = vld [vmem:[%s22640_s5 + $0x370] sm:$0xf0] }
 0xa85   :  { %v12964_v60 = vor.u32 %v13807_v41, %v12963_v48 }
 0xa88   :  { %9004 = vmatmul.bf16.gmra.mxu2 %v12936_v16  ;;  %9053 = vmatmul.bf16.gmra.mxu3 %v12716_v59 }
 0xa8b   :  { %v8916_v63 = vpop.f32.mrf.mxu3  ;;  %v8965_v18 = vpop.f32.mrf.mxu2 }
 0xa8c   :  { %v21776_v30 = vadd.f32 %v8916_v63, %v21572_v26  ;;  %v21779_v42 = vadd.f32 %v8965_v18, %v21575_v38  ;;  %v12741_v26 = vld [vmem:[%s22640_s5 + $0x1b4] sm:$0xf0] }
 0xa8d   :  { %v12744_v21 = vor.u32 %v13748_v23, %v12741_v26  ;;  %v12607_v23 = vld [vmem:[%s22640_s5 + $0x88] sm:$0xf] }
 0xa93   :  { %v8918_v44 = vpop.f32.mrf.mxu3  ;;  %v8967_v58 = vpop.f32.mrf.mxu2 }
 0xa94   :  { %v21794_v38 = vadd.f32 %v8918_v44, %v21593_v31  ;;  %v21797_v61 = vadd.f32 %v8967_v58, %v21596_v55  ;;  %v13755_v31 = vld [vmem:[%s22640_s5 + $0x1d4] sm:$0xf]  ;;  %v12769_v55 = vld [vmem:[%s22640_s5 + $0x1ec] sm:$0xf0] }
 0xa95   :  { %v12772_v6 = vor.u32 %v13755_v31, %v12769_v55 }
 0xa98   :  { %9009 = vmatmul.bf16.gmra.mxu2 %v12964_v60  ;;  %9058 = vmatmul.bf16.gmra.mxu3 %v12744_v21 }
 0xa9b   :  { %v8921_v25 = vpop.f32.mrf.mxu3  ;;  %v8970_v13 = vpop.f32.mrf.mxu2 }
 0xa9c   :  { %v21800_v14 = vadd.f32 %v8921_v25, %v21603_v10  ;;  %v21803_v9 = vadd.f32 %v8970_v13, %v21606_v19  ;;  %v13703_v10 = vld [vmem:[%s22640_s5 + $0x30] sm:$0xf0] }
 0xa9d   :  { %v12552_v4 = vor.u32 %v13703_v10, %v12551_v33  ;;  %v12635_v33 = vld [vmem:[%s22640_s5 + $0xc0] sm:$0xf] }
 0xaa3   :  { %v8923_v0 = vpop.f32.mrf.mxu3  ;;  %v8972_v12 = vpop.f32.mrf.mxu2 }
 0xaa4   :  { %v21818_v19 = vadd.f32 %v8923_v0, %v21625_v52  ;;  %v21821_v49 = vadd.f32 %v8972_v12, %v21628_v50  ;;  %v13762_v52 = vld [vmem:[%s22640_s5 + $0x20c] sm:$0xf]  ;;  %v12797_v50 = vld [vmem:[%s22640_s5 + $0x224] sm:$0xf0] }
 0xaa5   :  { %v12800_v16 = vor.u32 %v13762_v52, %v12797_v50 }
 0xaa8   :  { %9063 = vmatmul.bf16.gmra.mxu3 %v12772_v6  ;;  %12973 = vmatmul.msk.bf16.vlgmr.msrb.gmra.mxu2 %vm5528_vm0, %v12552_v4 }
 0xaab   :  { %v8975_v7 = vpop.f32.mrf.mxu2  ;;  %v9024_v36 = vpop.f32.mrf.mxu3 }
 0xaac   :  { %v21825_v37 = vadd.f32 %v8975_v7, %v21632_v35  ;;  %v21828_v51 = vadd.f32 %v9024_v36, %v21635_v22  ;;  %v13710_v35 = vld [vmem:[%s22640_s5 + $0x68] sm:$0xf0] }
 0xaad   :  { %v12580_v59 = vor.u32 %v13710_v35, %v12579_v2  ;;  %v12663_v2 = vld [vmem:[%s22640_s5 + $0xf8] sm:$0xf] }
 0xab3   :  { %v8977_v8 = vpop.f32.mrf.mxu2  ;;  %v9026_v53 = vpop.f32.mrf.mxu3 }
 0xab4   :  { %v21843_v22 = vadd.f32 %v8977_v8, %v21650_v32  ;;  %v21846_v3 = vadd.f32 %v9026_v53, %v21653_v1  ;;  %v13769_v32 = vld [vmem:[%s22640_s5 + $0x244] sm:$0xf]  ;;  %v12825_v1 = vld [vmem:[%s22640_s5 + $0x25c] sm:$0xf0] }
 0xab5   :  { %v12828_v60 = vor.u32 %v13769_v32, %v12825_v1 }
 0xab8   :  { %9068 = vmatmul.bf16.gmra.mxu3 %v12800_v16  ;;  %12974 = vmatmul.msk.bf16.gmra.mxu2 %vm5528_vm0, %v12580_v59 }
 0xabb   :  { %v8980_v63 = vpop.f32.mrf.mxu2  ;;  %v9029_v18 = vpop.f32.mrf.mxu3 }
 0xabc   :  { %v21850_v48 = vadd.f32 %v8980_v63, %v21656_v45  ;;  %v21853_v41 = vadd.f32 %v9029_v18, %v21659_v17  ;;  %v13717_v45 = vld [vmem:[%s22640_s5 + $0xa0] sm:$0xf0] }
 0xabd   :  { %v12608_v21 = vor.u32 %v13717_v45, %v12607_v23  ;;  %v12691_v23 = vld [vmem:[%s22640_s5 + $0x130] sm:$0xf] }
 0xac3   :  { %v8982_v26 = vpop.f32.mrf.mxu2  ;;  %v9031_v44 = vpop.f32.mrf.mxu3 }
 0xac4   :  { %v21868_v17 = vadd.f32 %v8982_v26, %v21674_v11  ;;  %v21871_v58 = vadd.f32 %v9031_v44, %v21677_v54  ;;  %v13776_v11 = vld [vmem:[%s22640_s5 + $0x27c] sm:$0xf]  ;;  %v12853_v54 = vld [vmem:[%s22640_s5 + $0x294] sm:$0xf0] }
 0xac5   :  { %v12856_v6 = vor.u32 %v13776_v11, %v12853_v54  ;;  %v13797_v11 = vld [vmem:[%s22640_s5 + $0x324] sm:$0xf]  ;;  %v12719_v54 = vld [vmem:[%s22640_s5 + $0x168] sm:$0xf] }
 0xac8   :  { %9073 = vmatmul.bf16.gmra.mxu3 %v12828_v60  ;;  %12975 = vmatmul.msk.bf16.gmra.mxu2 %vm5528_vm0, %v12608_v21 }
 0xacb   :  { %v8985_v25 = vpop.f32.mrf.mxu2  ;;  %v9034_v13 = vpop.f32.mrf.mxu3 }
 0xacc   :  { %v21875_v31 = vadd.f32 %v8985_v25, %v21680_v47  ;;  %v21878_v55 = vadd.f32 %v9034_v13, %v21683_v29  ;;  %v13724_v47 = vld [vmem:[%s22640_s5 + $0xd8] sm:$0xf0] }
 0xacd   :  { %v12636_v4 = vor.u32 %v13724_v47, %v12635_v33  ;;  %v13745_v33 = vld [vmem:[%s22640_s5 + $0x180] sm:$0xf0] }
 0xad3   :  { %v8987_v10 = vpop.f32.mrf.mxu2  ;;  %v9036_v0 = vpop.f32.mrf.mxu3 }
 0xad4   :  { %v21893_v29 = vadd.f32 %v8987_v10, %v21698_v57  ;;  %v21896_v12 = vadd.f32 %v9036_v0, %v21701_v43  ;;  %v13783_v57 = vld [vmem:[%s22640_s5 + $0x2b4] sm:$0xf]  ;;  %v12881_v43 = vld [vmem:[%s22640_s5 + $0x2cc] sm:$0xf0] }
 0xad5   :  { %v12884_v16 = vor.u32 %v13783_v57, %v12881_v43  ;;  %v13804_v57 = vld [vmem:[%s22640_s5 + $0x35c] sm:$0xf]  ;;  %v12747_v43 = vld [vmem:[%s22640_s5 + $0x1a0] sm:$0xf] }
 0xad8   :  { %9078 = vmatmul.bf16.gmra.mxu3 %v12856_v6  ;;  %12976 = vmatmul.msk.bf16.gmra.mxu2 %vm5528_vm0, %v12636_v4  ;;  %v12720_v6 = vor.u32 %v13745_v33, %v12719_v54 }
 0xadb   :  { %v8990_v7 = vpop.f32.mrf.mxu2  ;;  %v9039_v36 = vpop.f32.mrf.mxu3 }
 0xadc   :  { %v21900_v52 = vadd.f32 %v8990_v7, %v21704_v5  ;;  %v21903_v50 = vadd.f32 %v9039_v36, %v21707_v24  ;;  %v13731_v5 = vld [vmem:[%s22640_s5 + $0x110] sm:$0xf0] }
 0xadd   :  { %v12664_v59 = vor.u32 %v13731_v5, %v12663_v2  ;;  %v13752_v2 = vld [vmem:[%s22640_s5 + $0x1b8] sm:$0xf0] }
 0xae3   :  { %v8992_v35 = vpop.f32.mrf.mxu2  ;;  %v9041_v8 = vpop.f32.mrf.mxu3 }
 0xae4   :  { %v21918_v24 = vadd.f32 %v8992_v35, %v21722_v39  ;;  %v21921_v53 = vadd.f32 %v9041_v8, %v21725_v15  ;;  %v13790_v39 = vld [vmem:[%s22640_s5 + $0x2ec] sm:$0xf]  ;;  %v12909_v15 = vld [vmem:[%s22640_s5 + $0x304] sm:$0xf0] }
 0xae5   :  { %v12912_v44 = vor.u32 %v13790_v39, %v12909_v15  ;;  %v12775_v39 = vld [vmem:[%s22640_s5 + $0x1d8] sm:$0xf] }
 0xae8   :  { %9083 = vmatmul.bf16.gmra.mxu3 %v12884_v16  ;;  %12977 = vmatmul.msk.bf16.gmra.mxu2 %vm5528_vm0, %v12664_v59  ;;  %v12748_v16 = vor.u32 %v13752_v2, %v12747_v43  ;;  %v12831_v43 = vld [vmem:[%s22640_s5 + $0x248] sm:$0xf] }
 0xaeb   :  { %v8995_v63 = vpop.f32.mrf.mxu2  ;;  %v9044_v18 = vpop.f32.mrf.mxu3 }
 0xaec   :  { %v21925_v32 = vadd.f32 %v8995_v63, %v21728_v56  ;;  %v21928_v1 = vadd.f32 %v9044_v18, %v21731_v46  ;;  %v13738_v56 = vld [vmem:[%s22640_s5 + $0x148] sm:$0xf0] }
 0xaed   :  { %v12692_v60 = vor.u32 %v13738_v56, %v12691_v23 }
 0xaf3   :  { %v8997_v45 = vpop.f32.mrf.mxu2  ;;  %v21942_v26 = vpop.f32.mrf.mxu3 }
 0xaf4   :  { %v21945_v46 = vadd.f32 %v8997_v45, %v21746_v34  ;;  %v12937_v34 = vld [vmem:[%s22640_s5 + $0x33c] sm:$0xf0] }
 0xaf5   :  { %v12940_v0 = vor.u32 %v13797_v11, %v12937_v34  ;;  %v12803_v11 = vld [vmem:[%s22640_s5 + $0x210] sm:$0xf]  ;;  %v13766_v34 = vld [vmem:[%s22640_s5 + $0x228] sm:$0xf0] }
 0xaf8   :  { %9088 = vmatmul.bf16.gmra.mxu3 %v12912_v44  ;;  %12978 = vmatmul.msk.bf16.gmra.mxu2 %vm5528_vm0, %v12692_v60 }
 0xafb   :  { %v9000_v21 = vpop.f32.mrf.mxu2  ;;  %v21948_v25 = vpop.f32.mrf.mxu3 }
 0xafc   :  { %v21951_v13 = vadd.f32 %v9000_v21, %v21752_v40 }
 0xb03   :  { %v9002_v47 = vpop.f32.mrf.mxu2  ;;  %v21965_v10 = vpop.f32.mrf.mxu3 }
 0xb04   :  { %v21968_v40 = vadd.f32 %v9002_v47, %v21770_v20  ;;  %v12965_v20 = vld [vmem:[%s22640_s5 + $0x374] sm:$0xf0]  ;;  %v12804_v47 = vor.u32 %v13766_v34, %v12803_v11 }
 0xb05   :  { %v12968_v8 = vor.u32 %v13804_v57, %v12965_v20 }
 0xb08   :  { %9093 = vmatmul.bf16.gmra.mxu3 %v12940_v0  ;;  %12979 = vmatmul.msk.bf16.gmra.mxu2 %vm5528_vm0, %v12720_v6 }
 0xb0b   :  { %v9005_v4 = vpop.f32.mrf.mxu2  ;;  %v21971_v7 = vpop.f32.mrf.mxu3 }
 0xb0c   :  { %v21974_v36 = vadd.f32 %v9005_v4, %v21776_v30 }
 0xb13   :  { %v9007_v5 = vpop.f32.mrf.mxu2  ;;  %v21988_v35 = vpop.f32.mrf.mxu3 }
 0xb14   :  { %v21991_v30 = vadd.f32 %v9007_v5, %v21794_v38  ;;  %v13759_v38 = vld [vmem:[%s22640_s5 + $0x1f0] sm:$0xf0] }
 0xb15   :  { %v12776_v45 = vor.u32 %v13759_v38, %v12775_v39 }
 0xb18   :  { %9098 = vmatmul.bf16.gmra.mxu3 %v12968_v8  ;;  %12980 = vmatmul.msk.bf16.gmra.mxu2 %vm5528_vm0, %v12748_v16 }
 0xb1b   :  { %v9010_v59 = vpop.f32.mrf.mxu2  ;;  %v21994_v63 = vpop.f32.mrf.mxu3 }
 0xb1c   :  { %v21997_v18 = vadd.f32 %v9010_v59, %v21800_v14 }
 0xb23   :  { %v9012_v15 = vpop.f32.mrf.mxu2  ;;  %v22005_v23 = vpop.f32.mrf.mxu3 }
 0xb24   :  { %v22008_v56 = vadd.f32 %v9012_v15, %v21818_v19 }
 0xb28   :  { %12981 = vmatmul.msk.bf16.gmra.mxu2 %vm5528_vm0, %v12776_v45 }
 0xb2b   :  { %v9064_v44 = vpop.f32.mrf.mxu3  ;;  %v9113_v14 = vpop.f32.mrf.mxu2 }
 0xb2c   :  { %v22012_v60 = vadd.f32 %v9064_v44, %v21825_v37  ;;  %v9114_v21 = vadd.f32 %v9113_v14, %v21828_v51  ;;  %v12859_v44 = vld [vmem:[%s22640_s5 + $0x280] sm:$0xf] }
 0xb2e   :  { %v9193_v0 = vmax.f32 %v9114_v21, 0.0 }
 0xb33   :  { %v22021_v19 = vpop.f32.mrf.mxu3  ;;  %v9115_v54 = vpop.f32.mrf.mxu2 }
 0xb34   :  { %v9116_v33 = vadd.f32 %v9115_v54, %v21846_v3  ;;  %v13773_v3 = vld [vmem:[%s22640_s5 + $0x260] sm:$0xf0] }
 0xb35   :  { %v12832_v16 = vor.u32 %v13773_v3, %v12831_v43 }
 0xb36   :  { %v9194_v6 = vmax.f32 %v9116_v33, 0.0 }
 0xb38   :  { %12982 = vmatmul.msk.bf16.gmra.mxu2 %vm5528_vm0, %v12804_v47  ;;  %v22025_v37 = vpack.c.bf16 %v9194_v6, %v9193_v0 }
 0xb3b   :  { %v9069_v51 = vpop.f32.mrf.mxu3  ;;  %v9118_v4 = vpop.f32.mrf.mxu2 }
 0xb3c   :  { %v22028_v57 = vadd.f32 %v9069_v51, %v21850_v48  ;;  %v9119_v20 = vadd.f32 %v9118_v4, %v21853_v41  ;;  %v12887_v51 = vld [vmem:[%s22640_s5 + $0x2b8] sm:$0xf] }
 0xb3e   :  { %v9195_v59 = vmax.f32 %v9119_v20, 0.0 }
 0xb43   :  { %v22037_v2 = vpop.f32.mrf.mxu3  ;;  %v9120_v5 = vpop.f32.mrf.mxu2 }
 0xb44   :  { %v9121_v8 = vadd.f32 %v9120_v5, %v21871_v58  ;;  %v13780_v58 = vld [vmem:[%s22640_s5 + $0x298] sm:$0xf0] }
 0xb45   :  { %v12860_v34 = vor.u32 %v13780_v58, %v12859_v44 }
 0xb46   :  { %v9196_v39 = vmax.f32 %v9121_v8, 0.0 }
 0xb48   :  { %12983 = vmatmul.msk.bf16.gmra.mxu2 %vm5528_vm0, %v12832_v16  ;;  %v22041_v48 = vpack.c.bf16 %v9196_v39, %v9195_v59 }
 0xb4b   :  { %v9074_v41 = vpop.f32.mrf.mxu3  ;;  %v9123_v38 = vpop.f32.mrf.mxu2 }
 0xb4c   :  { %v22044_v15 = vadd.f32 %v9074_v41, %v21875_v31  ;;  %v9124_v45 = vadd.f32 %v9123_v38, %v21878_v55  ;;  %v12915_v41 = vld [vmem:[%s22640_s5 + $0x2f0] sm:$0xf]  ;;  %v9047_v38 = vadd.f32 %v21942_v26, %v21749_v28  ;;  %v13801_v28 = vld [vmem:[%s22640_s5 + $0x340] sm:$0xf0]  ;;  %v9052_v26 = vadd.f32 %v21965_v10, %v21773_v27  ;;  %v13808_v27 = vld [vmem:[%s22640_s5 + $0x378] sm:$0xf0] }
 0xb4d   :  { %v9057_v10 = vadd.f32 %v21988_v35, %v21797_v61 }
 0xb4e   :  { %v9197_v54 = vmax.f32 %v9124_v45, 0.0 }
 0xb53   :  { %v22053_v14 = vpop.f32.mrf.mxu3  ;;  %v9125_v21 = vpop.f32.mrf.mxu2 }
 0xb54   :  { %v9126_v11 = vadd.f32 %v9125_v21, %v21896_v12  ;;  %v13787_v12 = vld [vmem:[%s22640_s5 + $0x2d0] sm:$0xf0] }
 0xb55   :  { %v12888_v3 = vor.u32 %v13787_v12, %v12887_v51 }
 0xb56   :  { %v9198_v33 = vmax.f32 %v9126_v11, 0.0 }
 0xb58   :  { %12984 = vmatmul.msk.bf16.gmra.mxu2 %vm5528_vm0, %v12860_v34  ;;  %v22057_v31 = vpack.c.bf16 %v9198_v33, %v9197_v54  ;;  %v9050_v34 = vadd.f32 %v21948_v25, %v21755_v62  ;;  %v12943_v54 = vld [vmem:[%s22640_s5 + $0x328] sm:$0xf]  ;;  %v9055_v25 = vadd.f32 %v21971_v7, %v21779_v42  ;;  %v9060_v7 = vadd.f32 %v21994_v63, %v21803_v9 }
 0xb5b   :  { %v9079_v55 = vpop.f32.mrf.mxu3  ;;  %v9128_v47 = vpop.f32.mrf.mxu2 }
 0xb5c   :  { %v22060_v0 = vadd.f32 %v9079_v55, %v21900_v52  ;;  %v9129_v6 = vadd.f32 %v9128_v47, %v21903_v50 }
 0xb5e   :  { %v9199_v5 = vmax.f32 %v9129_v6, 0.0  ;;  %v12944_v6 = vor.u32 %v13801_v28, %v12943_v54 }
 0xb63   :  { %v22069_v4 = vpop.f32.mrf.mxu3  ;;  %v9130_v20 = vpop.f32.mrf.mxu2 }
 0xb64   :  { %v9131_v43 = vadd.f32 %v9130_v20, %v21921_v53  ;;  %v13794_v53 = vld [vmem:[%s22640_s5 + $0x308] sm:$0xf0] }
 0xb65   :  { %v12916_v58 = vor.u32 %v13794_v53, %v12915_v41  ;;  %v9062_v53 = vadd.f32 %v22005_v23, %v21821_v49 }
 0xb66   :  { %v9200_v8 = vmax.f32 %v9131_v43, 0.0  ;;  %v12971_v43 = vld [vmem:[%s22640_s5 + $0x360] sm:$0xf] }
 0xb68   :  { %12985 = vmatmul.msk.bf16.gmra.mxu2 %vm5528_vm0, %v12888_v3  ;;  %v9260_v52 = vpack.c.bf16 %v9200_v8, %v9199_v5 }
 0xb6b   :  { %v9084_v50 = vpop.f32.mrf.mxu3  ;;  %v9133_v16 = vpop.f32.mrf.mxu2 }
 0xb6c   :  { %v22074_v59 = vadd.f32 %v9084_v50, %v21925_v32  ;;  %v9134_v39 = vadd.f32 %v9133_v16, %v21928_v1  ;;  %v12972_v50 = vor.u32 %v13808_v27, %v12971_v43  ;;  %v13814_v43 = vld [vmem:[%s22641_s7 + $0x24] sm:$0xf0] }
 0xb6e   :  { %v9201_v21 = vmax.f32 %v9134_v39, 0.0 }
 0xb73   :  { %v9135_v45 = vpop.f32.mrf.mxu2  ;;  %v9086_v27 = vpop.f32.mrf.mxu3 }
 0xb74   :  { %v9136_v44 = vadd.f32 %v9135_v45, %v9047_v38 }
 0xb76   :  { %v9202_v11 = vmax.f32 %v9136_v44, 0.0 }
 0xb78   :  { %v9261_v32 = vpack.c.bf16 %v9202_v11, %v9201_v21  ;;  %12986 = vmatmul.msk.bf16.gmra.mxu2 %vm5528_vm0, %v12916_v58 }
 0xb7b   :  { %v9138_v1 = vpop.f32.mrf.mxu2 }
 0xb7c   :  { %v9139_v33 = vadd.f32 %v9138_v1, %v9050_v34  ;;  %v9067_v1 = vadd.f32 %v22021_v19, %v21843_v22  ;;  %v12991_v22 = vld [vmem:[%s22641_s7] sm:$0xf]  ;;  %v13810_v19 = vld [vmem:[%s22641_s7 + $0x4] sm:$0xf0] }
 0xb7e   :  { %v9203_v51 = vmax.f32 %v9139_v33, 0.0 }
 0xb83   :  { %v9140_v55 = vpop.f32.mrf.mxu2 }
 0xb84   :  { %v9141_v47 = vadd.f32 %v9140_v55, %v9052_v26  ;;  %v12992_v26 = vor.u32 %v13810_v19, %v12991_v22  ;;  %v12999_v55 = vld [vmem:[%s22641_s7 + $0x10] sm:$0xf] }
 0xb86   :  { %v9204_v12 = vmax.f32 %v9141_v47, 0.0  ;;  %v13812_v47 = vld [vmem:[%s22641_s7 + $0x14] sm:$0xf0] }
 0xb88   :  { %v9262_v20 = vpack.c.bf16 %v9204_v12, %v9203_v51  ;;  %12987 = vmatmul.msk.bf16.gmra.mxu2 %vm5528_vm0, %v12944_v6 }
 0xb8b   :  { %v9143_v62 = vpop.f32.mrf.mxu2 }
 0xb8c   :  { %v9144_v3 = vadd.f32 %v9143_v62, %v9055_v25 }
 0xb8e   :  { %v9205_v16 = vmax.f32 %v9144_v3, 0.0 }
 0xb93   :  { %v9145_v5 = vpop.f32.mrf.mxu2 }
 0xb94   :  { %v9146_v8 = vadd.f32 %v9145_v5, %v9057_v10 }
 0xb96   :  { %v9206_v39 = vmax.f32 %v9146_v8, 0.0 }
 0xb98   :  { %v9263_v41 = vpack.c.bf16 %v9206_v39, %v9205_v16  ;;  %12988 = vmatmul.msk.bf16.gmra.mxu2 %vm5528_vm0, %v12972_v50  ;;  %v9087_v39 = vadd.f32 %v9086_v27, %v21945_v46 }
 0xb9b   :  { %v9148_v42 = vpop.f32.mrf.mxu2 }
 0xb9c   :  { %v9149_v38 = vadd.f32 %v9148_v42, %v9060_v7  ;;  %v13816_v42 = vld [vmem:[%s22641_s7 + $0x34] sm:$0xf0] }
 0xb9e   :  { %v9207_v61 = vmax.f32 %v9149_v38, 0.0 }
 0xba3   :  { %v9150_v45 = vpop.f32.mrf.mxu2 }
 0xba4   :  { %v9151_v44 = vadd.f32 %v9150_v45, %v9062_v53 }
 0xba6   :  { %v9208_v35 = vmax.f32 %v9151_v44, 0.0 }
 0xba8   :  { %v9264_v58 = vpack.c.bf16 %v9208_v35, %v9207_v61 }
 0xbaa   :  { %9625 = vmatpush.bf16.msrb.mxu3 %v9264_v58 }
 0xbab   :  { %v9153_v21 = vpop.f32.mrf.mxu2 }
 0xbac   :  { %v9154_v11 = vadd.f32 %v9153_v21, %v22012_v60  ;;  %v9072_v60 = vadd.f32 %v22037_v2, %v21868_v17 }
 0xbae   :  { %9626 = vmatpush.bf16.msrb.mxu3 %v9263_v41  ;;  %v9209_v63 = vmax.f32 %v9154_v11, 0.0  ;;  %v13015_v41 = vld [vmem:[%s22641_s7 + $0x30] sm:$0xf] }
 0xbaf   :  { %v13016_v38 = vor.u32 %v13816_v42, %v13015_v41 }
 0xbb2   :  { %9627 = vmatpush.bf16.msrb.mxu3 %v9262_v20 }
 0xbb3   :  { %v9155_v34 = vpop.f32.mrf.mxu2 }
 0xbb4   :  { %v9156_v9 = vadd.f32 %v9155_v34, %v9067_v1  ;;  %v13023_v1 = vld [vmem:[%s22641_s7 + $0x40] sm:$0xf]  ;;  %v13818_v34 = vld [vmem:[%s22641_s7 + $0x44] sm:$0xf0] }
 0xbb6   :  { %v9210_v54 = vmax.f32 %v9156_v9, 0.0  ;;  %9628 = vmatpush.bf16.msrb.mxu3 %v9261_v32 }
 0xbb8   :  { %v22115_v49 = vpack.c.bf16 %v9210_v54, %v9209_v63  ;;  %v13024_v54 = vor.u32 %v13818_v34, %v13023_v1  ;;  %v13017_v1 = vld [vmem:[%s22641_s7 + $0x38] sm:$0xf0]  ;;  %v9338_v34 = vpop.permute.xlu1 %9337 }
 0xbba   :  { %9629 = vmatpush.bf16.msrb.mxu3 %v9260_v52 }
 0xbbb   :  { %v9158_v23 = vpop.f32.mrf.mxu2 }
 0xbbc   :  { %v9159_v28 = vadd.f32 %v9158_v23, %v22028_v57 }
 0xbbe   :  { %9630 = vmatpush.bf16.msrb.mxu3 %v22057_v31  ;;  %v9211_v33 = vmax.f32 %v9159_v28, 0.0 }
 0xbc2   :  { %9631 = vmatpush.bf16.msrb.mxu3 %v22041_v48  ;;  %v9077_v48 = vadd.f32 %v22053_v14, %v21893_v29  ;;  %v9082_v29 = vadd.f32 %v22069_v4, %v21918_v24  ;;  %v13007_v14 = vld [vmem:[%s22641_s7 + $0x20] sm:$0xf]  ;;  %v9089_v4 = vpop.f32.mrf.mxu3 }
 0xbc3   :  { %v9160_v32 = vpop.f32.mrf.mxu2  ;;  %v13008_v5 = vor.u32 %v13814_v43, %v13007_v14  ;;  %v9090_v58 = vadd.f32 %v9089_v4, %v21951_v13  ;;  %v13811_v4 = vld [vmem:[%s22641_s7 + $0x14] sm:$0xf] }
 0xbc4   :  { %v9161_v52 = vadd.f32 %v9160_v32, %v9072_v60 }
 0xbc6   :  { %v9212_v57 = vmax.f32 %v9161_v52, 0.0  ;;  %9632 = vmatpush.bf16.msrb.mxu3 %v22025_v37  ;;  %v13000_v37 = vor.u32 %v13812_v47, %v12999_v55  ;;  %v13031_v52 = vld [vmem:[%s22641_s7 + $0x50] sm:$0xf] }
 0xbc8   :  { %v22129_v31 = vpack.c.bf16 %v9212_v57, %v9211_v33 }
 0xbc9   :  { %9633 = vmatmul.bf16.vlgmr.msrb.gmra.mxu3 %v12992_v26  ;;  %v13820_v26 = vld [vmem:[%s22641_s7 + $0x54] sm:$0xf0] }
 0xbca   :  { %v9091_v61 = vpop.f32.mrf.mxu3 }
 0xbcb   :  { %v9163_v17 = vpop.f32.mrf.mxu2  ;;  %v9092_v21 = vadd.f32 %v9091_v61, %v21968_v40 }
 0xbcc   :  { %v9164_v2 = vadd.f32 %v9163_v17, %v22044_v15 }
 0xbce   :  { %v9213_v12 = vmax.f32 %v9164_v2, 0.0  ;;  %v13032_v2 = vor.u32 %v13820_v26, %v13031_v52 }
 0xbd2   :  { %v9094_v46 = vpop.f32.mrf.mxu3 }
 0xbd3   :  { %v9165_v6 = vpop.f32.mrf.mxu2  ;;  %v9095_v40 = vadd.f32 %v9094_v46, %v21974_v36  ;;  %v13079_v46 = vld [vmem:[%s22641_s7 + $0xb0] sm:$0xf] }
 0xbd4   :  { %v9166_v51 = vadd.f32 %v9165_v6, %v9077_v48 }
 0xbd6   :  { %v9214_v20 = vmax.f32 %v9166_v51, 0.0 }
 0xbd8   :  { %v22140_v62 = vpack.c.bf16 %v9214_v20, %v9213_v12  ;;  %v13039_v12 = vld [vmem:[%s22641_s7 + $0x60] sm:$0xf]  ;;  %v13822_v20 = vld [vmem:[%s22641_s7 + $0x64] sm:$0xf0] }
 0xbd9   :  { %9638 = vmatmul.bf16.gmra.mxu3 %v13000_v37 }
 0xbda   :  { %v9096_v13 = vpop.f32.mrf.mxu3 }
 0xbdb   :  { %v9168_v15 = vpop.f32.mrf.mxu2  ;;  %v9097_v19 = vadd.f32 %v9096_v13, %v21991_v30  ;;  %v22257_v13 = vpop.permute.xlu1 %9382 }
 0xbdc   :  { %v9169_v25 = vadd.f32 %v9168_v15, %v22060_v0 }
 0xbde   :  { %v9215_v8 = vmax.f32 %v9169_v25, 0.0 }
 0xbe2   :  { %v9099_v17 = vpop.f32.mrf.mxu3 }
 0xbe3   :  { %v9170_v10 = vpop.f32.mrf.mxu2  ;;  %v9100_v30 = vadd.f32 %v9099_v17, %v21997_v18  ;;  %v13047_v18 = vld [vmem:[%s22641_s7 + $0x70] sm:$0xf] }
 0xbe4   :  { %v9171_v3 = vadd.f32 %v9170_v10, %v9082_v29  ;;  %v13040_v29 = vor.u32 %v13822_v20, %v13039_v12 }
 0xbe6   :  { %v9216_v50 = vmax.f32 %v9171_v3, 0.0  ;;  %v13055_v3 = vld [vmem:[%s22641_s7 + $0x80] sm:$0xf] }
 0xbe8   :  { %v22151_v16 = vpack.c.bf16 %v9216_v50, %v9215_v8  ;;  %v13809_v8 = vld [vmem:[%s22641_s7 + $0x4] sm:$0xf]  ;;  %v12993_v50 = vld [vmem:[%s22641_s7 + $0x8] sm:$0xf0] }
 0xbe9   :  { %9643 = vmatmul.bf16.gmra.mxu3 %v13008_v5  ;;  %v13826_v5 = vld [vmem:[%s22641_s7 + $0x84] sm:$0xf0] }
 0xbea   :  { %v9101_v6 = vpop.f32.mrf.mxu3 }
 0xbeb   :  { %v9173_v0 = vpop.f32.mrf.mxu2  ;;  %v9102_v51 = vadd.f32 %v9101_v6, %v22008_v56  ;;  %v13824_v56 = vld [vmem:[%s22641_s7 + $0x74] sm:$0xf0]  ;;  %v13819_v6 = vld [vmem:[%s22641_s7 + $0x54] sm:$0xf] }
 0xbec   :  { %v9174_v24 = vadd.f32 %v9173_v0, %v22074_v59  ;;  %v13048_v10 = vor.u32 %v13824_v56, %v13047_v18 }
 0xbee   :  { %v9217_v45 = vmax.f32 %v9174_v24, 0.0  ;;  %v13828_v24 = vld [vmem:[%s22641_s7 + $0x94] sm:$0xf0] }
 0xbf3   :  { %v9175_v7 = vpop.f32.mrf.mxu2 }
 0xbf4   :  { %v9176_v53 = vadd.f32 %v9175_v7, %v9087_v39 }
 0xbf6   :  { %v9218_v44 = vmax.f32 %v9176_v53, 0.0  ;;  %v13071_v53 = vld [vmem:[%s22641_s7 + $0xa0] sm:$0xf] }
 0xbf8   :  { %v9269_v35 = vpack.c.bf16 %v9218_v44, %v9217_v45  ;;  %v13813_v45 = vld [vmem:[%s22641_s7 + $0x24] sm:$0xf]  ;;  %v13009_v44 = vld [vmem:[%s22641_s7 + $0x28] sm:$0xf0] }
 0xbf9   :  { %9648 = vmatmul.bf16.gmra.mxu3 %v13016_v38  ;;  %v13830_v38 = vld [vmem:[%s22641_s7 + $0xa4] sm:$0xf0] }
 0xbfb   :  { %v9178_v59 = vpop.f32.mrf.mxu2 }
 0xbfc   :  { %v9179_v11 = vadd.f32 %v9178_v59, %v9090_v58  ;;  %v13012_v59 = vor.u32 %v13813_v45, %v13009_v44  ;;  %v13057_v45 = vld [vmem:[%s22641_s7 + $0x88] sm:$0xf0] }
 0xbfe   :  { %v9219_v23 = vmax.f32 %v9179_v11, 0.0  ;;  %v13815_v11 = vld [vmem:[%s22641_s7 + $0x34] sm:$0xf] }
 0xc03   :  { %v9180_v9 = vpop.f32.mrf.mxu2 }
 0xc04   :  { %v9181_v63 = vadd.f32 %v9180_v9, %v9092_v21  ;;  %v13832_v21 = vld [vmem:[%s22641_s7 + $0xb4] sm:$0xf0] }
 0xc06   :  { %v9220_v28 = vmax.f32 %v9181_v63, 0.0  ;;  %v13080_v63 = vor.u32 %v13832_v21, %v13079_v46 }
 0xc08   :  { %v9270_v60 = vpack.c.bf16 %v9220_v28, %v9219_v23  ;;  %v9343_v23 = vpop.permute.xlu2 %9342 }
 0xc09   :  { %9653 = vmatmul.bf16.gmra.mxu3 %v13024_v54  ;;  %v13020_v54 = vor.u32 %v13815_v11, %v13017_v1 }
 0xc0b   :  { %v9183_v22 = vpop.f32.mrf.mxu2 }
 0xc0c   :  { %v9184_v32 = vadd.f32 %v9183_v22, %v9095_v40  ;;  %v13087_v22 = vld [vmem:[%s22641_s7 + $0xc0] sm:$0xf]  ;;  %v13834_v40 = vld [vmem:[%s22641_s7 + $0xc4] sm:$0xf0] }
 0xc0e   :  { %v9221_v48 = vmax.f32 %v9184_v32, 0.0  ;;  %v13025_v32 = vld [vmem:[%s22641_s7 + $0x48] sm:$0xf0] }
 0xc10   :  { %v22273_v17 = vpop.permute.xlu2 %9417 }
 0xc13   :  { %v9185_v33 = vpop.f32.mrf.mxu2 }
 0xc14   :  { %v9186_v57 = vadd.f32 %v9185_v33, %v9097_v19  ;;  %v13817_v19 = vld [vmem:[%s22641_s7 + $0x44] sm:$0xf]  ;;  %v13088_v33 = vor.u32 %v13834_v40, %v13087_v22 }
 0xc16   :  { %v9222_v55 = vmax.f32 %v9186_v57, 0.0  ;;  %v13028_v57 = vor.u32 %v13817_v19, %v13025_v32 }
 0xc18   :  { %v9271_v47 = vpack.c.bf16 %v9222_v55, %v9221_v48  ;;  %v22277_v48 = vpop.permute.xlu2 %9462  ;;  %v13095_v55 = vld [vmem:[%s22641_s7 + $0xd0] sm:$0xf] }
 0xc19   :  { %9658 = vmatmul.bf16.gmra.mxu3 %v13032_v2  ;;  %v22275_v2 = vpop.permute.xlu1 %9457 }
 0xc1b   :  { %v9188_v36 = vpop.f32.mrf.mxu2 }
 0xc1c   :  { %v9189_v37 = vadd.f32 %v9188_v36, %v9100_v30  ;;  %v13836_v36 = vld [vmem:[%s22641_s7 + $0xd4] sm:$0xf0]  ;;  %v13033_v30 = vld [vmem:[%s22641_s7 + $0x58] sm:$0xf0] }
 0xc1e   :  { %v9223_v14 = vmax.f32 %v9189_v37, 0.0  ;;  %v13036_v37 = vor.u32 %v13819_v6, %v13033_v30  ;;  %v13829_v6 = vld [vmem:[%s22641_s7 + $0xa4] sm:$0xf]  ;;  %v13073_v30 = vld [vmem:[%s22641_s7 + $0xa8] sm:$0xf0] }
 0xc20   :  { %v22293_v12 = vpop.permute.xlu2 %9367 }
 0xc23   :  { %v9190_v15 = vpop.f32.mrf.mxu2 }
 0xc24   :  { %v9191_v25 = vadd.f32 %v9190_v15, %v9102_v51  ;;  %v13096_v51 = vor.u32 %v13836_v36, %v13095_v55  ;;  %v13103_v15 = vld [vmem:[%s22641_s7 + $0xe0] sm:$0xf] }
 0xc26   :  { %v9224_v43 = vmax.f32 %v9191_v25, 0.0  ;;  %v13838_v25 = vld [vmem:[%s22641_s7 + $0xe4] sm:$0xf0] }
 0xc28   :  { %v9272_v27 = vpack.c.bf16 %v9224_v43, %v9223_v14  ;;  %v13041_v14 = vld [vmem:[%s22641_s7 + $0x68] sm:$0xf0]  ;;  %v22309_v43 = vpop.permute.xlu2 %9412 }
 0xc29   :  { %9663 = vmatmul.bf16.gmra.mxu3 %v13040_v29  ;;  %v13821_v29 = vld [vmem:[%s22641_s7 + $0x64] sm:$0xf] }
 0xc2a   :  { %9714 = vmatpush.bf16.msrb.mxu0 %v9272_v27  ;;  %v13104_v27 = vor.u32 %v13838_v25, %v13103_v15  ;;  %v13044_v18 = vor.u32 %v13821_v29, %v13041_v14 }
 0xc2e   :  { %9715 = vmatpush.bf16.msrb.mxu0 %v9271_v47  ;;  %v22282_v47 = vpop.permute.xlu1 %9332 }
 0xc32   :  { %9716 = vmatpush.bf16.msrb.mxu0 %v9270_v60 }
 0xc36   :  { %9717 = vmatpush.bf16.msrb.mxu0 %v9269_v35  ;;  %v13072_v35 = vor.u32 %v13830_v38, %v13071_v53  ;;  %v22295_v20 = vpop.permute.xlu1 %9407  ;;  %v13825_v38 = vld [vmem:[%s22641_s7 + $0x84] sm:$0xf] }
 0xc39   :  { %9668 = vmatmul.bf16.gmra.mxu3 %v13048_v10  ;;  %v22313_v10 = vpop.permute.xlu0 %9377 }
 0xc3a   :  { %9718 = vmatpush.bf16.msrb.mxu0 %v22151_v16  ;;  %v13056_v16 = vor.u32 %v13826_v5, %v13055_v3  ;;  %v9318_v3 = vpop.permute.xlu2 %9317 }
 0xc3e   :  { %9719 = vmatpush.bf16.msrb.mxu0 %v22140_v62  ;;  %v12996_v62 = vor.u32 %v13809_v8, %v12993_v50  ;;  %v22311_v56 = vpop.permute.xlu1 %9452  ;;  %v13111_v8 = vld [vmem:[%s22641_s7 + $0xf0] sm:$0xf]  ;;  %v13840_v50 = vld [vmem:[%s22641_s7 + $0xf4] sm:$0xf0] }
 0xc42   :  { %9720 = vmatpush.bf16.msrb.mxu0 %v22129_v31  ;;  %v13063_v31 = vld [vmem:[%s22641_s7 + $0x90] sm:$0xf] }
 0xc43   :  { %v13064_v41 = vor.u32 %v13828_v24, %v13063_v31  ;;  %v22329_v31 = vpop.permute.xlu0 %9422  ;;  %v13112_v24 = vor.u32 %v13840_v50, %v13111_v8 }
 0xc46   :  { %9721 = vmatpush.bf16.msrb.mxu0 %v22115_v49  ;;  %v13001_v49 = vld [vmem:[%s22641_s7 + $0x18] sm:$0xf0]  ;;  %v22315_v5 = vpop.permute.xlu1 %9357 }
 0xc47   :  { %v13004_v42 = vor.u32 %v13811_v4, %v13001_v49  ;;  %v22331_v49 = vpop.permute.xlu2 %9362 }
 0xc49   :  { %9673 = vmatmul.bf16.gmra.mxu3 %v13056_v16  ;;  %9722 = vmatmul.bf16.vlgmr.msrb.gmra.mxu0 %v12996_v62  ;;  %v13823_v16 = vld [vmem:[%s22641_s7 + $0x74] sm:$0xf]  ;;  %v13049_v62 = vld [vmem:[%s22641_s7 + $0x78] sm:$0xf0] }
 0xc4a   :  { %v13052_v4 = vor.u32 %v13823_v16, %v13049_v62 }
 0xc4c   :  { %v22207_v0 = vpop.f32.mrf.mxu3 }
 0xc4f   :  { %v22335_v53 = vpop.permute.xlu2 %9437 }
 0xc54   :  { %v22221_v39 = vpop.f32.mrf.mxu3 }
 0xc57   :  { %v9313_v1 = vpop.permute.xlu2 %9312 }
 0xc59   :  { %9678 = vmatmul.bf16.gmra.mxu3 %v13064_v41  ;;  %9727 = vmatmul.bf16.gmra.mxu0 %v13004_v42  ;;  %v22333_v41 = vpop.permute.xlu1 %9402  ;;  %v9328_v42 = vpop.permute.xlu0 %9327 }
 0xc5c   :  { %v22223_v7 = vpop.f32.mrf.mxu3 }
 0xc5d   :  { %v9640_v40 = vadd.f32 %v22223_v7, %v9318_v3  ;;  %v13831_v3 = vld [vmem:[%s22641_s7 + $0xb4] sm:$0xf] }
 0xc61   :  { %v9308_v44 = vpop.permute.xlu1 %9307  ;;  %v22344_v11 = vpop.permute.xlu0 %9372 }
 0xc64   :  { %v22237_v61 = vpop.f32.mrf.mxu3 }
 0xc69   :  { %9683 = vmatmul.bf16.gmra.mxu3 %v13072_v35  ;;  %9732 = vmatmul.bf16.gmra.mxu0 %v13012_v59  ;;  %v9635_v35 = vadd.f32 %v22207_v0, %v9308_v44  ;;  %v13060_v59 = vor.u32 %v13825_v38, %v13057_v45  ;;  %v13065_v0 = vld [vmem:[%s22641_s7 + $0x98] sm:$0xf0] }
 0xc6c   :  { %v22239_v58 = vpop.f32.mrf.mxu3 }
 0xc6d   :  { %v9645_v7 = vadd.f32 %v22239_v58, %v9328_v42  ;;  %v13081_v58 = vld [vmem:[%s22641_s7 + $0xb8] sm:$0xf0]  ;;  %v13089_v42 = vld [vmem:[%s22641_s7 + $0xc8] sm:$0xf0] }
 0xc6e   :  { %v13084_v8 = vor.u32 %v13831_v3, %v13081_v58 }
 0xc74   :  { %v22253_v9 = vpop.f32.mrf.mxu3 }
 0xc79   :  { %9688 = vmatmul.bf16.gmra.mxu3 %v13080_v63  ;;  %9737 = vmatmul.bf16.gmra.mxu0 %v13020_v54 }
 0xc7c   :  { %v9649_v28 = vpop.f32.mrf.mxu3 }
 0xc7d   :  { %v22255_v60 = vadd.f32 %v9649_v28, %v9338_v34  ;;  %v9637_v34 = vadd.f32 %v22221_v39, %v9313_v1  ;;  %v13827_v28 = vld [vmem:[%s22641_s7 + $0x94] sm:$0xf] }
 0xc7e   :  { %v13068_v19 = vor.u32 %v13827_v28, %v13065_v0 }
 0xc84   :  { %v9651_v52 = vpop.f32.mrf.mxu3 }
 0xc85   :  { %v22271_v26 = vadd.f32 %v9651_v52, %v9343_v23  ;;  %v22347_v23 = vpop.permute.xlu0 %9447 }
 0xc89   :  { %9693 = vmatmul.bf16.gmra.mxu3 %v13088_v33  ;;  %9742 = vmatmul.bf16.gmra.mxu0 %v13028_v57 }
 0xc8c   :  { %v9654_v22 = vpop.f32.mrf.mxu3 }
 0xc8d   :  { %v9323_v39 = vpop.permute.xlu0 %9322 }
 0xc8e   :  { %v9642_v33 = vadd.f32 %v22237_v61, %v9323_v39  ;;  %v9647_v61 = vadd.f32 %v22253_v9, %v22282_v47  ;;  %v13097_v39 = vld [vmem:[%s22641_s7 + $0xd8] sm:$0xf0] }
 0xc94   :  { %v9656_v57 = vpop.f32.mrf.mxu3 }
 0xc99   :  { %9698 = vmatmul.bf16.gmra.mxu3 %v13096_v51  ;;  %9747 = vmatmul.bf16.gmra.mxu0 %v13036_v37  ;;  %v13076_v51 = vor.u32 %v13829_v6, %v13073_v30 }
 0xc9c   :  { %v9659_v25 = vpop.f32.mrf.mxu3 }
 0xca9   :  { %9703 = vmatmul.bf16.gmra.mxu3 %v13104_v27  ;;  %9752 = vmatmul.bf16.gmra.mxu0 %v13044_v18  ;;  %v22372_v27 = vpop.permute.xlu0 %9397  ;;  %v9661_v18 = vpop.f32.mrf.mxu3 }
 0xcb1   :  { %v22383_v9 = vpop.permute.xlu0 %9442  ;;  %v9664_v47 = vpop.f32.mrf.mxu3 }
 0xcb9   :  { %9708 = vmatmul.bf16.gmra.mxu3 %v13112_v24  ;;  %9757 = vmatmul.bf16.gmra.mxu0 %v13052_v4  ;;  %v13833_v4 = vld [vmem:[%s22641_s7 + $0xc4] sm:$0xf]  ;;  %v9348_v38 = vpop.permute.xlu0 %9347  ;;  %v9666_v44 = vpop.f32.mrf.mxu3 }
 0xcba   :  { %v9655_v45 = vadd.f32 %v9654_v22, %v9348_v38  ;;  %v13835_v22 = vld [vmem:[%s22641_s7 + $0xd4] sm:$0xf]  ;;  %v9667_v38 = vadd.f32 %v9666_v44, %v22344_v11 }
 0xcc6   :  { %v9723_v46 = vpop.f32.mrf.mxu0 }
 0xcc7   :  { %v9724_v21 = vadd.f32 %v9723_v46, %v9635_v35 }
 0xcc9   :  { %9762 = vmatmul.bf16.gmra.mxu0 %v13060_v59  ;;  %v9803_v46 = vmax.f32 %v9724_v21, 0.0 }
 0xcce   :  { %v9725_v63 = vpop.f32.mrf.mxu0 }
 0xccf   :  { %v9726_v54 = vadd.f32 %v9725_v63, %v9637_v34 }
 0xcd6   :  { %v9728_v32 = vpop.f32.mrf.mxu0 }
 0xcd7   :  { %v9729_v52 = vadd.f32 %v9728_v32, %v9640_v40  ;;  %v9669_v40 = vpop.f32.mrf.mxu3 }
 0xcd9   :  { %9767 = vmatmul.bf16.gmra.mxu0 %v13068_v19  ;;  %v9804_v19 = vmax.f32 %v9726_v54, 0.0  ;;  %v9805_v30 = vmax.f32 %v9729_v52, 0.0  ;;  %v13105_v52 = vld [vmem:[%s22641_s7 + $0xe8] sm:$0xf0] }
 0xcde   :  { %v9730_v55 = vpop.f32.mrf.mxu0 }
 0xcdf   :  { %v22357_v36 = vadd.f32 %v9730_v55, %v9642_v33  ;;  %v9660_v33 = vadd.f32 %v9659_v25, %v22315_v5  ;;  %v13100_v55 = vor.u32 %v13835_v22, %v13097_v39  ;;  %v9671_v54 = vpop.f32.mrf.mxu3  ;;  %v13837_v5 = vld [vmem:[%s22641_s7 + $0xe4] sm:$0xf] }
 0xce1   :  { %v9806_v3 = vmax.f32 %v22357_v36, 0.0 }
 0xce6   :  { %v9733_v37 = vpop.f32.mrf.mxu0 }
 0xce7   :  { %v22366_v15 = vadd.f32 %v9733_v37, %v9645_v7  ;;  %v9662_v37 = vadd.f32 %v9661_v18, %v22331_v49 }
 0xce9   :  { %9772 = vmatmul.bf16.gmra.mxu0 %v13076_v51 }
 0xcee   :  { %v9735_v29 = vpop.f32.mrf.mxu0 }
 0xcef   :  { %v22370_v14 = vadd.f32 %v9735_v29, %v9647_v61 }
 0xcf6   :  { %v9738_v50 = vpop.f32.mrf.mxu0 }
 0xcf7   :  { %v22381_v16 = vadd.f32 %v9738_v50, %v22255_v60  ;;  %v13092_v60 = vor.u32 %v13833_v4, %v13089_v42  ;;  %v9665_v50 = vadd.f32 %v9664_v47, %v22293_v12  ;;  %v9807_v4 = vmax.f32 %v22366_v15, 0.0  ;;  %v13839_v12 = vld [vmem:[%s22641_s7 + $0xf4] sm:$0xf]  ;;  %v13113_v15 = vld [vmem:[%s22641_s7 + $0xf8] sm:$0xf0] }
 0xcf9   :  { %9777 = vmatmul.bf16.gmra.mxu0 %v13084_v8  ;;  %v9674_v8 = vpop.f32.mrf.mxu3 }
 0xcfe   :  { %v9740_v62 = vpop.f32.mrf.mxu0 }
 0xcff   :  { %v22386_v24 = vadd.f32 %v9740_v62, %v22271_v26  ;;  %v9353_v26 = vpop.permute.xlu1 %9352  ;;  %v13108_v62 = vor.u32 %v13837_v5, %v13105_v52 }
 0xd00   :  { %v9657_v63 = vadd.f32 %v9656_v57, %v9353_v26  ;;  %v13116_v26 = vor.u32 %v13839_v12, %v13113_v15 }
 0xd01   :  { %v9810_v39 = vmax.f32 %v22386_v24, 0.0 }
 0xd06   :  { %v9743_v35 = vpop.f32.mrf.mxu0 }
 0xd07   :  { %v9744_v59 = vadd.f32 %v9743_v35, %v9655_v45  ;;  %v9676_v45 = vpop.f32.mrf.mxu3 }
 0xd09   :  { %v9811_v1 = vmax.f32 %v9744_v59, 0.0  ;;  %9782 = vmatmul.bf16.gmra.mxu0 %v13092_v60  ;;  %v9808_v59 = vmax.f32 %v22370_v14, 0.0 }
 0xd0b   :  { %v22394_v34 = vmax.f32 %v9803_v46, %v9811_v1  ;;  %v9670_v1 = vadd.f32 %v9669_v40, %v22313_v10  ;;  %v9388_v10 = vpop.permute.xlu2 %9387 }
 0xd0c   :  { %v9675_v40 = vadd.f32 %v9674_v8, %v9388_v10 }
 0xd0e   :  { %v9745_v28 = vpop.f32.mrf.mxu0 }
 0xd0f   :  { %v9746_v0 = vadd.f32 %v9745_v28, %v9657_v63  ;;  %v9679_v63 = vpop.f32.mrf.mxu3  ;;  %v9809_v28 = vmax.f32 %v22381_v16, 0.0 }
 0xd11   :  { %v9812_v32 = vmax.f32 %v9746_v0, 0.0 }
 0xd13   :  { %v22402_v21 = vmax.f32 %v9804_v19, %v9812_v32  ;;  %v9672_v19 = vadd.f32 %v9671_v54, %v22257_v13 }
 0xd16   :  { %v9748_v6 = vpop.f32.mrf.mxu0 }
 0xd17   :  { %v9749_v57 = vadd.f32 %v9748_v6, %v9660_v33 }
 0xd19   :  { %v9813_v7 = vmax.f32 %v9749_v57, 0.0  ;;  %9787 = vmatmul.bf16.gmra.mxu0 %v13100_v55  ;;  %v9681_v55 = vpop.f32.mrf.mxu3 }
 0xd1a   :  { %v9682_v24 = vadd.f32 %v9681_v55, %v22333_v41 }
 0xd1b   :  { %v22405_v51 = vmax.f32 %v9805_v30, %v9813_v7  ;;  %v9393_v7 = vpop.permute.xlu0 %9392 }
 0xd1e   :  { %v9750_v61 = vpop.f32.mrf.mxu0 }
 0xd1f   :  { %v9751_v29 = vadd.f32 %v9750_v61, %v9662_v37  ;;  %v9677_v37 = vadd.f32 %v9676_v45, %v9393_v7 }
 0xd21   :  { %v9814_v58 = vmax.f32 %v9751_v29, 0.0  ;;  %v9684_v16 = vpop.f32.mrf.mxu3 }
 0xd23   :  { %v22415_v25 = vmax.f32 %v9806_v3, %v9814_v58  ;;  %v9680_v3 = vadd.f32 %v9679_v63, %v22372_v27 }
 0xd26   :  { %v9753_v49 = vpop.f32.mrf.mxu0 }
 0xd27   :  { %v9754_v18 = vadd.f32 %v9753_v49, %v9665_v50 }
 0xd29   :  { %v9815_v36 = vmax.f32 %v9754_v18, 0.0  ;;  %9792 = vmatmul.bf16.gmra.mxu0 %v13108_v62  ;;  %v9686_v13 = vpop.f32.mrf.mxu3  ;;  %v9685_v62 = vadd.f32 %v9684_v16, %v22295_v20  ;;  %v9428_v20 = vpop.permute.xlu1 %9427 }
 0xd2b   :  { %v22419_v42 = vmax.f32 %v9807_v4, %v9815_v36  ;;  %v9687_v4 = vadd.f32 %v9686_v13, %v22309_v43 }
 0xd2e   :  { %v9755_v60 = vpop.f32.mrf.mxu0 }
 0xd2f   :  { %v9756_v35 = vadd.f32 %v9755_v60, %v9667_v38 }
 0xd31   :  { %v9816_v46 = vmax.f32 %v9756_v35, 0.0  ;;  %v9689_v50 = vpop.f32.mrf.mxu3 }
 0xd32   :  { %v9690_v27 = vadd.f32 %v9689_v50, %v22273_v17 }
 0xd33   :  { %v22429_v47 = vmax.f32 %v9808_v59, %v9816_v46 }
 0xd36   :  { %v9758_v11 = vpop.f32.mrf.mxu0 }
 0xd37   :  { %v9759_v44 = vadd.f32 %v9758_v11, %v9670_v1 }
 0xd39   :  { %v9817_v14 = vmax.f32 %v9759_v44, 0.0  ;;  %9797 = vmatmul.bf16.gmra.mxu0 %v13116_v26  ;;  %v9691_v18 = vpop.f32.mrf.mxu3 }
 0xd3a   :  { %v9692_v41 = vadd.f32 %v9691_v18, %v22329_v31 }
 0xd3b   :  { %v22433_v0 = vmax.f32 %v9809_v28, %v9817_v14  ;;  %v9433_v28 = vpop.permute.xlu2 %9432 }
 0xd3e   :  { %v9760_v32 = vpop.f32.mrf.mxu0 }
 0xd3f   :  { %v9761_v22 = vadd.f32 %v9760_v32, %v9672_v19 }
 0xd41   :  { %v9818_v33 = vmax.f32 %v9761_v22, 0.0  ;;  %v9694_v45 = vpop.f32.mrf.mxu3 }
 0xd42   :  { %v9695_v15 = vadd.f32 %v9694_v45, %v9428_v20 }
 0xd43   :  { %v22437_v6 = vmax.f32 %v9810_v39, %v9818_v33 }
 0xd46   :  { %v9763_v57 = vpop.f32.mrf.mxu0 }
 0xd47   :  { %v9764_v30 = vadd.f32 %v9763_v57, %v9675_v40 }
 0xd49   :  { %v9696_v59 = vpop.f32.mrf.mxu3  ;;  %v9819_v43 = vmax.f32 %v9764_v30, 0.0 }
 0xd4a   :  { %v9697_v14 = vadd.f32 %v9696_v59, %v9433_v28 }
 0xd4e   :  { %v9765_v61 = vpop.f32.mrf.mxu0 }
 0xd4f   :  { %v9766_v29 = vadd.f32 %v9765_v61, %v9677_v37 }
 0xd51   :  { %v9699_v11 = vpop.f32.mrf.mxu3  ;;  %v9820_v22 = vmax.f32 %v9766_v29, 0.0 }
 0xd52   :  { %v9700_v55 = vadd.f32 %v9699_v11, %v22335_v53 }
 0xd56   :  { %v9768_v54 = vpop.f32.mrf.mxu0 }
 0xd57   :  { %v9769_v58 = vadd.f32 %v9768_v54, %v9680_v3 }
 0xd59   :  { %v9701_v39 = vpop.f32.mrf.mxu3  ;;  %v9821_v30 = vmax.f32 %v9769_v58, 0.0 }
 0xd5a   :  { %v9702_v3 = vadd.f32 %v9701_v39, %v22383_v9 }
 0xd5e   :  { %v9770_v5 = vpop.f32.mrf.mxu0 }
 0xd5f   :  { %v9771_v52 = vadd.f32 %v9770_v5, %v9682_v24 }
 0xd61   :  { %v9704_v61 = vpop.f32.mrf.mxu3  ;;  %v9822_v54 = vmax.f32 %v9771_v52, 0.0 }
 0xd62   :  { %v9705_v53 = vadd.f32 %v9704_v61, %v22347_v23 }
 0xd66   :  { %v9773_v8 = vpop.f32.mrf.mxu0 }
 0xd67   :  { %v9774_v49 = vadd.f32 %v9773_v8, %v9685_v62 }
 0xd69   :  { %v9706_v50 = vpop.f32.mrf.mxu3  ;;  %v9823_v18 = vmax.f32 %v9774_v49, 0.0 }
 0xd6a   :  { %v9707_v9 = vadd.f32 %v9706_v50, %v22311_v56 }
 0xd6e   :  { %v9775_v36 = vpop.f32.mrf.mxu0 }
 0xd6f   :  { %v9776_v38 = vadd.f32 %v9775_v36, %v9687_v4 }
 0xd71   :  { %v9709_v52 = vpop.f32.mrf.mxu3 }
 0xd72   :  { %v9710_v23 = vadd.f32 %v9709_v52, %v22275_v2 }
 0xd76   :  { %v9778_v60 = vpop.f32.mrf.mxu0 }
 0xd77   :  { %v22444_v35 = vadd.f32 %v9778_v60, %v9690_v27  ;;  %v9824_v60 = vmax.f32 %v9776_v38, 0.0 }
 0xd79   :  { %v9825_v49 = vmax.f32 %v22444_v35, 0.0  ;;  %v13841_v35 = vld [vmem:[%s22642_s9] sm:$0xff] }
 0xd7e   :  { %v9780_v46 = vpop.f32.mrf.mxu0 }
 0xd7f   :  { %v22447_v12 = vadd.f32 %v9780_v46, %v9692_v41 }
 0xd86   :  { %v9783_v1 = vpop.f32.mrf.mxu0 }
 0xd87   :  { %v9784_v26 = vadd.f32 %v9783_v1, %v9695_v15 }
 0xd89   :  { %v9827_v44 = vmax.f32 %v9784_v26, 0.0  ;;  %v9711_v26 = vpop.f32.mrf.mxu3 }
 0xd8b   :  { %v9843_v63 = vmax.f32 %v9819_v43, %v9827_v44  ;;  %v9826_v44 = vmax.f32 %v22447_v12, 0.0  ;;  %v13845_v12 = vld [vmem:[%s22642_s9 + $0x20] sm:$0xff] }
 0xd8d   :  { %v9851_v17 = vmax.f32 %v22394_v34, %v9843_v63 }
 0xd8e   :  { %v9785_v19 = vpop.f32.mrf.mxu0 }
 0xd8f   :  { %v9786_v32 = vadd.f32 %v9785_v19, %v9697_v14  ;;  %v13846_v14 = vld [vmem:[%s22642_s9 + $0x28] sm:$0xff]  ;;  %v22491_v19 = vpop.permute.xlu2 %9957 }
 0xd91   :  { %v9828_v31 = vmax.f32 %v9786_v32, 0.0  ;;  %v13847_v32 = vld [vmem:[%s22642_s9 + $0x30] sm:$0xff] }
 0xd93   :  { %v9844_v33 = vmax.f32 %v9820_v22, %v9828_v31 }
 0xd95   :  { %v9852_v10 = vmax.f32 %v22402_v21, %v9844_v33  ;;  %v13848_v33 = vld [vmem:[%s22642_s9 + $0x38] sm:$0xff] }
 0xd96   :  { %v9788_v40 = vpop.f32.mrf.mxu0 }
 0xd97   :  { %v9789_v57 = vadd.f32 %v9788_v40, %v9700_v55  ;;  %v9875_v7 = vpack.c.bf16 %v9852_v10, %v9851_v17  ;;  %v22489_v17 = vpop.permute.xlu0 %9967  ;;  %v22499_v31 = vpop.permute.xlu2 %9952 }
 0xd98   :  { %v22506_v10 = vpop.permute.xlu1 %9972 }
 0xd99   :  { %v9829_v16 = vmax.f32 %v9789_v57, 0.0 }
 0xd9b   :  { %v9845_v37 = vmax.f32 %v9821_v30, %v9829_v16 }
 0xd9d   :  { %v9853_v34 = vmax.f32 %v22405_v51, %v9845_v37 }
 0xd9e   :  { %v9790_v13 = vpop.f32.mrf.mxu0 }
 0xd9f   :  { %v9791_v29 = vadd.f32 %v9790_v13, %v9702_v3  ;;  %v22496_v22 = vpop.permute.xlu0 %9962  ;;  %v9928_v55 = vpop.permute.xlu2 %9927 }
 0xda1   :  { %v9830_v24 = vmax.f32 %v9791_v29, 0.0 }
 0xda3   :  { %v9846_v5 = vmax.f32 %v9822_v54, %v9830_v24  ;;  %v10105_v24 = vld [vmem:[%s22643_s15] sm:$0xff] }
 0xda5   :  { %v9854_v21 = vmax.f32 %v22415_v25, %v9846_v5  ;;  %v10106_v5 = vld [vmem:[%s22643_s15 + $0x8] sm:$0xff] }
 0xda6   :  { %v9793_v62 = vpop.f32.mrf.mxu0 }
 0xda7   :  { %v9794_v8 = vadd.f32 %v9793_v62, %v9705_v53  ;;  %v9876_v58 = vpack.c.bf16 %v9854_v21, %v9853_v34  ;;  %v22501_v39 = vpop.permute.xlu0 %9937  ;;  %v9923_v57 = vpop.permute.xlu2 %9922 }
 0xda9   :  { %v9831_v4 = vmax.f32 %v9794_v8, 0.0 }
 0xdab   :  { %v9847_v36 = vmax.f32 %v9823_v18, %v9831_v4 }
 0xdad   :  { %v9855_v51 = vmax.f32 %v22419_v42, %v9847_v36  ;;  %v9712_v42 = vadd.f32 %v9711_v26, %v22277_v48  ;;  %v13842_v48 = vld [vmem:[%s22642_s9 + $0x8] sm:$0xff] }
 0xdae   :  { %v9795_v45 = vpop.f32.mrf.mxu0 }
 0xdaf   :  { %v9796_v27 = vadd.f32 %v9795_v45, %v9707_v9  ;;  %v9933_v40 = vpop.permute.xlu0 %9932  ;;  %v9898_v37 = vpop.permute.xlu2 %9897  ;;  %v10107_v45 = vld [vmem:[%s22643_s15 + $0x10] sm:$0xff] }
 0xdb1   :  { %v9832_v41 = vmax.f32 %v9796_v27, 0.0  ;;  %v10108_v27 = vld [vmem:[%s22643_s15 + $0x18] sm:$0xff] }
 0xdb3   :  { %v9848_v59 = vmax.f32 %v9824_v60, %v9832_v41 }
 0xdb5   :  { %v9856_v25 = vmax.f32 %v22429_v47, %v9848_v59 }
 0xdb6   :  { %v9798_v46 = vpop.f32.mrf.mxu0 }
 0xdb7   :  { %v9799_v20 = vadd.f32 %v9798_v46, %v9710_v23  ;;  %v9877_v15 = vpack.c.bf16 %v9856_v25, %v9855_v51  ;;  %v9908_v30 = vpop.permute.xlu0 %9907 }
 0xdb9   :  { %v9833_v1 = vmax.f32 %v9799_v20, 0.0 }
 0xdbb   :  { %v9849_v56 = vmax.f32 %v9825_v49, %v9833_v1  ;;  %v10109_v49 = vld [vmem:[%s22643_s15 + $0x20] sm:$0xff]  ;;  %v10110_v1 = vld [vmem:[%s22643_s15 + $0x28] sm:$0xff] }
 0xdbd   :  { %v9857_v11 = vmax.f32 %v22433_v0, %v9849_v56  ;;  %v13843_v0 = vld [vmem:[%s22642_s9 + $0x10] sm:$0xff] }
 0xdbe   :  { %v9800_v43 = vpop.f32.mrf.mxu0 }
 0xdbf   :  { %v9801_v38 = vadd.f32 %v9800_v43, %v9712_v42  ;;  %v9903_v34 = vpop.permute.xlu0 %9902 }
 0xdc1   :  { %v9834_v63 = vmax.f32 %v9801_v38, 0.0 }
 0xdc3   :  { %v9850_v2 = vmax.f32 %v9826_v44, %v9834_v63 }
 0xdc5   :  { %v9858_v47 = vmax.f32 %v22437_v6, %v9850_v2  ;;  %v13844_v6 = vld [vmem:[%s22642_s9 + $0x18] sm:$0xff] }
 0xdc7   :  { %v9878_v28 = vpack.c.bf16 %v9858_v47, %v9857_v11  ;;  %v10111_v47 = vld [vmem:[%s22643_s15 + $0x30] sm:$0xff] }
 0xdc9   :  { %10044 = vmatpush.bf16.msra.mxu1 %v9878_v28  ;;  %v10112_v28 = vld [vmem:[%s22643_s15 + $0x38] sm:$0xff] }
 0xdcd   :  { %10045 = vmatpush.bf16.msra.mxu1 %v9877_v15 }
 0xdd1   :  { %10046 = vmatpush.bf16.msra.mxu1 %v9876_v58 }
 0xdd5   :  { %10047 = vmatpush.bf16.msra.mxu1 %v9875_v7  ;;  %v22509_v7 = vpop.permute.xlu1 %9947 }
 0xdd8   :  { %13149 = vmatmul.msk.bf16.vlgmr.msra.gmra.mxu1 %vm10015_vm1, %v13841_v35 }
 0xddd   :  { %v22511_v61 = vpop.permute.xlu1 %9942 }
 0xde5   :  { %v9918_v62 = vpop.permute.xlu1 %9917 }
 0xde8   :  { %13150 = vmatmul.msk.bf16.gmra.mxu1 %vm10015_vm1, %v13842_v48 }
 0xded   :  { %v9913_v4 = vpop.permute.xlu1 %9912 }
 0xdf8   :  { %13151 = vmatmul.msk.bf16.gmra.mxu1 %vm10015_vm1, %v13843_v0 }
 0xe08   :  { %13152 = vmatmul.msk.bf16.gmra.mxu1 %vm10015_vm1, %v13844_v6 }
 0xe18   :  { %13153 = vmatmul.msk.bf16.gmra.mxu1 %vm10015_vm1, %v13845_v12 }
 0xe28   :  { %13154 = vmatmul.msk.bf16.gmra.mxu1 %vm10015_vm1, %v13846_v14 }
 0xe38   :  { %13155 = vmatmul.msk.bf16.gmra.mxu1 %vm10015_vm1, %v13847_v32 }
 0xe48   :  { %13156 = vmatmul.msk.bf16.gmra.mxu1 %vm10015_vm1, %v13848_v33 }
 0xe55   :  { %v10049_v16 = vpop.f32.mrf.mxu1 }
 0xe56   :  { %v10050_v3 = vadd.f32 %v10049_v16, %v9898_v37 }
 0xe58   :  { %v10089_v29 = vmax.f32 %v10050_v3, 0.0 }
 0xe5a   :  { %v22519_v21 = vmul.f32 %v10105_v24, %v10089_v29  ;;  %v10119_v29 = vld [vmem:[%s22643_s15 + $0x70] sm:$0xff] }
 0xe5d   :  { %v10051_v13 = vpop.f32.mrf.mxu1 }
 0xe5e   :  { %v10052_v54 = vadd.f32 %v10051_v13, %v9903_v34 }
 0xe60   :  { %v10090_v53 = vmax.f32 %v10052_v54, 0.0  ;;  %v10120_v54 = vld [vmem:[%s22643_s15 + $0x78] sm:$0xff] }
 0xe62   :  { %v22521_v50 = vmul.f32 %v10106_v5, %v10090_v53 }
 0xe64   :  { %v10145_v8 = vpack.c.bf16 %v22521_v50, %v22519_v21  ;;  %v10164_v21 = vpop.permute.xlu1 %10163  ;;  %v10169_v50 = vpop.permute.xlu2 %10168 }
 0xe65   :  { %v10054_v58 = vpop.f32.mrf.mxu1 }
 0xe66   :  { %v10055_v18 = vadd.f32 %v10054_v58, %v9908_v30  ;;  %v10117_v58 = vld [vmem:[%s22643_s15 + $0x60] sm:$0xff] }
 0xe68   :  { %v10091_v9 = vmax.f32 %v10055_v18, 0.0 }
 0xe6a   :  { %v22531_v60 = vmul.f32 %v10107_v45, %v10091_v9  ;;  %v10116_v9 = vld [vmem:[%s22643_s15 + $0x58] sm:$0xff] }
 0xe6d   :  { %v10056_v36 = vpop.f32.mrf.mxu1 }
 0xe6e   :  { %v10057_v51 = vadd.f32 %v10056_v36, %v9913_v4 }
 0xe70   :  { %v10092_v52 = vmax.f32 %v10057_v51, 0.0 }
 0xe72   :  { %v22533_v41 = vmul.f32 %v10108_v27, %v10092_v52  ;;  %v10115_v27 = vld [vmem:[%s22643_s15 + $0x50] sm:$0xff] }
 0xe74   :  { %v10146_v59 = vpack.c.bf16 %v22533_v41, %v22531_v60  ;;  %v13852_v60 = vld [vmem:[%s22644_s11 + $0x18] sm:$0xff] }
 0xe75   :  { %v10059_v23 = vpop.f32.mrf.mxu1 }
 0xe76   :  { %v10060_v25 = vadd.f32 %v10059_v23, %v9918_v62 }
 0xe78   :  { %v10093_v20 = vmax.f32 %v10060_v25, 0.0 }
 0xe7a   :  { %v22543_v56 = vmul.f32 %v10109_v49, %v10093_v20 }
 0xe7d   :  { %v10061_v46 = vpop.f32.mrf.mxu1 }
 0xe7e   :  { %v10062_v15 = vadd.f32 %v10061_v46, %v9923_v57 }
 0xe80   :  { %v10094_v26 = vmax.f32 %v10062_v15, 0.0 }
 0xe82   :  { %v10126_v42 = vmul.f32 %v10110_v1, %v10094_v26 }
 0xe84   :  { %v10147_v11 = vpack.c.bf16 %v10126_v42, %v22543_v56  ;;  %v13849_v56 = vld [vmem:[%s22644_s11] sm:$0xff]  ;;  %v13850_v42 = vld [vmem:[%s22644_s11 + $0x8] sm:$0xff] }
 0xe85   :  { %v10064_v43 = vpop.f32.mrf.mxu1 }
 0xe86   :  { %v10065_v38 = vadd.f32 %v10064_v43, %v9928_v55  ;;  %v10174_v43 = vpop.permute.xlu0 %10173 }
 0xe88   :  { %v10095_v63 = vmax.f32 %v10065_v38, 0.0  ;;  %v10179_v38 = vpop.permute.xlu1 %10178 }
 0xe8a   :  { %v10127_v48 = vmul.f32 %v10111_v47, %v10095_v63  ;;  %v10184_v63 = vpop.permute.xlu2 %10183 }
 0xe8d   :  { %v10066_v44 = vpop.f32.mrf.mxu1 }
 0xe8e   :  { %v10067_v2 = vadd.f32 %v10066_v44, %v9933_v40 }
 0xe90   :  { %v10096_v35 = vmax.f32 %v10067_v2, 0.0  ;;  %v10289_v2 = vpop.permute.xlu0 %10288  ;;  %v10294_v47 = vpop.permute.xlu1 %10293 }
 0xe92   :  { %v10128_v0 = vmul.f32 %v10112_v28, %v10096_v35  ;;  %v10189_v35 = vpop.permute.xlu2 %10188 }
 0xe94   :  { %v10148_v6 = vpack.c.bf16 %v10128_v0, %v10127_v48 }
 0xe95   :  { %v10069_v12 = vpop.f32.mrf.mxu1 }
 0xe96   :  { %v10070_v51 = vadd.f32 %v10069_v12, %v22501_v39  ;;  %v10113_v39 = vld [vmem:[%s22643_s15 + $0x40] sm:$0xff] }
 0xe98   :  { %v10097_v46 = vmax.f32 %v10070_v51, 0.0  ;;  %v10299_v0 = vpop.permute.xlu0 %10298 }
 0xe9a   :  { %v10129_v1 = vmul.f32 %v10113_v39, %v10097_v46 }
 0xe9d   :  { %v10071_v14 = vpop.f32.mrf.mxu1 }
 0xe9e   :  { %v10072_v18 = vadd.f32 %v10071_v14, %v22511_v61  ;;  %v10114_v61 = vld [vmem:[%s22643_s15 + $0x48] sm:$0xff] }
 0xea0   :  { %v10098_v52 = vmax.f32 %v10072_v18, 0.0 }
 0xea2   :  { %v10130_v15 = vmul.f32 %v10114_v61, %v10098_v52 }
 0xea4   :  { %v10149_v26 = vpack.c.bf16 %v10130_v15, %v10129_v1 }
 0xea5   :  { %v10074_v32 = vpop.f32.mrf.mxu1 }
 0xead   :  { %v10076_v33 = vpop.f32.mrf.mxu1 }
 0xeae   :  { %v10077_v24 = vadd.f32 %v10076_v33, %v22499_v31 }
 0xeb0   :  { %v10100_v4 = vmax.f32 %v10077_v24, 0.0  ;;  %v10265_v24 = vld [vmem:[%s22645_s16 + $0x18] sm:$0xff] }
 0xeb2   :  { %v10132_v23 = vmul.f32 %v10116_v9, %v10100_v4 }
 0xeb5   :  { %v10079_v55 = vpop.f32.mrf.mxu1 }
 0xeb6   :  { %v10080_v3 = vadd.f32 %v10079_v55, %v22491_v19  ;;  %v10075_v19 = vadd.f32 %v10074_v32, %v22509_v7  ;;  %v10194_v55 = vpop.permute.xlu1 %10193 }
 0xeb8   :  { %v10101_v53 = vmax.f32 %v10080_v3, 0.0  ;;  %v10099_v45 = vmax.f32 %v10075_v19, 0.0  ;;  %v10264_v3 = vld [vmem:[%s22645_s16 + $0x10] sm:$0xff]  ;;  %v10199_v19 = vpop.permute.xlu0 %10198 }
 0xeba   :  { %v10133_v7 = vmul.f32 %v10117_v58, %v10101_v53  ;;  %v10131_v20 = vmul.f32 %v10115_v27, %v10099_v45  ;;  %v10266_v53 = vld [vmem:[%s22645_s16 + $0x20] sm:$0xff]  ;;  %v10268_v27 = vld [vmem:[%s22645_s16 + $0x30] sm:$0xff] }
 0xebc   :  { %v10150_v49 = vpack.c.bf16 %v10132_v23, %v10131_v20 }
 0xebd   :  { %v10081_v57 = vpop.f32.mrf.mxu1 }
 0xebe   :  { %v10082_v16 = vadd.f32 %v10081_v57, %v22496_v22  ;;  %v10118_v22 = vld [vmem:[%s22643_s15 + $0x68] sm:$0xff] }
 0xebf   :  { %v10263_v57 = vld [vmem:[%s22645_s16 + $0x8] sm:$0xff] }
 0xec0   :  { %v10102_v5 = vmax.f32 %v10082_v16, 0.0 }
 0xec2   :  { %v10134_v36 = vmul.f32 %v10118_v22, %v10102_v5 }
 0xec4   :  { %v10151_v25 = vpack.c.bf16 %v10134_v36, %v10133_v7  ;;  %v10267_v36 = vld [vmem:[%s22645_s16 + $0x28] sm:$0xff]  ;;  %v10309_v7 = vpop.permute.xlu1 %10308 }
 0xec5   :  { %v10084_v30 = vpop.f32.mrf.mxu1 }
 0xec6   :  { %v10085_v40 = vadd.f32 %v10084_v30, %v22489_v17 }
 0xec8   :  { %v10103_v34 = vmax.f32 %v10085_v40, 0.0 }
 0xecd   :  { %v10086_v37 = vpop.f32.mrf.mxu1 }
 0xece   :  { %v10087_v13 = vadd.f32 %v10086_v37, %v22506_v10  ;;  %v10135_v10 = vmul.f32 %v10119_v29, %v10103_v34  ;;  %v10262_v37 = vld [vmem:[%s22645_s16] sm:$0xff] }
 0xed0   :  { %v10104_v17 = vmax.f32 %v10087_v13, 0.0 }
 0xed2   :  { %v10136_v62 = vmul.f32 %v10120_v54, %v10104_v17  ;;  %v10304_v54 = vpop.permute.xlu2 %10303 }
 0xed4   :  { %v10152_v31 = vpack.c.bf16 %v10136_v62, %v10135_v10 }
 0xed6   :  { %10225 = vmatpush.bf16.msrb.mxu1 %v10152_v31 }
 0xeda   :  { %10226 = vmatpush.bf16.msrb.mxu1 %v10151_v25  ;;  %v10314_v39 = vpop.permute.xlu2 %10313 }
 0xede   :  { %10227 = vmatpush.bf16.msrb.mxu1 %v10150_v49 }
 0xee2   :  { %10228 = vmatpush.bf16.msrb.mxu1 %v10149_v26 }
 0xee6   :  { %10229 = vmatpush.bf16.msrb.mxu1 %v10148_v6 }
 0xeea   :  { %10230 = vmatpush.bf16.msrb.mxu1 %v10147_v11  ;;  %v13851_v11 = vld [vmem:[%s22644_s11 + $0x10] sm:$0xff] }
 0xeee   :  { %10231 = vmatpush.bf16.msrb.mxu1 %v10146_v59 }
 0xef2   :  { %10232 = vmatpush.bf16.msrb.mxu1 %v10145_v8 }
 0xef5   :  { %10233 = vmatmul.bf16.vlgmr.msrb.gmra.mxu1 %v13849_v56  ;;  %v10319_v56 = vpop.permute.xlu0 %10318 }
 0xf05   :  { %10238 = vmatmul.bf16.gmra.mxu1 %v13850_v42  ;;  %v10269_v42 = vld [vmem:[%s22645_s16 + $0x38] sm:$0xff] }
 0xf15   :  { %10243 = vmatmul.bf16.gmra.mxu1 %v13851_v11 }
 0xf25   :  { %10248 = vmatmul.bf16.gmra.mxu1 %v13852_v60 }
 0xf72   :  { %v10234_v41 = vpop.f32.mrf.mxu1 }
 0xf73   :  { %v10235_v6 = vadd.f32 %v10234_v41, %v10164_v21 }
 0xf75   :  { %v10254_v30 = vmax.f32 %v10235_v6, 0.0 }
 0xf77   :  { %v10270_v5 = vmul.f32 %v10262_v37, %v10254_v30 }
 0xf79   :  { %v10326_v31 = vmul.f32 %v10289_v2, %v10270_v5 }
 0xf7a   :  { %v10236_v59 = vpop.f32.mrf.mxu1 }
 0xf7b   :  { %v10237_v48 = vadd.f32 %v10236_v59, %v10169_v50  ;;  %v10324_v50 = vpop.permute.xlu1 %10323 }
 0xf7d   :  { %v10255_v32 = vmax.f32 %v10237_v48, 0.0 }
 0xf7f   :  { %v10271_v34 = vmul.f32 %v10263_v57, %v10255_v32 }
 0xf81   :  { %v10327_v62 = vmul.f32 %v10294_v47, %v10271_v34 }
 0xf82   :  { %v10239_v8 = vpop.f32.mrf.mxu1 }
 0xf83   :  { %v10240_v12 = vadd.f32 %v10239_v8, %v10174_v43  ;;  %v10334_v52 = vadd.f32 %v10327_v62, %v10326_v31 }
 0xf85   :  { %v10256_v40 = vmax.f32 %v10240_v12, 0.0 }
 0xf87   :  { %v10272_v17 = vmul.f32 %v10264_v3, %v10256_v40 }
 0xf89   :  { %v10328_v9 = vmul.f32 %v10299_v0, %v10272_v17 }
 0xf8a   :  { %v10241_v44 = vpop.f32.mrf.mxu1 }
 0xf8b   :  { %v10242_v33 = vadd.f32 %v10241_v44, %v10179_v38  ;;  %v10335_v61 = vadd.f32 %v10334_v52, %v10328_v9 }
 0xf8d   :  { %v10257_v13 = vmax.f32 %v10242_v33, 0.0 }
 0xf8f   :  { %v10273_v58 = vmul.f32 %v10265_v24, %v10257_v13 }
 0xf91   :  { %v10329_v23 = vmul.f32 %v10304_v54, %v10273_v58 }
 0xf92   :  { %v10244_v28 = vpop.f32.mrf.mxu1 }
 0xf93   :  { %v10245_v16 = vadd.f32 %v10244_v28, %v10184_v63  ;;  %v10336_v49 = vadd.f32 %v10335_v61, %v10329_v23  ;;  %v10351_v28 = vpop.permute.xlu2 %10350 }
 0xf94   :  { %v10353_v48 = vperm.slane %v10351_v28, 0 }
 0xf95   :  { %v10258_v22 = vmax.f32 %v10245_v16, 0.0 }
 0xf97   :  { %v10274_v51 = vmul.f32 %v10266_v53, %v10258_v22 }
 0xf99   :  { %v10330_v46 = vmul.f32 %v10309_v7, %v10274_v51 }
 0xf9a   :  { %v10246_v14 = vpop.f32.mrf.mxu1 }
 0xf9b   :  { %v10247_v29 = vadd.f32 %v10246_v14, %v10189_v35  ;;  %v10337_v11 = vadd.f32 %v10336_v49, %v10330_v46 }
 0xf9d   :  { %v10259_v18 = vmax.f32 %v10247_v29, 0.0 }
 0xf9f   :  { %v10275_v25 = vmul.f32 %v10267_v36, %v10259_v18 }
 0xfa1   :  { %v10331_v1 = vmul.f32 %v10314_v39, %v10275_v25 }
 0xfa2   :  { %v10249_v10 = vpop.f32.mrf.mxu1 }
 0xfa3   :  { %v10250_v4 = vadd.f32 %v10249_v10, %v10194_v55  ;;  %v10338_v59 = vadd.f32 %v10337_v11, %v10331_v1 }
 0xfa5   :  { %v10260_v45 = vmax.f32 %v10250_v4, 0.0 }
 0xfa7   :  { %v10276_v20 = vmul.f32 %v10268_v27, %v10260_v45 }
 0xfa9   :  { %v10332_v60 = vmul.f32 %v10319_v56, %v10276_v20 }
 0xfaa   :  { %v10251_v15 = vpop.f32.mrf.mxu1 }
 0xfab   :  { %v10252_v26 = vadd.f32 %v10251_v15, %v10199_v19  ;;  %v10339_v8 = vadd.f32 %v10338_v59, %v10332_v60 }
 0xfad   :  { %v10261_v41 = vmax.f32 %v10252_v26, 0.0 }
 0xfaf   :  { %v10277_v21 = vmul.f32 %v10269_v42, %v10261_v41 }
 0xfb1   :  { %v10333_v43 = vmul.f32 %v10324_v50, %v10277_v21 }
 0xfb3   :  { %v10340_v38 = vadd.f32 %v10339_v8, %v10333_v43 }
 0xfb5   :  { %v10341_v44 = vrot.slane %v10340_v38, 4 }
 0xfb7   :  { %v10342_v63 = vadd.f32 %v10341_v44, %v10340_v38 }
 0xfb9   :  { %v10343_v2 = vrot.slane %v10342_v63, 2 }
 0xfbb   :  { %v10344_v47 = vadd.f32 %v10343_v2, %v10342_v63 }
 0xfbd   :  { %v10345_v35 = vrot.slane %v10344_v47, 1 }
 0xfbf   :  { %v10346_v0 = vadd.f32 %v10345_v35, %v10344_v47 }
 0xfc1   :  { %v10354_v6 = vadd.f32 %v10353_v48, %v10346_v0 }
 0xfc3   :  { %v10355_v12 = vsub.f32 0.0, %v10354_v6 }
 0xfc5   :  { %v10356_v14 = vmul.f32 1.442695, %v10355_v12 }
 0xfc7   :  { %13865 = vpow2.f32 %v10356_v14 }
 0xfcd   :  { %v13866_v32 = vpop.eup %13865 }
 0xfce   :  { %v10358_v33 = vadd.f32 1.0, %v13866_v32 }
 0xfd0   :  { %13867 = vrcp.f32 %v10358_v33  ;;  %v10370_v40 = vand.u32 2147483648, %v10358_v33  ;;  %v10368_v37 = vand.u32 2147483647, %v10358_v33  ;;  %vm10364_vm3 = vweird.f32 %v10358_v33 }
 0xfd2   :  { %v10371_v34 = vor.u32 1.1754944e-38, %v10370_v40  ;;  %vm10369_vm5 = vcmp.eq.f32.partialorder %v10368_v37, 8.507059e+37 }
 0xfd6   :  { %v13868_v55 = vpop.eup %13867 }
 0xfd7   :  { %v10360_v57 = vmul.f32 %v13868_v55, %v10358_v33  ;;  %vm10365_vm2 = vweird.f32 %v13868_v55 }
 0xfd8   :  { %vm10366_vm4 = vmor %vm10364_vm3, %vm10365_vm2 }
 0xfd9   :  { %v10361_v30 = vsub.f32 1.0, %v10360_v57 }
 0xfdb   :  { %v10362_v16 = vmul.f32 %v13868_v55, %v10361_v30 }
 0xfdd   :  { %v10363_v3 = vadd.f32 %v13868_v55, %v10362_v16 }
 0xfdf   :  { %v10367_v13 = vsel %vm10366_vm4, %v13868_v55, %v10363_v3 }
 0xfe0   :  { %v10372_v29 = vsel %vm10369_vm5, %v10371_v34, %v10367_v13 }
 0xfe1   :  { %10374 = vst [vmem:[%s22646_s17] sm:$0x1] %v10372_v29 }

</bundles_post_ra>
